<compile_context>
chip_gen: v5e
topology: v5e:2x2
jax: 0.10.0
libtpu: 0.0.40
codegen_flags: <defaults>
</compile_context>

<pallas_src>
from functools import partial, lru_cache

import numpy as np
import jax
import jax.numpy as jnp
from jax import lax
from jax.experimental import pallas as pl
from jax.experimental.pallas import tpu as pltpu

EPS = 1.1920929e-07  # torch.finfo(torch.float32).eps — F.rms_norm default


def _rms(x):
    return x * lax.rsqrt(jnp.mean(x * x, axis=-1, keepdims=True) + EPS)


# ----------------------------- kernel body ------------------------------
def _block_body(lambdas_ref, lamb_ref, x_ref, x0_ref, v1_ref,
                cos_ref, sin_ref, hmean_ref, hperm_ref,
                wqkv_ref, wo_ref, wfc_ref, wproj_ref,
                out_x_ref, out_v1_ref, *, n_head):
    T, D = x_ref.shape
    H = n_head
    Dh = D // H

    l0 = lambdas_ref[0]
    l1 = lambdas_ref[1]
    lam = lamb_ref[0]

    # ---- lambda mix + pre-attention rms-norm (full D, f32) --------------
    x = l0 * x_ref[...] + l1 * x0_ref[...]                   # [T, D] f32
    xn = _rms(x)

    # ---- fused QKV projection: one bf16 MXU matmul, f32 accumulate ------
    qkv = jnp.dot(xn.astype(jnp.bfloat16), wqkv_ref[...],
                  preferred_element_type=jnp.float32)        # [T, 3D]
    q = qkv[:, :D]                                           # 128-aligned slices
    k = qkv[:, D:2 * D]
    v = qkv[:, 2 * D:]

    # ---- v1 handling, full width (hoisted out of per-head work) ---------
    v1_full = v if v1_ref is None else v1_ref[...].astype(jnp.float32)
    if out_v1_ref is not None:
        out_v1_ref[...] = v.astype(out_v1_ref.dtype)         # bf16 writeback
    v_mix = (1.0 - lam) * v + lam * v1_full                  # [T, D]

    # ---- per-head RMS + RoPE on full-width [T, D] tensors ---------------
    # hmean: [D,D] block matrix averaging each head's Dh columns (exact in
    # bf16).  hperm: [D,D] rotate-half permutation (0/1, exact in bf16).
    # Operands are cast to bf16 so these ride single-pass bf16 MXU.
    def head_rms(u):
        ms = jnp.dot((u * u).astype(jnp.bfloat16), hmean_ref[...],
                     preferred_element_type=jnp.float32)
        return u * lax.rsqrt(ms + EPS)

    cos = cos_ref[...].astype(jnp.float32)                   # cast once, reuse
    sin = sin_ref[...].astype(jnp.float32)                   # sign folded in

    def rope(u):
        rot = jnp.dot(u.astype(jnp.bfloat16), hperm_ref[...],
                      preferred_element_type=jnp.float32)
        return u * cos + rot * sin

    scale = 1.0 / (Dh ** 0.5)                                # flex_attention default
    q = rope(head_rms(q)) * scale
    k = rope(head_rms(k))

    # ---- one layout transform per tensor: [T, D] -> [H, T, Dh] (bf16) ----
    def split_heads(u):
        return jnp.swapaxes(u.astype(jnp.bfloat16).reshape(T, H, Dh), 0, 1)

    qh = split_heads(q)
    kh = split_heads(k)
    vh = split_heads(v_mix)

    # ---- batched causal attention: all heads through the MXU together ----
    s = jnp.einsum('hqd,hkd->hqk', qh, kh,
                   preferred_element_type=jnp.float32)       # [H, T, T]
    rows = lax.broadcasted_iota(jnp.int32, (T, T), 0)
    cols = lax.broadcasted_iota(jnp.int32, (T, T), 1)
    s = jnp.where((rows >= cols)[None, :, :], s, -jnp.inf)

    # No running-max subtraction: |s| <= sqrt(Dh) ~ 5.7 (per-head RMS norm +
    # orthogonal RoPE + 1/sqrt(Dh) scale), so exp() cannot overflow and the
    # masked -inf entries give exp -> 0 exactly.
    p = jnp.exp(s)
    denom = jnp.sum(p, axis=-1, keepdims=True)
    p = (p * pl.reciprocal(denom, approx=True)).astype(jnp.bfloat16)

    # ---- Wo folded into PV: lane-dense [T, D] PV passes, no concat -------
    vo = jnp.einsum('htd,hde->hte', vh, wo_ref[...],
                    preferred_element_type=jnp.float32).astype(jnp.bfloat16)
    yh = jnp.einsum('hqk,hkd->hqd', p, vo,
                    preferred_element_type=jnp.float32)      # [H, T, D]
    y = jnp.sum(yh, axis=0)                                  # [T, D]

    x = x + y                                                # residual 1

    # ---- MLP: relu(x @ Wfc)^2 @ Wproj (bf16 MXU, f32 accumulate) ---------
    xn2 = _rms(x)
    h_mid = jnp.dot(xn2.astype(jnp.bfloat16), wfc_ref[...],
                    preferred_element_type=jnp.float32)
    h_mid = jnp.maximum(h_mid, 0.0)
    h_mid = h_mid * h_mid
    mlp = jnp.dot(h_mid.astype(jnp.bfloat16), wproj_ref[...],
                  preferred_element_type=jnp.float32)

    out_x_ref[...] = x + mlp                                 # residual 2


def block_kernel_no_v1(lambdas_ref, lamb_ref, x_ref, x0_ref,
                       cos_ref, sin_ref, hmean_ref, hperm_ref,
                       wqkv_ref, wo_ref, wfc_ref, wproj_ref,
                       out_x_ref, out_v1_ref, *, n_head):
    _block_body(lambdas_ref, lamb_ref, x_ref, x0_ref, None,
                cos_ref, sin_ref, hmean_ref, hperm_ref,
                wqkv_ref, wo_ref, wfc_ref, wproj_ref,
                out_x_ref, out_v1_ref, n_head=n_head)


def block_kernel_with_v1(lambdas_ref, lamb_ref, x_ref, x0_ref, v1_ref,
                         cos_ref, sin_ref, hmean_ref, hperm_ref,
                         wqkv_ref, wo_ref, wfc_ref, wproj_ref,
                         out_x_ref, *, n_head):
    _block_body(lambdas_ref, lamb_ref, x_ref, x0_ref, v1_ref,
                cos_ref, sin_ref, hmean_ref, hperm_ref,
                wqkv_ref, wo_ref, wfc_ref, wproj_ref,
                out_x_ref, None, n_head=n_head)


# --------------------------- parameter setup -----------------------------
def prepare_params(params, n_head):
    """One-time prep: transpose to [in,out], fuse QKV, split Wo per head, bf16."""
    D = params["wq"].shape[0]
    Dh = D // n_head
    wqkv = jnp.concatenate(
        [params["wq"].T, params["wk"].T, params["wv"].T], axis=1)       # [D, 3D]
    wo_heads = params["wo"].T.reshape(n_head, Dh, D)                    # [H, Dh, D]
    return {
        "lambdas": params["lambdas"].astype(jnp.float32),
        "lamb": params["lamb"].astype(jnp.float32),
        "wqkv": wqkv.astype(jnp.bfloat16),
        "wo_heads": wo_heads.astype(jnp.bfloat16),
        "wfc": params["wfc"].T.astype(jnp.bfloat16),                    # [D, 4D]
        "wproj": params["wproj"].T.astype(jnp.bfloat16),                # [4D, D]
    }


@lru_cache(maxsize=None)
def _attn_tables(T, D, H):
    """Rotary tables and per-head helper matrices (built once per shape), bf16."""
    Dh = D // H
    d = Dh // 2
    inv_freq = 1.0 / (10000.0 ** (np.arange(0, Dh, 2, dtype=np.float32) / Dh))
    t = np.arange(T, dtype=np.float32)
    freqs = np.outer(t, inv_freq)                                       # [T, d]
    cos_h = np.concatenate([np.cos(freqs), np.cos(freqs)], axis=1)      # [T, Dh]
    sin_h = np.concatenate([np.sin(freqs), -np.sin(freqs)], axis=1)     # [T, Dh]
    cos_full = np.tile(cos_h, (1, H)).astype(np.float32)                # [T, D]
    sin_full = np.tile(sin_h, (1, H)).astype(np.float32)                # [T, D]

    hmean = np.zeros((D, D), np.float32)   # per-head mean broadcast (1/Dh exact in bf16)
    hperm = np.zeros((D, D), np.float32)   # per-head rotate-half permutation (0/1)
    for h in range(H):
        lo = h * Dh
        hmean[lo:lo + Dh, lo:lo + Dh] = 1.0 / Dh
        for i in range(Dh):
            hperm[lo + (i + d) % Dh, lo + i] = 1.0

    bf16 = lambda a: jnp.asarray(a).astype(jnp.bfloat16)
    return bf16(cos_full), bf16(sin_full), bf16(hmean), bf16(hperm)


# ------------------------------- wrapper ----------------------------------
def block_forward(x, v1, x0, pp, n_head):
    """x, x0: [1, T, D]; v1: [1, T, H, Dh] or None. Returns (x_out, v1_out)."""
    B, T, D = x.shape
    assert B == 1, "Must use batch size = 1 (matches PyTorch module)"
    H = n_head
    Dh = D // H

    cos, sin, hmean, hperm = _attn_tables(T, D, H)

    smem = pl.BlockSpec(memory_space=pltpu.MemorySpace.SMEM)
    vmem = pl.BlockSpec(memory_space=pltpu.MemorySpace.VMEM)

    common = (pp["lambdas"], pp["lamb"],
              x[0].astype(jnp.float32), x0[0].astype(jnp.float32))
    tables_weights = (cos, sin, hmean, hperm,
                      pp["wqkv"], pp["wo_heads"], pp["wfc"], pp["wproj"])

    if v1 is None:
        out_x, out_v1 = pl.pallas_call(
            partial(block_kernel_no_v1, n_head=H),
            out_shape=(jax.ShapeDtypeStruct((T, D), jnp.float32),
                       jax.ShapeDtypeStruct((T, D), jnp.bfloat16)),
            in_specs=[smem, smem] + [vmem] * 10,
            out_specs=(vmem, vmem),
        )(*common, *tables_weights)
        return out_x[None], out_v1.reshape(1, T, H, Dh)
    else:
        v1_flat = v1.reshape(T, D)          # keep caller dtype (f32 or bf16)
        out_x = pl.pallas_call(
            partial(block_kernel_with_v1, n_head=H),
            out_shape=jax.ShapeDtypeStruct((T, D), jnp.float32),
            in_specs=[smem, smem] + [vmem] * 11,
            out_specs=vmem,
        )(*common, v1_flat, *tables_weights)
        # PyTorch returns the provided v1 unchanged — pure passthrough, no copy.
        return out_x[None], v1


# ----------------------- pure-JAX reference for checking -------------------
def block_ref(x, v1, x0, params, n_head):
    B, T, D = x.shape
    H = n_head
    Dh = D // H
    lambdas = params["lambdas"]
    lam = params["lamb"][0]

    xx = lambdas[0] * x + lambdas[1] * x0
    xn = _rms(xx)
    q = (xn @ params["wq"].T).reshape(B, T, H, Dh)
    k = (xn @ params["wk"].T).reshape(B, T, H, Dh)
    v = (xn @ params["wv"].T).reshape(B, T, H, Dh)
    if v1 is None:
        v1 = v
    v = (1.0 - lam) * v + lam * v1.reshape(v.shape).astype(jnp.float32)
    q, k = _rms(q), _rms(k)

    d = Dh // 2
    inv_freq = 1.0 / (10000.0 ** (jnp.arange(0, Dh, 2, dtype=jnp.float32) / Dh))
    t = jnp.arange(T, dtype=jnp.float32)
    freqs = jnp.outer(t, inv_freq)
    cos = jnp.cos(freqs)[None, :, None, :]
    sin = jnp.sin(freqs)[None, :, None, :]

    def rope(u):
        u1, u2 = u[..., :d], u[..., d:]
        return jnp.concatenate([u1 * cos + u2 * sin, -u1 * sin + u2 * cos], -1)

    q, k = rope(q), rope(k)
    scale = 1.0 / (Dh ** 0.5)
    s = jnp.einsum("bthd,bshd->bhts", q, k) * scale
    mask = jnp.tril(jnp.ones((T, T), bool))
    s = jnp.where(mask[None, None], s, -jnp.inf)
    p = jax.nn.softmax(s, axis=-1)
    y = jnp.einsum("bhts,bshd->bthd", p, v).reshape(B, T, D)
    y = y @ params["wo"].T
    xx = xx + y
    h = jnp.maximum(_rms(xx) @ params["wfc"].T, 0.0) ** 2
    return xx + h @ params["wproj"].T, v1


if __name__ == "__main__":
    T, D, H = 128, 128, 4

    key = jax.random.PRNGKey(0)
    ks = jax.random.split(key, 8)
    x = jax.random.normal(ks[0], (1, T, D), jnp.float32)
    x0 = jax.random.normal(ks[1], (1, T, D), jnp.float32)

    # Deterministic synthetic weights (PyTorch shapes: Linear weight is [out, in]).
    # NOTE: the PyTorch __init__ zero-inits both c_proj weights; small random
    # values are used instead so the kernel exercises a non-trivial data path.
    params = {
        "wq": 0.05 * jax.random.normal(ks[2], (D, D), jnp.float32),
        "wk": 0.05 * jax.random.normal(ks[3], (D, D), jnp.float32),
        "wv": 0.05 * jax.random.normal(ks[4], (D, D), jnp.float32),
        "wo": 0.05 * jax.random.normal(ks[5], (D, D), jnp.float32),
        "wfc": 0.05 * jax.random.normal(ks[6], (4 * D, D), jnp.float32),
        "wproj": 0.05 * jax.random.normal(ks[7], (D, 4 * D), jnp.float32),
        "lambdas": jnp.array([1.0, 0.0], jnp.float32),   # as in __init__
        "lamb": jnp.array([0.5], jnp.float32),           # as in __init__
    }
    pp = prepare_params(params, H)   # one-time: transpose, fuse QKV, split Wo, bf16

    # First block call: v1 is None (kernel emits v1 = v, in bf16).
    y1, v1_out = block_forward(x, None, x0, pp, H)
    # Second block call: feed the produced v1 back in (passthrough path).
    y2, v2_out = block_forward(y1, v1_out, x0, pp, H)
    jax.block_until_ready((y1, v1_out, y2, v2_out))

    # Check against the pure-JAX (f32) reference.  Tolerance covers bf16 MXU
    # operands, bf16 rotary/helper tables and the bf16 v1 writeback.
    r1, rv1 = block_ref(x, None, x0, params, H)
    r2, rv2 = block_ref(y1, rv1, x0, params, H)

    for got, want in ((y1, r1), (v1_out, rv1), (y2, r2), (v2_out, rv2)):
        err = float(jnp.max(jnp.abs(got.astype(jnp.float32) - want)))
        assert err < 3e-2, f"mismatch vs reference: max abs err = {err}"

    print("KERNEL_OK")
</pallas_src>

<mosaic_0001>
module attributes {stable_mosaic.version = 11 : i64} {
  func.func @block_kernel_no_v1(%arg0: memref<2xf32, #tpu.memory_space<smem>>, %arg1: memref<1xf32, #tpu.memory_space<smem>>, %arg2: memref<128x128xf32, #tpu.memory_space<vmem>>, %arg3: memref<128x128xf32, #tpu.memory_space<vmem>>, %arg4: memref<128x128xbf16, #tpu.memory_space<vmem>>, %arg5: memref<128x128xbf16, #tpu.memory_space<vmem>>, %arg6: memref<128x128xbf16, #tpu.memory_space<vmem>>, %arg7: memref<128x128xbf16, #tpu.memory_space<vmem>>, %arg8: memref<128x384xbf16, #tpu.memory_space<vmem>>, %arg9: memref<4x32x128xbf16, #tpu.memory_space<vmem>>, %arg10: memref<128x512xbf16, #tpu.memory_space<vmem>>, %arg11: memref<512x128xbf16, #tpu.memory_space<vmem>>, %arg12: memref<128x128xf32, #tpu.memory_space<vmem>>, %arg13: memref<128x128xbf16, #tpu.memory_space<vmem>>) attributes {dimension_semantics = [], scalar_prefetch = 0 : i64, scratch_operands = 0 : i64, tpu.core_type = #tpu.core_type<tc>} {
    %c0 = arith.constant 0 : index
    %0 = memref.load %arg0[%c0] : memref<2xf32, #tpu.memory_space<smem>>
    %c1 = arith.constant 1 : index
    %1 = memref.load %arg0[%c1] : memref<2xf32, #tpu.memory_space<smem>>
    %c0_0 = arith.constant 0 : index
    %2 = memref.load %arg1[%c0_0] : memref<1xf32, #tpu.memory_space<smem>>
    %c0_1 = arith.constant 0 : index
    %c0_2 = arith.constant 0 : index
    %3 = vector.load %arg2[%c0_1, %c0_2] : memref<128x128xf32, #tpu.memory_space<vmem>>, vector<128x128xf32>
    %4 = vector.broadcast %0 : f32 to vector<128x128xf32>
    %5 = arith.mulf %4, %3 : vector<128x128xf32>
    %c0_3 = arith.constant 0 : index
    %c0_4 = arith.constant 0 : index
    %6 = vector.load %arg3[%c0_3, %c0_4] : memref<128x128xf32, #tpu.memory_space<vmem>>, vector<128x128xf32>
    %7 = vector.broadcast %1 : f32 to vector<128x128xf32>
    %8 = arith.mulf %7, %6 : vector<128x128xf32>
    %9 = arith.addf %5, %8 : vector<128x128xf32>
    %10 = arith.mulf %9, %9 : vector<128x128xf32>
    %cst = arith.constant dense<0.000000e+00> : vector<128xf32>
    %11 = vector.multi_reduction <add>, %10, %cst [1] : vector<128x128xf32> to vector<128xf32>
    %12 = vector.shape_cast %11 : vector<128xf32> to vector<128x1xf32>
    %cst_5 = arith.constant 1.280000e+02 : f32
    %13 = vector.broadcast %cst_5 : f32 to vector<128x1xf32>
    %14 = arith.divf %12, %13 : vector<128x1xf32>
    %cst_6 = arith.constant 1.1920929E-7 : f32
    %15 = vector.broadcast %cst_6 : f32 to vector<128x1xf32>
    %16 = arith.addf %14, %15 : vector<128x1xf32>
    %17 = math.rsqrt %16 : vector<128x1xf32>
    %18 = vector.broadcast %17 : vector<128x1xf32> to vector<128x128xf32>
    %19 = arith.mulf %9, %18 : vector<128x128xf32>
    %20 = arith.truncf %19 : vector<128x128xf32> to vector<128x128xbf16>
    %c0_7 = arith.constant 0 : index
    %c0_8 = arith.constant 0 : index
    %21 = vector.load %arg8[%c0_7, %c0_8] : memref<128x384xbf16, #tpu.memory_space<vmem>>, vector<128x384xbf16>
    %cst_9 = arith.constant dense<0.000000e+00> : vector<128x384xf32>
    %22 = tpu.matmul %20, %21, %cst_9 {dimension_numbers = #tpu.dot_dimension_numbers<[1], [0], [0], [1], [0, 0, 1, 1], [], []>} : vector<128x128xbf16>, vector<128x384xbf16>, vector<128x384xf32> -> vector<128x384xf32>
    %23 = vector.extract_strided_slice %22 {offsets = [0, 0], sizes = [128, 128], strides = [1, 1]} : vector<128x384xf32> to vector<128x128xf32>
    %24 = vector.extract_strided_slice %22 {offsets = [0, 128], sizes = [128, 128], strides = [1, 1]} : vector<128x384xf32> to vector<128x128xf32>
    %25 = vector.extract_strided_slice %22 {offsets = [0, 256], sizes = [128, 128], strides = [1, 1]} : vector<128x384xf32> to vector<128x128xf32>
    %26 = arith.truncf %25 : vector<128x128xf32> to vector<128x128xbf16>
    %c0_10 = arith.constant 0 : index
    %c0_11 = arith.constant 0 : index
    %27 = vector.load %arg13[%c0_10, %c0_11] : memref<128x128xbf16, #tpu.memory_space<vmem>>, vector<128x128xbf16>
    tpu.vector_store %arg13[%c0_10, %c0_11], %26 {strides = array<i32>} : memref<128x128xbf16, #tpu.memory_space<vmem>>, vector<128x128xbf16>,
    %cst_12 = arith.constant 1.000000e+00 : f32
    %28 = arith.subf %cst_12, %2 : f32
    %29 = vector.broadcast %28 : f32 to vector<128x128xf32>
    %30 = arith.mulf %29, %25 : vector<128x128xf32>
    %31 = vector.broadcast %2 : f32 to vector<128x128xf32>
    %32 = arith.mulf %31, %25 : vector<128x128xf32>
    %33 = arith.addf %30, %32 : vector<128x128xf32>
    %c0_13 = arith.constant 0 : index
    %c0_14 = arith.constant 0 : index
    %34 = vector.load %arg4[%c0_13, %c0_14] : memref<128x128xbf16, #tpu.memory_space<vmem>>, vector<128x128xbf16>
    %35 = arith.extf %34 : vector<128x128xbf16> to vector<128x128xf32>
    %c0_15 = arith.constant 0 : index
    %c0_16 = arith.constant 0 : index
    %36 = vector.load %arg5[%c0_15, %c0_16] : memref<128x128xbf16, #tpu.memory_space<vmem>>, vector<128x128xbf16>
    %37 = arith.extf %36 : vector<128x128xbf16> to vector<128x128xf32>
    %38 = arith.mulf %23, %23 : vector<128x128xf32>
    %39 = arith.truncf %38 : vector<128x128xf32> to vector<128x128xbf16>
    %c0_17 = arith.constant 0 : index
    %c0_18 = arith.constant 0 : index
    %40 = vector.load %arg6[%c0_17, %c0_18] : memref<128x128xbf16, #tpu.memory_space<vmem>>, vector<128x128xbf16>
    %cst_19 = arith.constant dense<0.000000e+00> : vector<128x128xf32>
    %41 = tpu.matmul %39, %40, %cst_19 {dimension_numbers = #tpu.dot_dimension_numbers<[1], [0], [0], [1], [0, 0, 1, 1], [], []>} : vector<128x128xbf16>, vector<128x128xbf16>, vector<128x128xf32> -> vector<128x128xf32>
    %cst_20 = arith.constant 1.1920929E-7 : f32
    %42 = vector.broadcast %cst_20 : f32 to vector<128x128xf32>
    %43 = arith.addf %41, %42 : vector<128x128xf32>
    %44 = math.rsqrt %43 : vector<128x128xf32>
    %45 = arith.mulf %23, %44 : vector<128x128xf32>
    %46 = arith.truncf %45 : vector<128x128xf32> to vector<128x128xbf16>
    %c0_21 = arith.constant 0 : index
    %c0_22 = arith.constant 0 : index
    %47 = vector.load %arg7[%c0_21, %c0_22] : memref<128x128xbf16, #tpu.memory_space<vmem>>, vector<128x128xbf16>
    %cst_23 = arith.constant dense<0.000000e+00> : vector<128x128xf32>
    %48 = tpu.matmul %46, %47, %cst_23 {dimension_numbers = #tpu.dot_dimension_numbers<[1], [0], [0], [1], [0, 0, 1, 1], [], []>} : vector<128x128xbf16>, vector<128x128xbf16>, vector<128x128xf32> -> vector<128x128xf32>
    %49 = arith.mulf %45, %35 : vector<128x128xf32>
    %50 = arith.mulf %48, %37 : vector<128x128xf32>
    %51 = arith.addf %49, %50 : vector<128x128xf32>
    %cst_24 = arith.constant 0.176776692 : f32
    %52 = vector.broadcast %cst_24 : f32 to vector<128x128xf32>
    %53 = arith.mulf %51, %52 : vector<128x128xf32>
    %54 = arith.mulf %24, %24 : vector<128x128xf32>
    %55 = arith.truncf %54 : vector<128x128xf32> to vector<128x128xbf16>
    %c0_25 = arith.constant 0 : index
    %c0_26 = arith.constant 0 : index
    %56 = vector.load %arg6[%c0_25, %c0_26] : memref<128x128xbf16, #tpu.memory_space<vmem>>, vector<128x128xbf16>
    %cst_27 = arith.constant dense<0.000000e+00> : vector<128x128xf32>
    %57 = tpu.matmul %55, %56, %cst_27 {dimension_numbers = #tpu.dot_dimension_numbers<[1], [0], [0], [1], [0, 0, 1, 1], [], []>} : vector<128x128xbf16>, vector<128x128xbf16>, vector<128x128xf32> -> vector<128x128xf32>
    %cst_28 = arith.constant 1.1920929E-7 : f32
    %58 = vector.broadcast %cst_28 : f32 to vector<128x128xf32>
    %59 = arith.addf %57, %58 : vector<128x128xf32>
    %60 = math.rsqrt %59 : vector<128x128xf32>
    %61 = arith.mulf %24, %60 : vector<128x128xf32>
    %62 = arith.truncf %61 : vector<128x128xf32> to vector<128x128xbf16>
    %c0_29 = arith.constant 0 : index
    %c0_30 = arith.constant 0 : index
    %63 = vector.load %arg7[%c0_29, %c0_30] : memref<128x128xbf16, #tpu.memory_space<vmem>>, vector<128x128xbf16>
    %cst_31 = arith.constant dense<0.000000e+00> : vector<128x128xf32>
    %64 = tpu.matmul %62, %63, %cst_31 {dimension_numbers = #tpu.dot_dimension_numbers<[1], [0], [0], [1], [0, 0, 1, 1], [], []>} : vector<128x128xbf16>, vector<128x128xbf16>, vector<128x128xf32> -> vector<128x128xf32>
    %65 = arith.mulf %61, %35 : vector<128x128xf32>
    %66 = arith.mulf %64, %37 : vector<128x128xf32>
    %67 = arith.addf %65, %66 : vector<128x128xf32>
    %68 = arith.truncf %53 : vector<128x128xf32> to vector<128x128xbf16>
    %69 = vector.shape_cast %68 : vector<128x128xbf16> to vector<128x4x32xbf16>
    %70 = tpu.transpose %69, [1, 0, 2] : vector<128x4x32xbf16> -> vector<4x128x32xbf16>
    %71 = arith.truncf %67 : vector<128x128xf32> to vector<128x128xbf16>
    %72 = vector.shape_cast %71 : vector<128x128xbf16> to vector<128x4x32xbf16>
    %73 = tpu.transpose %72, [1, 0, 2] : vector<128x4x32xbf16> -> vector<4x128x32xbf16>
    %74 = arith.truncf %33 : vector<128x128xf32> to vector<128x128xbf16>
    %75 = vector.shape_cast %74 : vector<128x128xbf16> to vector<128x4x32xbf16>
    %76 = tpu.transpose %75, [1, 0, 2] : vector<128x4x32xbf16> -> vector<4x128x32xbf16>
    "tpu.trace_start"() <{level = 10 : i32, message = "hqd,hkd->hqk"}> : () -> ()
    %cst_32 = arith.constant dense<0.000000e+00> : vector<4x128x128xf32>
    %77 = tpu.matmul %70, %73, %cst_32 {dimension_numbers = #tpu.dot_dimension_numbers<[2], [2], [1], [1], [0, 0, 0, 1, 1, 1], [0], [0]>} : vector<4x128x32xbf16>, vector<4x128x32xbf16>, vector<4x128x128xf32> -> vector<4x128x128xf32>
    "tpu.trace_stop"() : () -> ()
    %78 = tpu.iota {dimensions = array<i32: 0>} : vector<128x128xi32>
    %79 = tpu.iota {dimensions = array<i32: 1>} : vector<128x128xi32>
    %80 = arith.cmpi sge, %78, %79 : vector<128x128xi32>
    %81 = vector.shape_cast %80 : vector<128x128xi1> to vector<1x128x128xi1>
    %cst_33 = arith.constant 0xFF800000 : f32
    %82 = vector.shape_cast %81 : vector<1x128x128xi1> to vector<1x128x128xi1>
    %83 = vector.broadcast %82 : vector<1x128x128xi1> to vector<4x128x128xi1>
    %84 = vector.broadcast %cst_33 : f32 to vector<4x128x128xf32>
    %85 = arith.select %83, %77, %84 : vector<4x128x128xi1>, vector<4x128x128xf32>
    %86 = math.exp %85 : vector<4x128x128xf32>
    %cst_34 = arith.constant dense<0.000000e+00> : vector<4x128xf32>
    %87 = vector.multi_reduction <add>, %86, %cst_34 [2] : vector<4x128x128xf32> to vector<4x128xf32>
    %88 = vector.shape_cast %87 : vector<4x128xf32> to vector<4x128x1xf32>
    %89 = tpu.reciprocal %88 {approx = true} : vector<4x128x1xf32> -> vector<4x128x1xf32>
    %90 = vector.broadcast %89 : vector<4x128x1xf32> to vector<4x128x128xf32>
    %91 = arith.mulf %86, %90 : vector<4x128x128xf32>
    %92 = arith.truncf %91 : vector<4x128x128xf32> to vector<4x128x128xbf16>
    %c0_35 = arith.constant 0 : index
    %c0_36 = arith.constant 0 : index
    %c0_37 = arith.constant 0 : index
    %93 = vector.load %arg9[%c0_35, %c0_36, %c0_37] : memref<4x32x128xbf16, #tpu.memory_space<vmem>>, vector<4x32x128xbf16>
    "tpu.trace_start"() <{level = 10 : i32, message = "htd,hde->hte"}> : () -> ()
    %cst_38 = arith.constant dense<0.000000e+00> : vector<4x128x128xf32>
    %94 = tpu.matmul %76, %93, %cst_38 {dimension_numbers = #tpu.dot_dimension_numbers<[2], [1], [1], [2], [0, 0, 0, 1, 1, 2], [0], [0]>} : vector<4x128x32xbf16>, vector<4x32x128xbf16>, vector<4x128x128xf32> -> vector<4x128x128xf32>
    "tpu.trace_stop"() : () -> ()
    %95 = arith.truncf %94 : vector<4x128x128xf32> to vector<4x128x128xbf16>
    "tpu.trace_start"() <{level = 10 : i32, message = "hqk,hkd->hqd"}> : () -> ()
    %cst_39 = arith.constant dense<0.000000e+00> : vector<4x128x128xf32>
    %96 = tpu.matmul %92, %95, %cst_39 {dimension_numbers = #tpu.dot_dimension_numbers<[2], [1], [1], [2], [0, 0, 0, 1, 1, 2], [0], [0]>} : vector<4x128x128xbf16>, vector<4x128x128xbf16>, vector<4x128x128xf32> -> vector<4x128x128xf32>
    "tpu.trace_stop"() : () -> ()
    %cst_40 = arith.constant dense<0.000000e+00> : vector<128x128xf32>
    %97 = vector.multi_reduction <add>, %96, %cst_40 [0] : vector<4x128x128xf32> to vector<128x128xf32>
    %98 = arith.addf %9, %97 : vector<128x128xf32>
    %99 = arith.mulf %98, %98 : vector<128x128xf32>
    %cst_41 = arith.constant dense<0.000000e+00> : vector<128xf32>
    %100 = vector.multi_reduction <add>, %99, %cst_41 [1] : vector<128x128xf32> to vector<128xf32>
    %101 = vector.shape_cast %100 : vector<128xf32> to vector<128x1xf32>
    %cst_42 = arith.constant 1.280000e+02 : f32
    %102 = vector.broadcast %cst_42 : f32 to vector<128x1xf32>
    %103 = arith.divf %101, %102 : vector<128x1xf32>
    %cst_43 = arith.constant 1.1920929E-7 : f32
    %104 = vector.broadcast %cst_43 : f32 to vector<128x1xf32>
    %105 = arith.addf %103, %104 : vector<128x1xf32>
    %106 = math.rsqrt %105 : vector<128x1xf32>
    %107 = vector.broadcast %106 : vector<128x1xf32> to vector<128x128xf32>
    %108 = arith.mulf %98, %107 : vector<128x128xf32>
    %109 = arith.truncf %108 : vector<128x128xf32> to vector<128x128xbf16>
    %c0_44 = arith.constant 0 : index
    %c0_45 = arith.constant 0 : index
    %110 = vector.load %arg10[%c0_44, %c0_45] : memref<128x512xbf16, #tpu.memory_space<vmem>>, vector<128x512xbf16>
    %cst_46 = arith.constant dense<0.000000e+00> : vector<128x512xf32>
    %111 = tpu.matmul %109, %110, %cst_46 {dimension_numbers = #tpu.dot_dimension_numbers<[1], [0], [0], [1], [0, 0, 1, 1], [], []>} : vector<128x128xbf16>, vector<128x512xbf16>, vector<128x512xf32> -> vector<128x512xf32>
    %cst_47 = arith.constant 0.000000e+00 : f32
    %112 = vector.broadcast %cst_47 : f32 to vector<128x512xf32>
    %113 = arith.maximumf %111, %112 : vector<128x512xf32>
    %114 = arith.mulf %113, %113 : vector<128x512xf32>
    %115 = arith.truncf %114 : vector<128x512xf32> to vector<128x512xbf16>
    %c0_48 = arith.constant 0 : index
    %c0_49 = arith.constant 0 : index
    %116 = vector.load %arg11[%c0_48, %c0_49] : memref<512x128xbf16, #tpu.memory_space<vmem>>, vector<512x128xbf16>
    %cst_50 = arith.constant dense<0.000000e+00> : vector<128x128xf32>
    %117 = tpu.matmul %115, %116, %cst_50 {dimension_numbers = #tpu.dot_dimension_numbers<[1], [0], [0], [1], [0, 0, 1, 1], [], []>} : vector<128x512xbf16>, vector<512x128xbf16>, vector<128x128xf32> -> vector<128x128xf32>
    %118 = arith.addf %98, %117 : vector<128x128xf32>
    %c0_51 = arith.constant 0 : index
    %c0_52 = arith.constant 0 : index
    %119 = vector.load %arg12[%c0_51, %c0_52] : memref<128x128xf32, #tpu.memory_space<vmem>>, vector<128x128xf32>
    tpu.vector_store %arg12[%c0_51, %c0_52], %118 {strides = array<i32>} : memref<128x128xf32, #tpu.memory_space<vmem>>, vector<128x128xf32>,
    return
  }
}

</mosaic_0001>

<bundles_post_ra>
// kernel: tpu_custom_call.1
= control target key start
LH: loop header
LB: loop body
LE: loop exit
PB: predicated region body
PF: predicated region fallthrough
CT: control target
= control target key end

     0   :  { %20 = vsyncpa [#allocation6], 0  ;;  %s19515_s0 = inlined_call_operand.vmem [shape: f32[2], index: 0, kind: input, shape index: {}]   ;;  %s19516_s1 = inlined_call_operand.<no memory space> [shape: f32[1], index: 1, kind: input, shape index: {}]   ;;  %s19517_s2 = inlined_call_operand.hbm [shape: f32[128,128], index: 2, kind: input, shape index: {}]   ;;  %s19518_s3 = inlined_call_operand.hbm [shape: f32[128,128], index: 3, kind: input, shape index: {}]   ;;  %s19519_s4 = inlined_call_operand.hbm [shape: bf16[128,128], index: 4, kind: input, shape index: {}]   ;;  %s19520_s5 = inlined_call_operand.hbm [shape: bf16[128,128], index: 5, kind: input, shape index: {}]   ;;  %s19521_s6 = inlined_call_operand.hbm [shape: bf16[128,128], index: 6, kind: input, shape index: {}]   ;;  %s19522_s7 = inlined_call_operand.hbm [shape: bf16[128,128], index: 7, kind: input, shape index: {}]   ;;  %s19523_s8 = inlined_call_operand.hbm [shape: bf16[128,384], index: 8, kind: input, shape index: {}]   ;;  %s19524_s9 = inlined_call_operand.hbm [shape: bf16[4,32,128], index: 9, kind: input, shape index: {}]   ;;  %s19525_s10 = inlined_call_operand.hbm [shape: bf16[128,512], index: 10, kind: input, shape index: {}]   ;;  %s19526_s11 = inlined_call_operand.hbm [shape: bf16[512,128], index: 11, kind: input, shape index: {}]   ;;  %s19527_s12 = inlined_call_operand.hbm [shape: f32[128,128], index: 12, kind: output, shape index: {0}]   ;;  %s19528_s13 = inlined_call_operand.hbm [shape: bf16[128,128], index: 13, kind: output, shape index: {1}]  }
   0x1   :  { %21 = vsyncpa [#allocation4], 0 }
   0x2   :  { %22 = vsyncpa [#allocation9], 0 }
   0x3   :  { %23 = vsyncpa [#allocation12], 0 }
   0x4   :  { %24 = vsyncpa [#allocation15], 0 }
   0x5   :  { %25 = vsyncpa [#allocation18], 0 }
   0x6   :  { %26 = vsyncpa [#allocation21], 0 }
   0x7   :  { %27 = vsyncpa [#allocation5], 0 }
   0x8   :  { %28 = vsyncpa [#allocation24], 0  ;;  %s57_s27 = sshll.u32 %s19518_s3, 4  ;;  %s12898_s28 = smov [#allocation8]   ;;  %s58_s27 = int_to_ptr.hbm [resolvable:$true] %s57_s27 }
   0x9   :  { %s59_s29 = sshll.u32 %s12898_s28, 4  ;;  %s12899_s30 = smov 128   ;;  %s60_s29 = int_to_ptr.vmem [resolvable:$true] %s59_s29 }
   0xa   :  { %s12900_s14 = smov 8   ;;  %s83_s17 = sshll.u32 %s19520_s5, 4  ;;  %s84_s17 = int_to_ptr.hbm [resolvable:$true] %s83_s17 }
   0xb   :  { %65 = dma.hbm_to_vmem [thread:$0]  %s58_s27, 2048, %s60_s29, [#allocation9], %s12899_s30, %s12899_s30, %s12900_s14  }
   0xc   :  { %s12901_s18 = smov [#allocation11]   ;;  %s109_s3 = sshll.u32 %s19522_s7, 4  ;;  %s110_s3 = int_to_ptr.hbm [resolvable:$true] %s109_s3 }
   0xd   :  { %s85_s19 = sshll.u32 %s12901_s18, 4  ;;  %s12902_s22 = smov 64   ;;  %s86_s19 = int_to_ptr.vmem [resolvable:$true] %s85_s19 }
   0xe   :  { %s12903_s23 = smov 4   ;;  %s135_s26 = sshll.u32 %s19524_s9, 4  ;;  %s136_s26 = int_to_ptr.hbm [resolvable:$true] %s135_s26 }
   0xf   :  { %91 = dma.hbm_to_vmem [thread:$0]  %s84_s17, 1024, %s86_s19, [#allocation12], %s12902_s22, %s12902_s22, %s12903_s23  }
  0x10   :  { %s12904_s5 = smov [#allocation14]   ;;  %s12905_s7 = smov [#allocation17]  }
  0x11   :  { %s111_s27 = sshll.u32 %s12904_s5, 4  ;;  %s137_s28 = sshll.u32 %s12905_s7, 4  ;;  %s112_s27 = int_to_ptr.vmem [resolvable:$true] %s111_s27  ;;  %s138_s28 = int_to_ptr.vmem [resolvable:$true] %s137_s28 }
  0x12   :  { %117 = dma.hbm_to_vmem [thread:$0]  %s110_s3, 1024, %s112_s27, [#allocation15], %s12902_s22, %s12902_s22, %s12903_s23  }
  0x13   :  { %s34_s16 = sshll.u32 %s19515_s0, 4  ;;  %s44_s18 = sshll.u32 %s19517_s2, 4  ;;  %s35_s16 = int_to_ptr.vmem [resolvable:$true] %s34_s16  ;;  %s45_s18 = int_to_ptr.hbm [resolvable:$true] %s44_s18 }
  0x14   :  { %143 = dma.hbm_to_vmem [thread:$0]  %s136_s26, 1024, %s138_s28, [#allocation18], %s12902_s22, %s12902_s22, %s12903_s23  }
  0x15   :  { %s12906_s19 = smov [#allocation3]   ;;  %s12907_s20 = smov [#allocation7]  }
  0x16   :  { %37 = dma.vmem_to_smem %s35_s16, 16, %s12906_s19, [#allocation6]  }
  0x17   :  { %s46_s21 = sshll.u32 %s12907_s20, 4  ;;  %s70_s25 = sshll.u32 %s19519_s4, 4  ;;  %s47_s21 = int_to_ptr.vmem [resolvable:$true] %s46_s21  ;;  %s71_s25 = int_to_ptr.hbm [resolvable:$true] %s70_s25 }
  0x18   :  { %52 = dma.hbm_to_vmem [thread:$0]  %s45_s18, 2048, %s47_s21, [#allocation4], %s12899_s30, %s12899_s30, %s12900_s14  }
  0x19   :  { %s96_s5 = sshll.u32 %s19521_s6, 4  ;;  %s12908_s2 = smov [#allocation10]   ;;  %s97_s5 = int_to_ptr.hbm [resolvable:$true] %s96_s5 }
  0x1a   :  { %s72_s27 = sshll.u32 %s12908_s2, 4  ;;  %s12909_s7 = smov [#allocation13]   ;;  %s73_s27 = int_to_ptr.vmem [resolvable:$true] %s72_s27 }
  0x1b   :  { %78 = dma.hbm_to_vmem [thread:$0]  %s71_s25, 1024, %s73_s27, [#allocation9], %s12902_s22, %s12902_s22, %s12903_s23  }
  0x1c   :  { %s98_s4 = sshll.u32 %s12909_s7, 4  ;;  %s122_s15 = sshll.u32 %s19523_s8, 4  ;;  %s99_s4 = int_to_ptr.vmem [resolvable:$true] %s98_s4  ;;  %s123_s15 = int_to_ptr.hbm [resolvable:$true] %s122_s15 }
  0x1d   :  { %104 = dma.hbm_to_vmem [thread:$0]  %s97_s5, 1024, %s99_s4, [#allocation12], %s12902_s22, %s12902_s22, %s12903_s23  }
  0x1e   :  { %s12910_s6 = smov [#allocation16]   ;;  %s148_s18 = sshll.u32 %s19525_s10, 4  ;;  %s149_s18 = int_to_ptr.hbm [resolvable:$true] %s148_s18 }
  0x1f   :  { %s124_s16 = sshll.u32 %s12910_s6, 4  ;;  %s12911_s19 = smov 192   ;;  %s125_s16 = int_to_ptr.vmem [resolvable:$true] %s124_s16 }
  0x20   :  { %s12912_s20 = smov 12   ;;  %s12913_s21 = smov [#allocation19]  }
  0x21   :  { %130 = dma.hbm_to_vmem [thread:$0]  %s123_s15, 3072, %s125_s16, [#allocation15], %s12911_s19, %s12911_s19, %s12912_s20  }
  0x22   :  { %s150_s3 = sshll.u32 %s12913_s21, 4  ;;  %s12914_s8 = smov 256   ;;  %s151_s3 = int_to_ptr.vmem [resolvable:$true] %s150_s3 }
  0x23   :  { %s12915_s24 = smov 16   ;;  %s161_s26 = sshll.u32 %s19526_s11, 4  ;;  %s162_s26 = int_to_ptr.hbm [resolvable:$true] %s161_s26 }
  0x24   :  { %156 = dma.hbm_to_vmem [thread:$0]  %s149_s18, 4096, %s151_s3, [#allocation18], %s12914_s8, %s12914_s8, %s12915_s24  }
  0x25   :  { %s12916_s5 = smov [#allocation20]  }
  0x26   :  { %s163_s2 = sshll.u32 %s12916_s5, 4  ;;  %s164_s2 = int_to_ptr.vmem [resolvable:$true] %s163_s2 }
  0x27   :  { %169 = dma.hbm_to_vmem [thread:$0]  %s162_s26, 4096, %s164_s2, [#allocation21], %s12902_s22, %s12902_s22, %s12903_s23  }
  0x28   :  { %12880 = dma.done.wait [#allocation6], 16  }
  0x29   :  { %12881 = vsyncadd [#allocation6], 4294967280 }
  0x2a   :  { %12882 = dma.done.wait [#allocation4], 2048  }
  0x2b   :  { %12883 = vsyncadd [#allocation4], 4294965248 }
  0x2c   :  { %12884 = dma.done.wait [#allocation9], 3072  }
  0x2d   :  { %12885 = vsyncadd [#allocation9], 4294964224 }
  0x2e   :  { %12886 = dma.done.wait [#allocation12], 2048  }
  0x2f   :  { %12887 = vsyncadd [#allocation12], 4294965248 }
  0x30   :  { %12888 = dma.done.wait [#allocation15], 4096  }
  0x31   :  { %12889 = vsyncadd [#allocation15], 4294963200 }
  0x32   :  { %12890 = dma.done.wait [#allocation18], 5120  }
  0x33   :  { %12891 = vsyncadd [#allocation18], 4294962176 }
  0x34   :  { %12892 = dma.done.wait [#allocation21], 4096  }
  0x35   :  { %12893 = vsyncadd [#allocation21], 4294963200 }
  0x36   :  { %214 = sfence }
  0x37   :  { %s216_s10 = sld [smem:[#allocation3]]  ;;  %v221_v0 = vld [vmem:[#allocation7 + $0x10] sm:$0xff]  ;;  %v219_v1 = vld [vmem:[#allocation7] sm:$0xff]  ;;  %v222_v7 = vld [vmem:[#allocation7 + $0x18] sm:$0xff]  ;;  %s12918_s27 = smov 32  }
  0x38   :  { %s11394_s11 = sld [smem:[#allocation3 + $0x1]]  ;;  %v223_v2 = vld [vmem:[#allocation7 + $0x20] sm:$0xff]  ;;  %v254_v3 = vld [vmem:[#allocation8 + $0x10] sm:$0xff]  ;;  %v255_v8 = vld [vmem:[#allocation8 + $0x18] sm:$0xff]  ;;  %s12919_s7 = smov 96  }
  0x39   :  { %v252_v4 = vld [vmem:[#allocation8] sm:$0xff]  ;;  %v220_v9 = vld [vmem:[#allocation7 + $0x8] sm:$0xff]  ;;  %v226_v34 = vld [vmem:[#allocation7 + $0x38] sm:$0xff]  ;;  %s911_s29 = ssub.f32 1.0, %s19516_s1  ;;  %s11370_s18 = sshll.u32 %s19528_s13, 4  ;;  %s11371_s18 = int_to_ptr.hbm [resolvable:$true] %s11370_s18 }
  0x3a   :  { %v256_v5 = vld [vmem:[#allocation8 + $0x20] sm:$0xff]  ;;  %v253_v14 = vld [vmem:[#allocation8 + $0x8] sm:$0xff]  ;;  %v259_v35 = vld [vmem:[#allocation8 + $0x38] sm:$0xff]  ;;  %s12923_s13 = smov [#allocation22]   ;;  %s11357_s20 = sshll.u32 %s19527_s12, 4  ;;  %s11358_s20 = int_to_ptr.hbm [resolvable:$true] %s11357_s20 }
  0x3b   :  { %v224_v18 = vld [vmem:[#allocation7 + $0x28] sm:$0xff]  ;;  %v225_v37 = vld [vmem:[#allocation7 + $0x30] sm:$0xff]  ;;  %v227_v39 = vld [vmem:[#allocation7 + $0x40] sm:$0xff] }
  0x3c   :  { %v257_v19 = vld [vmem:[#allocation8 + $0x28] sm:$0xff]  ;;  %v258_v38 = vld [vmem:[#allocation8 + $0x30] sm:$0xff]  ;;  %v260_v40 = vld [vmem:[#allocation8 + $0x40] sm:$0xff] }
  0x3d   :  { %v13051_v6 = vstv %s216_s10  ;;  %v228_v52 = vld [vmem:[#allocation7 + $0x48] sm:$0xff]  ;;  %v229_v55 = vld [vmem:[#allocation7 + $0x50] sm:$0xff]  ;;  %v230_v57 = vld [vmem:[#allocation7 + $0x58] sm:$0xff] }
  0x3e   :  { %v238_v10 = vmul.f32 %v13051_v6, %v221_v0  ;;  %v13054_v11 = vstv %s11394_s11  ;;  %v236_v12 = vmul.f32 %v13051_v6, %v219_v1  ;;  %v240_v13 = vmul.f32 %v13051_v6, %v223_v2  ;;  %v261_v54 = vld [vmem:[#allocation8 + $0x48] sm:$0xff]  ;;  %v262_v56 = vld [vmem:[#allocation8 + $0x50] sm:$0xff]  ;;  %v263_v58 = vld [vmem:[#allocation8 + $0x58] sm:$0xff] }
  0x3f   :  { %v271_v15 = vmul.f32 %v13054_v11, %v254_v3  ;;  %v269_v16 = vmul.f32 %v13054_v11, %v252_v4  ;;  %v273_v17 = vmul.f32 %v13054_v11, %v256_v5  ;;  %v239_v20 = vmul.f32 %v13051_v6, %v222_v7  ;;  %v232_v7 = vld [vmem:[#allocation7 + $0x68] sm:$0xff] }
  0x40   :  { %v272_v21 = vmul.f32 %v13054_v11, %v255_v8  ;;  %v237_v22 = vmul.f32 %v13051_v6, %v220_v9  ;;  %v270_v26 = vmul.f32 %v13054_v11, %v253_v14  ;;  %v241_v27 = vmul.f32 %v13051_v6, %v224_v18  ;;  %v265_v8 = vld [vmem:[#allocation8 + $0x68] sm:$0xff]  ;;  %v266_v14 = vld [vmem:[#allocation8 + $0x70] sm:$0xff] }
  0x41   :  { %v13064_v23 = vadd.f32 %v271_v15, %v238_v10  ;;  %v13066_v24 = vadd.f32 %v269_v16, %v236_v12  ;;  %v13068_v25 = vadd.f32 %v273_v17, %v240_v13  ;;  %v274_v28 = vmul.f32 %v13054_v11, %v257_v19  ;;  %v231_v10 = vld [vmem:[#allocation7 + $0x60] sm:$0xff]  ;;  %v233_v13 = vld [vmem:[#allocation7 + $0x70] sm:$0xff] }
  0x42   :  { %v13079_v32 = vadd.f32 %v272_v21, %v239_v20  ;;  %v13081_v33 = vadd.f32 %v270_v26, %v237_v22  ;;  %v243_v41 = vmul.f32 %v13051_v6, %v226_v34  ;;  %v276_v42 = vmul.f32 %v13054_v11, %v259_v35  ;;  %v264_v12 = vld [vmem:[#allocation8 + $0x60] sm:$0xff] }
  0x43   :  { %19761 = vst [vmem:[#allocation34_spill] sm:$0xff] %v13064_v23  ;;  %v303_v29 = vmul.f32 %v13064_v23, %v13064_v23  ;;  %v301_v30 = vmul.f32 %v13066_v24, %v13066_v24  ;;  %v305_v31 = vmul.f32 %v13068_v25, %v13068_v25  ;;  %v13083_v36 = vadd.f32 %v274_v28, %v241_v27 }
  0x44   :  { %19762 = vst [vmem:[#allocation35_spill] sm:$0xff] %v13066_v24  ;;  %v304_v43 = vmul.f32 %v13079_v32, %v13079_v32  ;;  %v302_v44 = vmul.f32 %v13081_v33, %v13081_v33  ;;  %v242_v45 = vmul.f32 %v13051_v6, %v225_v37  ;;  %v275_v46 = vmul.f32 %v13054_v11, %v258_v38 }
  0x45   :  { %19763 = vst [vmem:[#allocation36_spill] sm:$0xff] %v13068_v25  ;;  %321 = vadd.xlane.f32.xlu1 %v303_v29  ;;  %317 = vadd.xlane.f32.xlu0 %v301_v30  ;;  %v306_v47 = vmul.f32 %v13083_v36, %v13083_v36  ;;  %v244_v48 = vmul.f32 %v13051_v6, %v227_v39  ;;  %v234_v30 = vld [vmem:[#allocation7 + $0x78] sm:$0xff] }
  0x46   :  { %19764 = vst [vmem:[#allocation37_spill] sm:$0xff] %v13079_v32  ;;  %325 = vadd.xlane.f32.xlu2 %v305_v31  ;;  %v277_v49 = vmul.f32 %v13054_v11, %v260_v40  ;;  %v13097_v50 = vadd.f32 %v276_v42, %v243_v41  ;;  %v13099_v51 = vadd.f32 %v275_v46, %v242_v45  ;;  %v267_v31 = vld [vmem:[#allocation8 + $0x78] sm:$0xff]  ;;  %v11481_v42 = vld [vmem:[#allocation16 + $0xa8] sm:$0xf] }
  0x47   :  { %19765 = vst [vmem:[#allocation38_spill] sm:$0xff] %v13081_v33  ;;  %v245_v60 = vmul.f32 %v13051_v6, %v228_v52  ;;  %v278_v62 = vmul.f32 %v13054_v11, %v261_v54  ;;  %v246_v63 = vmul.f32 %v13051_v6, %v229_v55  ;;  %v279_v0 = vmul.f32 %v13054_v11, %v262_v56  ;;  %v11930_v46 = vld [vmem:[#allocation16 + $0xb8] sm:$0xf0]  ;;  %v11469_v52 = vld [vmem:[#allocation16 + $0x90] sm:$0xf] }
  0x48   :  { %19766 = vst [vmem:[#allocation39_spill] sm:$0xff] %v13083_v36  ;;  %v13101_v53 = vadd.f32 %v277_v49, %v244_v48  ;;  %v308_v59 = vmul.f32 %v13097_v50, %v13097_v50  ;;  %v307_v61 = vmul.f32 %v13099_v51, %v13099_v51  ;;  %v247_v2 = vmul.f32 %v13051_v6, %v230_v57  ;;  %v11926_v54 = vld [vmem:[#allocation16 + $0x98] sm:$0xf0]  ;;  %v11477_v55 = vld [vmem:[#allocation16 + $0x98] sm:$0xf] }
  0x49   :  { %19767 = vst [vmem:[#allocation40_spill] sm:$0xff] %v13097_v50  ;;  %v280_v3 = vmul.f32 %v13054_v11, %v263_v58  ;;  %v13115_v4 = vadd.f32 %v278_v62, %v245_v60  ;;  %v13117_v5 = vadd.f32 %v279_v0, %v246_v63  ;;  %v249_v15 = vmul.f32 %v13051_v6, %v232_v7  ;;  %v11927_v57 = vld [vmem:[#allocation16 + $0xa0] sm:$0xf0]  ;;  %v11471_v60 = vld [vmem:[#allocation16 + $0x9c] sm:$0xf0] }
  0x4a   :  { %19768 = vst [vmem:[#allocation41_spill] sm:$0xff] %v13099_v51  ;;  %v309_v1 = vmul.f32 %v13101_v53, %v13101_v53  ;;  %v282_v16 = vmul.f32 %v13054_v11, %v265_v8  ;;  %v248_v19 = vmul.f32 %v13051_v6, %v231_v10  ;;  %v281_v20 = vmul.f32 %v13054_v11, %v264_v12  ;;  %v11457_v63 = vld [vmem:[#allocation16 + $0x78] sm:$0xf]  ;;  %v11923_v0 = vld [vmem:[#allocation16 + $0x80] sm:$0xf0] }
  0x4b   :  { %19769 = vst [vmem:[#allocation42_spill] sm:$0xff] %v13101_v53  ;;  %v13119_v9 = vadd.f32 %v280_v3, %v247_v2  ;;  %v310_v17 = vmul.f32 %v13115_v4, %v13115_v4  ;;  %v311_v18 = vmul.f32 %v13117_v5, %v13117_v5  ;;  %v250_v22 = vmul.f32 %v13051_v6, %v233_v13  ;;  %v11924_v3 = vld [vmem:[#allocation16 + $0x88] sm:$0xf0]  ;;  %v11922_v7 = vld [vmem:[#allocation16 + $0x7c] sm:$0xf] }
  0x4c   :  { %19770 = vst [vmem:[#allocation43_spill] sm:$0xff] %v13115_v4  ;;  %v283_v26 = vmul.f32 %v13054_v11, %v266_v14  ;;  %v13133_v27 = vadd.f32 %v282_v16, %v249_v15  ;;  %v13135_v28 = vadd.f32 %v281_v20, %v248_v19  ;;  %v251_v37 = vmul.f32 %v13051_v6, %v234_v30  ;;  %v11928_v6 = vld [vmem:[#allocation16 + $0xac] sm:$0xf]  ;;  %v11459_v8 = vld [vmem:[#allocation16 + $0x84] sm:$0xf0] }
  0x4d   :  { %323 = vadd.xlane.f32.xlu1 %v304_v43  ;;  %319 = vadd.xlane.f32.xlu0 %v302_v44  ;;  %19771 = vst [vmem:[#allocation44_spill] sm:$0xff] %v13117_v5  ;;  %v312_v21 = vmul.f32 %v13119_v9, %v13119_v9  ;;  %v284_v38 = vmul.f32 %v13054_v11, %v267_v31  ;;  %v11929_v43 = vld [vmem:[#allocation16 + $0xb0] sm:$0xf0]  ;;  %v11489_v44 = vld [vmem:[#allocation16 + $0xb0] sm:$0xf]  ;;  %v12917_v49 = vmov 128.0  }
  0x4e   :  { %327 = vadd.xlane.f32.xlu2 %v306_v47  ;;  %19772 = vst [vmem:[#allocation45_spill] sm:$0xff] %v13119_v9  ;;  %v13137_v29 = vadd.f32 %v283_v26, %v250_v22  ;;  %v314_v34 = vmul.f32 %v13133_v27, %v13133_v27  ;;  %v313_v35 = vmul.f32 %v13135_v28, %v13135_v28  ;;  %v11483_v47 = vld [vmem:[#allocation16 + $0xb4] sm:$0xf0]  ;;  %12194 = vrcp.f32 %v12917_v49  ;;  %v11445_v14 = vld [vmem:[#allocation16 + $0x60] sm:$0xf] }
  0x4f   :  { %19773 = vst [vmem:[#allocation46_spill] sm:$0xff] %v13133_v27  ;;  %v13147_v40 = vadd.f32 %v284_v38, %v251_v37  ;;  %v11482_v45 = vor.u32 %v11929_v43, %v11481_v42  ;;  %v11490_v11 = vor.u32 %v11930_v46, %v11489_v44  ;;  %v13151_v48 = vor.u32 %v11928_v6, %v11483_v47  ;;  %v11920_v15 = vld [vmem:[#allocation16 + $0x68] sm:$0xf0]  ;;  %v11453_v16 = vld [vmem:[#allocation16 + $0x68] sm:$0xf] }
  0x50   :  { %19774 = vst [vmem:[#allocation47_spill] sm:$0xff] %v13135_v28  ;;  %v315_v39 = vmul.f32 %v13137_v29, %v13137_v29  ;;  %v11470_v56 = vor.u32 %v11926_v54, %v11469_v52  ;;  %v11478_v58 = vor.u32 %v11927_v57, %v11477_v55  ;;  %v11458_v2 = vor.u32 %v11923_v0, %v11457_v63  ;;  %v11919_v19 = vld [vmem:[#allocation16 + $0x64] sm:$0xf]  ;;  %v11447_v20 = vld [vmem:[#allocation16 + $0x6c] sm:$0xf0] }
  0x51   :  { %19775 = vst [vmem:[#allocation48_spill] sm:$0xff] %v13137_v29  ;;  %v316_v41 = vmul.f32 %v13147_v40, %v13147_v40  ;;  %732 = vmatpush.bf16.msra.mxu0 %v11482_v45  ;;  %830 = vmatpush.bf16.msra.mxu2 %v11490_v11  ;;  %v13159_v12 = vor.u32 %v11922_v7, %v11459_v8  ;;  %v11433_v30 = vld [vmem:[#allocation16 + $0x48] sm:$0xf]  ;;  %v11917_v31 = vld [vmem:[#allocation16 + $0x50] sm:$0xf0] }
  0x52   :  { %19776 = vst [vmem:[#allocation49_spill] sm:$0xff] %v13147_v40  ;;  %12144 = vmatpush.bf16.msra.mxu1 %v13151_v48  ;;  %12152 = vmatpush.bf16.msra.mxu3 %v11490_v11  ;;  %v13163_v22 = vor.u32 %v11919_v19, %v11447_v20  ;;  %v11918_v37 = vld [vmem:[#allocation16 + $0x58] sm:$0xf0]  ;;  %v11916_v38 = vld [vmem:[#allocation16 + $0x4c] sm:$0xf] }
  0x53   :  { %v11421_v44 = vld [vmem:[#allocation16 + $0x30] sm:$0xf]  ;;  %v11914_v45 = vld [vmem:[#allocation16 + $0x38] sm:$0xf0]  ;;  %v11429_v46 = vld [vmem:[#allocation16 + $0x38] sm:$0xf] }
  0x54   :  { %v13156_v62 = vpop.eup %12194  ;;  %v11422_v6 = vor.u32 %v11914_v45, %v11421_v44  ;;  %v11915_v47 = vld [vmem:[#allocation16 + $0x40] sm:$0xf0]  ;;  %v11913_v11 = vld [vmem:[#allocation16 + $0x34] sm:$0xf]  ;;  %v11423_v49 = vld [vmem:[#allocation16 + $0x3c] sm:$0xf0] }
  0x55   :  { %331 = vadd.xlane.f32.xlu1 %v308_v59  ;;  %329 = vadd.xlane.f32.xlu0 %v307_v61  ;;  %v11925_v59 = vld [vmem:[#allocation16 + $0x94] sm:$0xf]  ;;  %v350_v13 = vmul.f32 128.0, %v13156_v62  ;;  %v11430_v52 = vor.u32 %v11915_v47, %v11429_v46  ;;  %v13170_v54 = vor.u32 %v11913_v11, %v11423_v49  ;;  %vm354_vm0 = vweird.f32 %v13156_v62  ;;  %v11911_v57 = vld [vmem:[#allocation16 + $0x20] sm:$0xf0] }
  0x56   :  { %333 = vadd.xlane.f32.xlu2 %v309_v1  ;;  %733 = vmatpush.bf16.msra.mxu0 %v11470_v56  ;;  %v13154_v61 = vor.u32 %v11925_v59, %v11471_v60  ;;  %v11465_v1 = vld [vmem:[#allocation16 + $0x80] sm:$0xf]  ;;  %v11409_v56 = vld [vmem:[#allocation16 + $0x18] sm:$0xf]  ;;  %v11912_v60 = vld [vmem:[#allocation16 + $0x28] sm:$0xf0] }
  0x57   :  { %831 = vmatpush.bf16.msra.mxu2 %v11478_v58  ;;  %12153 = vmatpush.bf16.msra.mxu3 %v11478_v58  ;;  %v11466_v10 = vor.u32 %v11924_v3, %v11465_v1  ;;  %v351_v26 = vsub.f32 1.0, %v350_v13  ;;  %v11417_v58 = vld [vmem:[#allocation16 + $0x20] sm:$0xf]  ;;  %v11410_v59 = vor.u32 %v11911_v57, %v11409_v56  ;;  %v11910_v63 = vld [vmem:[#allocation16 + $0x1c] sm:$0xf] }
  0x58   :  { %12145 = vmatpush.bf16.msra.mxu1 %v13154_v61  ;;  %v11411_v0 = vld [vmem:[#allocation16 + $0x24] sm:$0xf0]  ;;  %v11418_v1 = vor.u32 %v11912_v60, %v11417_v58  ;;  %v11397_v3 = vld [vmem:[#allocation16] sm:$0xf]  ;;  %v11908_v7 = vld [vmem:[#allocation16 + $0x8] sm:$0xf0] }
  0x59   :  { %v352_v43 = vmul.f32 %v13156_v62, %v351_v26  ;;  %v11405_v8 = vld [vmem:[#allocation16 + $0x8] sm:$0xf]  ;;  %v11398_v13 = vor.u32 %v11908_v7, %v11397_v3 }
  0x5a   :  { %734 = vmatpush.bf16.msra.mxu0 %v11458_v2  ;;  %v13175_v2 = vor.u32 %v11910_v63, %v11411_v0 }
  0x5b   :  { %832 = vmatpush.bf16.msra.mxu2 %v11466_v10  ;;  %12154 = vmatpush.bf16.msra.mxu3 %v11466_v10  ;;  %v353_v55 = vadd.f32 %v13156_v62, %v352_v43 }
  0x5c   :  { %12146 = vmatpush.bf16.msra.mxu1 %v13159_v12 }
  0x5d   :  { %335 = vadd.xlane.f32.xlu0 %v310_v17  ;;  %337 = vadd.xlane.f32.xlu1 %v311_v18  ;;  %v11446_v17 = vor.u32 %v11920_v15, %v11445_v14  ;;  %v11921_v18 = vld [vmem:[#allocation16 + $0x70] sm:$0xf0]  ;;  %v13180_v10 = vsel %vm354_vm0, %v13156_v62, %v353_v55  ;;  %v11907_v15 = vld [vmem:[#allocation16 + $0x4] sm:$0xf] }
  0x5e   :  { %339 = vadd.xlane.f32.xlu2 %v312_v21  ;;  %v11454_v21 = vor.u32 %v11921_v18, %v11453_v16  ;;  %19777 = vst [vmem:[#allocation50_spill] sm:$0xff] %v13180_v10  ;;  %v11909_v14 = vld [vmem:[#allocation16 + $0x10] sm:$0xf0]  ;;  %v11399_v16 = vld [vmem:[#allocation16 + $0xc] sm:$0xf0] }
  0x5f   :  { %735 = vmatpush.bf16.msra.mxu0 %v11446_v17  ;;  %v11406_v17 = vor.u32 %v11909_v14, %v11405_v8  ;;  %v13183_v18 = vor.u32 %v11907_v15, %v11399_v16 }
  0x60   :  { %833 = vmatpush.bf16.msra.mxu2 %v11454_v21  ;;  %12147 = vmatpush.bf16.msra.mxu1 %v13163_v22 }
  0x61   :  { %12155 = vmatpush.bf16.msra.mxu3 %v11454_v21 }
  0x65   :  { %343 = vadd.xlane.f32.xlu1 %v314_v34  ;;  %341 = vadd.xlane.f32.xlu0 %v313_v35  ;;  %v11441_v34 = vld [vmem:[#allocation16 + $0x50] sm:$0xf]  ;;  %v11434_v35 = vor.u32 %v11917_v31, %v11433_v30 }
  0x66   :  { %345 = vadd.xlane.f32.xlu2 %v315_v39  ;;  %v11435_v39 = vld [vmem:[#allocation16 + $0x54] sm:$0xf0] }
  0x67   :  { %v13166_v42 = vor.u32 %v11916_v38, %v11435_v39  ;;  %736 = vmatpush.bf16.msra.mxu0 %v11434_v35 }
  0x69   :  { %12148 = vmatpush.bf16.msra.mxu1 %v13166_v42 }
  0x6b   :  { %737 = vmatpush.bf16.msra.mxu0 %v11422_v6 }
  0x6d   :  { %347 = vadd.xlane.f32.xlu0 %v316_v41  ;;  %v11442_v41 = vor.u32 %v11918_v37, %v11441_v34  ;;  %12149 = vmatpush.bf16.msra.mxu1 %v13170_v54 }
  0x6f   :  { %834 = vmatpush.bf16.msra.mxu2 %v11442_v41  ;;  %12156 = vmatpush.bf16.msra.mxu3 %v11442_v41 }
  0x70   :  { %738 = vmatpush.bf16.msra.mxu0 %v11410_v59 }
  0x71   :  { %12150 = vmatpush.bf16.msra.mxu1 %v13175_v2 }
  0x73   :  { %835 = vmatpush.bf16.msra.mxu2 %v11430_v52  ;;  %12157 = vmatpush.bf16.msra.mxu3 %v11430_v52 }
  0x74   :  { %739 = vmatpush.bf16.msra.mxu0 %v11398_v13 }
  0x75   :  { %12151 = vmatpush.bf16.msra.mxu1 %v13183_v18 }
  0x77   :  { %836 = vmatpush.bf16.msra.mxu2 %v11418_v1  ;;  %12158 = vmatpush.bf16.msra.mxu3 %v11418_v1 }
  0x78   :  { %781 = vmatpush.bf16.msrb.mxu0 %v13151_v48 }
  0x7b   :  { %837 = vmatpush.bf16.msra.mxu2 %v11406_v17  ;;  %12159 = vmatpush.bf16.msra.mxu3 %v11406_v17 }
  0x7c   :  { %782 = vmatpush.bf16.msrb.mxu0 %v13154_v61 }
  0x80   :  { %783 = vmatpush.bf16.msrb.mxu0 %v13159_v12 }
  0x84   :  { %784 = vmatpush.bf16.msrb.mxu0 %v13163_v22 }
  0x88   :  { %785 = vmatpush.bf16.msrb.mxu0 %v13166_v42 }
  0x8c   :  { %786 = vmatpush.bf16.msrb.mxu0 %v13170_v54 }
  0x90   :  { %787 = vmatpush.bf16.msrb.mxu0 %v13175_v2 }
  0x94   :  { %788 = vmatpush.bf16.msrb.mxu0 %v13183_v18 }
  0xb8   :  { %v322_v19 = vpop.xlane.xlu1 %321  ;;  %v318_v20 = vpop.xlane.xlu0 %317 }
  0xb9   :  { %v356_v21 = vmul.f32 %v13180_v10, %v318_v20  ;;  %v326_v26 = vpop.xlane.xlu2 %325  ;;  %v358_v31 = vmul.f32 %v13180_v10, %v322_v19 }
  0xba   :  { %v360_v62 = vmul.f32 %v13180_v10, %v326_v26 }
  0xbb   :  { %v13187_v30 = vadd.f32 1.1920929e-07, %v356_v21  ;;  %v13193_v35 = vadd.f32 1.1920929e-07, %v358_v31 }
  0xbc   :  { %v376_v34 = vadd.f32 1.1920929e-07, %v360_v62 }
  0xbd   :  { %12196 = vrsqrt.f32 %v13187_v30  ;;  %vm394_vm3 = vweird.f32 %v13187_v30  ;;  %vm414_vm13 = vweird.f32 %v13193_v35 }
  0xbe   :  { %12198 = vrsqrt.f32 %v376_v34  ;;  %vm434_vm1 = vweird.f32 %v376_v34 }
  0xbf   :  { %12200 = vrsqrt.f32 %v13193_v35 }
  0xc0   :  { %v324_v37 = vpop.xlane.xlu1 %323  ;;  %v320_v38 = vpop.xlane.xlu0 %319 }
  0xc1   :  { %v359_v39 = vmul.f32 %v13180_v10, %v324_v37  ;;  %v357_v41 = vmul.f32 %v13180_v10, %v320_v38  ;;  %v328_v43 = vpop.xlane.xlu2 %327 }
  0xc2   :  { %v361_v44 = vmul.f32 %v13180_v10, %v328_v43 }
  0xc3   :  { %v13199_v45 = vadd.f32 1.1920929e-07, %v359_v39  ;;  %v13201_v46 = vadd.f32 1.1920929e-07, %v357_v41  ;;  %v13203_v48 = vpop.eup %12196 }
  0xc4   :  { %v13206_v6 = vadd.f32 1.1920929e-07, %v361_v44  ;;  %v13209_v61 = vpop.eup %12198  ;;  %v389_v47 = vmul.f32 %v13203_v48, %v13187_v30  ;;  %vm395_vm4 = vweird.f32 %v13203_v48 }
  0xc5   :  { %12202 = vrsqrt.f32 %v13199_v45  ;;  %v429_v11 = vmul.f32 %v13209_v61, %v376_v34  ;;  %v13222_v60 = vpop.eup %12200  ;;  %vm435_vm2 = vweird.f32 %v13209_v61  ;;  %vm404_vm6 = vweird.f32 %v13201_v46  ;;  %vm13267_vm10 = vmor %vm394_vm3, %vm395_vm4 }
  0xc6   :  { %12204 = vrsqrt.f32 %v13201_v46  ;;  %v390_v49 = vmul.f32 %v13203_v48, %v389_v47  ;;  %v409_v14 = vmul.f32 %v13222_v60, %v13193_v35  ;;  %vm13248_vm5 = vmor %vm434_vm1, %vm435_vm2  ;;  %vm444_vm7 = vweird.f32 %v13206_v6 }
  0xc7   :  { %12206 = vrsqrt.f32 %v13206_v6  ;;  %v430_v52 = vmul.f32 %v13209_v61, %v429_v11  ;;  %vm415_vm14 = vweird.f32 %v13222_v60  ;;  %vm424_vm1 = vweird.f32 %v13199_v45 }
  0xc8   :  { %v332_v55 = vpop.xlane.xlu1 %331  ;;  %v330_v56 = vpop.xlane.xlu0 %329  ;;  %v391_v12 = vmul.f32 0.5, %v390_v49  ;;  %v410_v31 = vmul.f32 %v13222_v60, %v409_v14 }
  0xc9   :  { %v363_v57 = vmul.f32 %v13180_v10, %v332_v55  ;;  %v362_v58 = vmul.f32 %v13180_v10, %v330_v56  ;;  %v334_v59 = vpop.xlane.xlu2 %333  ;;  %v431_v63 = vmul.f32 0.5, %v430_v52 }
  0xca   :  { %v364_v13 = vmul.f32 %v13180_v10, %v334_v59  ;;  %v392_v15 = vsub.f32 1.5, %v391_v12 }
  0xcb   :  { %v13224_v0 = vpop.eup %12202  ;;  %v13226_v1 = vadd.f32 1.1920929e-07, %v363_v57  ;;  %v13228_v3 = vadd.f32 1.1920929e-07, %v362_v58  ;;  %v432_v8 = vsub.f32 1.5, %v431_v63 }
  0xcc   :  { %v12205_v7 = vpop.eup %12204  ;;  %v419_v42 = vmul.f32 %v13224_v0, %v13199_v45  ;;  %v13244_v26 = vadd.f32 1.1920929e-07, %v364_v13  ;;  %v393_v38 = vmul.f32 %v13203_v48, %v392_v15  ;;  %vm425_vm4 = vweird.f32 %v13224_v0 }
  0xcd   :  { %v12207_v22 = vpop.eup %12206  ;;  %v399_v16 = vmul.f32 %v12205_v7, %v13201_v46  ;;  %12208 = vrsqrt.f32 %v13226_v1  ;;  %v433_v21 = vmul.f32 %v13209_v61, %v432_v8  ;;  %vm405_vm9 = vweird.f32 %v12205_v7 }
  0xce   :  { %v439_v17 = vmul.f32 %v12207_v22, %v13206_v6  ;;  %12210 = vrsqrt.f32 %v13228_v3  ;;  %vm445_vm8 = vweird.f32 %v12207_v22  ;;  %v420_v54 = vmul.f32 %v13224_v0, %v419_v42  ;;  %vm406_vm12 = vmor %vm404_vm6, %vm405_vm9 }
  0xcf   :  { %v400_v19 = vmul.f32 %v12205_v7, %v399_v16  ;;  %v437_v55 = vsel %vm13248_vm5, %v13209_v61, %v433_v21  ;;  %12212 = vrsqrt.f32 %v13244_v26  ;;  %vm13278_vm11 = vmor %vm444_vm7, %vm445_vm8  ;;  %v397_v12 = vsel %vm13267_vm10, %v13203_v48, %v393_v38 }
  0xd0   :  { %v440_v20 = vmul.f32 %v12207_v22, %v439_v17  ;;  %v336_v62 = vpop.xlane.xlu0 %335  ;;  %v338_v58 = vpop.xlane.xlu1 %337  ;;  %v411_v61 = vmul.f32 0.5, %v410_v31  ;;  %v421_v8 = vmul.f32 0.5, %v420_v54  ;;  %v552_v15 = vmul.f32 %v437_v55, %v13068_v25  ;;  %vm13352_vm7 = vmor %vm424_vm1, %vm425_vm4 }
  0xd1   :  { %v401_v37 = vmul.f32 0.5, %v400_v19  ;;  %v365_v39 = vmul.f32 %v13180_v10, %v336_v62  ;;  %v340_v63 = vpop.xlane.xlu2 %339  ;;  %v548_v16 = vmul.f32 %v397_v12, %v13066_v24  ;;  %vm464_vm15 = vweird.f32 %v13226_v1  ;;  %vm13361_vm8 = vmor %vm414_vm13, %vm415_vm14 }
  0xd2   :  { %v441_v41 = vmul.f32 0.5, %v440_v20  ;;  %v367_v20 = vmul.f32 %v13180_v10, %v340_v63  ;;  %vm454_vm2 = vweird.f32 %v13228_v3  ;;  %vm474_vm9 = vweird.f32 %v13244_v26 }
  0xd3   :  { %v13256_v43 = vpop.eup %12208  ;;  %v402_v44 = vsub.f32 1.5, %v401_v37  ;;  %v13259_v47 = vadd.f32 1.1920929e-07, %v365_v39  ;;  %v412_v37 = vsub.f32 1.5, %v411_v61 }
  0xd4   :  { %v13261_v11 = vpop.eup %12210  ;;  %v442_v6 = vsub.f32 1.5, %v441_v41  ;;  %v459_v52 = vmul.f32 %v13256_v43, %v13226_v1  ;;  %vm465_vm0 = vweird.f32 %v13256_v43  ;;  %v13322_v39 = vadd.f32 1.1920929e-07, %v367_v20 }
  0xd5   :  { %v449_v30 = vmul.f32 %v13261_v11, %v13228_v3  ;;  %v403_v57 = vmul.f32 %v12205_v7, %v402_v44  ;;  %12214 = vrsqrt.f32 %v13259_v47  ;;  %vm455_vm3 = vweird.f32 %v13261_v11  ;;  %vm13329_vm5 = vmor %vm464_vm15, %vm465_vm0 }
  0xd6   :  { %v460_v2 = vmul.f32 %v13256_v43, %v459_v52  ;;  %v443_v59 = vmul.f32 %v12207_v22, %v442_v6  ;;  %v366_v41 = vmul.f32 %v13180_v10, %v338_v58  ;;  %vm13342_vm6 = vmor %vm454_vm2, %vm455_vm3  ;;  %v413_v58 = vmul.f32 %v13222_v60, %v412_v37 }
  0xd7   :  { %v450_v13 = vmul.f32 %v13261_v11, %v449_v30  ;;  %v407_v14 = vsel %vm406_vm12, %v12205_v7, %v403_v57  ;;  %v13302_v7 = vpop.eup %12212  ;;  %12216 = vrsqrt.f32 %v13322_v39  ;;  %vm504_vm4 = vweird.f32 %v13322_v39 }
  0xd8   :  { %v461_v48 = vmul.f32 0.5, %v460_v2  ;;  %v549_v17 = vmul.f32 %v407_v14, %v13081_v33  ;;  %v447_v42 = vsel %vm13278_vm11, %v12207_v22, %v443_v59  ;;  %v422_v22 = vsub.f32 1.5, %v421_v8  ;;  %v344_v54 = vpop.xlane.xlu1 %343  ;;  %v342_v44 = vpop.xlane.xlu0 %341 }
  0xd9   :  { %v451_v46 = vmul.f32 0.5, %v450_v13  ;;  %v553_v19 = vmul.f32 %v447_v42, %v13083_v36  ;;  %v469_v38 = vmul.f32 %v13302_v7, %v13244_v26  ;;  %v369_v56 = vmul.f32 %v13180_v10, %v344_v54 }
  0xda   :  { %v462_v21 = vsub.f32 1.5, %v461_v48  ;;  %v13306_v62 = vpack.c.bf16 %v549_v17, %v548_v16  ;;  %v423_v1 = vmul.f32 %v13224_v0, %v422_v22  ;;  %v368_v12 = vmul.f32 %v13180_v10, %v342_v44 }
  0xdb   :  { %v13308_v31 = vpop.eup %12214  ;;  %v452_v18 = vsub.f32 1.5, %v451_v46  ;;  %v13311_v34 = vpack.c.bf16 %v553_v19, %v552_v15  ;;  %v470_v61 = vmul.f32 %v13302_v7, %v469_v38  ;;  %v13366_v2 = vadd.f32 1.1920929e-07, %v366_v41  ;;  %v346_v41 = vpop.xlane.xlu2 %345 }
  0xdc   :  { %740 = vmatmul.bf16.vlgmr.msra.gmra.mxu0 %v13306_v62  ;;  %838 = vmatmul.bf16.vlgmr.msra.gmra.mxu2 %v13306_v62  ;;  %v479_v6 = vmul.f32 %v13308_v31, %v13259_v47  ;;  %v463_v55 = vmul.f32 %v13256_v43, %v462_v21  ;;  %v13368_v59 = vadd.f32 1.1920929e-07, %v369_v56  ;;  %v13370_v45 = vadd.f32 1.1920929e-07, %v368_v12 }
  0xdd   :  { %799 = vmatmul.bf16.vlgmr.msra.gmra.mxu1 %v13311_v34  ;;  %v453_v52 = vmul.f32 %v13261_v11, %v452_v18  ;;  %v427_v13 = vsel %vm13352_vm7, %v13224_v0, %v423_v1  ;;  %v417_v14 = vsel %vm13361_vm8, %v13222_v60, %v413_v58  ;;  %v471_v15 = vmul.f32 0.5, %v470_v61  ;;  %v13392_v17 = vpop.eup %12216 }
  0xde   :  { %v480_v63 = vmul.f32 %v13308_v31, %v479_v6  ;;  %v467_v35 = vsel %vm13329_vm5, %v13256_v43, %v463_v55  ;;  %12218 = vrsqrt.f32 %v13368_v59  ;;  %v551_v16 = vmul.f32 %v427_v13, %v13079_v32 }
  0xdf   :  { %v457_v8 = vsel %vm13342_vm6, %v13261_v11, %v453_v52  ;;  %12220 = vrsqrt.f32 %v13370_v45  ;;  %v555_v48 = vmul.f32 %v467_v35, %v13097_v50  ;;  %v550_v0 = vmul.f32 %v417_v14, %v13064_v23 }
  0xe0   :  { %v554_v11 = vmul.f32 %v457_v8, %v13099_v51  ;;  %12222 = vrsqrt.f32 %v13366_v2  ;;  %v481_v43 = vmul.f32 0.5, %v480_v63  ;;  %v472_v46 = vsub.f32 1.5, %v471_v15  ;;  %v348_v54 = vpop.xlane.xlu0 %347 }
  0xe1   :  { %v13401_v21 = vpack.c.bf16 %v551_v16, %v550_v0  ;;  %vm475_vm10 = vweird.f32 %v13302_v7  ;;  %vm484_vm11 = vweird.f32 %v13259_v47  ;;  %vm485_vm12 = vweird.f32 %v13308_v31 }
  0xe2   :  { %v13397_v60 = vpack.c.bf16 %v555_v48, %v554_v11  ;;  %v482_v20 = vsub.f32 1.5, %v481_v43  ;;  %v499_v26 = vmul.f32 %v13392_v17, %v13322_v39  ;;  %v473_v38 = vmul.f32 %v13302_v7, %v472_v46  ;;  %vm13419_vm13 = vmor %vm474_vm9, %vm475_vm10 }
  0xe3   :  { %v370_v52 = vmul.f32 %v13180_v10, %v346_v41  ;;  %v371_v55 = vmul.f32 %v13180_v10, %v348_v54  ;;  %vm486_vm14 = vmor %vm484_vm11, %vm485_vm12  ;;  %vm524_vm15 = vweird.f32 %v13368_v59  ;;  %vm514_vm1 = vweird.f32 %v13370_v45 }
  0xe4   :  { %v13395_v42 = vpop.eup %12218  ;;  %v483_v6 = vmul.f32 %v13308_v31, %v482_v20  ;;  %v477_v57 = vsel %vm13419_vm13, %v13302_v7, %v473_v38  ;;  %v500_v58 = vmul.f32 %v13392_v17, %v499_v26  ;;  %vm505_vm5 = vweird.f32 %v13392_v17 }
  0xe5   :  { %v13399_v19 = vpop.eup %12220  ;;  %v519_v18 = vmul.f32 %v13395_v42, %v13368_v59  ;;  %v13434_v1 = vadd.f32 1.1920929e-07, %v370_v52  ;;  %v13436_v12 = vadd.f32 1.1920929e-07, %v371_v55  ;;  %v556_v8 = vmul.f32 %v477_v57, %v13101_v53  ;;  %vm13470_vm9 = vmor %vm504_vm4, %vm505_vm5 }
  0xe6   :  { %v13403_v22 = vpop.eup %12222  ;;  %v509_v37 = vmul.f32 %v13399_v19, %v13370_v45  ;;  %v487_v61 = vsel %vm486_vm14, %v13308_v31, %v483_v6  ;;  %v501_v13 = vmul.f32 0.5, %v500_v58  ;;  %vm525_vm0 = vweird.f32 %v13395_v42 }
  0xe7   :  { %v489_v49 = vmul.f32 %v13403_v22, %v13366_v2  ;;  %v520_v56 = vmul.f32 %v13395_v42, %v519_v18  ;;  %12224 = vrsqrt.f32 %v13434_v1  ;;  %v557_v35 = vmul.f32 %v487_v61, %v13115_v4  ;;  %vm13452_vm3 = vmor %vm524_vm15, %vm525_vm0 }
  0xe8   :  { %v510_v30 = vmul.f32 %v13399_v19, %v509_v37  ;;  %12226 = vrsqrt.f32 %v13436_v12  ;;  %vm515_vm2 = vweird.f32 %v13399_v19  ;;  %v502_v43 = vsub.f32 1.5, %v501_v13  ;;  %v11934_v13 = vld [vmem:[#allocation13 + $0x18] sm:$0xff] }
  0xe9   :  { %v490_v3 = vmul.f32 %v13403_v22, %v489_v49  ;;  %v521_v47 = vmul.f32 0.5, %v520_v56  ;;  %v568_v48 = vpack.c.bf16 %v557_v35, %v556_v8  ;;  %vm494_vm6 = vweird.f32 %v13366_v2  ;;  %vm13459_vm7 = vmor %vm514_vm1, %vm515_vm2  ;;  %v11937_v8 = vld [vmem:[#allocation13 + $0x30] sm:$0xff]  ;;  %v11935_v35 = vld [vmem:[#allocation13 + $0x20] sm:$0xff] }
  0xea   :  { %v511_v63 = vmul.f32 0.5, %v510_v30  ;;  %vm495_vm8 = vweird.f32 %v13403_v22  ;;  %v503_v26 = vmul.f32 %v13392_v17, %v502_v43  ;;  %vm534_vm11 = vweird.f32 %v13434_v1 }
  0xeb   :  { %v491_v14 = vmul.f32 0.5, %v490_v3  ;;  %v522_v15 = vsub.f32 1.5, %v521_v47  ;;  %vm496_vm10 = vmor %vm494_vm6, %vm495_vm8  ;;  %vm544_vm13 = vweird.f32 %v13436_v12 }
  0xec   :  { %745 = vmatmul.bf16.gmra.mxu0 %v13401_v21  ;;  %843 = vmatmul.bf16.gmra.mxu2 %v13401_v21  ;;  %v512_v11 = vsub.f32 1.5, %v511_v63 }
  0xed   :  { %804 = vmatmul.bf16.gmra.mxu1 %v13397_v60  ;;  %v12225_v7 = vpop.eup %12224  ;;  %v492_v16 = vsub.f32 1.5, %v491_v14  ;;  %v523_v20 = vmul.f32 %v13395_v42, %v522_v15  ;;  %v11933_v14 = vld [vmem:[#allocation13 + $0x10] sm:$0xff]  ;;  %v11931_v15 = vld [vmem:[#allocation13] sm:$0xff] }
  0xee   :  { %v12227_v31 = vpop.eup %12226  ;;  %v529_v45 = vmul.f32 %v12225_v7, %v13434_v1  ;;  %v513_v39 = vmul.f32 %v13399_v19, %v512_v11  ;;  %vm535_vm12 = vweird.f32 %v12225_v7 }
  0xef   :  { %v539_v46 = vmul.f32 %v12227_v31, %v13436_v12  ;;  %v493_v37 = vmul.f32 %v13403_v22, %v492_v16  ;;  %vm545_vm14 = vweird.f32 %v12227_v31  ;;  %vm536_vm15 = vmor %vm534_vm11, %vm535_vm12  ;;  %v11938_v12 = vld [vmem:[#allocation13 + $0x38] sm:$0xff] }
  0xf0   :  { %v517_v38 = vsel %vm13459_vm7, %v13399_v19, %v513_v39  ;;  %v530_v44 = vmul.f32 %v12225_v7, %v529_v45  ;;  %v507_v19 = vsel %vm13470_vm9, %v13392_v17, %v503_v26  ;;  %vm546_vm0 = vmor %vm544_vm13, %vm545_vm14  ;;  %1114 = vmatpush.bf16.msrb.mxu3 %v11938_v12  ;;  %1548 = vmatpush.bf16.msrb.mxu1 %v11938_v12 }
  0xf1   :  { %v560_v41 = vmul.f32 %v517_v38, %v13135_v28  ;;  %v540_v49 = vmul.f32 %v12227_v31, %v539_v46  ;;  %v497_v52 = vsel %vm496_vm10, %v13403_v22, %v493_v37  ;;  %v559_v2 = vmul.f32 %v507_v19, %v13119_v9 }
  0xf2   :  { %v531_v55 = vmul.f32 0.5, %v530_v44 }
  0xf3   :  { %v541_v56 = vmul.f32 0.5, %v540_v49 }
  0xf4   :  { %v532_v30 = vsub.f32 1.5, %v531_v55  ;;  %1115 = vmatpush.bf16.msrb.mxu3 %v11937_v8  ;;  %1549 = vmatpush.bf16.msrb.mxu1 %v11937_v8 }
  0xf5   :  { %v542_v57 = vsub.f32 1.5, %v541_v56 }
  0xf6   :  { %v533_v17 = vmul.f32 %v12225_v7, %v532_v30 }
  0xf7   :  { %v543_v58 = vmul.f32 %v12227_v31, %v542_v57 }
  0xf8   :  { %v537_v3 = vsel %vm536_vm15, %v12225_v7, %v533_v17  ;;  %v11932_v7 = vld [vmem:[#allocation13 + $0x8] sm:$0xff] }
  0xf9   :  { %v547_v61 = vsel %vm546_vm0, %v12227_v31, %v543_v58  ;;  %v562_v1 = vmul.f32 %v537_v3, %v13137_v29 }
  0xfa   :  { %v563_v47 = vmul.f32 %v547_v61, %v13147_v40 }
  0xfc   :  { %750 = vmatmul.bf16.gmra.mxu0 %v13311_v34  ;;  %848 = vmatmul.bf16.gmra.mxu2 %v13311_v34  ;;  %v527_v34 = vsel %vm13452_vm3, %v13395_v42, %v523_v20  ;;  %v558_v42 = vmul.f32 %v497_v52, %v13117_v5  ;;  %v571_v63 = vpack.c.bf16 %v563_v47, %v562_v1 }
  0xfd   :  { %809 = vmatmul.bf16.gmra.mxu1 %v568_v48  ;;  %v561_v54 = vmul.f32 %v527_v34, %v13133_v27 }
  0xfe   :  { %v569_v22 = vpack.c.bf16 %v559_v2, %v558_v42 }
  0xff   :  { %v570_v6 = vpack.c.bf16 %v561_v54, %v560_v41 }
 0x101   :  { %868 = vmatmul.bf16.vlgmr.msra.gmra.mxu3 %v570_v6 }
 0x10c   :  { %755 = vmatmul.bf16.gmra.mxu0 %v13397_v60  ;;  %853 = vmatmul.bf16.gmra.mxu2 %v13397_v60  ;;  %v11936_v60 = vld [vmem:[#allocation13 + $0x28] sm:$0xff] }
 0x10d   :  { %814 = vmatmul.bf16.gmra.mxu1 %v569_v22  ;;  %1116 = vmatpush.bf16.msrb.mxu3 %v11936_v60 }
 0x10e   :  { %1550 = vmatpush.bf16.msrb.mxu1 %v11936_v60 }
 0x111   :  { %873 = vmatmul.bf16.gmra.mxu3 %v571_v63 }
 0x112   :  { %1117 = vmatpush.bf16.msrb.mxu3 %v11935_v35  ;;  %1551 = vmatpush.bf16.msrb.mxu1 %v11935_v35 }
 0x116   :  { %1118 = vmatpush.bf16.msrb.mxu3 %v11934_v13  ;;  %1552 = vmatpush.bf16.msrb.mxu1 %v11934_v13 }
 0x11a   :  { %1119 = vmatpush.bf16.msrb.mxu3 %v11933_v14  ;;  %1553 = vmatpush.bf16.msrb.mxu1 %v11933_v14 }
 0x11c   :  { %760 = vmatmul.bf16.gmra.mxu0 %v568_v48  ;;  %858 = vmatmul.bf16.gmra.mxu2 %v568_v48 }
 0x11d   :  { %819 = vmatmul.bf16.gmra.mxu1 %v570_v6 }
 0x11e   :  { %1120 = vmatpush.bf16.msrb.mxu3 %v11932_v7  ;;  %1554 = vmatpush.bf16.msrb.mxu1 %v11932_v7 }
 0x122   :  { %1121 = vmatpush.bf16.msrb.mxu3 %v11931_v15  ;;  %1555 = vmatpush.bf16.msrb.mxu1 %v11931_v15 }
 0x12c   :  { %765 = vmatmul.bf16.gmra.mxu0 %v569_v22  ;;  %863 = vmatmul.bf16.gmra.mxu2 %v569_v22 }
 0x12d   :  { %824 = vmatmul.bf16.gmra.mxu1 %v571_v63 }
 0x13c   :  { %770 = vmatmul.bf16.gmra.mxu0 %v570_v6 }
 0x14c   :  { %775 = vmatmul.bf16.gmra.mxu0 %v571_v63 }
 0x159   :  { %v13498_v11 = vpop.f32.mrf.mxu0 }
 0x15a   :  { %v1026_v43 = vmul.f32 %v13498_v11, %v13498_v11 }
 0x15c   :  { %789 = vmatmul.bf16.vlgmr.msrb.gmra.mxu0 %v13306_v62 }
 0x15f   :  { %v13501_v31 = vpop.f32.mrf.mxu2 }
 0x161   :  { %v13503_v48 = vpop.f32.mrf.mxu0 }
 0x162   :  { %v1027_v16 = vmul.f32 %v13503_v48, %v13503_v48 }
 0x164   :  { %v1042_v0 = vpack.c.bf16 %v1027_v16, %v1026_v43 }
 0x166   :  { %1122 = vmatmul.bf16.vlgmr.msrb.gmra.mxu3 %v1042_v0 }
 0x167   :  { %v13509_v59 = vpop.f32.mrf.mxu2 }
 0x168   :  { %v12022_v45 = vpack.c.bf16 %v13509_v59, %v13501_v31 }
 0x169   :  { %v13513_v46 = vpop.f32.mrf.mxu0 }
 0x16a   :  { %12023 = vst [vmem:[#allocation23] sm:$0xff] %v12022_v45   ;;  %v1028_v20 = vmul.f32 %v13513_v46, %v13513_v46 }
 0x16c   :  { %794 = vmatmul.bf16.gmra.mxu0 %v13401_v21 }
 0x16f   :  { %v13516_v62 = vpop.f32.mrf.mxu2 }
 0x171   :  { %v13518_v39 = vpop.f32.mrf.mxu0 }
 0x172   :  { %v1029_v18 = vmul.f32 %v13518_v39, %v13518_v39 }
 0x174   :  { %v1043_v37 = vpack.c.bf16 %v1029_v18, %v1028_v20 }
 0x176   :  { %1127 = vmatmul.bf16.gmra.mxu3 %v1043_v37 }
 0x177   :  { %v13524_v26 = vpop.f32.mrf.mxu2 }
 0x178   :  { %v12027_v38 = vpack.c.bf16 %v13524_v26, %v13516_v62 }
 0x179   :  { %v13528_v34 = vpop.f32.mrf.mxu0 }
 0x17a   :  { %12123 = vst [vmem:[#allocation23 + $0x8] sm:$0xff] %v12027_v38   ;;  %v1030_v54 = vmul.f32 %v13528_v34, %v13528_v34 }
 0x17f   :  { %v13530_v21 = vpop.f32.mrf.mxu2 }
 0x181   :  { %v13532_v41 = vpop.f32.mrf.mxu0 }
 0x182   :  { %v1031_v44 = vmul.f32 %v13532_v41, %v13532_v41 }
 0x184   :  { %v1044_v49 = vpack.c.bf16 %v1031_v44, %v1030_v54  ;;  %v13544_v55 = vpop.f32.mrf.mxu3 }
 0x186   :  { %1132 = vmatmul.bf16.gmra.mxu3 %v1044_v49 }
 0x187   :  { %v13538_v6 = vpop.f32.mrf.mxu2 }
 0x188   :  { %v12032_v52 = vpack.c.bf16 %v13538_v6, %v13530_v21 }
 0x189   :  { %v13542_v19 = vpop.f32.mrf.mxu0 }
 0x18a   :  { %12124 = vst [vmem:[#allocation23 + $0x10] sm:$0xff] %v12032_v52   ;;  %v1032_v2 = vmul.f32 %v13542_v19, %v13542_v19 }
 0x18c   :  { %v13554_v22 = vpop.f32.mrf.mxu3 }
 0x18d   :  { %v12052_v17 = vpack.c.bf16 %v13554_v22, %v13544_v55 }
 0x18f   :  { %v13546_v56 = vpop.f32.mrf.mxu2  ;;  %12128 = vst [vmem:[#allocation23 + $0x30] sm:$0xff] %v12052_v17  }
 0x191   :  { %v13548_v42 = vpop.f32.mrf.mxu0 }
 0x192   :  { %v1033_v30 = vmul.f32 %v13548_v42, %v13548_v42 }
 0x194   :  { %v1045_v57 = vpack.c.bf16 %v1033_v30, %v1032_v2  ;;  %v13564_v1 = vpop.f32.mrf.mxu3 }
 0x196   :  { %1137 = vmatmul.bf16.gmra.mxu3 %v1045_v57  ;;  %v11946_v57 = vld [vmem:[#allocation14 + $0x38] sm:$0xff] }
 0x197   :  { %v13558_v58 = vpop.f32.mrf.mxu2  ;;  %1411 = vmatpush.bf16.msra.mxu0 %v11946_v57  ;;  %12160 = vmatpush.bf16.msra.mxu3 %v11946_v57 }
 0x198   :  { %v12037_v3 = vpack.c.bf16 %v13558_v58, %v13546_v56  ;;  %1781 = vmatpush.bf16.msrb.mxu2 %v11946_v57 }
 0x199   :  { %v13562_v61 = vpop.f32.mrf.mxu0 }
 0x19a   :  { %12125 = vst [vmem:[#allocation23 + $0x18] sm:$0xff] %v12037_v3   ;;  %v1034_v12 = vmul.f32 %v13562_v61, %v13562_v61 }
 0x19c   :  { %v13574_v35 = vpop.f32.mrf.mxu3 }
 0x19d   :  { %v12057_v13 = vpack.c.bf16 %v13574_v35, %v13564_v1 }
 0x19f   :  { %v13566_v47 = vpop.f32.mrf.mxu2  ;;  %12129 = vst [vmem:[#allocation23 + $0x38] sm:$0xff] %v12057_v13   ;;  %v11944_v13 = vld [vmem:[#allocation14 + $0x28] sm:$0xff] }
 0x1a1   :  { %v13568_v63 = vpop.f32.mrf.mxu0 }
 0x1a2   :  { %v1035_v8 = vmul.f32 %v13568_v63, %v13568_v63 }
 0x1a4   :  { %v1046_v60 = vpack.c.bf16 %v1035_v8, %v1034_v12  ;;  %v11945_v8 = vld [vmem:[#allocation14 + $0x30] sm:$0xff] }
 0x1a5   :  { %1412 = vmatpush.bf16.msra.mxu0 %v11945_v8  ;;  %12161 = vmatpush.bf16.msra.mxu3 %v11945_v8 }
 0x1a6   :  { %1142 = vmatmul.bf16.gmra.mxu3 %v1046_v60  ;;  %1782 = vmatpush.bf16.msrb.mxu2 %v11945_v8 }
 0x1a7   :  { %v13578_v14 = vpop.f32.mrf.mxu2 }
 0x1a8   :  { %v12042_v7 = vpack.c.bf16 %v13578_v14, %v13566_v47 }
 0x1a9   :  { %v13582_v15 = vpop.f32.mrf.mxu0  ;;  %1413 = vmatpush.bf16.msra.mxu0 %v11944_v13  ;;  %12162 = vmatpush.bf16.msra.mxu3 %v11944_v13 }
 0x1aa   :  { %12126 = vst [vmem:[#allocation23 + $0x20] sm:$0xff] %v12042_v7   ;;  %v1036_v0 = vmul.f32 %v13582_v15, %v13582_v15  ;;  %1783 = vmatpush.bf16.msrb.mxu2 %v11944_v13  ;;  %v11943_v7 = vld [vmem:[#allocation14 + $0x20] sm:$0xff] }
 0x1ab   :  { %v11939_v13 = vld [vmem:[#allocation14] sm:$0xff] }
 0x1ad   :  { %1414 = vmatpush.bf16.msra.mxu0 %v11943_v7  ;;  %12163 = vmatpush.bf16.msra.mxu3 %v11943_v7 }
 0x1ae   :  { %1784 = vmatpush.bf16.msrb.mxu2 %v11943_v7 }
 0x1af   :  { %v13584_v43 = vpop.f32.mrf.mxu2 }
 0x1b1   :  { %v13586_v16 = vpop.f32.mrf.mxu0 }
 0x1b2   :  { %v1037_v45 = vmul.f32 %v13586_v16, %v13586_v16 }
 0x1b4   :  { %v1047_v20 = vpack.c.bf16 %v1037_v45, %v1036_v0  ;;  %v13614_v0 = vpop.f32.mrf.mxu1 }
 0x1b5   :  { %v1528_v51 = vmul.f32 %v13614_v0, %v13614_v0 }
 0x1b6   :  { %1147 = vmatmul.bf16.gmra.mxu3 %v1047_v20  ;;  %v11942_v20 = vld [vmem:[#allocation14 + $0x18] sm:$0xff] }
 0x1b7   :  { %v13592_v18 = vpop.f32.mrf.mxu2  ;;  %1415 = vmatpush.bf16.msra.mxu0 %v11942_v20  ;;  %12164 = vmatpush.bf16.msra.mxu3 %v11942_v20 }
 0x1b8   :  { %v12047_v37 = vpack.c.bf16 %v13592_v18, %v13584_v43  ;;  %1785 = vmatpush.bf16.msrb.mxu2 %v11942_v20 }
 0x1b9   :  { %v13596_v38 = vpop.f32.mrf.mxu0 }
 0x1ba   :  { %12127 = vst [vmem:[#allocation23 + $0x28] sm:$0xff] %v12047_v37   ;;  %v1038_v44 = vmul.f32 %v13596_v38, %v13596_v38 }
 0x1bc   :  { %v13624_v8 = vpop.f32.mrf.mxu1 }
 0x1c1   :  { %v13598_v54 = vpop.f32.mrf.mxu0 }
 0x1c2   :  { %v1039_v49 = vmul.f32 %v13598_v54, %v13598_v54 }
 0x1c4   :  { %v1048_v52 = vpack.c.bf16 %v1039_v49, %v1038_v44 }
 0x1c6   :  { %1152 = vmatmul.bf16.gmra.mxu3 %v1048_v52  ;;  %v11941_v52 = vld [vmem:[#allocation14 + $0x10] sm:$0xff] }
 0x1c7   :  { %1416 = vmatpush.bf16.msra.mxu0 %v11941_v52  ;;  %12165 = vmatpush.bf16.msra.mxu3 %v11941_v52 }
 0x1c8   :  { %1786 = vmatpush.bf16.msrb.mxu2 %v11941_v52 }
 0x1c9   :  { %v13604_v2 = vpop.f32.mrf.mxu0 }
 0x1ca   :  { %v1040_v17 = vmul.f32 %v13604_v2, %v13604_v2 }
 0x1d1   :  { %v13606_v30 = vpop.f32.mrf.mxu0 }
 0x1d2   :  { %v1041_v3 = vmul.f32 %v13606_v30, %v13606_v30 }
 0x1d4   :  { %v1049_v12 = vpack.c.bf16 %v1041_v3, %v1040_v17  ;;  %v11940_v3 = vld [vmem:[#allocation14 + $0x8] sm:$0xff] }
 0x1d5   :  { %1417 = vmatpush.bf16.msra.mxu0 %v11940_v3  ;;  %12166 = vmatpush.bf16.msra.mxu3 %v11940_v3 }
 0x1d6   :  { %1157 = vmatmul.bf16.gmra.mxu3 %v1049_v12  ;;  %1787 = vmatpush.bf16.msrb.mxu2 %v11940_v3 }
 0x1d9   :  { %v13612_v60 = vpop.f32.mrf.mxu0  ;;  %1418 = vmatpush.bf16.msra.mxu0 %v11939_v13  ;;  %12167 = vmatpush.bf16.msra.mxu3 %v11939_v13 }
 0x1da   :  { %v1524_v37 = vmul.f32 %v13612_v60, %v13612_v60  ;;  %1788 = vmatpush.bf16.msrb.mxu2 %v11939_v13 }
 0x1e1   :  { %v13616_v45 = vpop.f32.mrf.mxu0 }
 0x1e2   :  { %v1525_v44 = vmul.f32 %v13616_v45, %v13616_v45 }
 0x1e4   :  { %v1540_v49 = vpack.c.bf16 %v1525_v44, %v1524_v37 }
 0x1e6   :  { %1556 = vmatmul.bf16.vlgmr.msrb.gmra.mxu1 %v1540_v49 }
 0x1e9   :  { %v13622_v57 = vpop.f32.mrf.mxu0  ;;  %v1123_v17 = vpop.f32.mrf.mxu3 }
 0x1ea   :  { %v1124_v12 = vadd.f32 1.1920929e-07, %v1123_v17  ;;  %v1526_v44 = vmul.f32 %v13622_v57, %v13622_v57  ;;  %v13632_v17 = vpop.f32.mrf.mxu1 }
 0x1ec   :  { %12228 = vrsqrt.f32 %v1124_v12  ;;  %vm1169_vm2 = vweird.f32 %v1124_v12 }
 0x1f1   :  { %v13626_v7 = vpop.f32.mrf.mxu0  ;;  %v1125_v20 = vpop.f32.mrf.mxu3 }
 0x1f2   :  { %v12229_v37 = vpop.eup %12228  ;;  %v1126_v49 = vadd.f32 1.1920929e-07, %v1125_v20  ;;  %v1527_v52 = vmul.f32 %v13626_v7, %v13626_v7  ;;  %v13634_v4 = vpop.f32.mrf.mxu1 }
 0x1f3   :  { %v1164_v10 = vmul.f32 %v12229_v37, %v1124_v12  ;;  %vm1170_vm1 = vweird.f32 %v12229_v37 }
 0x1f4   :  { %12230 = vrsqrt.f32 %v1126_v49  ;;  %v1541_v3 = vpack.c.bf16 %v1527_v52, %v1526_v44  ;;  %vm1171_vm4 = vmor %vm1169_vm2, %vm1170_vm1  ;;  %vm1179_vm5 = vweird.f32 %v1126_v49 }
 0x1f5   :  { %v1165_v40 = vmul.f32 %v12229_v37, %v1164_v10  ;;  %v1529_v10 = vmul.f32 %v13624_v8, %v13624_v8 }
 0x1f6   :  { %1561 = vmatmul.bf16.gmra.mxu1 %v1541_v3 }
 0x1f7   :  { %v1166_v29 = vmul.f32 0.5, %v1165_v40 }
 0x1f9   :  { %v1128_v13 = vpop.f32.mrf.mxu3  ;;  %v1167_v9 = vsub.f32 1.5, %v1166_v29 }
 0x1fa   :  { %v12231_v27 = vpop.eup %12230  ;;  %v1129_v28 = vadd.f32 1.1920929e-07, %v1128_v13  ;;  %v13646_v12 = vpop.f32.mrf.mxu1 }
 0x1fb   :  { %v1174_v5 = vmul.f32 %v12231_v27, %v1126_v49  ;;  %v1168_v53 = vmul.f32 %v12229_v37, %v1167_v9  ;;  %vm1180_vm3 = vweird.f32 %v12231_v27  ;;  %v1542_v9 = vpack.c.bf16 %v1529_v10, %v1528_v51 }
 0x1fc   :  { %12232 = vrsqrt.f32 %v1129_v28  ;;  %vm1181_vm6 = vmor %vm1179_vm5, %vm1180_vm3  ;;  %vm1189_vm8 = vweird.f32 %v1129_v28 }
 0x1fd   :  { %v1175_v20 = vmul.f32 %v12231_v27, %v1174_v5  ;;  %v1172_v3 = vsel %vm1171_vm4, %v12229_v37, %v1168_v53 }
 0x1fe   :  { %v13641_v25 = vmul.f32 %v1172_v3, %v13498_v11 }
 0x1ff   :  { %v1176_v50 = vmul.f32 0.5, %v1175_v20 }
 0x201   :  { %v1177_v40 = vsub.f32 1.5, %v1176_v50  ;;  %v1130_v44 = vpop.f32.mrf.mxu3 }
 0x202   :  { %v12233_v52 = vpop.eup %12232  ;;  %v1131_v29 = vadd.f32 1.1920929e-07, %v1130_v44  ;;  %v13654_v3 = vpop.f32.mrf.mxu1 }
 0x203   :  { %v1178_v13 = vmul.f32 %v12231_v27, %v1177_v40  ;;  %v1184_v5 = vmul.f32 %v12233_v52, %v1129_v28  ;;  %vm1190_vm7 = vweird.f32 %v12233_v52 }
 0x204   :  { %12234 = vrsqrt.f32 %v1131_v29  ;;  %vm1191_vm10 = vmor %vm1189_vm8, %vm1190_vm7  ;;  %vm1199_vm11 = vweird.f32 %v1131_v29 }
 0x205   :  { %v1182_v20 = vsel %vm1181_vm6, %v12231_v27, %v1178_v13  ;;  %v1185_v36 = vmul.f32 %v12233_v52, %v1184_v5 }
 0x206   :  { %1566 = vmatmul.bf16.gmra.mxu1 %v1542_v9  ;;  %v13644_v50 = vmul.f32 %v1182_v20, %v13503_v48  ;;  %v1530_v48 = vmul.f32 %v13632_v17, %v13632_v17 }
 0x207   :  { %v1186_v32 = vmul.f32 0.5, %v1185_v36  ;;  %v1531_v36 = vmul.f32 %v13634_v4, %v13634_v4 }
 0x208   :  { %v1339_v53 = vpack.c.bf16 %v13644_v50, %v13641_v25 }
 0x209   :  { %v1133_v37 = vpop.f32.mrf.mxu3  ;;  %v1187_v51 = vsub.f32 1.5, %v1186_v32 }
 0x20a   :  { %v12235_v49 = vpop.eup %12234  ;;  %v1134_v40 = vadd.f32 1.1920929e-07, %v1133_v37  ;;  %1419 = vmatmul.bf16.vlgmr.msra.gmra.mxu0 %v1339_v53 }
 0x20b   :  { %v1194_v27 = vmul.f32 %v12235_v49, %v1131_v29  ;;  %v1188_v44 = vmul.f32 %v12233_v52, %v1187_v51  ;;  %vm1200_vm9 = vweird.f32 %v12235_v49  ;;  %v1543_v51 = vpack.c.bf16 %v1531_v36, %v1530_v48 }
 0x20c   :  { %12236 = vrsqrt.f32 %v1134_v40  ;;  %vm1201_vm12 = vmor %vm1199_vm11, %vm1200_vm9  ;;  %vm1209_vm14 = vweird.f32 %v1134_v40 }
 0x20d   :  { %v1195_v10 = vmul.f32 %v12235_v49, %v1194_v27  ;;  %v1192_v53 = vsel %vm1191_vm10, %v12233_v52, %v1188_v44  ;;  %v13664_v44 = vpop.f32.mrf.mxu1 }
 0x20e   :  { %v13657_v23 = vmul.f32 %v1192_v53, %v13513_v46 }
 0x20f   :  { %v1196_v11 = vmul.f32 0.5, %v1195_v10 }
 0x211   :  { %v1197_v13 = vsub.f32 1.5, %v1196_v11  ;;  %v1135_v5 = vpop.f32.mrf.mxu3 }
 0x212   :  { %v12237_v9 = vpop.eup %12236  ;;  %v1136_v32 = vadd.f32 1.1920929e-07, %v1135_v5 }
 0x213   :  { %v1204_v20 = vmul.f32 %v12237_v9, %v1134_v40  ;;  %v1198_v37 = vmul.f32 %v12235_v49, %v1197_v13  ;;  %vm1210_vm13 = vweird.f32 %v12237_v9 }
 0x214   :  { %12238 = vrsqrt.f32 %v1136_v32  ;;  %vm1211_vm0 = vmor %vm1209_vm14, %vm1210_vm13  ;;  %vm1219_vm1 = vweird.f32 %v1136_v32 }
 0x215   :  { %v1205_v27 = vmul.f32 %v12237_v9, %v1204_v20  ;;  %v1202_v10 = vsel %vm1201_vm12, %v12235_v49, %v1198_v37  ;;  %v1533_v20 = vmul.f32 %v13654_v3, %v13654_v3 }
 0x216   :  { %1571 = vmatmul.bf16.gmra.mxu1 %v1543_v51  ;;  %v13660_v28 = vmul.f32 %v1202_v10, %v13518_v39  ;;  %v1532_v39 = vmul.f32 %v13646_v12, %v13646_v12 }
 0x217   :  { %v1206_v11 = vmul.f32 0.5, %v1205_v27 }
 0x218   :  { %v1340_v5 = vpack.c.bf16 %v13660_v28, %v13657_v23 }
 0x219   :  { %v1138_v29 = vpop.f32.mrf.mxu3  ;;  %v1207_v48 = vsub.f32 1.5, %v1206_v11 }
 0x21a   :  { %v12239_v33 = vpop.eup %12238  ;;  %v1139_v52 = vadd.f32 1.1920929e-07, %v1138_v29  ;;  %1424 = vmatmul.bf16.gmra.mxu0 %v1340_v5  ;;  %v1544_v29 = vpack.c.bf16 %v1533_v20, %v1532_v39 }
 0x21b   :  { %v1214_v36 = vmul.f32 %v12239_v33, %v1136_v32  ;;  %v1208_v13 = vmul.f32 %v12237_v9, %v1207_v48  ;;  %vm1220_vm15 = vweird.f32 %v12239_v33  ;;  %v13670_v48 = vpop.f32.mrf.mxu1 }
 0x21c   :  { %12240 = vrsqrt.f32 %v1139_v52  ;;  %vm1221_vm2 = vmor %vm1219_vm1, %vm1220_vm15  ;;  %vm1229_vm4 = vweird.f32 %v1139_v52 }
 0x21d   :  { %v1215_v49 = vmul.f32 %v12239_v33, %v1214_v36  ;;  %v1212_v5 = vsel %vm1211_vm0, %v12237_v9, %v1208_v13 }
 0x21e   :  { %v13673_v40 = vmul.f32 %v1212_v5, %v13528_v34 }
 0x21f   :  { %v1216_v46 = vmul.f32 0.5, %v1215_v49 }
 0x220   :  { %19800 = vst [vmem:[#allocation51_spill] sm:$0xff] %v13673_v40 }
 0x221   :  { %v1217_v53 = vsub.f32 1.5, %v1216_v46  ;;  %v1140_v37 = vpop.f32.mrf.mxu3 }
 0x222   :  { %v12241_v51 = vpop.eup %12240  ;;  %v1141_v27 = vadd.f32 1.1920929e-07, %v1140_v37 }
 0x223   :  { %v1218_v10 = vmul.f32 %v12239_v33, %v1217_v53  ;;  %v1224_v11 = vmul.f32 %v12241_v51, %v1139_v52  ;;  %vm1230_vm3 = vweird.f32 %v12241_v51 }
 0x224   :  { %12242 = vrsqrt.f32 %v1141_v27  ;;  %vm1231_vm6 = vmor %vm1229_vm4, %vm1230_vm3  ;;  %vm1239_vm7 = vweird.f32 %v1141_v27 }
 0x225   :  { %v1225_v36 = vmul.f32 %v12241_v51, %v1224_v11  ;;  %v1222_v49 = vsel %vm1221_vm2, %v12239_v33, %v1218_v10  ;;  %v13680_v33 = vpop.f32.mrf.mxu1  ;;  %v1535_v11 = vmul.f32 %v13670_v48, %v13670_v48 }
 0x226   :  { %1576 = vmatmul.bf16.gmra.mxu1 %v1544_v29  ;;  %v13676_v46 = vmul.f32 %v1222_v49, %v13532_v41  ;;  %v1534_v41 = vmul.f32 %v13664_v44, %v13664_v44 }
 0x227   :  { %v1226_v24 = vmul.f32 0.5, %v1225_v36 }
 0x228   :  { %19801 = vst [vmem:[#allocation52_spill] sm:$0xff] %v13676_v46  ;;  %v1341_v32 = vpack.c.bf16 %v13676_v46, %v13673_v40 }
 0x229   :  { %v1143_v53 = vpop.f32.mrf.mxu3  ;;  %v1227_v39 = vsub.f32 1.5, %v1226_v24 }
 0x22a   :  { %v12243_v9 = vpop.eup %12242  ;;  %v1144_v13 = vadd.f32 1.1920929e-07, %v1143_v53  ;;  %1429 = vmatmul.bf16.gmra.mxu0 %v1341_v32 }
 0x22b   :  { %v1234_v20 = vmul.f32 %v12243_v9, %v1141_v27  ;;  %v1228_v10 = vmul.f32 %v12241_v51, %v1227_v39  ;;  %vm1240_vm5 = vweird.f32 %v12243_v9  ;;  %v1545_v39 = vpack.c.bf16 %v1535_v11, %v1534_v41 }
 0x22c   :  { %12244 = vrsqrt.f32 %v1144_v13  ;;  %vm1241_vm8 = vmor %vm1239_vm7, %vm1240_vm5  ;;  %vm1249_vm10 = vweird.f32 %v1144_v13 }
 0x22d   :  { %v1235_v37 = vmul.f32 %v12243_v9, %v1234_v20  ;;  %v1232_v53 = vsel %vm1231_vm6, %v12241_v51, %v1228_v10 }
 0x22e   :  { %v13687_v46 = vmul.f32 %v1232_v53, %v13542_v19 }
 0x22f   :  { %v1236_v34 = vmul.f32 0.5, %v1235_v37 }
 0x230   :  { %19802 = vst [vmem:[#allocation53_spill] sm:$0xff] %v13687_v46 }
 0x231   :  { %v1237_v5 = vsub.f32 1.5, %v1236_v34  ;;  %v1145_v29 = vpop.f32.mrf.mxu3 }
 0x232   :  { %v12245_v36 = vpop.eup %12244  ;;  %v1146_v24 = vadd.f32 1.1920929e-07, %v1145_v29 }
 0x233   :  { %v1238_v49 = vmul.f32 %v12243_v9, %v1237_v5  ;;  %v1244_v32 = vmul.f32 %v12245_v36, %v1144_v13  ;;  %v13694_v5 = vpop.f32.mrf.mxu1  ;;  %vm1250_vm9 = vweird.f32 %v12245_v36 }
 0x234   :  { %12246 = vrsqrt.f32 %v1146_v24  ;;  %vm1251_vm12 = vmor %vm1249_vm10, %vm1250_vm9  ;;  %vm1259_vm13 = vweird.f32 %v1146_v24 }
 0x235   :  { %v1245_v20 = vmul.f32 %v12245_v36, %v1244_v32  ;;  %v1242_v37 = vsel %vm1241_vm8, %v12243_v9, %v1238_v49  ;;  %v1537_v32 = vmul.f32 %v13694_v5, %v13694_v5 }
 0x236   :  { %1581 = vmatmul.bf16.gmra.mxu1 %v1545_v39  ;;  %v13690_v52 = vmul.f32 %v1242_v37, %v13548_v42  ;;  %v1536_v42 = vmul.f32 %v13680_v33, %v13680_v33 }
 0x237   :  { %v1246_v34 = vmul.f32 0.5, %v1245_v20 }
 0x238   :  { %19803 = vst [vmem:[#allocation54_spill] sm:$0xff] %v13690_v52  ;;  %v1342_v29 = vpack.c.bf16 %v13690_v52, %v13687_v46 }
 0x239   :  { %v1148_v27 = vpop.f32.mrf.mxu3  ;;  %v1247_v41 = vsub.f32 1.5, %v1246_v34 }
 0x23a   :  { %v12247_v51 = vpop.eup %12246  ;;  %v1149_v10 = vadd.f32 1.1920929e-07, %v1148_v27  ;;  %1434 = vmatmul.bf16.gmra.mxu0 %v1342_v29 }
 0x23b   :  { %v1254_v11 = vmul.f32 %v12247_v51, %v1146_v24  ;;  %v1248_v49 = vmul.f32 %v12245_v36, %v1247_v41  ;;  %vm1260_vm11 = vweird.f32 %v12247_v51  ;;  %v13700_v34 = vpop.f32.mrf.mxu1 }
 0x23c   :  { %12248 = vrsqrt.f32 %v1149_v10  ;;  %vm1261_vm14 = vmor %vm1259_vm13, %vm1260_vm11  ;;  %vm1269_vm0 = vweird.f32 %v1149_v10 }
 0x23d   :  { %v1255_v9 = vmul.f32 %v12247_v51, %v1254_v11  ;;  %v1252_v29 = vsel %vm1251_vm12, %v12245_v36, %v1248_v49  ;;  %v1546_v11 = vpack.c.bf16 %v1537_v32, %v1536_v42 }
 0x23e   :  { %v13703_v46 = vmul.f32 %v1252_v29, %v13562_v61 }
 0x23f   :  { %v1256_v19 = vmul.f32 0.5, %v1255_v9 }
 0x241   :  { %v1257_v53 = vsub.f32 1.5, %v1256_v19  ;;  %v1150_v39 = vpop.f32.mrf.mxu3 }
 0x242   :  { %v12249_v20 = vpop.eup %12248  ;;  %v1151_v37 = vadd.f32 1.1920929e-07, %v1150_v39 }
 0x243   :  { %v1258_v27 = vmul.f32 %v12247_v51, %v1257_v53  ;;  %v1264_v41 = vmul.f32 %v12249_v20, %v1149_v10  ;;  %vm1270_vm15 = vweird.f32 %v12249_v20 }
 0x244   :  { %12250 = vrsqrt.f32 %v1151_v37  ;;  %vm1271_vm2 = vmor %vm1269_vm0, %vm1270_vm15  ;;  %vm1279_vm3 = vweird.f32 %v1151_v37 }
 0x245   :  { %v1262_v9 = vsel %vm1261_vm14, %v12247_v51, %v1258_v27  ;;  %v1265_v52 = vmul.f32 %v12249_v20, %v1264_v41  ;;  %v13710_v51 = vpop.f32.mrf.mxu1 }
 0x246   :  { %1586 = vmatmul.bf16.gmra.mxu1 %v1546_v11  ;;  %v13706_v13 = vmul.f32 %v1262_v9, %v13568_v63  ;;  %v1538_v63 = vmul.f32 %v13700_v34, %v13700_v34 }
 0x247   :  { %v1266_v19 = vmul.f32 0.5, %v1265_v52  ;;  %v1539_v52 = vmul.f32 %v13710_v51, %v13710_v51 }
 0x248   :  { %19804 = vst [vmem:[#allocation55_spill] sm:$0xff] %v13706_v13  ;;  %v1343_v39 = vpack.c.bf16 %v13706_v13, %v13703_v46 }
 0x249   :  { %v1153_v36 = vpop.f32.mrf.mxu3  ;;  %v1267_v53 = vsub.f32 1.5, %v1266_v19 }
 0x24a   :  { %v12251_v49 = vpop.eup %12250  ;;  %v1154_v24 = vadd.f32 1.1920929e-07, %v1153_v36  ;;  %1439 = vmatmul.bf16.vlgmr.msra.gmra.mxu3 %v1343_v39  ;;  %v1547_v39 = vpack.c.bf16 %v1539_v52, %v1538_v63 }
 0x24b   :  { %v1274_v40 = vmul.f32 %v12251_v49, %v1151_v37  ;;  %v1268_v32 = vmul.f32 %v12249_v20, %v1267_v53  ;;  %vm1280_vm1 = vweird.f32 %v12251_v49 }
 0x24c   :  { %12252 = vrsqrt.f32 %v1154_v24  ;;  %vm1281_vm4 = vmor %vm1279_vm3, %vm1280_vm1  ;;  %vm1289_vm6 = vweird.f32 %v1154_v24 }
 0x24d   :  { %v1275_v42 = vmul.f32 %v12251_v49, %v1274_v40  ;;  %v1272_v19 = vsel %vm1271_vm2, %v12249_v20, %v1268_v32 }
 0x24f   :  { %v1276_v61 = vmul.f32 0.5, %v1275_v42  ;;  %v13717_v42 = vmul.f32 %v1272_v19, %v13582_v15 }
 0x251   :  { %v1277_v29 = vsub.f32 1.5, %v1276_v61  ;;  %v1155_v27 = vpop.f32.mrf.mxu3 }
 0x252   :  { %v12253_v41 = vpop.eup %12252  ;;  %v1156_v11 = vadd.f32 1.1920929e-07, %v1155_v27 }
 0x253   :  { %v1284_v9 = vmul.f32 %v12253_v41, %v1154_v24  ;;  %v1278_v40 = vmul.f32 %v12251_v49, %v1277_v29  ;;  %vm1290_vm5 = vweird.f32 %v12253_v41 }
 0x254   :  { %12254 = vrsqrt.f32 %v1156_v11  ;;  %vm1291_vm8 = vmor %vm1289_vm6, %vm1290_vm5  ;;  %vm1299_vm9 = vweird.f32 %v1156_v11 }
 0x255   :  { %v1285_v36 = vmul.f32 %v12253_v41, %v1284_v9  ;;  %v1282_v53 = vsel %vm1281_vm4, %v12251_v49, %v1278_v40 }
 0x256   :  { %1591 = vmatmul.bf16.gmra.mxu1 %v1547_v39  ;;  %v13720_v10 = vmul.f32 %v1282_v53, %v13586_v16 }
 0x257   :  { %v1286_v61 = vmul.f32 0.5, %v1285_v36 }
 0x258   :  { %v1344_v27 = vpack.c.bf16 %v13720_v10, %v13717_v42 }
 0x259   :  { %v1158_v37 = vpop.f32.mrf.mxu3  ;;  %v1287_v32 = vsub.f32 1.5, %v1286_v61 }
 0x25a   :  { %v12255_v13 = vpop.eup %12254  ;;  %v1159_v20 = vadd.f32 1.1920929e-07, %v1158_v37  ;;  %1444 = vmatmul.bf16.gmra.mxu3 %v1344_v27 }
 0x25b   :  { %v1294_v63 = vmul.f32 %v12255_v13, %v1156_v11  ;;  %v1288_v49 = vmul.f32 %v12253_v41, %v1287_v32  ;;  %vm1300_vm7 = vweird.f32 %v12255_v13 }
 0x25c   :  { %12256 = vrsqrt.f32 %v1159_v20  ;;  %vm1301_vm10 = vmor %vm1299_vm9, %vm1300_vm7  ;;  %vm1309_vm12 = vweird.f32 %v1159_v20 }
 0x25d   :  { %v1295_v52 = vmul.f32 %v12255_v13, %v1294_v63  ;;  %v1292_v53 = vsel %vm1291_vm8, %v12253_v41, %v1288_v49 }
 0x25e   :  { %v13725_v32 = vmul.f32 %v1292_v53, %v13596_v38 }
 0x25f   :  { %v1296_v29 = vmul.f32 0.5, %v1295_v52 }
 0x260   :  { %19805 = vst [vmem:[#allocation56_spill] sm:$0xff] %v13725_v32 }
 0x261   :  { %v1297_v15 = vsub.f32 1.5, %v1296_v29  ;;  %v1160_v16 = vpop.f32.mrf.mxu3 }
 0x262   :  { %v12257_v9 = vpop.eup %12256  ;;  %v1161_v19 = vadd.f32 1.1920929e-07, %v1160_v16 }
 0x263   :  { %v1298_v40 = vmul.f32 %v12255_v13, %v1297_v15  ;;  %v1304_v39 = vmul.f32 %v12257_v9, %v1159_v20  ;;  %v1557_v36 = vpop.f32.mrf.mxu1  ;;  %vm1310_vm11 = vweird.f32 %v12257_v9 }
 0x264   :  { %12258 = vrsqrt.f32 %v1161_v19  ;;  %v1558_v61 = vadd.f32 1.1920929e-07, %v1557_v36  ;;  %vm1311_vm14 = vmor %vm1309_vm12, %vm1310_vm11  ;;  %vm1319_vm15 = vweird.f32 %v1161_v19 }
 0x265   :  { %v1305_v27 = vmul.f32 %v12257_v9, %v1304_v39  ;;  %v1302_v37 = vsel %vm1301_vm10, %v12255_v13, %v1298_v40 }
 0x266   :  { %12260 = vrsqrt.f32 %v1558_v61  ;;  %v13728_v24 = vmul.f32 %v1302_v37, %v13598_v54  ;;  %vm1603_vm2 = vweird.f32 %v1558_v61 }
 0x267   :  { %v1306_v63 = vmul.f32 0.5, %v1305_v27 }
 0x268   :  { %19806 = vst [vmem:[#allocation57_spill] sm:$0xff] %v13728_v24  ;;  %v1345_v52 = vpack.c.bf16 %v13728_v24, %v13725_v32 }
 0x269   :  { %v1307_v29 = vsub.f32 1.5, %v1306_v63 }
 0x26a   :  { %v12259_v11 = vpop.eup %12258  ;;  %1449 = vmatmul.bf16.gmra.mxu3 %v1345_v52 }
 0x26b   :  { %v1314_v41 = vmul.f32 %v12259_v11, %v1161_v19  ;;  %v1559_v49 = vpop.f32.mrf.mxu1  ;;  %v1308_v40 = vmul.f32 %v12257_v9, %v1307_v29  ;;  %vm1320_vm13 = vweird.f32 %v12259_v11 }
 0x26c   :  { %v12261_v15 = vpop.eup %12260  ;;  %v1560_v16 = vadd.f32 1.1920929e-07, %v1559_v49  ;;  %vm1321_vm0 = vmor %vm1319_vm15, %vm1320_vm13 }
 0x26d   :  { %v1315_v39 = vmul.f32 %v12259_v11, %v1314_v41  ;;  %v1598_v13 = vmul.f32 %v12261_v15, %v1558_v61  ;;  %v1312_v63 = vsel %vm1311_vm14, %v12257_v9, %v1308_v40  ;;  %vm1604_vm1 = vweird.f32 %v12261_v15 }
 0x26e   :  { %12262 = vrsqrt.f32 %v1560_v16  ;;  %v13733_v29 = vmul.f32 %v1312_v63, %v13604_v2  ;;  %vm1605_vm4 = vmor %vm1603_vm2, %vm1604_vm1  ;;  %vm1613_vm5 = vweird.f32 %v1560_v16 }
 0x26f   :  { %v1316_v38 = vmul.f32 0.5, %v1315_v39  ;;  %v1599_v36 = vmul.f32 %v12261_v15, %v1598_v13 }
 0x270   :  { %19807 = vst [vmem:[#allocation58_spill] sm:$0xff] %v13733_v29 }
 0x271   :  { %v1317_v54 = vsub.f32 1.5, %v1316_v38  ;;  %v1600_v53 = vmul.f32 0.5, %v1599_v36 }
 0x273   :  { %v1318_v27 = vmul.f32 %v12259_v11, %v1317_v54  ;;  %v1562_v37 = vpop.f32.mrf.mxu1  ;;  %v1601_v49 = vsub.f32 1.5, %v1600_v53 }
 0x274   :  { %v12263_v52 = vpop.eup %12262  ;;  %v1563_v24 = vadd.f32 1.1920929e-07, %v1562_v37 }
 0x275   :  { %v1608_v41 = vmul.f32 %v12263_v52, %v1560_v16  ;;  %v1322_v32 = vsel %vm1321_vm0, %v12259_v11, %v1318_v27  ;;  %v1602_v19 = vmul.f32 %v12261_v15, %v1601_v49  ;;  %vm1614_vm3 = vweird.f32 %v12263_v52 }
 0x276   :  { %12264 = vrsqrt.f32 %v1563_v24  ;;  %v13736_v20 = vmul.f32 %v1322_v32, %v13606_v30  ;;  %vm1615_vm6 = vmor %vm1613_vm5, %vm1614_vm3  ;;  %vm1623_vm8 = vweird.f32 %v1563_v24 }
 0x277   :  { %v1609_v39 = vmul.f32 %v12263_v52, %v1608_v41  ;;  %v1606_v30 = vsel %vm1605_vm4, %v12261_v15, %v1602_v19 }
 0x278   :  { %19808 = vst [vmem:[#allocation59_spill] sm:$0xff] %v13736_v20  ;;  %v1346_v13 = vpack.c.bf16 %v13736_v20, %v13733_v29  ;;  %v13741_v27 = vmul.f32 %v1606_v30, %v13612_v60 }
 0x279   :  { %v1610_v9 = vmul.f32 0.5, %v1609_v39 }
 0x27a   :  { %1454 = vmatmul.bf16.gmra.mxu3 %v1346_v13 }
 0x27b   :  { %v1611_v40 = vsub.f32 1.5, %v1610_v9  ;;  %v1564_v38 = vpop.f32.mrf.mxu1 }
 0x27c   :  { %v12265_v11 = vpop.eup %12264  ;;  %v1565_v36 = vadd.f32 1.1920929e-07, %v1564_v38 }
 0x27d   :  { %v1612_v2 = vmul.f32 %v12263_v52, %v1611_v40  ;;  %v1618_v54 = vmul.f32 %v12265_v11, %v1563_v24  ;;  %vm1624_vm7 = vweird.f32 %v12265_v11 }
 0x27e   :  { %12266 = vrsqrt.f32 %v1565_v36  ;;  %vm1625_vm10 = vmor %vm1623_vm8, %vm1624_vm7  ;;  %vm1633_vm11 = vweird.f32 %v1565_v36 }
 0x27f   :  { %v1619_v32 = vmul.f32 %v12265_v11, %v1618_v54  ;;  %v1616_v53 = vsel %vm1615_vm6, %v12263_v52, %v1612_v2 }
 0x280   :  { %v13744_v37 = vmul.f32 %v1616_v53, %v13616_v45 }
 0x281   :  { %v1620_v61 = vmul.f32 0.5, %v1619_v32 }
 0x282   :  { %19809 = vst [vmem:[#allocation60_spill] sm:$0xff] %v13744_v37  ;;  %v1773_v63 = vpack.c.bf16 %v13744_v37, %v13741_v27 }
 0x283   :  { %v1567_v49 = vpop.f32.mrf.mxu1  ;;  %v1621_v16 = vsub.f32 1.5, %v1620_v61 }
 0x284   :  { %v12267_v41 = vpop.eup %12266  ;;  %v1568_v39 = vadd.f32 1.1920929e-07, %v1567_v49  ;;  %1789 = vmatmul.bf16.vlgmr.msrb.gmra.mxu2 %v1773_v63 }
 0x285   :  { %v1628_v15 = vmul.f32 %v12267_v41, %v1565_v36  ;;  %v1622_v19 = vmul.f32 %v12265_v11, %v1621_v16  ;;  %vm1634_vm9 = vweird.f32 %v12267_v41 }
 0x286   :  { %12268 = vrsqrt.f32 %v1568_v39  ;;  %vm1635_vm12 = vmor %vm1633_vm11, %vm1634_vm9  ;;  %vm1643_vm14 = vweird.f32 %v1568_v39 }
 0x287   :  { %v1629_v13 = vmul.f32 %v12267_v41, %v1628_v15  ;;  %v1626_v2 = vsel %vm1625_vm10, %v12265_v11, %v1622_v19 }
 0x288   :  { %v13749_v53 = vmul.f32 %v1626_v2, %v13622_v57 }
 0x289   :  { %v1630_v52 = vmul.f32 0.5, %v1629_v13 }
 0x28b   :  { %v1631_v60 = vsub.f32 1.5, %v1630_v52  ;;  %v1569_v9 = vpop.f32.mrf.mxu1 }
 0x28c   :  { %v12269_v45 = vpop.eup %12268  ;;  %v1570_v40 = vadd.f32 1.1920929e-07, %v1569_v9 }
 0x28d   :  { %v1638_v38 = vmul.f32 %v12269_v45, %v1568_v39  ;;  %v1632_v54 = vmul.f32 %v12267_v41, %v1631_v60  ;;  %vm1644_vm13 = vweird.f32 %v12269_v45 }
 0x28e   :  { %12270 = vrsqrt.f32 %v1570_v40  ;;  %vm1645_vm0 = vmor %vm1643_vm14, %vm1644_vm13  ;;  %vm1653_vm1 = vweird.f32 %v1570_v40 }
 0x28f   :  { %v1639_v30 = vmul.f32 %v12269_v45, %v1638_v38  ;;  %v1636_v32 = vsel %vm1635_vm12, %v12267_v41, %v1632_v54 }
 0x290   :  { %v13752_v61 = vmul.f32 %v1636_v32, %v13626_v7 }
 0x291   :  { %v1640_v24 = vmul.f32 0.5, %v1639_v30 }
 0x292   :  { %v1774_v63 = vpack.c.bf16 %v13752_v61, %v13749_v53 }
 0x293   :  { %v1572_v49 = vpop.f32.mrf.mxu1  ;;  %v1641_v11 = vsub.f32 1.5, %v1640_v24 }
 0x294   :  { %v12271_v16 = vpop.eup %12270  ;;  %v1573_v36 = vadd.f32 1.1920929e-07, %v1572_v49  ;;  %1794 = vmatmul.bf16.gmra.mxu2 %v1774_v63 }
 0x295   :  { %v1648_v15 = vmul.f32 %v12271_v16, %v1570_v40  ;;  %v1642_v52 = vmul.f32 %v12269_v45, %v1641_v11  ;;  %vm1654_vm15 = vweird.f32 %v12271_v16 }
 0x296   :  { %12272 = vrsqrt.f32 %v1573_v36  ;;  %vm1655_vm2 = vmor %vm1653_vm1, %vm1654_vm15  ;;  %vm1663_vm4 = vweird.f32 %v1573_v36 }
 0x297   :  { %v1649_v13 = vmul.f32 %v12271_v16, %v1648_v15  ;;  %v1646_v38 = vsel %vm1645_vm0, %v12269_v45, %v1642_v52 }
 0x298   :  { %v13757_v32 = vmul.f32 %v1646_v38, %v13614_v0 }
 0x299   :  { %v1650_v41 = vmul.f32 0.5, %v1649_v13 }
 0x29b   :  { %v1651_v57 = vsub.f32 1.5, %v1650_v41  ;;  %v1574_v19 = vpop.f32.mrf.mxu1 }
 0x29c   :  { %v12273_v7 = vpop.eup %12272  ;;  %v1575_v60 = vadd.f32 1.1920929e-07, %v1574_v19 }
 0x29d   :  { %v1658_v9 = vmul.f32 %v12273_v7, %v1573_v36  ;;  %v1652_v2 = vmul.f32 %v12271_v16, %v1651_v57  ;;  %vm1664_vm3 = vweird.f32 %v12273_v7 }
 0x29e   :  { %12274 = vrsqrt.f32 %v1575_v60  ;;  %vm1665_vm6 = vmor %vm1663_vm4, %vm1664_vm3  ;;  %vm1673_vm7 = vweird.f32 %v1575_v60 }
 0x29f   :  { %v1659_v54 = vmul.f32 %v12273_v7, %v1658_v9  ;;  %v1656_v30 = vsel %vm1655_vm2, %v12271_v16, %v1652_v2 }
 0x2a0   :  { %v13760_v24 = vmul.f32 %v1656_v30, %v13624_v8 }
 0x2a1   :  { %v1660_v39 = vmul.f32 0.5, %v1659_v54 }
 0x2a2   :  { %v1775_v63 = vpack.c.bf16 %v13760_v24, %v13757_v32 }
 0x2a3   :  { %v1577_v49 = vpop.f32.mrf.mxu1  ;;  %v1661_v45 = vsub.f32 1.5, %v1660_v39 }
 0x2a4   :  { %v12275_v11 = vpop.eup %12274  ;;  %v1578_v40 = vadd.f32 1.1920929e-07, %v1577_v49  ;;  %1799 = vmatmul.bf16.gmra.mxu2 %v1775_v63 }
 0x2a5   :  { %v1668_v15 = vmul.f32 %v12275_v11, %v1575_v60  ;;  %v1662_v41 = vmul.f32 %v12273_v7, %v1661_v45  ;;  %vm1674_vm5 = vweird.f32 %v12275_v11 }
 0x2a6   :  { %12276 = vrsqrt.f32 %v1578_v40  ;;  %vm1675_vm8 = vmor %vm1673_vm7, %vm1674_vm5  ;;  %vm1683_vm10 = vweird.f32 %v1578_v40 }
 0x2a7   :  { %v1669_v13 = vmul.f32 %v12275_v11, %v1668_v15  ;;  %v1666_v9 = vsel %vm1665_vm6, %v12273_v7, %v1662_v41 }
 0x2a8   :  { %v13765_v30 = vmul.f32 %v1666_v9, %v13632_v17 }
 0x2a9   :  { %v1670_v16 = vmul.f32 0.5, %v1669_v13 }
 0x2ab   :  { %v1671_v0 = vsub.f32 1.5, %v1670_v16  ;;  %v1579_v52 = vpop.f32.mrf.mxu1 }
 0x2ac   :  { %v12277_v8 = vpop.eup %12276  ;;  %v1580_v57 = vadd.f32 1.1920929e-07, %v1579_v52 }
 0x2ad   :  { %v1678_v19 = vmul.f32 %v12277_v8, %v1578_v40  ;;  %v1672_v38 = vmul.f32 %v12275_v11, %v1671_v0  ;;  %vm1684_vm9 = vweird.f32 %v12277_v8 }
 0x2ae   :  { %12278 = vrsqrt.f32 %v1580_v57  ;;  %vm1685_vm12 = vmor %vm1683_vm10, %vm1684_vm9  ;;  %vm1693_vm13 = vweird.f32 %v1580_v57 }
 0x2af   :  { %v1679_v2 = vmul.f32 %v12277_v8, %v1678_v19  ;;  %v1676_v54 = vsel %vm1675_vm8, %v12275_v11, %v1672_v38 }
 0x2b0   :  { %v13768_v39 = vmul.f32 %v1676_v54, %v13634_v4 }
 0x2b1   :  { %v1680_v36 = vmul.f32 0.5, %v1679_v2 }
 0x2b2   :  { %v1776_v63 = vpack.c.bf16 %v13768_v39, %v13765_v30 }
 0x2b3   :  { %v1582_v49 = vpop.f32.mrf.mxu1  ;;  %v1681_v7 = vsub.f32 1.5, %v1680_v36 }
 0x2b4   :  { %v12279_v45 = vpop.eup %12278  ;;  %v1583_v60 = vadd.f32 1.1920929e-07, %v1582_v49  ;;  %1804 = vmatmul.bf16.gmra.mxu2 %v1776_v63 }
 0x2b5   :  { %v1688_v15 = vmul.f32 %v12279_v45, %v1580_v57  ;;  %v1682_v16 = vmul.f32 %v12277_v8, %v1681_v7  ;;  %vm1694_vm11 = vweird.f32 %v12279_v45 }
 0x2b6   :  { %12280 = vrsqrt.f32 %v1583_v60  ;;  %vm1695_vm14 = vmor %vm1693_vm13, %vm1694_vm11  ;;  %vm1703_vm0 = vweird.f32 %v1583_v60 }
 0x2b7   :  { %v1689_v13 = vmul.f32 %v12279_v45, %v1688_v15  ;;  %v1686_v19 = vsel %vm1685_vm12, %v12277_v8, %v1682_v16 }
 0x2b8   :  { %v13773_v54 = vmul.f32 %v1686_v19, %v13646_v12 }
 0x2b9   :  { %v1690_v11 = vmul.f32 0.5, %v1689_v13 }
 0x2bb   :  { %v1691_v17 = vsub.f32 1.5, %v1690_v11  ;;  %v1584_v41 = vpop.f32.mrf.mxu1 }
 0x2bc   :  { %v12281_v4 = vpop.eup %12280  ;;  %v1585_v0 = vadd.f32 1.1920929e-07, %v1584_v41 }
 0x2bd   :  { %v1698_v52 = vmul.f32 %v12281_v4, %v1583_v60  ;;  %v1692_v9 = vmul.f32 %v12279_v45, %v1691_v17  ;;  %vm1704_vm15 = vweird.f32 %v12281_v4 }
 0x2be   :  { %12282 = vrsqrt.f32 %v1585_v0  ;;  %vm1705_vm2 = vmor %vm1703_vm0, %vm1704_vm15  ;;  %vm1713_vm3 = vweird.f32 %v1585_v0 }
 0x2bf   :  { %v1699_v38 = vmul.f32 %v12281_v4, %v1698_v52  ;;  %v1696_v2 = vsel %vm1695_vm14, %v12279_v45, %v1692_v9 }
 0x2c0   :  { %v13776_v36 = vmul.f32 %v1696_v2, %v13654_v3 }
 0x2c1   :  { %v1700_v40 = vmul.f32 0.5, %v1699_v38 }
 0x2c2   :  { %v1777_v63 = vpack.c.bf16 %v13776_v36, %v13773_v54 }
 0x2c3   :  { %v1587_v49 = vpop.f32.mrf.mxu1  ;;  %v1701_v8 = vsub.f32 1.5, %v1700_v40 }
 0x2c4   :  { %v12283_v7 = vpop.eup %12282  ;;  %v1588_v57 = vadd.f32 1.1920929e-07, %v1587_v49  ;;  %1809 = vmatmul.bf16.gmra.mxu2 %v1777_v63 }
 0x2c5   :  { %v1708_v15 = vmul.f32 %v12283_v7, %v1585_v0  ;;  %v1702_v11 = vmul.f32 %v12281_v4, %v1701_v8  ;;  %vm1714_vm1 = vweird.f32 %v12283_v7 }
 0x2c6   :  { %12284 = vrsqrt.f32 %v1588_v57  ;;  %vm1715_vm4 = vmor %vm1713_vm3, %vm1714_vm1  ;;  %vm1723_vm6 = vweird.f32 %v1588_v57  ;;  %vm2209_vm1 = vcmask 1047556  }
 0x2c7   :  { %v1709_v13 = vmul.f32 %v12283_v7, %v1708_v15  ;;  %v1706_v52 = vsel %vm1705_vm2, %v12281_v4, %v1702_v11  ;;  %vm7783_vm2 = vcmask 261120  }
 0x2c8   :  { %v13781_v2 = vmul.f32 %v1706_v52, %v13664_v44 }
 0x2c9   :  { %v1710_v45 = vmul.f32 0.5, %v1709_v13 }
 0x2cb   :  { %v1711_v12 = vsub.f32 1.5, %v1710_v45  ;;  %v1589_v16 = vpop.f32.mrf.mxu1 }
 0x2cc   :  { %v12285_v3 = vpop.eup %12284  ;;  %v1590_v17 = vadd.f32 1.1920929e-07, %v1589_v16 }
 0x2cd   :  { %v1718_v41 = vmul.f32 %v12285_v3, %v1588_v57  ;;  %v1712_v19 = vmul.f32 %v12283_v7, %v1711_v12  ;;  %vm1724_vm5 = vweird.f32 %v12285_v3 }
 0x2ce   :  { %12286 = vrsqrt.f32 %v1590_v17  ;;  %vm1725_vm8 = vmor %vm1723_vm6, %vm1724_vm5  ;;  %vm1733_vm9 = vweird.f32 %v1590_v17 }
 0x2cf   :  { %v1719_v9 = vmul.f32 %v12285_v3, %v1718_v41  ;;  %v1716_v38 = vsel %vm1715_vm4, %v12283_v7, %v1712_v19 }
 0x2d0   :  { %v13784_v40 = vmul.f32 %v1716_v38, %v13670_v48 }
 0x2d1   :  { %v1720_v60 = vmul.f32 0.5, %v1719_v9 }
 0x2d2   :  { %v1778_v63 = vpack.c.bf16 %v13784_v40, %v13781_v2 }
 0x2d3   :  { %v1592_v49 = vpop.f32.mrf.mxu1  ;;  %v1721_v4 = vsub.f32 1.5, %v1720_v60 }
 0x2d4   :  { %v12287_v8 = vpop.eup %12286  ;;  %v1593_v0 = vadd.f32 1.1920929e-07, %v1592_v49  ;;  %1814 = vmatmul.bf16.gmra.mxu2 %v1778_v63 }
 0x2d5   :  { %v1728_v15 = vmul.f32 %v12287_v8, %v1590_v17  ;;  %v1722_v45 = vmul.f32 %v12285_v3, %v1721_v4  ;;  %vm1734_vm7 = vweird.f32 %v12287_v8 }
 0x2d6   :  { %12288 = vrsqrt.f32 %v1593_v0  ;;  %vm1735_vm10 = vmor %vm1733_vm9, %vm1734_vm7  ;;  %vm1743_vm12 = vweird.f32 %v1593_v0 }
 0x2d7   :  { %v1729_v13 = vmul.f32 %v12287_v8, %v1728_v15  ;;  %v1726_v52 = vsel %vm1725_vm8, %v12285_v3, %v1722_v45 }
 0x2d8   :  { %v13789_v38 = vmul.f32 %v1726_v52, %v13680_v33 }
 0x2d9   :  { %v1730_v7 = vmul.f32 0.5, %v1729_v13 }
 0x2db   :  { %v1731_v44 = vsub.f32 1.5, %v1730_v7  ;;  %v1594_v48 = vpop.f32.mrf.mxu1 }
 0x2dc   :  { %v12289_v11 = vpop.eup %12288  ;;  %v1595_v12 = vadd.f32 1.1920929e-07, %v1594_v48 }
 0x2dd   :  { %v1732_v16 = vmul.f32 %v12287_v8, %v1731_v44  ;;  %v1738_v41 = vmul.f32 %v12289_v11, %v1593_v0  ;;  %vm1744_vm11 = vweird.f32 %v12289_v11  ;;  %v13806_v0 = vld [vmem:[#allocation11] sm:$0xff]  }
 0x2de   :  { %12290 = vrsqrt.f32 %v1595_v12  ;;  %vm1745_vm14 = vmor %vm1743_vm12, %vm1744_vm11  ;;  %vm1753_vm15 = vweird.f32 %v1595_v12 }
 0x2df   :  { %v1739_v19 = vmul.f32 %v12289_v11, %v1738_v41  ;;  %v1736_v9 = vsel %vm1735_vm10, %v12287_v8, %v1732_v16  ;;  %v13804_v16 = vld [vmem:[#allocation10] sm:$0xff]  }
 0x2e0   :  { %v13792_v60 = vmul.f32 %v1736_v9, %v13694_v5  ;;  %v19560_v41 = vunpack.c.l.bf16 %v13804_v16  ;;  %v13819_v9 = vld [vmem:[#allocation10 + $0x8] sm:$0xff]  }
 0x2e1   :  { %v1740_v57 = vmul.f32 0.5, %v1739_v19 }
 0x2e2   :  { %v1779_v63 = vpack.c.bf16 %v13792_v60, %v13789_v38 }
 0x2e3   :  { %v1741_v4 = vsub.f32 1.5, %v1740_v57  ;;  %v13821_v57 = vld [vmem:[#allocation11 + $0x8] sm:$0xff]  }
 0x2e4   :  { %v12291_v49 = vpop.eup %12290  ;;  %1819 = vmatmul.bf16.gmra.mxu2 %v1779_v63  ;;  %v19559_v63 = vunpack.c.l.bf16 %v13819_v9 }
 0x2e5   :  { %v1748_v17 = vmul.f32 %v12291_v49, %v1595_v12  ;;  %v1742_v3 = vmul.f32 %v12289_v11, %v1741_v4  ;;  %vm1754_vm13 = vweird.f32 %v12291_v49 }
 0x2e6   :  { %vm1755_vm0 = vmor %vm1753_vm15, %vm1754_vm13 }
 0x2e7   :  { %v1749_v15 = vmul.f32 %v12291_v49, %v1748_v17  ;;  %v1746_v5 = vsel %vm1745_vm14, %v12289_v11, %v1742_v3  ;;  %v19565_v11 = vunpack.c.l.bf16 %v13806_v0 }
 0x2e8   :  { %v13797_v7 = vmul.f32 %v1746_v5, %v13700_v34  ;;  %v1830_v34 = vmul.f32 %v19560_v41, %v13741_v27  ;;  %v1832_v27 = vmul.f32 %v19559_v63, %v13749_v53 }
 0x2e9   :  { %v1750_v13 = vmul.f32 0.5, %v1749_v15 }
 0x2eb   :  { %v1751_v8 = vsub.f32 1.5, %v1750_v13  ;;  %v13834_v13 = vld [vmem:[#allocation10 + $0x10] sm:$0xff]  }
 0x2ed   :  { %v1752_v33 = vmul.f32 %v12291_v49, %v1751_v8  ;;  %v13836_v8 = vld [vmem:[#allocation11 + $0x10] sm:$0xff]  }
 0x2ee   :  { %v19555_v5 = vunpack.c.l.bf16 %v13836_v8  ;;  %v19608_v29 = vunpack.c.h.bf16 %v13836_v8 }
 0x2ef   :  { %v1756_v45 = vsel %vm1755_vm0, %v12291_v49, %v1752_v33  ;;  %v19554_v49 = vunpack.c.l.bf16 %v13821_v57  ;;  %v19556_v33 = vunpack.c.l.bf16 %v13834_v13 }
 0x2f0   :  { %v13800_v44 = vmul.f32 %v1756_v45, %v13710_v51 }
 0x2f1   :  { %v1834_v53 = vmul.f32 %v19556_v33, %v13757_v32 }
 0x2f2   :  { %v1780_v48 = vpack.c.bf16 %v13800_v44, %v13797_v7 }
 0x2f4   :  { %1824 = vmatmul.bf16.gmra.mxu2 %v1780_v48 }
 0x307   :  { %v1790_v12 = vpop.f32.mrf.mxu2 }
 0x308   :  { %v1846_v51 = vmul.f32 %v19565_v11, %v1790_v12 }
 0x30a   :  { %v13815_v52 = vadd.f32 %v1846_v51, %v1830_v34  ;;  %v13849_v51 = vld [vmem:[#allocation10 + $0x18] sm:$0xff]  }
 0x30c   :  { %19810 = vst [vmem:[#allocation61_spill] sm:$0xff] %v13815_v52 }
 0x30f   :  { %v13817_v19 = vpop.f32.mrf.mxu2 }
 0x310   :  { %19811 = vst [vmem:[#allocation62_spill] sm:$0xff] %v13817_v19 }
 0x317   :  { %v1795_v4 = vpop.f32.mrf.mxu2 }
 0x318   :  { %v1848_v17 = vmul.f32 %v19554_v49, %v1795_v4  ;;  %v13851_v4 = vld [vmem:[#allocation11 + $0x18] sm:$0xff]  }
 0x319   :  { %19813 = vst [vmem:[#allocation64_spill] sm:$0xff] %v13851_v4  ;;  %v19561_v33 = vunpack.c.h.bf16 %v13851_v4 }
 0x31a   :  { %v13830_v15 = vadd.f32 %v1848_v17, %v1832_v27  ;;  %v19558_v27 = vunpack.c.l.bf16 %v13849_v51  ;;  %v19557_v17 = vunpack.c.l.bf16 %v13851_v4 }
 0x31c   :  { %19812 = vst [vmem:[#allocation63_spill] sm:$0xff] %v13830_v15  ;;  %v1836_v32 = vmul.f32 %v19558_v27, %v13765_v30 }
 0x31f   :  { %v13832_v3 = vpop.f32.mrf.mxu2 }
 0x327   :  { %v1800_v45 = vpop.f32.mrf.mxu2 }
 0x328   :  { %v1850_v48 = vmul.f32 %v19555_v5, %v1800_v45  ;;  %v19562_v5 = vunpack.c.h.bf16 %v13849_v51 }
 0x32a   :  { %v13845_v12 = vadd.f32 %v1850_v48, %v1834_v53 }
 0x32f   :  { %v13847_v34 = vpop.f32.mrf.mxu2 }
 0x337   :  { %v1805_v49 = vpop.f32.mrf.mxu2 }
 0x338   :  { %v1852_v45 = vmul.f32 %v19557_v17, %v1805_v49  ;;  %v1837_v49 = vmul.f32 %v19562_v5, %v13768_v39  ;;  %v13877_v17 = vld [vmem:[#allocation11 + $0x20] sm:$0xff]  }
 0x339   :  { %19815 = vst [vmem:[#allocation66_spill] sm:$0xff] %v13877_v17  ;;  %v19563_v41 = vunpack.c.l.bf16 %v13877_v17  ;;  %v19572_v5 = vunpack.c.h.bf16 %v13877_v17 }
 0x33a   :  { %v1868_v53 = vadd.f32 %v1852_v45, %v1836_v32 }
 0x33c   :  { %v13860_v48 = vpack.c.bf16 %v1868_v53, %v1868_v53  ;;  %v13875_v53 = vld [vmem:[#allocation10 + $0x20] sm:$0xff]  }
 0x33d   :  { %v19564_v63 = vunpack.c.l.bf16 %v13875_v53 }
 0x33e   :  { %19814 = vst [vmem:[#allocation65_spill] sm:$0xff] %v13860_v48  ;;  %3939 = vrot.lane.b32.xlu1 %v13860_v48, %s12918_s27  ;;  %3907 = vrot.lane.b32.xlu0 %v13860_v48, %s12902_s22 }
 0x33f   :  { %3875 = vrot.lane.b32.xlu2 %v13860_v48, %s12919_s7  ;;  %v1807_v30 = vpop.f32.mrf.mxu2 }
 0x340   :  { %v1853_v32 = vmul.f32 %v19561_v33, %v1807_v30  ;;  %v1838_v30 = vmul.f32 %v19564_v63, %v13773_v54  ;;  %v19573_v33 = vunpack.c.h.bf16 %v13875_v53  ;;  %v13913_v63 = vld [vmem:[#allocation11 + $0x28] sm:$0xff]  }
 0x341   :  { %19818 = vst [vmem:[#allocation69_spill] sm:$0xff] %v13913_v63  ;;  %v19574_v48 = vunpack.c.l.bf16 %v13913_v63  ;;  %v19580_v52 = vunpack.c.h.bf16 %v13913_v63 }
 0x342   :  { %v1869_v45 = vadd.f32 %v1853_v32, %v1837_v49 }
 0x344   :  { %v13879_v27 = vpack.c.bf16 %v1869_v45, %v1869_v45 }
 0x346   :  { %19816 = vst [vmem:[#allocation67_spill] sm:$0xff] %v13879_v27  ;;  %3941 = vrot.lane.b32.xlu0 %v13879_v27, %s12918_s27  ;;  %3877 = vrot.lane.b32.xlu1 %v13879_v27, %s12919_s7 }
 0x347   :  { %3909 = vrot.lane.b32.xlu2 %v13879_v27, %s12902_s22  ;;  %v1810_v39 = vpop.f32.mrf.mxu2  ;;  %v13917_v27 = vpop.f32.mrf.mxu3 }
 0x348   :  { %v1854_v49 = vmul.f32 %v19563_v41, %v1810_v39  ;;  %v1839_v39 = vmul.f32 %v19573_v33, %v13776_v36  ;;  %v13911_v41 = vld [vmem:[#allocation10 + $0x28] sm:$0xff]   ;;  %19820 = vst [vmem:[#allocation71_spill] sm:$0xff] %v13917_v27 }
 0x349   :  { %v19581_v33 = vunpack.c.h.bf16 %v13911_v41 }
 0x34a   :  { %v1870_v32 = vadd.f32 %v1854_v49, %v1838_v30  ;;  %v13909_v49 = vpop.f32.mrf.mxu0 }
 0x34c   :  { %v13894_v45 = vpack.c.bf16 %v1870_v32, %v1870_v32 }
 0x34e   :  { %19817 = vst [vmem:[#allocation68_spill] sm:$0xff] %v13894_v45  ;;  %3943 = vrot.lane.b32.xlu1 %v13894_v45, %s12918_s27  ;;  %3911 = vrot.lane.b32.xlu0 %v13894_v45, %s12902_s22 }
 0x34f   :  { %3879 = vrot.lane.b32.xlu2 %v13894_v45, %s12919_s7  ;;  %v1812_v54 = vpop.f32.mrf.mxu2  ;;  %v19575_v45 = vunpack.c.l.bf16 %v13911_v41 }
 0x350   :  { %v1855_v30 = vmul.f32 %v19572_v5, %v1812_v54 }
 0x351   :  { %v1840_v54 = vmul.f32 %v19575_v45, %v13781_v2  ;;  %v13953_v45 = vld [vmem:[#allocation11 + $0x30] sm:$0xff]  }
 0x352   :  { %v1871_v32 = vadd.f32 %v1855_v30, %v1839_v39  ;;  %19823 = vst [vmem:[#allocation74_spill] sm:$0xff] %v13953_v45  ;;  %v19584_v15 = vunpack.c.l.bf16 %v13953_v45  ;;  %v19590_v63 = vunpack.c.h.bf16 %v13953_v45 }
 0x354   :  { %v13915_v11 = vpack.c.bf16 %v1871_v32, %v1871_v32  ;;  %v13932_v32 = vpop.f32.mrf.mxu0 }
 0x356   :  { %19819 = vst [vmem:[#allocation70_spill] sm:$0xff] %v13915_v11  ;;  %3945 = vrot.lane.b32.xlu0 %v13915_v11, %s12918_s27  ;;  %3881 = vrot.lane.b32.xlu1 %v13915_v11, %s12919_s7 }
 0x357   :  { %3913 = vrot.lane.b32.xlu2 %v13915_v11, %s12902_s22  ;;  %v1815_v36 = vpop.f32.mrf.mxu2 }
 0x358   :  { %v1856_v39 = vmul.f32 %v19574_v48, %v1815_v36  ;;  %v1841_v36 = vmul.f32 %v19581_v33, %v13784_v40  ;;  %v13951_v48 = vld [vmem:[#allocation10 + $0x30] sm:$0xff]  }
 0x359   :  { %v19591_v33 = vunpack.c.h.bf16 %v13951_v48 }
 0x35a   :  { %v1872_v30 = vadd.f32 %v1856_v39, %v1840_v54  ;;  %v13947_v54 = vpop.f32.mrf.mxu3 }
 0x35b   :  { %19822 = vst [vmem:[#allocation73_spill] sm:$0xff] %v13947_v54 }
 0x35c   :  { %v13934_v5 = vpack.c.bf16 %v1872_v30, %v1872_v30  ;;  %v13957_v19 = vpop.f32.mrf.mxu0 }
 0x35e   :  { %19821 = vst [vmem:[#allocation72_spill] sm:$0xff] %v13934_v5  ;;  %3947 = vrot.lane.b32.xlu1 %v13934_v5, %s12918_s27  ;;  %3915 = vrot.lane.b32.xlu0 %v13934_v5, %s12902_s22 }
 0x35f   :  { %3883 = vrot.lane.b32.xlu2 %v13934_v5, %s12919_s7  ;;  %v1817_v2 = vpop.f32.mrf.mxu2  ;;  %v19585_v5 = vunpack.c.l.bf16 %v13951_v48 }
 0x360   :  { %v1857_v39 = vmul.f32 %v19580_v52, %v1817_v2 }
 0x361   :  { %v1842_v2 = vmul.f32 %v19585_v5, %v13789_v38  ;;  %v13993_v5 = vld [vmem:[#allocation11 + $0x38] sm:$0xff]  }
 0x362   :  { %v1873_v30 = vadd.f32 %v1857_v39, %v1841_v36  ;;  %v13972_v39 = vpop.f32.mrf.mxu3 }
 0x363   :  { %19825 = vst [vmem:[#allocation76_spill] sm:$0xff] %v13972_v39 }
 0x364   :  { %v13955_v11 = vpack.c.bf16 %v1873_v30, %v1873_v30 }
 0x366   :  { %19824 = vst [vmem:[#allocation75_spill] sm:$0xff] %v13955_v11  ;;  %3949 = vrot.lane.b32.xlu0 %v13955_v11, %s12918_s27  ;;  %3885 = vrot.lane.b32.xlu1 %v13955_v11, %s12919_s7 }
 0x367   :  { %3917 = vrot.lane.b32.xlu2 %v13955_v11, %s12902_s22  ;;  %v1820_v40 = vpop.f32.mrf.mxu2 }
 0x368   :  { %v1858_v36 = vmul.f32 %v19584_v15, %v1820_v40  ;;  %v13984_v40 = vpop.f32.mrf.mxu0  ;;  %v13991_v15 = vld [vmem:[#allocation10 + $0x38] sm:$0xff]  }
 0x369   :  { %19827 = vst [vmem:[#allocation78_spill] sm:$0xff] %v13984_v40  ;;  %v19597_v39 = vunpack.c.l.bf16 %v13991_v15  ;;  %v19609_v17 = vunpack.c.h.bf16 %v13991_v15 }
 0x36a   :  { %v1874_v30 = vadd.f32 %v1858_v36, %v1842_v2  ;;  %v1843_v2 = vmul.f32 %v19591_v33, %v13792_v60  ;;  %19828 = vst [vmem:[#allocation79_spill] sm:$0xff] %v13991_v15  ;;  %v19596_v60 = vunpack.c.l.bf16 %v13993_v5 }
 0x36c   :  { %v13974_v52 = vpack.c.bf16 %v1874_v30, %v1874_v30 }
 0x36e   :  { %19826 = vst [vmem:[#allocation77_spill] sm:$0xff] %v13974_v52  ;;  %3951 = vrot.lane.b32.xlu1 %v13974_v52, %s12918_s27  ;;  %3919 = vrot.lane.b32.xlu0 %v13974_v52, %s12902_s22 }
 0x36f   :  { %3887 = vrot.lane.b32.xlu2 %v13974_v52, %s12919_s7  ;;  %v1822_v38 = vpop.f32.mrf.mxu2  ;;  %v13998_v52 = vpop.f32.mrf.mxu3 }
 0x370   :  { %v1859_v36 = vmul.f32 %v19590_v63, %v1822_v38  ;;  %19829 = vst [vmem:[#allocation80_spill] sm:$0xff] %v13998_v52  ;;  %v14020_v63 = vstv %s19516_s1  ;;  %v14022_v33 = vpop.f32.mrf.mxu0  ;;  %s12922_s1 = smov [#allocation23]  }
 0x371   :  { %19831 = vst [vmem:[#allocation82_spill] sm:$0xff] %v14022_v33  ;;  %v930_v52 = vmul.f32 %v14020_v63, %v13501_v31  ;;  %v934_v20 = vmul.f32 %v14020_v63, %v13530_v21  ;;  %s11368_s16 = sshll.u32 %s12922_s1, 4  ;;  %s11369_s16 = int_to_ptr.vmem [resolvable:$true] %s11368_s16 }
 0x372   :  { %v1875_v30 = vadd.f32 %v1859_v36, %v1843_v2  ;;  %v14010_v2 = vstv %s911_s29  ;;  %v1844_v36 = vmul.f32 %v19597_v39, %v13797_v7 }
 0x373   :  { %v914_v7 = vmul.f32 %v14010_v2, %v13509_v59  ;;  %v915_v39 = vmul.f32 %v14010_v2, %v13516_v62  ;;  %v917_v33 = vmul.f32 %v14010_v2, %v13530_v21  ;;  %v918_v15 = vmul.f32 %v14010_v2, %v13538_v6  ;;  %11376 = dma.vmem_to_hbm [thread:$0]  %s11369_s16, 1024, %s11371_s18, [#allocation24], %s12902_s22, %s12902_s22, %s12903_s23  }
 0x374   :  { %v14000_v11 = vpack.c.bf16 %v1875_v30, %v1875_v30 }
 0x376   :  { %19830 = vst [vmem:[#allocation81_spill] sm:$0xff] %v14000_v11  ;;  %3953 = vrot.lane.b32.xlu0 %v14000_v11, %s12918_s27  ;;  %3889 = vrot.lane.b32.xlu1 %v14000_v11, %s12919_s7 }
 0x377   :  { %3921 = vrot.lane.b32.xlu2 %v14000_v11, %s12902_s22  ;;  %v1825_v38 = vpop.f32.mrf.mxu2  ;;  %v913_v11 = vmul.f32 %v14010_v2, %v13501_v31  ;;  %v933_v31 = vmul.f32 %v14020_v63, %v13524_v26  ;;  %v14042_v54 = vpop.f32.mrf.mxu3 }
 0x378   :  { %v1860_v30 = vmul.f32 %v19596_v60, %v1825_v38  ;;  %v931_v38 = vmul.f32 %v14020_v63, %v13509_v59  ;;  %19832 = vst [vmem:[#allocation83_spill] sm:$0xff] %v14042_v54  ;;  %v19607_v59 = vunpack.c.h.bf16 %v13993_v5 }
 0x379   :  { %v946_v27 = vadd.f32 %v930_v52, %v913_v11  ;;  %v19610_v11 = vunpack.c.h.bf16 %v13834_v13  ;;  %v14065_v52 = vpop.f32.mrf.mxu0 }
 0x37a   :  { %v1876_v45 = vadd.f32 %v1860_v30, %v1844_v36  ;;  %v932_v36 = vmul.f32 %v14020_v63, %v13516_v62  ;;  %v916_v30 = vmul.f32 %v14010_v2, %v13524_v26  ;;  %v1845_v62 = vmul.f32 %v19609_v17, %v13800_v44 }
 0x37b   :  { %v947_v54 = vadd.f32 %v931_v38, %v914_v7  ;;  %v935_v44 = vmul.f32 %v14020_v63, %v13538_v6  ;;  %v14072_v21 = vpack.c.bf16 %v946_v27, %v946_v27  ;;  %v1835_v6 = vmul.f32 %v19610_v11, %v13760_v24 }
 0x37c   :  { %v14032_v60 = vpack.c.bf16 %v1876_v45, %v1876_v45  ;;  %v948_v4 = vadd.f32 %v932_v36, %v915_v39  ;;  %v949_v37 = vadd.f32 %v933_v31, %v916_v30  ;;  %v1851_v39 = vmul.f32 %v19608_v29, %v13847_v34 }
 0x37d   :  { %19833 = vst [vmem:[#allocation84_spill] sm:$0xff] %v14072_v21  ;;  %v14074_v38 = vpack.c.bf16 %v947_v54, %v947_v54  ;;  %v950_v31 = vadd.f32 %v934_v20, %v917_v33  ;;  %v951_v34 = vadd.f32 %v935_v44, %v918_v15  ;;  %v919_v27 = vmul.f32 %v14010_v2, %v13546_v56 }
 0x37e   :  { %3923 = vrot.lane.b32.xlu0 %v14032_v60, %s12902_s22  ;;  %3891 = vrot.lane.b32.xlu1 %v14032_v60, %s12919_s7  ;;  %v14076_v36 = vpack.c.bf16 %v948_v4, %v948_v4  ;;  %v14078_v30 = vpack.c.bf16 %v949_v37, %v949_v37  ;;  %v925_v4 = vmul.f32 %v14010_v2, %v13544_v55 }
 0x37f   :  { %v1827_v45 = vpop.f32.mrf.mxu2  ;;  %19834 = vst [vmem:[#allocation85_spill] sm:$0xff] %v14074_v38  ;;  %v942_v20 = vmul.f32 %v14020_v63, %v13544_v55  ;;  %v936_v37 = vmul.f32 %v14020_v63, %v13546_v56  ;;  %v926_v24 = vmul.f32 %v14010_v2, %v13554_v22  ;;  %v943_v15 = vmul.f32 %v14020_v63, %v13554_v22  ;;  %v14101_v33 = vpop.f32.mrf.mxu3 }
 0x380   :  { %v1861_v26 = vmul.f32 %v19607_v59, %v1827_v45  ;;  %19835 = vst [vmem:[#allocation86_spill] sm:$0xff] %v14076_v36  ;;  %v1867_v54 = vadd.f32 %v1851_v39, %v1835_v6  ;;  %v937_v55 = vmul.f32 %v14020_v63, %v13558_v58  ;;  %v927_v45 = vmul.f32 %v14010_v2, %v13564_v1 }
 0x381   :  { %19836 = vst [vmem:[#allocation87_spill] sm:$0xff] %v14078_v30  ;;  %v944_v56 = vmul.f32 %v14020_v63, %v13564_v1  ;;  %v938_v22 = vmul.f32 %v14020_v63, %v13566_v47  ;;  %v945_v44 = vmul.f32 %v14020_v63, %v13574_v35  ;;  %v939_v39 = vmul.f32 %v14020_v63, %v13578_v14 }
 0x382   :  { %v1877_v40 = vadd.f32 %v1861_v26, %v1845_v62  ;;  %v921_v62 = vmul.f32 %v14010_v2, %v13566_v47  ;;  %v928_v26 = vmul.f32 %v14010_v2, %v13574_v35  ;;  %v923_v1 = vmul.f32 %v14010_v2, %v13584_v43 }
 0x383   :  { %v940_v6 = vmul.f32 %v14020_v63, %v13584_v43  ;;  %v924_v47 = vmul.f32 %v14010_v2, %v13592_v18  ;;  %v941_v59 = vmul.f32 %v14020_v63, %v13592_v18  ;;  %v14133_v35 = vpack.c.bf16 %v13845_v12, %v13845_v12  ;;  %v1435_v63 = vpop.f32.mrf.mxu0 }
 0x384   :  { %v14070_v7 = vpack.c.bf16 %v1877_v40, %v1877_v40  ;;  %v920_v40 = vmul.f32 %v14010_v2, %v13558_v58  ;;  %v922_v58 = vmul.f32 %v14010_v2, %v13578_v14  ;;  %v14135_v29 = vpack.c.bf16 %v1867_v54, %v1867_v54 }
 0x385   :  { %v14137_v17 = vpack.c.bf16 %v950_v31, %v950_v31  ;;  %v952_v14 = vadd.f32 %v936_v37, %v919_v27  ;;  %v958_v11 = vadd.f32 %v942_v20, %v925_v4  ;;  %v959_v30 = vadd.f32 %v943_v15, %v926_v24 }
 0x386   :  { %3955 = vrot.lane.b32.xlu1 %v14032_v60, %s12918_s27  ;;  %3957 = vrot.lane.b32.xlu0 %v14070_v7, %s12918_s27  ;;  %v14139_v36 = vpack.c.bf16 %v951_v34, %v951_v34  ;;  %v953_v43 = vadd.f32 %v937_v55, %v920_v40  ;;  %v19839_v2 = vunpack.c.l.bf16 %v13806_v0  ;;  %v19614_v18 = vunpack.c.h.bf16 %v13806_v0 }
 0x387   :  { %3893 = vrot.lane.b32.xlu2 %v14070_v7, %s12919_s7  ;;  %19837 = vst [vmem:[#allocation88_spill] sm:$0xff] %v14137_v17  ;;  %v954_v12 = vadd.f32 %v938_v22, %v921_v62  ;;  %v955_v31 = vadd.f32 %v939_v39, %v922_v58  ;;  %v960_v27 = vadd.f32 %v944_v56, %v927_v45  ;;  %v12062_v24 = vunpack.c.h.bf16 %v13804_v16 }
 0x388   :  { %19838 = vst [vmem:[#allocation89_spill] sm:$0xff] %v14139_v36  ;;  %v1476_v38 = vmul.f32 %v19839_v2, %v13909_v49  ;;  %v961_v4 = vadd.f32 %v945_v44, %v928_v26  ;;  %v956_v34 = vadd.f32 %v940_v6, %v923_v1  ;;  %v957_v20 = vadd.f32 %v941_v59, %v924_v47  ;;  %v19852_v6 = vld [vmem:[#allocation51_spill] sm:$0xff] }
 0x389   :  { %v19840_v49 = vunpack.c.l.bf16 %v13804_v16  ;;  %v14155_v15 = vpack.c.bf16 %v952_v14, %v952_v14  ;;  %v14157_v54 = vpack.c.bf16 %v958_v11, %v958_v11  ;;  %v14159_v40 = vpack.c.bf16 %v959_v30, %v959_v30 }
 0x38a   :  { %v12066_v55 = vunpack.c.h.bf16 %v13819_v9  ;;  %v14162_v45 = vpack.c.bf16 %v953_v43, %v953_v43  ;;  %v1477_v59 = vmul.f32 %v19614_v18, %v13932_v32  ;;  %v12098_v62 = vunpack.c.h.bf16 %v13821_v57  ;;  %v19854_v43 = vld [vmem:[#allocation52_spill] sm:$0xff]  ;;  %v19886_v18 = vld [vmem:[#allocation73_spill] sm:$0xff] }
 0x38b   :  { %v1460_v37 = vmul.f32 %v19840_v49, %v13641_v25  ;;  %19841 = vst [vmem:[#allocation90_spill] sm:$0xff] %v14155_v15  ;;  %v1455_v25 = vpop.f32.mrf.mxu3  ;;  %v14168_v22 = vpack.c.bf16 %v954_v12, %v954_v12  ;;  %v14170_v16 = vpack.c.bf16 %v955_v31, %v955_v31  ;;  %v14172_v11 = vpack.c.bf16 %v960_v27, %v960_v27 }
 0x38c   :  { %19842 = vst [vmem:[#allocation91_spill] sm:$0xff] %v14157_v54  ;;  %v14174_v30 = vpack.c.bf16 %v961_v4, %v961_v4  ;;  %v14176_v26 = vpack.c.bf16 %v956_v34, %v956_v34  ;;  %v14178_v44 = vpack.c.bf16 %v957_v20, %v957_v20  ;;  %v1849_v58 = vmul.f32 %v12098_v62, %v13832_v3  ;;  %v19856_v4 = vld [vmem:[#allocation53_spill] sm:$0xff] }
 0x38d   :  { %19843 = vst [vmem:[#allocation92_spill] sm:$0xff] %v14159_v40  ;;  %v1492_v56 = vadd.f32 %v1476_v38, %v1460_v37  ;;  %v1461_v38 = vmul.f32 %v12062_v24, %v13644_v50  ;;  %v1463_v32 = vmul.f32 %v12066_v55, %v13660_v28  ;;  %v19851_v39 = vunpack.c.l.bf16 %v13819_v9  ;;  %v19862_v37 = vld [vmem:[#allocation55_spill] sm:$0xff] }
 0x38e   :  { %3873 = vrot.lane.b32.xlu1 %v14135_v29, %s12919_s7  ;;  %3903 = vrot.lane.b32.xlu0 %v14133_v35, %s12902_s22  ;;  %19844 = vst [vmem:[#allocation93_spill] sm:$0xff] %v14162_v45  ;;  %v19853_v47 = vunpack.c.l.bf16 %v13834_v13  ;;  %v19855_v2 = vunpack.c.h.bf16 %v13834_v13  ;;  %v1833_v50 = vmul.f32 %v12066_v55, %v13752_v61  ;;  %v19857_v3 = vunpack.c.l.bf16 %v13849_v51  ;;  %v19859_v13 = vld [vmem:[#allocation54_spill] sm:$0xff] }
 0x38f   :  { %3925 = vrot.lane.b32.xlu2 %v14070_v7, %s12902_s22  ;;  %19845 = vst [vmem:[#allocation94_spill] sm:$0xff] %v14168_v22  ;;  %v1462_v1 = vmul.f32 %v19851_v39, %v13657_v23  ;;  %v1508_v31 = vmul.f32 0.17677669, %v1492_v56  ;;  %v1493_v27 = vadd.f32 %v1477_v59, %v1461_v38  ;;  %v19858_v23 = vunpack.c.l.bf16 %v13821_v57  ;;  %v19866_v39 = vld [vmem:[#allocation56_spill] sm:$0xff] }
 0x390   :  { %19846 = vst [vmem:[#allocation95_spill] sm:$0xff] %v14170_v16  ;;  %v1464_v14 = vmul.f32 %v19853_v47, %v19852_v6  ;;  %v1465_v12 = vmul.f32 %v19855_v2, %v19854_v43  ;;  %v1466_v28 = vmul.f32 %v19857_v3, %v19856_v4  ;;  %v19860_v34 = vunpack.c.h.bf16 %v13849_v51  ;;  %v19868_v43 = vld [vmem:[#allocation78_spill] sm:$0xff]  ;;  %v19869_v2 = vld [vmem:[#allocation57_spill] sm:$0xff] }
 0x391   :  { %19847 = vst [vmem:[#allocation96_spill] sm:$0xff] %v14172_v11  ;;  %v1478_v9 = vmul.f32 %v19858_v23, %v13957_v19  ;;  %v19861_v61 = vunpack.c.l.bf16 %v13875_v53  ;;  %v19863_v55 = vunpack.c.h.bf16 %v13875_v53  ;;  %v19864_v59 = vunpack.c.h.bf16 %v13911_v41  ;;  %v1437_v19 = vpop.f32.mrf.mxu0  ;;  %v19871_v23 = vld [vmem:[#allocation58_spill] sm:$0xff] }
 0x392   :  { %19848 = vst [vmem:[#allocation97_spill] sm:$0xff] %v14174_v30  ;;  %v1467_v20 = vmul.f32 %v19860_v34, %v19859_v13  ;;  %v19865_v51 = vunpack.c.l.bf16 %v13911_v41  ;;  %v19867_v6 = vunpack.c.l.bf16 %v13951_v48  ;;  %v1865_v47 = vadd.f32 %v1849_v58, %v1833_v50  ;;  %v19872_v13 = vld [vmem:[#allocation79_spill] sm:$0xff]  ;;  %v19876_v58 = vld [vmem:[#allocation82_spill] sm:$0xff] }
 0x393   :  { %19849 = vst [vmem:[#allocation98_spill] sm:$0xff] %v14176_v26  ;;  %v1468_v49 = vmul.f32 %v19861_v61, %v13703_v46  ;;  %v1469_v56 = vmul.f32 %v19863_v55, %v19862_v37  ;;  %v1471_v57 = vmul.f32 %v19864_v59, %v13720_v10  ;;  %v1479_v53 = vmul.f32 %v12098_v62, %v19868_v43  ;;  %v19874_v61 = vld [vmem:[#allocation59_spill] sm:$0xff] }
 0x394   :  { %19850 = vst [vmem:[#allocation99_spill] sm:$0xff] %v14178_v44  ;;  %v1470_v38 = vmul.f32 %v19865_v51, %v13717_v42  ;;  %v1472_v46 = vmul.f32 %v19867_v6, %v19866_v39  ;;  %v19870_v4 = vunpack.c.h.bf16 %v13951_v48  ;;  %v19873_v34 = vunpack.c.l.bf16 %v19872_v13  ;;  %v19878_v51 = vld [vmem:[#allocation60_spill] sm:$0xff] }
 0x395   :  { %v19875_v37 = vunpack.c.h.bf16 %v19872_v13  ;;  %v14235_v55 = vpack.c.bf16 %v1508_v31, %v1508_v31  ;;  %v1509_v59 = vmul.f32 0.17677669, %v1493_v27  ;;  %v19877_v62 = vunpack.c.l.bf16 %v13836_v8  ;;  %v19883_v31 = vld [vmem:[#allocation71_spill] sm:$0xff] }
 0x396   :  { %3935 = vrot.lane.b32.xlu1 %v14133_v35, %s12918_s27  ;;  %3937 = vrot.lane.b32.xlu0 %v14135_v29, %s12918_s27  ;;  %v1473_v3 = vmul.f32 %v19870_v4, %v19869_v2  ;;  %v1474_v10 = vmul.f32 %v19873_v34, %v19871_v23  ;;  %v1831_v48 = vmul.f32 %v12062_v24, %v19878_v51  ;;  %v19879_v6 = vunpack.c.h.bf16 %v13836_v8  ;;  %v19880_v2 = vld [vmem:[#allocation64_spill] sm:$0xff]  ;;  %v1457_v24 = vpop.f32.mrf.mxu3  ;;  %v19890_v51 = vld [vmem:[#allocation69_spill] sm:$0xff] }
 0x397   :  { %3871 = vrot.lane.b32.xlu2 %v14133_v35, %s12919_s7  ;;  %v1475_v41 = vmul.f32 %v19875_v37, %v19874_v61  ;;  %v1480_v50 = vmul.f32 %v19877_v62, %v19876_v58  ;;  %v1494_v39 = vadd.f32 %v1478_v9, %v1462_v1  ;;  %v19881_v4 = vunpack.c.l.bf16 %v19880_v2  ;;  %v19884_v61 = vld [vmem:[#allocation66_spill] sm:$0xff]  ;;  %v19888_v1 = vld [vmem:[#allocation63_spill] sm:$0xff] }
 0x398   :  { %v1481_v43 = vmul.f32 %v19879_v6, %v14065_v52  ;;  %v19882_v13 = vunpack.c.h.bf16 %v19880_v2  ;;  %v19885_v27 = vunpack.c.l.bf16 %v19884_v61  ;;  %v19887_v58 = vunpack.c.h.bf16 %v19884_v61  ;;  %v19892_v2 = vld [vmem:[#allocation80_spill] sm:$0xff] }
 0x399   :  { %v14233_v42 = vpop.permute.xlu2 %3875  ;;  %v1482_v23 = vmul.f32 %v19881_v4, %v1435_v63  ;;  %v14256_v9 = vpack.c.bf16 %v19888_v1, %v19888_v1  ;;  %v14258_v8 = vpack.c.bf16 %v1865_v47, %v1865_v47  ;;  %v1495_v52 = vadd.f32 %v1479_v53, %v1463_v32  ;;  %v19889_v63 = vld [vmem:[#allocation76_spill] sm:$0xff] }
 0x39a   :  { %v1483_v34 = vmul.f32 %v19882_v13, %v1437_v19  ;;  %v1484_v37 = vmul.f32 %v19885_v27, %v19883_v31  ;;  %v1485_v62 = vmul.f32 %v19887_v58, %v19886_v18  ;;  %v19891_v6 = vunpack.c.l.bf16 %v19890_v51  ;;  %v19894_v31 = vld [vmem:[#allocation83_spill] sm:$0xff]  ;;  %v19895_v27 = vld [vmem:[#allocation74_spill] sm:$0xff] }
 0x39b   :  { %v19893_v4 = vunpack.c.h.bf16 %v19890_v51  ;;  %v19896_v61 = vunpack.c.l.bf16 %v19895_v27  ;;  %v1496_v58 = vadd.f32 %v1480_v50, %v1464_v14  ;;  %v19897_v1 = vunpack.c.h.bf16 %v19895_v27 }
 0x39c   :  { %v1486_v19 = vmul.f32 %v19891_v6, %v19889_v63  ;;  %v19898_v47 = vunpack.c.l.bf16 %v13993_v5  ;;  %v1497_v53 = vadd.f32 %v1481_v43, %v1465_v12  ;;  %v1498_v63 = vadd.f32 %v1482_v23, %v1466_v28  ;;  %v19901_v43 = vld [vmem:[#allocation62_spill] sm:$0xff] }
 0x39d   :  { %v1487_v13 = vmul.f32 %v19893_v4, %v19892_v2  ;;  %v1488_v18 = vmul.f32 %v19896_v61, %v19894_v31  ;;  %v1489_v30 = vmul.f32 %v19897_v1, %v14101_v33  ;;  %v1499_v51 = vadd.f32 %v1483_v34, %v1467_v20 }
 0x39e   :  { %v1490_v32 = vmul.f32 %v19898_v47, %v1455_v25  ;;  %3869 = vrot.lane.b32.xlu1 %v14258_v8, %s12919_s7  ;;  %3899 = vrot.lane.b32.xlu0 %v14256_v9, %s12902_s22  ;;  %v19899_v6 = vunpack.c.h.bf16 %v13993_v5  ;;  %v14282_v14 = vpack.c.bf16 %v1509_v59, %v1509_v59  ;;  %v1510_v33 = vmul.f32 0.17677669, %v1494_v39 }
 0x39f   :  { %3905 = vrot.lane.b32.xlu2 %v14135_v29, %s12902_s22  ;;  %v1500_v50 = vadd.f32 %v1484_v37, %v1468_v49  ;;  %v1501_v25 = vadd.f32 %v1485_v62, %v1469_v56  ;;  %v1511_v4 = vmul.f32 0.17677669, %v1495_v52  ;;  %v1502_v31 = vadd.f32 %v1486_v19, %v1470_v38 }
 0x3a0   :  { %v1491_v2 = vmul.f32 %v19899_v6, %v1457_v24  ;;  %19900 = vst [vmem:[#allocation51_spill] sm:$0xff] %v14282_v14  ;;  %v1503_v27 = vadd.f32 %v1487_v13, %v1471_v57  ;;  %v1504_v61 = vadd.f32 %v1488_v18, %v1472_v46  ;;  %v1512_v12 = vmul.f32 0.17677669, %v1496_v58 }
 0x3a1   :  { %v14284_v1 = vpop.permute.xlu2 %3909  ;;  %v1505_v28 = vadd.f32 %v1489_v30, %v1473_v3  ;;  %v1506_v20 = vadd.f32 %v1490_v32, %v1474_v10  ;;  %v19902_v5 = vunpack.c.h.bf16 %v13806_v0  ;;  %v1513_v34 = vmul.f32 0.17677669, %v1497_v53 }
 0x3a2   :  { %v1514_v24 = vmul.f32 0.17677669, %v1498_v63  ;;  %v1515_v59 = vmul.f32 0.17677669, %v1499_v51  ;;  %v1507_v47 = vadd.f32 %v1491_v2, %v1475_v41  ;;  %v14289_v39 = vpack.c.bf16 %v1510_v33, %v1510_v33 }
 0x3a3   :  { %v1847_v23 = vmul.f32 %v19902_v5, %v19901_v43  ;;  %v1516_v49 = vmul.f32 0.17677669, %v1500_v50  ;;  %v1517_v56 = vmul.f32 0.17677669, %v1501_v25  ;;  %v14291_v38 = vpack.c.bf16 %v1511_v4, %v1511_v4  ;;  %v19924_v43 = vld [vmem:[#allocation77_spill] sm:$0xff] }
 0x3a4   :  { %19903 = vst [vmem:[#allocation52_spill] sm:$0xff] %v14289_v39  ;;  %v1518_v57 = vmul.f32 0.17677669, %v1502_v31  ;;  %v1519_v46 = vmul.f32 0.17677669, %v1503_v27  ;;  %v14293_v62 = vpack.c.bf16 %v1512_v12, %v1512_v12  ;;  %v14299_v0 = vpack.c.bf16 %v1513_v34, %v1513_v34  ;;  %v19918_v12 = vld [vmem:[#allocation65_spill] sm:$0xff] }
 0x3a5   :  { %19904 = vst [vmem:[#allocation53_spill] sm:$0xff] %v14291_v38  ;;  %v1520_v37 = vmul.f32 0.17677669, %v1504_v61  ;;  %v1521_v30 = vmul.f32 0.17677669, %v1505_v28  ;;  %v1863_v10 = vadd.f32 %v1847_v23, %v1831_v48  ;;  %v14301_v41 = vpack.c.bf16 %v1514_v24, %v1514_v24  ;;  %v19910_v48 = vld [vmem:[#allocation61_spill] sm:$0xff] }
 0x3a6   :  { %19905 = vst [vmem:[#allocation54_spill] sm:$0xff] %v14293_v62  ;;  %v1522_v3 = vmul.f32 0.17677669, %v1506_v20  ;;  %3931 = vrot.lane.b32.xlu1 %v14256_v9, %s12918_s27  ;;  %3933 = vrot.lane.b32.xlu0 %v14258_v8, %s12918_s27  ;;  %v1523_v52 = vmul.f32 0.17677669, %v1507_v47  ;;  %v14305_v18 = vpack.c.bf16 %v1515_v59, %v1515_v59  ;;  %v14307_v58 = vpack.c.bf16 %v1516_v49, %v1516_v49  ;;  %v19923_v47 = vld [vmem:[#allocation75_spill] sm:$0xff] }
 0x3a7   :  { %19906 = vst [vmem:[#allocation55_spill] sm:$0xff] %v14299_v0  ;;  %v12920_v19 = vmov 1983009808   ;;  %3867 = vrot.lane.b32.xlu2 %v14256_v9, %s12919_s7  ;;  %v14311_v32 = vpack.c.bf16 %v19910_v48, %v19910_v48  ;;  %v14314_v63 = vpack.c.bf16 %v1517_v56, %v1517_v56  ;;  %v14316_v51 = vpack.c.bf16 %v1518_v57, %v1518_v57  ;;  %v19919_v57 = vld [vmem:[#allocation67_spill] sm:$0xff] }
 0x3a8   :  { %19907 = vst [vmem:[#allocation56_spill] sm:$0xff] %v14301_v41  ;;  %v2200_v13 = vunpack.c.l.s4 %v12920_v19  ;;  %v14318_v6 = vpack.c.bf16 %v1519_v46, %v1519_v46  ;;  %v14320_v2 = vpack.c.bf16 %v1520_v37, %v1520_v37  ;;  %v14322_v50 = vpack.c.bf16 %v1521_v30, %v1521_v30 }
 0x3a9   :  { %19908 = vst [vmem:[#allocation78_spill] sm:$0xff] %v14305_v18  ;;  %v3880_v33 = vpop.permute.xlu2 %3879  ;;  %v14324_v25 = vpack.c.bf16 %v1522_v3, %v1522_v3  ;;  %v14326_v4 = vpack.c.bf16 %v1863_v10, %v1863_v10  ;;  %v4035_v31 = vshrl.u32 %v14233_v42, 16  ;;  %v14329_v27 = vpack.c.bf16 %v1523_v52, %v1523_v52  ;;  %v19920_v3 = vld [vmem:[#allocation68_spill] sm:$0xff] }
 0x3aa   :  { %19909 = vst [vmem:[#allocation57_spill] sm:$0xff] %v14307_v58  ;;  %v14331_v61 = vunpack.c.0.s8 %v2200_v13  ;;  %v4033_v28 = vpack.i.b16 %v14233_v42, %v19918_v12  ;;  %v4034_v20 = vshrl.u32 %v19918_v12, 16  ;;  %v12921_v42 = vmov 1934713408   ;;  %v19921_v52 = vld [vmem:[#allocation72_spill] sm:$0xff]  ;;  %v19922_v13 = vld [vmem:[#allocation70_spill] sm:$0xff] }
 0x3ab   :  { %19911 = vst [vmem:[#allocation58_spill] sm:$0xff] %v14314_v63  ;;  %v2214_v56 = vunpack.c.l.s4 %v12921_v42  ;;  %v4058_v10 = vshrl.u32 %v19920_v3, 16  ;;  %v4057_v48 = vpack.i.b16 %v3880_v33, %v19920_v3 }
 0x3ac   :  { %19912 = vst [vmem:[#allocation79_spill] sm:$0xff] %v14316_v51  ;;  %v4036_v49 = vpack.i.b16 %v4035_v31, %v4034_v20  ;;  %v4467_v30 = vperm.slane %v4033_v28, %v14331_v61  ;;  %v4059_v31 = vshrl.u32 %v3880_v33, 16 }
 0x3ad   :  { %19913 = vst [vmem:[#allocation59_spill] sm:$0xff] %v14318_v6  ;;  %v14363_v19 = vunpack.c.0.s8 %v2214_v56 }
 0x3ae   :  { %19914 = vst [vmem:[#allocation82_spill] sm:$0xff] %v14320_v2  ;;  %3865 = vrot.lane.b32.xlu1 %v14326_v4, %s12919_s7  ;;  %3895 = vrot.lane.b32.xlu0 %v14311_v32, %s12902_s22  ;;  %v4493_v34 = vperm.slane %v4036_v49, %v14331_v61  ;;  %v4475_v46 = vrot.slane %v4467_v30, 4  ;;  %v4060_v11 = vpack.i.b16 %v4059_v31, %v4058_v10 }
 0x3af   :  { %19915 = vst [vmem:[#allocation60_spill] sm:$0xff] %v14322_v50  ;;  %3901 = vrot.lane.b32.xlu2 %v14258_v8, %s12902_s22 }
 0x3b0   :  { %19916 = vst [vmem:[#allocation64_spill] sm:$0xff] %v14324_v25  ;;  %v3940_v12 = vpop.permute.xlu1 %3939  ;;  %v3908_v20 = vpop.permute.xlu0 %3907  ;;  %v4501_v3 = vrot.slane %v4493_v34, 4 }
 0x3b1   :  { %19917 = vst [vmem:[#allocation71_spill] sm:$0xff] %v14329_v27  ;;  %v4041_v37 = vshrl.u32 %v3940_v12, 16  ;;  %v4039_v28 = vpack.i.b16 %v3940_v12, %v3908_v20  ;;  %v4040_v5 = vshrl.u32 %v3908_v20, 16  ;;  %v14358_v59 = vpop.permute.xlu2 %3913  ;;  %v19925_v12 = vld [vmem:[#allocation81_spill] sm:$0xff] }
 0x3b3   :  { %v4042_v42 = vpack.i.b16 %v4041_v37, %v4040_v5  ;;  %v4472_v23 = vperm.slane %v4039_v28, %v14331_v61  ;;  %v14374_v5 = vperm.slane %v4057_v48, %v14331_v61  ;;  %v14389_v28 = vperm.slane %v4060_v11, %v14331_v61 }
 0x3b5   :  { %v4473_v54 = vrot.slane %v4472_v23, 4  ;;  %v4476_v49 = vsel %vm2209_vm1, %v4472_v23, %v4475_v46  ;;  %v4498_v33 = vperm.slane %v4042_v42, %v14331_v61  ;;  %v4052_v42 = vshrl.u32 %v14284_v1, 16 }
 0x3b6   :  { %v4484_v37 = vperm.slane %v4476_v49, %v14363_v19  ;;  %3927 = vrot.lane.b32.xlu1 %v14311_v32, %s12918_s27  ;;  %3929 = vrot.lane.b32.xlu0 %v14326_v4, %s12918_s27  ;;  %v4579_v20 = vrot.slane %v14374_v5, 4 }
 0x3b7   :  { %v4474_v23 = vsel %vm2209_vm1, %v4473_v54, %v4467_v30  ;;  %v4499_v46 = vrot.slane %v4498_v33, 4  ;;  %3863 = vrot.lane.b32.xlu2 %v14311_v32, %s12919_s7  ;;  %v4502_v49 = vsel %vm2209_vm1, %v4498_v33, %v4501_v3 }
 0x3b8   :  { %v3942_v56 = vpop.permute.xlu0 %3941  ;;  %v3878_v24 = vpop.permute.xlu1 %3877  ;;  %v14394_v54 = vperm.slane %v4474_v23, %v14363_v19  ;;  %v4487_v10 = vrot.slane %v4484_v37, 4  ;;  %v4510_v53 = vperm.slane %v4502_v49, %v14363_v19 }
 0x3b9   :  { %v4051_v30 = vpack.i.b16 %v3942_v56, %v14284_v1  ;;  %v4053_v40 = vshrl.u32 %v3942_v56, 16  ;;  %v4045_v31 = vpack.i.b16 %v3878_v24, %v19919_v57  ;;  %v3884_v48 = vpop.permute.xlu2 %3883  ;;  %v4500_v3 = vsel %vm2209_vm1, %v4499_v46, %v4493_v34 }
 0x3ba   :  { %v4047_v26 = vshrl.u32 %v3878_v24, 16  ;;  %v4485_v37 = vrot.slane %v14394_v54, 4  ;;  %v14411_v34 = vsel %vm2209_vm1, 0, %v4487_v10  ;;  %v19928_v46 = vshrl.u32 %v19919_v57, 16 }
 0x3bb   :  { %v4054_v44 = vpack.i.b16 %v4053_v40, %v4052_v42  ;;  %v4524_v23 = vperm.slane %v4051_v30, %v14331_v61  ;;  %v4519_v33 = vperm.slane %v4045_v31, %v14331_v61  ;;  %19926 = vst [vmem:[#allocation66_spill] sm:$0xff] %v14411_v34  ;;  %v14414_v40 = vperm.slane %v4500_v3, %v14363_v19 }
 0x3bc   :  { %v4048_v42 = vpack.i.b16 %v4047_v26, %v19928_v46  ;;  %v4083_v49 = vshrl.u32 %v3884_v48, 16  ;;  %v14422_v24 = vrot.slane %v4510_v53, 4  ;;  %v14429_v57 = vsel %vm2209_vm1, %v4487_v10, %v14394_v54 }
 0x3bd   :  { %v4525_v22 = vrot.slane %v4524_v23, 4  ;;  %v4550_v11 = vperm.slane %v4054_v44, %v14331_v61  ;;  %19927 = vst [vmem:[#allocation73_spill] sm:$0xff] %v14414_v40  ;;  %v4527_v30 = vrot.slane %v4519_v33, 4  ;;  %v4081_v46 = vpack.i.b16 %v3884_v48, %v19921_v52 }
 0x3be   :  { %1942 = vrot.lane.b32.xlu0 %v14235_v55, %s12902_s22  ;;  %1912 = vrot.lane.b32.xlu1 %v14282_v14, %s12919_s7  ;;  %19929 = vst [vmem:[#allocation63_spill] sm:$0xff] %v14422_v24  ;;  %v4545_v3 = vperm.slane %v4048_v42, %v14331_v61  ;;  %v19931_v10 = vshrl.u32 %v19921_v52, 16 }
 0x3bf   :  { %v4551_v44 = vrot.slane %v4550_v11, 4  ;;  %v4526_v31 = vsel %vm2209_vm1, %v4525_v22, %v4519_v33  ;;  %3897 = vrot.lane.b32.xlu2 %v14326_v4, %s12902_s22  ;;  %19930 = vst [vmem:[#allocation76_spill] sm:$0xff] %v14429_v57  ;;  %v4528_v56 = vsel %vm2209_vm1, %v4524_v23, %v4527_v30 }
 0x3c0   :  { %v4532_v26 = vperm.slane %v4526_v31, %v14363_v19  ;;  %v3944_v16 = vpop.permute.xlu1 %3943  ;;  %v3912_v53 = vpop.permute.xlu0 %3911  ;;  %v4536_v45 = vperm.slane %v4528_v56, %v14363_v19  ;;  %v4553_v36 = vrot.slane %v4545_v3, 4  ;;  %v4084_v54 = vpack.i.b16 %v4083_v49, %v19931_v10 }
 0x3c1   :  { %v4065_v1 = vshrl.u32 %v3944_v16, 16  ;;  %v4063_v22 = vpack.i.b16 %v3944_v16, %v3912_v53  ;;  %v4064_v33 = vshrl.u32 %v3912_v53, 16  ;;  %v4552_v15 = vsel %vm2209_vm1, %v4551_v44, %v4545_v3  ;;  %v14444_v23 = vpop.permute.xlu2 %3917 }
 0x3c2   :  { %v4511_v31 = vrot.slane %v14414_v40, 4  ;;  %v14442_v48 = vperm.slane %v4552_v15, %v14363_v19  ;;  %v14448_v16 = vsel %vm2209_vm1, 0, %v14422_v24  ;;  %v4539_v56 = vrot.slane %v4536_v45, 4 }
 0x3c3   :  { %v4066_v57 = vpack.i.b16 %v4065_v1, %v4064_v33  ;;  %19933 = vst [vmem:[#allocation80_spill] sm:$0xff] %v14448_v16  ;;  %v4554_v44 = vsel %vm2209_vm1, %v4550_v11, %v4553_v36  ;;  %v4576_v52 = vperm.slane %v4063_v22, %v14331_v61  ;;  %v4537_v49 = vrot.slane %v4532_v26, 4 }
 0x3c4   :  { %19932 = vst [vmem:[#allocation69_spill] sm:$0xff] %v14442_v48  ;;  %v4562_v30 = vperm.slane %v4554_v44, %v14363_v19  ;;  %v14454_v3 = vperm.slane %v4081_v46, %v14331_v61  ;;  %v4540_v1 = vsel %vm2209_vm1, 0, %v4539_v56  ;;  %v14459_v53 = vperm.slane %v4084_v54, %v14331_v61 }
 0x3c5   :  { %v4602_v15 = vperm.slane %v4066_v57, %v14331_v61  ;;  %v4577_v33 = vrot.slane %v4576_v52, 4  ;;  %v4580_v45 = vsel %vm2209_vm1, %v4576_v52, %v4579_v20  ;;  %v14467_v36 = vsel %vm2209_vm1, 0, %v4485_v37 }
 0x3c6   :  { %1976 = vrot.lane.b32.xlu0 %v14282_v14, %s12918_s27  ;;  %1974 = vrot.lane.b32.xlu1 %v14235_v55, %s12918_s27  ;;  %19934 = vst [vmem:[#allocation83_spill] sm:$0xff] %v14467_v36  ;;  %v4563_v11 = vrot.slane %v14442_v48, 4  ;;  %v14470_v57 = vrot.slane %v4562_v30, 4  ;;  %v4588_v46 = vperm.slane %v4580_v45, %v14363_v19  ;;  %v14476_v20 = vsel %vm2209_vm1, 0, %v4511_v31 }
 0x3c7   :  { %1910 = vrot.lane.b32.xlu2 %v14235_v55, %s12919_s7  ;;  %19936 = vst [vmem:[#allocation62_spill] sm:$0xff] %v14476_v20  ;;  %v4578_v10 = vsel %vm2209_vm1, %v4577_v33, %v14374_v5  ;;  %v4603_v54 = vrot.slane %v4602_v15, 4  ;;  %v5254_v52 = vrot.slane %v4540_v1, 4  ;;  %v19937_v45 = vrot.slane %v14389_v28, 4 }
 0x3c8   :  { %19935 = vst [vmem:[#allocation74_spill] sm:$0xff] %v14470_v57  ;;  %v3946_v37 = vpop.permute.xlu0 %3945  ;;  %v3882_v44 = vpop.permute.xlu1 %3881  ;;  %v4591_v42 = vrot.slane %v4588_v46, 4  ;;  %v4538_v24 = vsel %vm2209_vm1, 0, %v4537_v49  ;;  %v4584_v22 = vperm.slane %v4578_v10, %v14363_v19  ;;  %v14490_v5 = vsel %vm2209_vm1, 0, %v4563_v11 }
 0x3c9   :  { %v4606_v48 = vsel %vm2209_vm1, %v4602_v15, %v19937_v45  ;;  %v4075_v16 = vpack.i.b16 %v3946_v37, %v14358_v59  ;;  %19938 = vst [vmem:[#allocation61_spill] sm:$0xff] %v14490_v5  ;;  %v14494_v1 = vsel %vm2209_vm1, 0, %v14470_v57  ;;  %v14497_v33 = vsel %vm2209_vm1, %v4539_v56, %v4532_v26  ;;  %v3888_v56 = vpop.permute.xlu2 %3887 }
 0x3ca   :  { %19939 = vst [vmem:[#allocation65_spill] sm:$0xff] %v14494_v1  ;;  %v4604_v49 = vsel %vm2209_vm1, %v4603_v54, %v14389_v28  ;;  %v4614_v46 = vperm.slane %v4606_v48, %v14363_v19  ;;  %v4077_v10 = vshrl.u32 %v3946_v37, 16  ;;  %v14505_v11 = vsel %vm2209_vm1, %v5254_v52, %v4538_v24 }
 0x3cb   :  { %19940 = vst [vmem:[#allocation67_spill] sm:$0xff] %v14497_v33  ;;  %v4628_v45 = vperm.slane %v4075_v16, %v14331_v61  ;;  %v14508_v31 = vsel %vm2209_vm1, 0, %v4591_v42  ;;  %v4069_v30 = vpack.i.b16 %v3882_v44, %v19922_v13  ;;  %v4071_v26 = vshrl.u32 %v3882_v44, 16 }
 0x3cc   :  { %19941 = vst [vmem:[#allocation68_spill] sm:$0xff] %v14505_v11  ;;  %v4589_v5 = vrot.slane %v4584_v22, 4  ;;  %v19943_v28 = vshrl.u32 %v14358_v59, 16  ;;  %v14519_v24 = vperm.slane %v4604_v49, %v14363_v19  ;;  %v14522_v16 = vsel %vm2209_vm1, %v4591_v42, %v4584_v22 }
 0x3cd   :  { %19942 = vst [vmem:[#allocation72_spill] sm:$0xff] %v14508_v31  ;;  %v4629_v48 = vrot.slane %v4628_v45, 4  ;;  %v19946_v37 = vshrl.u32 %v19922_v13, 16  ;;  %v4623_v52 = vperm.slane %v4069_v30, %v14331_v61  ;;  %v14529_v59 = vrot.slane %v4614_v46, 4 }
 0x3ce   :  { %v4078_v54 = vpack.i.b16 %v4077_v10, %v19943_v28  ;;  %1946 = vrot.lane.b32.xlu0 %v14289_v39, %s12902_s22  ;;  %1916 = vrot.lane.b32.xlu1 %v14291_v38, %s12919_s7  ;;  %19944 = vst [vmem:[#allocation70_spill] sm:$0xff] %v14519_v24  ;;  %v4107_v15 = vshrl.u32 %v3888_v56, 16  ;;  %v14536_v30 = vsel %vm2209_vm1, 0, %v4589_v5  ;;  %v4105_v57 = vpack.i.b16 %v3888_v56, %v19924_v43 }
 0x3cf   :  { %19945 = vst [vmem:[#allocation75_spill] sm:$0xff] %v14522_v16  ;;  %v4072_v44 = vpack.i.b16 %v4071_v26, %v19946_v37  ;;  %1944 = vrot.lane.b32.xlu2 %v14282_v14, %s12902_s22  ;;  %v4630_v42 = vsel %vm2209_vm1, %v4629_v48, %v4623_v52  ;;  %v4631_v22 = vrot.slane %v4623_v52, 4  ;;  %v4615_v20 = vrot.slane %v14519_v24, 4 }
 0x3d0   :  { %19947 = vst [vmem:[#allocation77_spill] sm:$0xff] %v14529_v59  ;;  %v4654_v28 = vperm.slane %v4078_v54, %v14331_v61  ;;  %v3948_v49 = vpop.permute.xlu1 %3947  ;;  %v3916_v1 = vpop.permute.xlu0 %3915  ;;  %v4636_v46 = vperm.slane %v4630_v42, %v14363_v19  ;;  %v19949_v52 = vshrl.u32 %v19924_v43, 16 }
 0x3d1   :  { %v4649_v13 = vperm.slane %v4072_v44, %v14331_v61  ;;  %v4089_v26 = vshrl.u32 %v3948_v49, 16  ;;  %19948 = vst [vmem:[#allocation81_spill] sm:$0xff] %v14536_v30  ;;  %v4632_v10 = vsel %vm2209_vm1, %v4628_v45, %v4631_v22  ;;  %v4087_v11 = vpack.i.b16 %v3948_v49, %v3916_v1 }
 0x3d2   :  { %v4655_v37 = vrot.slane %v4654_v28, 4  ;;  %v4088_v33 = vshrl.u32 %v3916_v1, 16  ;;  %v4640_v48 = vperm.slane %v4632_v10, %v14363_v19  ;;  %v4108_v5 = vpack.i.b16 %v4107_v15, %v19949_v52 }
 0x3d3   :  { %v4657_v54 = vrot.slane %v4649_v13, 4  ;;  %v4680_v45 = vperm.slane %v4087_v11, %v14331_v61  ;;  %v14553_v1 = vsel %vm2209_vm1, 0, %v14529_v59  ;;  %v14557_v22 = vperm.slane %v4105_v57, %v14331_v61 }
 0x3d4   :  { %v4656_v44 = vsel %vm2209_vm1, %v4655_v37, %v4649_v13  ;;  %v4090_v56 = vpack.i.b16 %v4089_v26, %v4088_v33  ;;  %19951 = vst [vmem:[#allocation101_spill] sm:$0xff] %v14553_v1  ;;  %v4643_v49 = vrot.slane %v4640_v48, 4  ;;  %v4641_v43 = vrot.slane %v4636_v46, 4 }
 0x3d5   :  { %v4658_v40 = vsel %vm2209_vm1, %v4654_v28, %v4657_v54  ;;  %v14548_v42 = vperm.slane %v4656_v44, %v14363_v19  ;;  %v4681_v33 = vrot.slane %v4680_v45, 4  ;;  %v19952_v15 = vrot.slane %v14454_v3, 4 }
 0x3d6   :  { %v4666_v10 = vperm.slane %v4658_v40, %v14363_v19  ;;  %1980 = vrot.lane.b32.xlu0 %v14291_v38, %s12918_s27  ;;  %1978 = vrot.lane.b32.xlu1 %v14289_v39, %s12918_s27  ;;  %v4706_v28 = vperm.slane %v4090_v56, %v14331_v61  ;;  %v4644_v40 = vsel %vm2209_vm1, 0, %v4643_v49  ;;  %v14573_v13 = vperm.slane %v4108_v5, %v14331_v61 }
 0x3d7   :  { %19950 = vst [vmem:[#allocation100_spill] sm:$0xff] %v14548_v42  ;;  %v4684_v11 = vsel %vm2209_vm1, %v4680_v45, %v19952_v15  ;;  %1914 = vrot.lane.b32.xlu2 %v14289_v39, %s12919_s7  ;;  %v4667_v48 = vrot.slane %v14548_v42, 4  ;;  %v5330_v44 = vrot.slane %v4644_v40, 4  ;;  %v4682_v52 = vsel %vm2209_vm1, %v4681_v33, %v14454_v3  ;;  %v14579_v45 = vpop.permute.xlu2 %3921 }
 0x3d8   :  { %v14570_v57 = vrot.slane %v4666_v10, 4  ;;  %v4692_v26 = vperm.slane %v4684_v11, %v14363_v19  ;;  %v3950_v37 = vpop.permute.xlu0 %3949  ;;  %v3886_v54 = vpop.permute.xlu1 %3885  ;;  %v4707_v56 = vrot.slane %v4706_v28, 4  ;;  %v14582_v15 = vsel %vm2209_vm1, 0, %v4615_v20 }
 0x3d9   :  { %19954 = vst [vmem:[#allocation103_spill] sm:$0xff] %v14582_v15  ;;  %v14586_v5 = vperm.slane %v4682_v52, %v14363_v19  ;;  %v19955_v11 = vrot.slane %v14459_v53, 4  ;;  %v4787_v3 = vrot.slane %v14557_v22, 4  ;;  %v4642_v20 = vsel %vm2209_vm1, 0, %v4641_v43 }
 0x3da   :  { %19953 = vst [vmem:[#allocation102_spill] sm:$0xff] %v14570_v57  ;;  %v14593_v40 = vsel %vm2209_vm1, 0, %v14570_v57  ;;  %v4695_v33 = vrot.slane %v4692_v26, 4  ;;  %v4708_v52 = vsel %vm2209_vm1, %v4707_v56, %v14459_v53  ;;  %v14609_v14 = vsel %vm2209_vm1, %v5330_v44, %v4642_v20 }
 0x3db   :  { %v4710_v34 = vsel %vm2209_vm1, %v4706_v28, %v19955_v11  ;;  %19956 = vst [vmem:[#allocation104_spill] sm:$0xff] %v14593_v40  ;;  %v14603_v28 = vsel %vm2209_vm1, 0, %v4667_v48  ;;  %v14606_v11 = vsel %vm2209_vm1, %v4643_v49, %v4636_v46  ;;  %v4099_v26 = vpack.i.b16 %v3950_v37, %v14444_v23 }
 0x3dc   :  { %v4718_v39 = vperm.slane %v4710_v34, %v14363_v19  ;;  %19957 = vst [vmem:[#allocation105_spill] sm:$0xff] %v14603_v28  ;;  %v4693_v36 = vrot.slane %v14586_v5, 4  ;;  %v4101_v10 = vshrl.u32 %v3950_v37, 16  ;;  %v4093_v53 = vpack.i.b16 %v3886_v54, %v19923_v47 }
 0x3dd   :  { %19958 = vst [vmem:[#allocation106_spill] sm:$0xff] %v14606_v11  ;;  %v14620_v34 = vsel %vm2209_vm1, 0, %v4695_v33  ;;  %v14623_v46 = vperm.slane %v4708_v52, %v14363_v19  ;;  %v4732_v49 = vperm.slane %v4099_v26, %v14331_v61  ;;  %v4095_v48 = vshrl.u32 %v3886_v54, 16 }
 0x3de   :  { %19959 = vst [vmem:[#allocation107_spill] sm:$0xff] %v14609_v14  ;;  %1950 = vrot.lane.b32.xlu0 %v14293_v62, %s12902_s22  ;;  %1920 = vrot.lane.b32.xlu1 %v14299_v0, %s12919_s7  ;;  %v14628_v37 = vrot.slane %v4718_v39, 4  ;;  %v14632_v44 = vsel %vm2209_vm1, %v4695_v33, %v14586_v5  ;;  %v19963_v56 = vshrl.u32 %v14444_v23, 16  ;;  %v4727_v43 = vperm.slane %v4093_v53, %v14331_v61 }
 0x3df   :  { %19960 = vst [vmem:[#allocation108_spill] sm:$0xff] %v14620_v34  ;;  %1948 = vrot.lane.b32.xlu2 %v14291_v38, %s12902_s22  ;;  %v4733_v28 = vrot.slane %v4732_v49, 4  ;;  %v19964_v26 = vshrl.u32 %v19923_v47, 16  ;;  %v4719_v23 = vrot.slane %v14623_v46, 4 }
 0x3e0   :  { %19961 = vst [vmem:[#allocation109_spill] sm:$0xff] %v14623_v46  ;;  %v4102_v20 = vpack.i.b16 %v4101_v10, %v19963_v56  ;;  %v3952_v40 = vpop.permute.xlu1 %3951  ;;  %v3920_v52 = vpop.permute.xlu0 %3919  ;;  %v4735_v33 = vrot.slane %v4727_v43, 4  ;;  %v14653_v1 = vsel %vm2209_vm1, 0, %v14628_v37 }
 0x3e1   :  { %19962 = vst [vmem:[#allocation110_spill] sm:$0xff] %v14628_v37  ;;  %v4096_v54 = vpack.i.b16 %v4095_v48, %v19964_v26  ;;  %v4113_v57 = vshrl.u32 %v3952_v40, 16  ;;  %v4111_v42 = vpack.i.b16 %v3952_v40, %v3920_v52  ;;  %v14639_v38 = vpop.permute.xlu2 %3893  ;;  %v4112_v14 = vshrl.u32 %v3920_v52, 16 }
 0x3e2   :  { %v4758_v5 = vperm.slane %v4102_v20, %v14331_v61  ;;  %v4734_v10 = vsel %vm2209_vm1, %v4733_v28, %v4727_v43  ;;  %v4736_v48 = vsel %vm2209_vm1, %v4732_v49, %v4735_v33  ;;  %19965 = vst [vmem:[#allocation111_spill] sm:$0xff] %v14653_v1  ;;  %v4143_v15 = vshrl.u32 %v14639_v38, 16 }
 0x3e3   :  { %v4753_v53 = vperm.slane %v4096_v54, %v14331_v61  ;;  %v4784_v56 = vperm.slane %v4111_v42, %v14331_v61  ;;  %v4740_v40 = vperm.slane %v4734_v10, %v14363_v19  ;;  %v4114_v26 = vpack.i.b16 %v4113_v57, %v4112_v14 }
 0x3e4   :  { %v4759_v47 = vrot.slane %v4758_v5, 4  ;;  %v4744_v39 = vperm.slane %v4736_v48, %v14363_v19  ;;  %v4124_v54 = vshrl.u32 %v14579_v45, 16 }
 0x3e5   :  { %v4761_v11 = vrot.slane %v4753_v53, 4  ;;  %v4785_v20 = vrot.slane %v4784_v56, 4  ;;  %v4788_v52 = vsel %vm2209_vm1, %v4784_v56, %v4787_v3  ;;  %v4810_v43 = vperm.slane %v4114_v26, %v14331_v61 }
 0x3e6   :  { %v4760_v28 = vsel %vm2209_vm1, %v4759_v47, %v4753_v53  ;;  %v4796_v42 = vperm.slane %v4788_v52, %v14363_v19  ;;  %1984 = vrot.lane.b32.xlu0 %v14299_v0, %s12918_s27  ;;  %1982 = vrot.lane.b32.xlu1 %v14293_v62, %s12918_s27  ;;  %v4747_v14 = vrot.slane %v4744_v39, 4  ;;  %v4745_v33 = vrot.slane %v4740_v40, 4 }
 0x3e7   :  { %v4762_v57 = vsel %vm2209_vm1, %v4758_v5, %v4761_v11  ;;  %v14664_v3 = vperm.slane %v4760_v28, %v14363_v19  ;;  %v4786_v49 = vsel %vm2209_vm1, %v4785_v20, %v14557_v22  ;;  %1918 = vrot.lane.b32.xlu2 %v14293_v62, %s12919_s7  ;;  %v4811_v48 = vrot.slane %v4810_v43, 4 }
 0x3e8   :  { %v4770_v10 = vperm.slane %v4762_v57, %v14363_v19  ;;  %v4792_v53 = vperm.slane %v4786_v49, %v14363_v19  ;;  %v3954_v56 = vpop.permute.xlu0 %3953  ;;  %v3890_v39 = vpop.permute.xlu1 %3889  ;;  %v4748_v11 = vsel %vm2209_vm1, 0, %v4747_v14  ;;  %v4799_v47 = vrot.slane %v4796_v42, 4 }
 0x3e9   :  { %19966 = vst [vmem:[#allocation112_spill] sm:$0xff] %v14664_v3  ;;  %v4771_v5 = vrot.slane %v14664_v3, 4  ;;  %v14675_v26 = vpop.permute.xlu2 %3925  ;;  %v14678_v22 = vsel %vm2209_vm1, 0, %v4693_v36  ;;  %v14681_v20 = vsel %vm2209_vm1, 0, %v4719_v23  ;;  %v5406_v57 = vrot.slane %v4748_v11, 4 }
 0x3ea   :  { %19967 = vst [vmem:[#allocation113_spill] sm:$0xff] %v14678_v22  ;;  %v14684_v28 = vrot.slane %v4770_v10, 4  ;;  %v4812_v49 = vsel %vm2209_vm1, %v4811_v48, %v14573_v13  ;;  %v19970_v62 = vrot.slane %v14573_v13, 4  ;;  %v4746_v36 = vsel %vm2209_vm1, 0, %v4745_v33 }
 0x3eb   :  { %19968 = vst [vmem:[#allocation114_spill] sm:$0xff] %v14681_v20  ;;  %v14694_v59 = vsel %vm2209_vm1, %v4747_v14, %v4740_v40  ;;  %v4797_v23 = vrot.slane %v4792_v53, 4  ;;  %v4141_v10 = vpack.i.b16 %v14639_v38, %v14070_v7  ;;  %v14699_v11 = vsel %vm2209_vm1, 0, %v4771_v5 }
 0x3ec   :  { %19969 = vst [vmem:[#allocation115_spill] sm:$0xff] %v14684_v28  ;;  %v4814_v42 = vsel %vm2209_vm1, %v4810_v43, %v19970_v62  ;;  %v14703_v48 = vsel %vm2209_vm1, 0, %v14684_v28  ;;  %v14706_v62 = vsel %vm2209_vm1, 0, %v4799_v47  ;;  %v14709_v13 = vperm.slane %v4812_v49, %v14363_v19 }
 0x3ed   :  { %19971 = vst [vmem:[#allocation116_spill] sm:$0xff] %v14694_v59  ;;  %v4822_v40 = vperm.slane %v4814_v42, %v14363_v19  ;;  %v14713_v43 = vsel %vm2209_vm1, %v4799_v47, %v4792_v53  ;;  %v4123_v38 = vpack.i.b16 %v3954_v56, %v14579_v45  ;;  %v4125_v14 = vshrl.u32 %v3954_v56, 16 }
 0x3ee   :  { %19972 = vst [vmem:[#allocation117_spill] sm:$0xff] %v14699_v11  ;;  %1954 = vrot.lane.b32.xlu0 %v14301_v41, %s12902_s22  ;;  %1924 = vrot.lane.b32.xlu1 %v14305_v18, %s12919_s7  ;;  %v14721_v33 = vsel %vm2209_vm1, %v5406_v57, %v4746_v36  ;;  %v19975_v5 = vshrl.u32 %v14070_v7, 16  ;;  %v4117_v42 = vpack.i.b16 %v3890_v39, %v19925_v12  ;;  %v4119_v52 = vshrl.u32 %v3890_v39, 16 }
 0x3ef   :  { %19973 = vst [vmem:[#allocation118_spill] sm:$0xff] %v14703_v48  ;;  %1952 = vrot.lane.b32.xlu2 %v14299_v0, %s12902_s22  ;;  %v14730_v53 = vsel %vm2209_vm1, 0, %v4797_v23  ;;  %v4126_v56 = vpack.i.b16 %v4125_v14, %v4124_v54  ;;  %v4836_v47 = vperm.slane %v4123_v38, %v14331_v61  ;;  %v4823_v36 = vrot.slane %v14709_v13, 4 }
 0x3f0   :  { %19974 = vst [vmem:[#allocation119_spill] sm:$0xff] %v14721_v33  ;;  %v4144_v49 = vpack.i.b16 %v4143_v15, %v19975_v5  ;;  %v3924_v24 = vpop.permute.xlu0 %3923  ;;  %v3892_v57 = vpop.permute.xlu1 %3891  ;;  %v19976_v15 = vshrl.u32 %v19925_v12, 16  ;;  %v4831_v5 = vperm.slane %v4117_v42, %v14331_v61  ;;  %v14738_v16 = vrot.slane %v4822_v40, 4 }
 0x3f1   :  { %v3872_v0 = vpop.permute.xlu2 %3871  ;;  %v14741_v23 = vperm.slane %v4141_v10, %v14331_v61  ;;  %v4837_v54 = vrot.slane %v4836_v47, 4  ;;  %v4862_v38 = vperm.slane %v4126_v56, %v14331_v61  ;;  %v4129_v12 = vpack.i.b16 %v3892_v57, %v14032_v60 }
 0x3f2   :  { %v4120_v39 = vpack.i.b16 %v4119_v52, %v19976_v15  ;;  %v14745_v14 = vperm.slane %v4144_v49, %v14331_v61  ;;  %v4839_v45 = vrot.slane %v4831_v5, 4  ;;  %v4131_v15 = vshrl.u32 %v3892_v57, 16 }
 0x3f3   :  { %v4863_v52 = vrot.slane %v4862_v38, 4  ;;  %v4838_v42 = vsel %vm2209_vm1, %v4837_v54, %v4831_v5  ;;  %v4009_v40 = vpack.i.b16 %v3872_v0, %v14133_v35  ;;  %v4883_v56 = vperm.slane %v4129_v12, %v14331_v61 }
 0x3f4   :  { %v4857_v7 = vperm.slane %v4120_v39, %v14331_v61  ;;  %v4840_v10 = vsel %vm2209_vm1, %v4836_v47, %v4839_v45  ;;  %v4844_v31 = vperm.slane %v4838_v42, %v14363_v19  ;;  %v14756_v49 = vsel %vm2209_vm1, 0, %v14738_v16 }
 0x3f5   :  { %v4848_v39 = vperm.slane %v4840_v10, %v14363_v19  ;;  %v19977_v5 = vshrl.u32 %v14032_v60, 16  ;;  %v4011_v12 = vshrl.u32 %v3872_v0, 16  ;;  %v4943_v60 = vrot.slane %v14741_v23, 4 }
 0x3f6   :  { %v4865_v30 = vrot.slane %v4857_v7, 4  ;;  %v4864_v17 = vsel %vm2209_vm1, %v4863_v52, %v4857_v7  ;;  %1988 = vrot.lane.b32.xlu0 %v14305_v18, %s12918_s27  ;;  %1986 = vrot.lane.b32.xlu1 %v14301_v41, %s12918_s27  ;;  %v4849_v45 = vrot.slane %v4844_v31, 4  ;;  %v14773_v7 = vsel %vm2209_vm1, 0, %v4823_v36 }
 0x3f7   :  { %v4132_v57 = vpack.i.b16 %v4131_v15, %v19977_v5  ;;  %v14768_v54 = vperm.slane %v4864_v17, %v14363_v19  ;;  %1922 = vrot.lane.b32.xlu2 %v14301_v41, %s12919_s7  ;;  %v4851_v52 = vrot.slane %v4848_v39, 4  ;;  %v4969_v5 = vrot.slane %v14745_v14, 4 }
 0x3f8   :  { %v4866_v47 = vsel %vm2209_vm1, %v4862_v38, %v4865_v30  ;;  %v3956_v15 = vpop.permute.xlu1 %3955  ;;  %v3958_v10 = vpop.permute.xlu0 %3957  ;;  %v4148_v41 = vshrl.u32 %v14675_v26, 16  ;;  %v4136_v36 = vshrl.u32 %v3924_v24, 16  ;;  %v4891_v48 = vrot.slane %v4883_v56, 4 }
 0x3f9   :  { %v4874_v42 = vperm.slane %v4866_v47, %v14363_v19  ;;  %v4875_v30 = vrot.slane %v14768_v54, 4  ;;  %v4909_v17 = vperm.slane %v4132_v57, %v14331_v61  ;;  %v4135_v0 = vpack.i.b16 %v3956_v15, %v3924_v24 }
 0x3fa   :  { %v4850_v11 = vsel %vm2209_vm1, 0, %v4849_v45  ;;  %v19978_v47 = vshrl.u32 %v14133_v35, 16  ;;  %v14788_v3 = vperm.slane %v4009_v40, %v14331_v61  ;;  %v4852_v33 = vsel %vm2209_vm1, 0, %v4851_v52  ;;  %v14799_v35 = vpop.permute.xlu2 %3905 }
 0x3fb   :  { %v14783_v39 = vrot.slane %v4874_v42, 4  ;;  %v4137_v57 = vshrl.u32 %v3956_v15, 16  ;;  %v4888_v59 = vperm.slane %v4135_v0, %v14331_v61  ;;  %v4147_v38 = vpack.i.b16 %v3958_v10, %v14675_v26 }
 0x3fc   :  { %v4012_v28 = vpack.i.b16 %v4011_v12, %v19978_v47  ;;  %v14794_v24 = vsel %vm2209_vm1, 0, %v4875_v30  ;;  %v14797_v45 = vsel %vm2209_vm1, %v4851_v52, %v4844_v31  ;;  %v4917_v42 = vrot.slane %v4909_v17, 4 }
 0x3fd   :  { %v4149_v1 = vshrl.u32 %v3958_v10, 16  ;;  %v4138_v12 = vpack.i.b16 %v4137_v57, %v4136_v36  ;;  %v4889_v40 = vrot.slane %v4888_v59, 4  ;;  %v4892_v47 = vsel %vm2209_vm1, %v4888_v59, %v4891_v48 }
 0x3fe   :  { %v4940_v15 = vperm.slane %v4147_v38, %v14331_v61  ;;  %1958 = vrot.lane.b32.xlu0 %v14307_v58, %s12902_s22  ;;  %1928 = vrot.lane.b32.xlu1 %v14314_v63, %s12919_s7  ;;  %v14809_v31 = vsel %vm2209_vm1, 0, %v14783_v39  ;;  %v5482_v26 = vrot.slane %v4852_v33, 4  ;;  %v4900_v52 = vperm.slane %v4892_v47, %v14363_v19 }
 0x3ff   :  { %v4150_v10 = vpack.i.b16 %v4149_v1, %v4148_v41  ;;  %1956 = vrot.lane.b32.xlu2 %v14305_v18, %s12902_s22  ;;  %v4890_v59 = vsel %vm2209_vm1, %v4889_v40, %v4883_v56  ;;  %v4914_v48 = vperm.slane %v4138_v12, %v14331_v61  ;;  %v14818_v36 = vperm.slane %v4012_v28, %v14331_v61 }
 0x400   :  { %v4941_v30 = vrot.slane %v4940_v15, 4  ;;  %v4944_v0 = vsel %vm2209_vm1, %v4940_v15, %v4943_v60  ;;  %v3874_v38 = vpop.permute.xlu1 %3873  ;;  %v4896_v57 = vperm.slane %v4890_v59, %v14363_v19  ;;  %v4903_v33 = vrot.slane %v4900_v52, 4  ;;  %v14822_v41 = vpop.permute.xlu0 %3903 }
 0x401   :  { %v4952_v47 = vperm.slane %v4944_v0, %v14363_v19  ;;  %v4915_v1 = vrot.slane %v4914_v48, 4  ;;  %v4918_v18 = vsel %vm2209_vm1, %v4914_v48, %v4917_v42  ;;  %v4966_v12 = vperm.slane %v4150_v10, %v14331_v61 }
 0x402   :  { %v4942_v56 = vsel %vm2209_vm1, %v4941_v30, %v14741_v23  ;;  %v14829_v60 = vsel %vm2209_vm1, %v5482_v26, %v4850_v11  ;;  %v4926_v15 = vperm.slane %v4918_v18, %v14363_v19  ;;  %v4901_v52 = vrot.slane %v4896_v57, 4 }
 0x403   :  { %v4904_v59 = vsel %vm2209_vm1, 0, %v4903_v33  ;;  %v4916_v0 = vsel %vm2209_vm1, %v4915_v1, %v4909_v17  ;;  %v4948_v42 = vperm.slane %v4942_v56, %v14363_v19  ;;  %v4955_v11 = vrot.slane %v4952_v47, 4  ;;  %v3868_v56 = vpop.permute.xlu2 %3867 }
 0x404   :  { %v4922_v10 = vperm.slane %v4916_v0, %v14363_v19  ;;  %v4929_v48 = vrot.slane %v4926_v15, 4  ;;  %v4967_v30 = vrot.slane %v4966_v12, 4  ;;  %v4970_v28 = vsel %vm2209_vm1, %v4966_v12, %v4969_v5 }
 0x405   :  { %v4953_v26 = vrot.slane %v4948_v42, 4  ;;  %v4028_v40 = vshrl.u32 %v14799_v35, 16  ;;  %v14846_v18 = vsel %vm2209_vm1, %v4903_v33, %v4896_v57  ;;  %v5520_v17 = vrot.slane %v4904_v59, 4 }
 0x406   :  { %1992 = vrot.lane.b32.xlu0 %v14314_v63, %s12918_s27  ;;  %1990 = vrot.lane.b32.xlu1 %v14307_v58, %s12918_s27  ;;  %v4956_v1 = vsel %vm2209_vm1, 0, %v4955_v11  ;;  %v4021_v47 = vpack.i.b16 %v3874_v38, %v14135_v29  ;;  %v4902_v5 = vsel %vm2209_vm1, 0, %v4901_v52  ;;  %v4927_v12 = vrot.slane %v4922_v10, 4 }
 0x407   :  { %1926 = vrot.lane.b32.xlu2 %v14307_v58, %s12919_s7  ;;  %v4968_v15 = vsel %vm2209_vm1, %v4967_v30, %v14745_v14  ;;  %v4978_v0 = vperm.slane %v4970_v28, %v14363_v19  ;;  %v14857_v57 = vsel %vm2209_vm1, 0, %v4929_v48  ;;  %v14861_v59 = vsel %vm2209_vm1, %v4955_v11, %v4948_v42 }
 0x408   :  { %v4974_v33 = vperm.slane %v4968_v15, %v14363_v19  ;;  %v5558_v23 = vrot.slane %v4956_v1, 4  ;;  %v4954_v20 = vsel %vm2209_vm1, 0, %v4953_v26  ;;  %v4023_v37 = vshrl.u32 %v3874_v38, 16  ;;  %v3936_v52 = vpop.permute.xlu1 %3935  ;;  %v3938_v11 = vpop.permute.xlu0 %3937 }
 0x409   :  { %v4981_v58 = vrot.slane %v4978_v0, 4  ;;  %v14869_v28 = vsel %vm2209_vm1, %v5520_v17, %v4902_v5  ;;  %v14872_v30 = vsel %vm2209_vm1, %v4929_v48, %v4922_v10  ;;  %v4415_v42 = vperm.slane %v4021_v47, %v14331_v61 }
 0x40a   :  { %v14876_v26 = vsel %vm2209_vm1, 0, %v4927_v12  ;;  %v4979_v1 = vrot.slane %v4974_v33, 4  ;;  %v14882_v0 = vsel %vm2209_vm1, %v5558_v23, %v4954_v20  ;;  %v19979_v17 = vshrl.u32 %v14135_v29, 16 }
 0x40b   :  { %v4016_v10 = vshrl.u32 %v14822_v41, 16  ;;  %v3985_v48 = vpack.i.b16 %v3868_v56, %v14256_v9  ;;  %v14889_v47 = vsel %vm2209_vm1, 0, %v4981_v58  ;;  %v4015_v12 = vpack.i.b16 %v3936_v52, %v14822_v41 }
 0x40c   :  { %v4024_v5 = vpack.i.b16 %v4023_v37, %v19979_v17  ;;  %v4017_v46 = vshrl.u32 %v3936_v52, 16  ;;  %v4027_v14 = vpack.i.b16 %v3938_v11, %v14799_v35  ;;  %v14898_v29 = vsel %vm2209_vm1, %v4981_v58, %v4974_v33  ;;  %v14912_v33 = vpop.permute.xlu2 %3901 }
 0x40d   :  { %v4423_v37 = vrot.slane %v4415_v42, 4  ;;  %v3987_v20 = vshrl.u32 %v3868_v56, 16  ;;  %v4029_v23 = vshrl.u32 %v3938_v11, 16  ;;  %v14903_v41 = vsel %vm2209_vm1, 0, %v4979_v1 }
 0x40e   :  { %1962 = vrot.lane.b32.xlu0 %v14316_v51, %s12902_s22  ;;  %1932 = vrot.lane.b32.xlu1 %v14318_v6, %s12919_s7  ;;  %v4018_v52 = vpack.i.b16 %v4017_v46, %v4016_v10  ;;  %v4368_v35 = vperm.slane %v4015_v12, %v14331_v61  ;;  %v4420_v17 = vperm.slane %v4027_v14, %v14331_v61  ;;  %v19981_v14 = vshrl.u32 %v14256_v9, 16 }
 0x40f   :  { %1960 = vrot.lane.b32.xlu2 %v14314_v63, %s12902_s22  ;;  %v4441_v38 = vperm.slane %v4024_v5, %v14331_v61  ;;  %v14910_v58 = vperm.slane %v3985_v48, %v14331_v61  ;;  %v4030_v56 = vpack.i.b16 %v4029_v23, %v4028_v40  ;;  %v19980_v63 = vrot.slane %v14788_v3, 4 }
 0x410   :  { %v4369_v11 = vrot.slane %v4368_v35, 4  ;;  %v4394_v46 = vperm.slane %v4018_v52, %v14331_v61  ;;  %v4421_v10 = vrot.slane %v4420_v17, 4  ;;  %v3988_v12 = vpack.i.b16 %v3987_v20, %v19981_v14 }
 0x411   :  { %v4372_v1 = vsel %vm2209_vm1, %v4368_v35, %v19980_v63  ;;  %v4424_v5 = vsel %vm2209_vm1, %v4420_v17, %v4423_v37  ;;  %v4446_v48 = vperm.slane %v4030_v56, %v14331_v61  ;;  %v19982_v34 = vrot.slane %v14818_v36, 4  ;;  %v3870_v35 = vpop.permute.xlu1 %3869 }
 0x412   :  { %v4380_v15 = vperm.slane %v4372_v1, %v14363_v19  ;;  %v4370_v40 = vsel %vm2209_vm1, %v4369_v11, %v14788_v3  ;;  %v4395_v23 = vrot.slane %v4394_v46, 4  ;;  %v4422_v52 = vsel %vm2209_vm1, %v4421_v10, %v4415_v42 }
 0x413   :  { %v4398_v63 = vsel %vm2209_vm1, %v4394_v46, %v19982_v34  ;;  %v4376_v9 = vperm.slane %v4370_v40, %v14363_v19  ;;  %v4428_v37 = vperm.slane %v4422_v52, %v14363_v19  ;;  %v4449_v17 = vrot.slane %v4441_v38, 4 }
 0x414   :  { %v4383_v20 = vrot.slane %v4380_v15, 4  ;;  %v4406_v1 = vperm.slane %v4398_v63, %v14363_v19  ;;  %v4396_v56 = vsel %vm2209_vm1, %v4395_v23, %v14818_v36  ;;  %v4432_v3 = vperm.slane %v4424_v5, %v14363_v19  ;;  %v14948_v36 = vpop.permute.xlu0 %3899 }
 0x415   :  { %v4447_v11 = vrot.slane %v4446_v48, 4  ;;  %v14940_v34 = vperm.slane %v3988_v12, %v14331_v61  ;;  %v14943_v42 = vperm.slane %v4396_v56, %v14363_v19  ;;  %v3997_v46 = vpack.i.b16 %v3870_v35, %v14258_v8 }
 0x416   :  { %1996 = vrot.lane.b32.xlu0 %v14318_v6, %s12918_s27  ;;  %1994 = vrot.lane.b32.xlu1 %v14316_v51, %s12918_s27  ;;  %v14945_v15 = vrot.slane %v4406_v1, 4  ;;  %v4381_v10 = vrot.slane %v4376_v9, 4  ;;  %v14953_v14 = vsel %vm2209_vm1, 0, %v4383_v20  ;;  %v4435_v5 = vrot.slane %v4432_v3, 4 }
 0x417   :  { %1930 = vrot.lane.b32.xlu2 %v14316_v51, %s12919_s7  ;;  %v4450_v12 = vsel %vm2209_vm1, %v4446_v48, %v4449_v17  ;;  %v4433_v23 = vrot.slane %v4428_v37, 4  ;;  %v4448_v63 = vsel %vm2209_vm1, %v4447_v11, %v4441_v38  ;;  %v3999_v52 = vshrl.u32 %v3870_v35, 16  ;;  %v14973_v35 = vpop.permute.xlu2 %3863 }
 0x418   :  { %19983 = vst [vmem:[#allocation120_spill] sm:$0xff] %v14945_v15  ;;  %v4407_v1 = vrot.slane %v14943_v42, 4  ;;  %v14961_v56 = vsel %vm2209_vm1, 0, %v14945_v15  ;;  %v14964_v51 = vperm.slane %v4448_v63, %v14363_v19  ;;  %v4004_v22 = vshrl.u32 %v14912_v33, 16 }
 0x419   :  { %v14969_v48 = vsel %vm2209_vm1, %v4383_v20, %v4376_v9  ;;  %v4458_v38 = vperm.slane %v4450_v12, %v14363_v19  ;;  %v14976_v11 = vsel %vm2209_vm1, 0, %v4381_v10  ;;  %v14979_v40 = vsel %vm2209_vm1, 0, %v4435_v5 }
 0x41a   :  { %19984 = vst [vmem:[#allocation121_spill] sm:$0xff] %v14964_v51  ;;  %v4459_v63 = vrot.slane %v14964_v51, 4  ;;  %v14983_v15 = vperm.slane %v3997_v46, %v14331_v61  ;;  %v14987_v20 = vsel %vm2209_vm1, 0, %v4433_v23  ;;  %v19986_v12 = vshrl.u32 %v14258_v8, 16  ;;  %v3932_v8 = vpop.permute.xlu1 %3931 }
 0x41b   :  { %19985 = vst [vmem:[#allocation122_spill] sm:$0xff] %v14969_v48  ;;  %v5525_v10 = vperm.slane %v14869_v28, %v14331_v61  ;;  %v14994_v3 = vsel %vm2209_vm1, 0, %v4407_v1  ;;  %v14996_v48 = vrot.slane %v4458_v38, 4  ;;  %v14999_v51 = vsel %vm2209_vm1, %v4435_v5, %v4428_v37 }
 0x41c   :  { %v4000_v17 = vpack.i.b16 %v3999_v52, %v19986_v12  ;;  %19988 = vst [vmem:[#allocation124_spill] sm:$0xff] %v14999_v51  ;;  %v3963_v46 = vshrl.u32 %v14973_v35, 16  ;;  %v3992_v28 = vshrl.u32 %v14948_v36, 16  ;;  %v3961_v23 = vpack.i.b16 %v14973_v35, %v14311_v32 }
 0x41d   :  { %19987 = vst [vmem:[#allocation123_spill] sm:$0xff] %v14996_v48  ;;  %v5526_v52 = vrot.slane %v5525_v10, 4  ;;  %v15013_v37 = vsel %vm2209_vm1, 0, %v4459_v63  ;;  %v4319_v5 = vrot.slane %v14983_v15, 4  ;;  %v19989_v1 = vrot.slane %v14857_v57, 4  ;;  %v3934_v57 = vpop.permute.xlu0 %3933 }
 0x41e   :  { %1966 = vrot.lane.b32.xlu0 %v14320_v2, %s12902_s22  ;;  %1936 = vrot.lane.b32.xlu1 %v14322_v50, %s12919_s7  ;;  %v5563_v12 = vperm.slane %v14882_v0, %v14331_v61  ;;  %v15023_v35 = vperm.slane %v4000_v17, %v14331_v61  ;;  %v19990_v10 = vperm.slane %v14846_v18, %v14331_v61  ;;  %v19991_v0 = vshrl.u32 %v14311_v32, 16 }
 0x41f   :  { %1964 = vrot.lane.b32.xlu2 %v14318_v6, %s12902_s22  ;;  %v5540_v38 = vsel %vm2209_vm1, %v19989_v1, %v14876_v26  ;;  %v5538_v9 = vperm.slane %v14872_v30, %v14331_v61  ;;  %v15034_v26 = vsel %vm2209_vm1, 0, %v14996_v48  ;;  %v19992_v51 = vrot.slane %v14889_v47, 4 }
 0x420   :  { %v5527_v63 = vsel %vm2209_vm1, %v5526_v52, %v19990_v10  ;;  %v5544_v6 = vperm.slane %v5540_v38, %v14331_v61  ;;  %v3964_v1 = vpack.i.b16 %v3963_v46, %v19991_v0  ;;  %v5564_v17 = vrot.slane %v5563_v12, 4 }
 0x421   :  { %v5578_v18 = vsel %vm2209_vm1, %v19992_v51, %v14903_v41  ;;  %v15043_v52 = vperm.slane %v5527_v63, %v14363_v19  ;;  %v3991_v10 = vpack.i.b16 %v3932_v8, %v14948_v36  ;;  %v19993_v48 = vperm.slane %v14861_v59, %v14331_v61 }
 0x422   :  { %v5545_v30 = vrot.slane %v5544_v6, 4  ;;  %v5582_v38 = vperm.slane %v5578_v18, %v14331_v61  ;;  %v3993_v46 = vshrl.u32 %v3932_v8, 16  ;;  %v4003_v12 = vpack.i.b16 %v3934_v57, %v14912_v33 }
 0x423   :  { %v5565_v32 = vsel %vm2209_vm1, %v5564_v17, %v19993_v48  ;;  %v4005_v0 = vshrl.u32 %v3934_v57, 16  ;;  %v5576_v51 = vperm.slane %v14898_v29, %v14331_v61  ;;  %v4264_v6 = vperm.slane %v3991_v10, %v14331_v61 }
 0x424   :  { %v5546_v47 = vsel %vm2209_vm1, %v5545_v30, %v5538_v9  ;;  %v5583_v41 = vrot.slane %v5582_v38, 4  ;;  %v3994_v36 = vpack.i.b16 %v3993_v46, %v3992_v28  ;;  %v4316_v59 = vperm.slane %v4003_v12, %v14331_v61 }
 0x425   :  { %v15057_v63 = vperm.slane %v5546_v47, %v14363_v19  ;;  %v4006_v18 = vpack.i.b16 %v4005_v0, %v4004_v22  ;;  %v15063_v33 = vperm.slane %v5565_v32, %v14363_v19  ;;  %v4265_v29 = vrot.slane %v4264_v6, 4 }
 0x426   :  { %2000 = vrot.lane.b32.xlu0 %v14322_v50, %s12918_s27  ;;  %v5584_v48 = vsel %vm2209_vm1, %v5583_v41, %v5576_v51  ;;  %v19994_v9 = vrot.slane %v14910_v58, 4  ;;  %1998 = vrot.lane.b32.xlu1 %v14320_v2, %s12918_s27  ;;  %v4290_v17 = vperm.slane %v3994_v36, %v14331_v61  ;;  %v15081_v30 = vperm.slane %v3961_v23, %v14331_v61 }
 0x427   :  { %1934 = vrot.lane.b32.xlu2 %v14320_v2, %s12919_s7  ;;  %v15074_v22 = vperm.slane %v5584_v48, %v14363_v19  ;;  %v5761_v28 = vpack.i.b16 %v15057_v63, %v15043_v52  ;;  %v4266_v38 = vsel %vm2209_vm1, %v4265_v29, %v14910_v58  ;;  %v4317_v10 = vrot.slane %v4316_v59, 4 }
 0x428   :  { %v4268_v8 = vsel %vm2209_vm1, %v4264_v6, %v19994_v9  ;;  %v4320_v32 = vsel %vm2209_vm1, %v4316_v59, %v4319_v5  ;;  %v4272_v0 = vperm.slane %v4266_v38, %v14363_v19  ;;  %v4342_v47 = vperm.slane %v4006_v18, %v14331_v61  ;;  %v15112_v38 = vpop.permute.xlu2 %3897 }
 0x429   :  { %v4276_v57 = vperm.slane %v4268_v8, %v14363_v19  ;;  %v5773_v46 = vpack.i.b16 %v15074_v22, %v15063_v33  ;;  %v7773_v12 = vunpack.c.l.b16 %v5761_v28  ;;  %v4291_v41 = vrot.slane %v4290_v17, 4 }
 0x42a   :  { %v19995_v6 = vrot.slane %v14940_v34, 4  ;;  %v4318_v58 = vsel %vm2209_vm1, %v4317_v10, %v14983_v15  ;;  %v4328_v48 = vperm.slane %v4320_v32, %v14363_v19  ;;  %v4345_v29 = vrot.slane %v15023_v35, 4 }
 0x42b   :  { %v4279_v51 = vrot.slane %v4276_v57, 4  ;;  %v7774_v5 = vunpack.c.l.b16 %v5773_v46  ;;  %v15100_v18 = vperm.slane %v3964_v1, %v14331_v61  ;;  %v4292_v9 = vsel %vm2209_vm1, %v4291_v41, %v14940_v34 }
 0x42c   :  { %v4294_v23 = vsel %vm2209_vm1, %v4290_v17, %v19995_v6  ;;  %v15105_v8 = vperm.slane %v4318_v58, %v14363_v19  ;;  %v4277_v15 = vrot.slane %v4272_v0, 4  ;;  %v15108_v57 = vperm.slane %v4292_v9, %v14363_v19 }
 0x42d   :  { %v4302_v59 = vperm.slane %v4294_v23, %v14363_v19  ;;  %v7782_v28 = vpack.c.b16 %v7774_v5, %v7773_v12  ;;  %v15117_v1 = vsel %vm2209_vm1, 0, %v4279_v51  ;;  %v4343_v10 = vrot.slane %v4342_v47, 4 }
 0x42e   :  { %1970 = vrot.lane.b32.xlu0 %v14324_v25, %s12902_s22  ;;  %v4329_v34 = vrot.slane %v15105_v8, 4  ;;  %v4346_v32 = vsel %vm2209_vm1, %v4342_v47, %v4345_v29  ;;  %1940 = vrot.lane.b32.xlu1 %v14329_v27, %s12919_s7  ;;  %v15131_v6 = vrot.slane %v4328_v48, 4  ;;  %v4303_v47 = vrot.slane %v15108_v57, 4 }
 0x42f   :  { %v15110_v17 = vrot.slane %v4302_v59, 4  ;;  %1968 = vrot.lane.b32.xlu2 %v14322_v50, %s12902_s22  ;;  %v7830_v12 = vsel %vm7783_vm2, %v7782_v28, 0  ;;  %v15136_v58 = vsel %vm2209_vm1, %v4279_v51, %v4272_v0  ;;  %v15140_v59 = vsel %vm2209_vm1, 0, %v4277_v15 }
 0x430   :  { %7832 = vmatpush.bf16.xpose.msrb.mxu3 %v7830_v12  ;;  %v4354_v48 = vperm.slane %v4346_v32, %v14363_v19  ;;  %v15146_v28 = vsel %vm2209_vm1, 0, %v4329_v34  ;;  %v4344_v12 = vsel %vm2209_vm1, %v4343_v10, %v15023_v35  ;;  %v5762_v0 = vshrl.u32 %v15043_v52, 16 }
 0x431   :  { %v15129_v41 = vsel %vm2209_vm1, 0, %v15110_v17  ;;  %19997 = vst [vmem:[#allocation126_spill] sm:$0xff] %v15146_v28  ;;  %v5763_v51 = vshrl.u32 %v15057_v63, 16  ;;  %v15154_v15 = vsel %vm2209_vm1, 0, %v15131_v6  ;;  %v5774_v29 = vshrl.u32 %v15063_v33, 16 }
 0x432   :  { %19996 = vst [vmem:[#allocation125_spill] sm:$0xff] %v15129_v41  ;;  %v5775_v9 = vshrl.u32 %v15074_v22, 16  ;;  %v5532_v32 = vrot.slane %v15043_v52, 4  ;;  %v15160_v34 = vsel %vm2209_vm1, 0, %v4303_v47  ;;  %v5551_v35 = vrot.slane %v15057_v63, 4 }
 0x433   :  { %19998 = vst [vmem:[#allocation127_spill] sm:$0xff] %v15160_v34  ;;  %v5764_v36 = vpack.i.b16 %v5763_v51, %v5762_v0  ;;  %v5570_v10 = vrot.slane %v15063_v33, 4  ;;  %v15165_v23 = vperm.slane %v4344_v12, %v14363_v19  ;;  %v5589_v50 = vrot.slane %v15074_v22, 4 }
 0x434   :  { %v5776_v5 = vpack.i.b16 %v5775_v9, %v5774_v29  ;;  %v5533_v46 = vsel %vm2209_vm1, 0, %v5532_v32  ;;  %v5552_v47 = vsel %vm2209_vm1, 0, %v5551_v35  ;;  %v15183_v34 = vrot.slane %v4354_v48, 4 }
 0x435   :  { %v7919_v52 = vunpack.c.l.b16 %v5764_v36  ;;  %v5571_v0 = vsel %vm2209_vm1, 0, %v5570_v10  ;;  %v5768_v51 = vshrl.u32 %v5533_v46, 16  ;;  %v5590_v33 = vsel %vm2209_vm1, 0, %v5589_v50 }
 0x436   :  { %2004 = vrot.lane.b32.xlu0 %v14329_v27, %s12918_s27  ;;  %2002 = vrot.lane.b32.xlu1 %v14324_v25, %s12918_s27  ;;  %v7920_v63 = vunpack.c.l.b16 %v5776_v5  ;;  %v5767_v29 = vpack.i.b16 %v5552_v47, %v5533_v46  ;;  %v5769_v22 = vshrl.u32 %v5552_v47, 16  ;;  %v5779_v9 = vpack.i.b16 %v5590_v33, %v5571_v0 }
 0x437   :  { %1938 = vrot.lane.b32.xlu2 %v14324_v25, %s12919_s7  ;;  %v5780_v12 = vshrl.u32 %v5571_v0, 16  ;;  %v5781_v32 = vshrl.u32 %v5590_v33, 16  ;;  %v19999_v36 = vrot.slane %v14706_v62, 4  ;;  %v20000_v50 = vrot.slane %v14756_v49, 4 }
 0x438   :  { %v7928_v10 = vpack.c.b16 %v7920_v63, %v7919_v52  ;;  %v8064_v2 = vunpack.c.l.b16 %v5767_v29  ;;  %v5770_v28 = vpack.i.b16 %v5769_v22, %v5768_v51  ;;  %v8065_v5 = vunpack.c.l.b16 %v5779_v9  ;;  %v3866_v29 = vpop.permute.xlu1 %3865 }
 0x439   :  { %v5445_v35 = vsel %vm2209_vm1, %v19999_v36, %v14730_v53  ;;  %v5782_v25 = vpack.i.b16 %v5781_v32, %v5780_v12  ;;  %v5464_v46 = vsel %vm2209_vm1, %v20000_v50, %v14773_v7  ;;  %v5458_v53 = vsel %vm2209_vm1, %v14738_v16, %v14709_v13 }
 0x43a   :  { %v5449_v41 = vperm.slane %v5445_v35, %v14331_v61  ;;  %v7975_v47 = vsel %vm7783_vm2, %v7928_v10, 0  ;;  %v8209_v0 = vunpack.c.l.b16 %v5770_v28  ;;  %v4355_v52 = vrot.slane %v15165_v23, 4 }
 0x43b   :  { %7977 = vmatpush.bf16.xpose.msrb.mxu0 %v7975_v47  ;;  %v8073_v48 = vpack.c.b16 %v8065_v5, %v8064_v2  ;;  %v8210_v51 = vunpack.c.l.b16 %v5782_v25  ;;  %v5468_v63 = vperm.slane %v5464_v46, %v14331_v61  ;;  %v20001_v49 = vperm.slane %v14713_v43, %v14331_v61  ;;  %v15230_v5 = vpop.permute.xlu2 %1910 }
 0x43c   :  { %v5450_v62 = vrot.slane %v5449_v41, 4  ;;  %v5487_v28 = vperm.slane %v14829_v60, %v14331_v61  ;;  %v5496_v41 = vsel %vm2209_vm1, %v14783_v39, %v14768_v54  ;;  %v20002_v16 = vrot.slane %v14809_v31, 4  ;;  %v20003_v54 = vld [vmem:[#allocation85_spill] sm:$0xff] }
 0x43d   :  { %v8120_v25 = vsel %vm7783_vm2, %v8073_v48, 0  ;;  %v8218_v13 = vpack.c.b16 %v8210_v51, %v8209_v0  ;;  %v5462_v43 = vperm.slane %v5458_v53, %v14331_v61  ;;  %v5469_v33 = vrot.slane %v5468_v63, 4 }
 0x43e   :  { %v5451_v7 = vsel %vm2209_vm1, %v5450_v62, %v20001_v49  ;;  %v5502_v2 = vsel %vm2209_vm1, %v20002_v16, %v14794_v24  ;;  %5847 = vrot.lane.b32.xlu0 %v14072_v21, %s12902_s22  ;;  %5817 = vrot.lane.b32.xlu1 %v20003_v54, %s12919_s7  ;;  %v5481_v24 = vperm.slane %v14797_v45, %v14331_v61  ;;  %v5488_v31 = vrot.slane %v5487_v28, 4  ;;  %v15239_v62 = vpop.permute.xlu0 %3895 }
 0x43f   :  { %1972 = vrot.lane.b32.xlu2 %v14329_v27, %s12902_s22  ;;  %8122 = vmatpush.bf16.xpose.msra.mxu1 %v8120_v25  ;;  %v5455_v39 = vperm.slane %v5451_v7, %v14363_v19  ;;  %v5506_v60 = vperm.slane %v5502_v2, %v14331_v61  ;;  %v15222_v22 = vsel %vm2209_vm1, 0, %v15183_v34  ;;  %v8265_v9 = vsel %vm7783_vm2, %v8218_v13, 0  ;;  %v20021_v7 = vld [vmem:[#allocation118_spill] sm:$0xff] }
 0x440   :  { %v5470_v12 = vsel %vm2209_vm1, %v5469_v33, %v5462_v43  ;;  %v5500_v32 = vperm.slane %v5496_v41, %v14331_v61  ;;  %8267 = vmatpush.bf16.xpose.msra.mxu2 %v8265_v9  ;;  %v5489_v35 = vsel %vm2209_vm1, %v5488_v31, %v5481_v24  ;;  %v3973_v45 = vpack.i.b16 %v3866_v29, %v14326_v4 }
 0x441   :  { %v5474_v36 = vperm.slane %v5470_v12, %v14363_v19  ;;  %v5507_v10 = vrot.slane %v5506_v60, 4  ;;  %v15235_v50 = vsel %vm2209_vm1, %v15131_v6, %v15105_v8  ;;  %v5493_v47 = vperm.slane %v5489_v35, %v14363_v19 }
 0x442   :  { %v3975_v0 = vshrl.u32 %v3866_v29, 16  ;;  %v5738_v51 = vshrl.u32 %v5455_v39, 16  ;;  %v15243_v49 = vsel %vm2209_vm1, 0, %v4355_v52  ;;  %v2010_v6 = vshrl.u32 %v15230_v5, 16 }
 0x443   :  { %v5508_v53 = vsel %vm2209_vm1, %v5507_v10, %v5500_v32  ;;  %v5737_v48 = vpack.i.b16 %v5474_v36, %v5455_v39  ;;  %v5739_v63 = vshrl.u32 %v5474_v36, 16  ;;  %v15249_v28 = vperm.slane %v3973_v45, %v14331_v61 }
 0x444   :  { %v5512_v8 = vperm.slane %v5508_v53, %v14363_v19  ;;  %v3968_v41 = vshrl.u32 %v15239_v62, 16  ;;  %v5456_v2 = vrot.slane %v5455_v39, 4  ;;  %v20004_v52 = vshrl.u32 %v14326_v4, 16 }
 0x445   :  { %v5740_v16 = vpack.i.b16 %v5739_v63, %v5738_v51  ;;  %v5750_v43 = vshrl.u32 %v5493_v47, 16  ;;  %v7771_v29 = vunpack.c.l.b16 %v5737_v48  ;;  %v2008_v39 = vpack.i.b16 %v15230_v5, %v14235_v55 }
 0x446   :  { %5881 = vrot.lane.b32.xlu0 %v20003_v54, %s12918_s27  ;;  %v5749_v25 = vpack.i.b16 %v5512_v8, %v5493_v47  ;;  %v15256_v13 = vpack.i.b16 %v3975_v0, %v20004_v52  ;;  %v5751_v33 = vshrl.u32 %v5512_v8, 16  ;;  %5879 = vrot.lane.b32.xlu1 %v14072_v21, %s12918_s27  ;;  %v5457_v24 = vsel %vm2209_vm1, 0, %v5456_v2 }
 0x447   :  { %5815 = vrot.lane.b32.xlu2 %v14072_v21, %s12919_s7  ;;  %v5475_v31 = vrot.slane %v5474_v36, 4  ;;  %v20005_v4 = vshrl.u32 %v14235_v55, 16  ;;  %v5494_v32 = vrot.slane %v5493_v47, 4  ;;  %v7917_v35 = vunpack.c.l.b16 %v5740_v16 }
 0x448   :  { %v7772_v60 = vunpack.c.l.b16 %v5749_v25  ;;  %v5752_v9 = vpack.i.b16 %v5751_v33, %v5750_v43  ;;  %v5513_v45 = vrot.slane %v5512_v8, 4  ;;  %v5744_v0 = vshrl.u32 %v5457_v24, 16 }
 0x449   :  { %v15267_v12 = vpack.i.b16 %v2010_v6, %v20005_v4  ;;  %v5476_v10 = vsel %vm2209_vm1, 0, %v5475_v31  ;;  %v5495_v51 = vsel %vm2209_vm1, 0, %v5494_v32  ;;  %v5367_v63 = vperm.slane %v14632_v44, %v14331_v61  ;;  %v20007_v31 = vld [vmem:[#allocation108_spill] sm:$0xff]  ;;  %v20009_v4 = vld [vmem:[#allocation109_spill] sm:$0xff]  ;;  %v20010_v44 = vld [vmem:[#allocation110_spill] sm:$0xff] }
 0x44a   :  { %v7781_v53 = vpack.c.b16 %v7772_v60, %v7771_v29  ;;  %v7918_v48 = vunpack.c.l.b16 %v5752_v9  ;;  %v5514_v36 = vsel %vm2209_vm1, 0, %v5513_v45  ;;  %v5743_v2 = vpack.i.b16 %v5476_v10, %v5457_v24  ;;  %v20006_v29 = vld [vmem:[#allocation113_spill] sm:$0xff]  ;;  %v20011_v24 = vld [vmem:[#allocation86_spill] sm:$0xff] }
 0x44b   :  { %v5745_v25 = vshrl.u32 %v5476_v10, 16  ;;  %v5756_v52 = vshrl.u32 %v5495_v51, 16  ;;  %v5755_v16 = vpack.i.b16 %v5514_v36, %v5495_v51  ;;  %v5757_v43 = vshrl.u32 %v5514_v36, 16 }
 0x44c   :  { %v7827_v6 = vsel %vm7783_vm2, %v7781_v53, 0  ;;  %v7927_v47 = vpack.c.b16 %v7918_v48, %v7917_v35  ;;  %v8062_v8 = vunpack.c.l.b16 %v5743_v2  ;;  %v20008_v60 = vrot.slane %v20007_v31, 4  ;;  %v3928_v48 = vpop.permute.xlu1 %3927  ;;  %v20013_v2 = vld [vmem:[#allocation114_spill] sm:$0xff] }
 0x44d   :  { %7833 = vmatpush.bf16.xpose.msrb.mxu3 %v7827_v6  ;;  %v5746_v33 = vpack.i.b16 %v5745_v25, %v5744_v0  ;;  %v5382_v32 = vsel %vm2209_vm1, %v20010_v44, %v20009_v4  ;;  %v8063_v35 = vunpack.c.l.b16 %v5755_v16  ;;  %v5758_v45 = vpack.i.b16 %v5757_v43, %v5756_v52  ;;  %v20012_v0 = vld [vmem:[#allocation87_spill] sm:$0xff]  ;;  %v20016_v52 = vld [vmem:[#allocation116_spill] sm:$0xff] }
 0x44e   :  { %v5369_v9 = vsel %vm2209_vm1, %v20008_v60, %v20006_v29  ;;  %5851 = vrot.lane.b32.xlu0 %v20011_v24, %s12902_s22  ;;  %v7972_v10 = vsel %vm7783_vm2, %v7927_v47, 0  ;;  %5821 = vrot.lane.b32.xlu1 %v20012_v0, %s12919_s7  ;;  %v5386_v36 = vperm.slane %v5382_v32, %v14331_v61  ;;  %v20014_v25 = vld [vmem:[#allocation111_spill] sm:$0xff]  ;;  %v5405_v16 = vperm.slane %v20016_v52, %v14331_v61  ;;  %v20018_v44 = vld [vmem:[#allocation112_spill] sm:$0xff] }
 0x44f   :  { %v5373_v53 = vperm.slane %v5369_v9, %v14331_v61  ;;  %5849 = vrot.lane.b32.xlu2 %v20003_v54, %s12902_s22  ;;  %7978 = vmatpush.bf16.xpose.msrb.mxu0 %v7972_v10  ;;  %v8207_v51 = vunpack.c.l.b16 %v5746_v33  ;;  %v20015_v6 = vrot.slane %v20014_v25, 4  ;;  %v8072_v43 = vpack.c.b16 %v8063_v35, %v8062_v8  ;;  %v20017_v9 = vld [vmem:[#allocation119_spill] sm:$0xff]  ;;  %v20020_v10 = vld [vmem:[#allocation117_spill] sm:$0xff] }
 0x450   :  { %v8208_v29 = vunpack.c.l.b16 %v5758_v45  ;;  %v5411_v4 = vperm.slane %v20017_v9, %v14331_v61  ;;  %v20019_v33 = vld [vmem:[#allocation115_spill] sm:$0xff]  ;;  %v20022_v25 = vrot.slane %v20021_v7, 4 }
 0x451   :  { %v5388_v47 = vsel %vm2209_vm1, %v20015_v6, %v20013_v2  ;;  %v5374_v31 = vrot.slane %v5373_v53, 4  ;;  %v5420_v32 = vsel %vm2209_vm1, %v20019_v33, %v20018_v44  ;;  %v3967_v6 = vpack.i.b16 %v3928_v48, %v15239_v62 }
 0x452   :  { %v5392_v60 = vperm.slane %v5388_v47, %v14331_v61  ;;  %v5426_v2 = vsel %vm2209_vm1, %v20022_v25, %v20020_v10  ;;  %v8117_v8 = vsel %vm7783_vm2, %v8072_v43, 0  ;;  %v8217_v35 = vpack.c.b16 %v8208_v29, %v8207_v51  ;;  %v3930_v47 = vpop.permute.xlu0 %3929 }
 0x453   :  { %v5375_v45 = vsel %vm2209_vm1, %v5374_v31, %v5367_v63  ;;  %8123 = vmatpush.bf16.xpose.msra.mxu1 %v8117_v8  ;;  %v5412_v9 = vrot.slane %v5411_v4, 4  ;;  %v5424_v44 = vperm.slane %v5420_v32, %v14331_v61  ;;  %v5430_v7 = vperm.slane %v5426_v2, %v14331_v61 }
 0x454   :  { %v5393_v53 = vrot.slane %v5392_v60, 4  ;;  %v15311_v52 = vperm.slane %v5375_v45, %v14363_v19  ;;  %v8262_v33 = vsel %vm7783_vm2, %v8217_v35, 0  ;;  %v3969_v25 = vshrl.u32 %v3928_v48, 16 }
 0x455   :  { %v4160_v51 = vperm.slane %v3967_v6, %v14331_v61  ;;  %8268 = vmatpush.bf16.xpose.msra.mxu2 %v8262_v33  ;;  %v5413_v43 = vsel %vm2209_vm1, %v5412_v9, %v5405_v16  ;;  %v5431_v29 = vrot.slane %v5430_v7, 4  ;;  %v3979_v31 = vpack.i.b16 %v3930_v47, %v15112_v38 }
 0x456   :  { %v5394_v10 = vsel %vm2209_vm1, %v5393_v53, %v5386_v36  ;;  %5885 = vrot.lane.b32.xlu0 %v20012_v0, %s12918_s27  ;;  %v15326_v60 = vperm.slane %v5413_v43, %v14363_v19  ;;  %v3970_v48 = vpack.i.b16 %v3969_v25, %v3968_v41  ;;  %v20023_v4 = vrot.slane %v15081_v30, 4  ;;  %5883 = vrot.lane.b32.xlu1 %v20011_v24, %s12918_s27 }
 0x457   :  { %v15319_v63 = vperm.slane %v5394_v10, %v14363_v19  ;;  %v4161_v36 = vrot.slane %v4160_v51, 4  ;;  %5819 = vrot.lane.b32.xlu2 %v20011_v24, %s12919_s7  ;;  %v5432_v16 = vsel %vm2209_vm1, %v5431_v29, %v5424_v44  ;;  %v3981_v62 = vshrl.u32 %v3930_v47, 16 }
 0x458   :  { %v4164_v32 = vsel %vm2209_vm1, %v4160_v51, %v20023_v4  ;;  %v15342_v41 = vperm.slane %v5432_v16, %v14363_v19  ;;  %v4186_v35 = vperm.slane %v3970_v48, %v14331_v61  ;;  %v4212_v45 = vperm.slane %v3979_v31, %v14331_v61 }
 0x459   :  { %v5713_v2 = vpack.i.b16 %v15319_v63, %v15311_v52  ;;  %v4172_v6 = vperm.slane %v4164_v32, %v14363_v19  ;;  %v4162_v8 = vsel %vm2209_vm1, %v4161_v36, %v15081_v30  ;;  %v4215_v53 = vrot.slane %v15249_v28, 4 }
 0x45a   :  { %v4233_v9 = vperm.slane %v15256_v13, %v14331_v61  ;;  %v4168_v44 = vperm.slane %v4162_v8, %v14363_v19  ;;  %v20024_v7 = vshrl.u32 %v15112_v38, 16  ;;  %v5725_v33 = vpack.i.b16 %v15342_v41, %v15326_v60 }
 0x45b   :  { %v4187_v10 = vrot.slane %v4186_v35, 4  ;;  %v20025_v30 = vrot.slane %v15100_v18, 4  ;;  %v4213_v51 = vrot.slane %v4212_v45, 4  ;;  %v15363_v43 = vperm.slane %v2008_v39, %v14331_v61 }
 0x45c   :  { %v3982_v47 = vpack.i.b16 %v3981_v62, %v20024_v7  ;;  %v15367_v13 = vperm.slane %v15267_v12, %v14331_v61  ;;  %v4175_v38 = vrot.slane %v4172_v6, 4  ;;  %v7769_v31 = vunpack.c.l.b16 %v5713_v2  ;;  %v20026_v12 = vld [vmem:[#allocation88_spill] sm:$0xff] }
 0x45d   :  { %v4190_v25 = vsel %vm2209_vm1, %v4186_v35, %v20025_v30  ;;  %v7770_v48 = vunpack.c.l.b16 %v5725_v33  ;;  %v4188_v36 = vsel %vm2209_vm1, %v4187_v10, %v15100_v18  ;;  %v4214_v4 = vsel %vm2209_vm1, %v4213_v51, %v15249_v28  ;;  %v20035_v10 = vld [vmem:[#allocation72_spill] sm:$0xff] }
 0x45e   :  { %v4198_v29 = vperm.slane %v4190_v25, %v14363_v19  ;;  %v4173_v32 = vrot.slane %v4168_v44, 4  ;;  %v15375_v55 = vperm.slane %v4188_v36, %v14363_v19  ;;  %v4216_v39 = vsel %vm2209_vm1, %v4212_v45, %v4215_v53  ;;  %5855 = vrot.lane.b32.xlu0 %v20026_v12, %s12902_s22  ;;  %v20027_v45 = vld [vmem:[#allocation89_spill] sm:$0xff] }
 0x45f   :  { %v7780_v16 = vpack.c.b16 %v7770_v48, %v7769_v31  ;;  %v4220_v2 = vperm.slane %v4214_v4, %v14363_v19  ;;  %v4224_v6 = vperm.slane %v4216_v39, %v14363_v19  ;;  %v4238_v18 = vperm.slane %v3982_v47, %v14331_v61  ;;  %5853 = vrot.lane.b32.xlu2 %v20012_v0, %s12902_s22 }
 0x460   :  { %v15377_v5 = vrot.slane %v4198_v29, 4  ;;  %v4241_v28 = vrot.slane %v4233_v9, 4  ;;  %v15389_v8 = vsel %vm2209_vm1, 0, %v4175_v38  ;;  %v5715_v35 = vshrl.u32 %v15319_v63, 16  ;;  %5825 = vrot.lane.b32.xlu1 %v20027_v45, %s12919_s7 }
 0x461   :  { %v7824_v53 = vsel %vm7783_vm2, %v7780_v16, 0  ;;  %v4199_v7 = vrot.slane %v15375_v55, 4  ;;  %v4225_v33 = vrot.slane %v4220_v2, 4  ;;  %v4227_v47 = vrot.slane %v4224_v6, 4 }
 0x462   :  { %7834 = vmatpush.bf16.xpose.msrb.mxu3 %v7824_v53  ;;  %v15399_v30 = vsel %vm2209_vm1, 0, %v15377_v5  ;;  %v4242_v25 = vsel %vm2209_vm1, %v4238_v18, %v4241_v28  ;;  %v5714_v51 = vshrl.u32 %v15311_v52, 16  ;;  %v15404_v29 = vsel %vm2209_vm1, 0, %v4173_v32 }
 0x463   :  { %20028 = vst [vmem:[#allocation113_spill] sm:$0xff] %v15399_v30  ;;  %v15407_v31 = vsel %vm2209_vm1, %v4175_v38, %v4168_v44  ;;  %v4239_v36 = vrot.slane %v4238_v18, 4  ;;  %v15411_v4 = vsel %vm2209_vm1, 0, %v4227_v47  ;;  %v5726_v16 = vshrl.u32 %v15326_v60, 16 }
 0x464   :  { %20029 = vst [vmem:[#allocation108_spill] sm:$0xff] %v15411_v4  ;;  %v5716_v39 = vpack.i.b16 %v5715_v35, %v5714_v51  ;;  %v5727_v6 = vshrl.u32 %v15342_v41, 16  ;;  %v15416_v28 = vsel %vm2209_vm1, 0, %v4199_v7  ;;  %v15420_v53 = vsel %vm2209_vm1, 0, %v4225_v33 }
 0x465   :  { %20030 = vst [vmem:[#allocation109_spill] sm:$0xff] %v15416_v28  ;;  %v4250_v44 = vperm.slane %v4242_v25, %v14363_v19  ;;  %v5380_v18 = vrot.slane %v15311_v52, 4  ;;  %v5399_v48 = vrot.slane %v15319_v63, 4  ;;  %v5418_v35 = vrot.slane %v15326_v60, 4 }
 0x466   :  { %20031 = vst [vmem:[#allocation110_spill] sm:$0xff] %v15420_v53  ;;  %v5728_v38 = vpack.i.b16 %v5727_v6, %v5726_v16  ;;  %5889 = vrot.lane.b32.xlu0 %v20027_v45, %s12918_s27  ;;  %v4240_v7 = vsel %vm2209_vm1, %v4239_v36, %v4233_v9  ;;  %v15430_v51 = vsel %vm2209_vm1, %v4227_v47, %v4220_v2  ;;  %v5437_v32 = vrot.slane %v15342_v41, 4  ;;  %v15442_v2 = vpop.permute.xlu2 %1944 }
 0x467   :  { %20032 = vst [vmem:[#allocation114_spill] sm:$0xff] %v15430_v51  ;;  %5823 = vrot.lane.b32.xlu2 %v20026_v12, %s12919_s7  ;;  %v7915_v52 = vunpack.c.l.b16 %v5716_v39  ;;  %v5381_v63 = vsel %vm2209_vm1, 0, %v5380_v18  ;;  %v5400_v60 = vsel %vm2209_vm1, 0, %v5399_v48  ;;  %v15440_v9 = vrot.slane %v4250_v44, 4  ;;  %v20034_v48 = vld [vmem:[#allocation81_spill] sm:$0xff] }
 0x468   :  { %v7916_v25 = vunpack.c.l.b16 %v5728_v38  ;;  %5887 = vrot.lane.b32.xlu1 %v20026_v12, %s12918_s27  ;;  %v5419_v47 = vsel %vm2209_vm1, 0, %v5418_v35  ;;  %v5438_v41 = vsel %vm2209_vm1, 0, %v5437_v32  ;;  %v5719_v36 = vpack.i.b16 %v5400_v60, %v5381_v63 }
 0x469   :  { %20033 = vst [vmem:[#allocation111_spill] sm:$0xff] %v15440_v9  ;;  %v5731_v6 = vpack.i.b16 %v5438_v41, %v5419_v47  ;;  %v5720_v39 = vshrl.u32 %v5381_v63, 16  ;;  %v5721_v38 = vshrl.u32 %v5400_v60, 16  ;;  %v5732_v18 = vshrl.u32 %v5419_v47, 16  ;;  %v20038_v63 = vld [vmem:[#allocation70_spill] sm:$0xff]  ;;  %v20039_v60 = vld [vmem:[#allocation77_spill] sm:$0xff] }
 0x46a   :  { %v7926_v16 = vpack.c.b16 %v7916_v25, %v7915_v52  ;;  %v8060_v33 = vunpack.c.l.b16 %v5719_v36  ;;  %v5733_v46 = vshrl.u32 %v5438_v41, 16  ;;  %v20036_v62 = vrot.slane %v20035_v10, 4  ;;  %v20037_v52 = vld [vmem:[#allocation75_spill] sm:$0xff]  ;;  %v20041_v36 = vld [vmem:[#allocation101_spill] sm:$0xff] }
 0x46b   :  { %v8061_v0 = vunpack.c.l.b16 %v5731_v6  ;;  %v5722_v24 = vpack.i.b16 %v5721_v38, %v5720_v39  ;;  %v5291_v25 = vperm.slane %v20037_v52, %v14331_v61  ;;  %v5306_v47 = vsel %vm2209_vm1, %v20039_v60, %v20038_v63  ;;  %v20040_v41 = vld [vmem:[#allocation103_spill] sm:$0xff]  ;;  %v20043_v39 = vld [vmem:[#allocation106_spill] sm:$0xff]  ;;  %v1913_v60 = vpop.permute.xlu1 %1912 }
 0x46c   :  { %v5293_v44 = vsel %vm2209_vm1, %v20036_v62, %v20034_v48  ;;  %v7969_v12 = vsel %vm7783_vm2, %v7926_v16, 0  ;;  %v5734_v32 = vpack.i.b16 %v5733_v46, %v5732_v18  ;;  %v20042_v10 = vrot.slane %v20041_v36, 4  ;;  %v20044_v46 = vld [vmem:[#allocation90_spill] sm:$0xff]  ;;  %v20045_v52 = vld [vmem:[#allocation107_spill] sm:$0xff]  ;;  %v20049_v36 = vld [vmem:[#allocation104_spill] sm:$0xff] }
 0x46d   :  { %v5297_v35 = vperm.slane %v5293_v44, %v14331_v61  ;;  %7979 = vmatpush.bf16.xpose.msrb.mxu0 %v7969_v12  ;;  %v8071_v48 = vpack.c.b16 %v8061_v0, %v8060_v33  ;;  %v8205_v16 = vunpack.c.l.b16 %v5722_v24  ;;  %v5329_v38 = vperm.slane %v20043_v39, %v14331_v61  ;;  %v20046_v33 = vld [vmem:[#allocation100_spill] sm:$0xff] }
 0x46e   :  { %v5312_v62 = vsel %vm2209_vm1, %v20042_v10, %v20040_v41  ;;  %5859 = vrot.lane.b32.xlu0 %v20044_v46, %s12902_s22  ;;  %v8206_v12 = vunpack.c.l.b16 %v5734_v32  ;;  %v5310_v18 = vperm.slane %v5306_v47, %v14331_v61  ;;  %v5335_v63 = vperm.slane %v20045_v52, %v14331_v61  ;;  %v20048_v32 = vld [vmem:[#allocation105_spill] sm:$0xff] }
 0x46f   :  { %v5298_v6 = vrot.slane %v5297_v35, 4  ;;  %v5316_v44 = vperm.slane %v5312_v62, %v14331_v61  ;;  %5857 = vrot.lane.b32.xlu2 %v20027_v45, %s12902_s22  ;;  %v8114_v24 = vsel %vm7783_vm2, %v8071_v48, 0  ;;  %v20047_v35 = vld [vmem:[#allocation102_spill] sm:$0xff]  ;;  %v20050_v47 = vrot.slane %v20049_v36, 4  ;;  %v20051_v62 = vld [vmem:[#allocation93_spill] sm:$0xff] }
 0x470   :  { %v5344_v41 = vsel %vm2209_vm1, %v20047_v35, %v20046_v33  ;;  %5829 = vrot.lane.b32.xlu1 %v20051_v62, %s12919_s7  ;;  %8124 = vmatpush.bf16.xpose.msra.mxu1 %v8114_v24  ;;  %v8216_v39 = vpack.c.b16 %v8206_v12, %v8205_v16  ;;  %v5336_v48 = vrot.slane %v5335_v63, 4  ;;  %v2022_v35 = vshrl.u32 %v1913_v60, 16 }
 0x471   :  { %v5299_v0 = vsel %vm2209_vm1, %v5298_v6, %v5291_v25  ;;  %v5350_v10 = vsel %vm2209_vm1, %v20050_v47, %v20048_v32  ;;  %v5317_v45 = vrot.slane %v5316_v44, 4  ;;  %v15484_v25 = vperm.slane %v4240_v7, %v14363_v19  ;;  %v15495_v44 = vpop.permute.xlu2 %1914  ;;  %v20053_v47 = vld [vmem:[#allocation51_spill] sm:$0xff] }
 0x472   :  { %v5303_v52 = vperm.slane %v5299_v0, %v14363_v19  ;;  %v15488_v6 = vsel %vm2209_vm1, 0, %v15440_v9  ;;  %v5354_v33 = vperm.slane %v5350_v10, %v14331_v61  ;;  %v8259_v32 = vsel %vm7783_vm2, %v8216_v39, 0  ;;  %v15499_v0 = vpop.permute.xlu0 %1942 }
 0x473   :  { %20052 = vst [vmem:[#allocation116_spill] sm:$0xff] %v15488_v6  ;;  %v5318_v36 = vsel %vm2209_vm1, %v5317_v45, %v5310_v18  ;;  %v5337_v16 = vsel %vm2209_vm1, %v5336_v48, %v5329_v38  ;;  %v5348_v12 = vperm.slane %v5344_v41, %v14331_v61  ;;  %8269 = vmatpush.bf16.xpose.msra.mxu2 %v8259_v32  ;;  %v20054_v45 = vshrl.u32 %v20053_v47, 16 }
 0x474   :  { %v5322_v7 = vperm.slane %v5318_v36, %v14363_v19  ;;  %v5341_v63 = vperm.slane %v5337_v16, %v14363_v19  ;;  %v5355_v24 = vrot.slane %v5354_v33, 4  ;;  %v2020_v10 = vpack.i.b16 %v1913_v60, %v20053_v47 }
 0x475   :  { %v5690_v54 = vshrl.u32 %v5303_v52, 16  ;;  %v2023_v38 = vpack.i.b16 %v2022_v35, %v20054_v45  ;;  %v5304_v18 = vrot.slane %v5303_v52, 4  ;;  %v2034_v36 = vshrl.u32 %v15495_v44, 16 }
 0x476   :  { %v5356_v41 = vsel %vm2209_vm1, %v5355_v24, %v5348_v12  ;;  %v5689_v48 = vpack.i.b16 %v5322_v7, %v5303_v52  ;;  %v5691_v32 = vshrl.u32 %v5322_v7, 16  ;;  %5893 = vrot.lane.b32.xlu0 %v20051_v62, %s12918_s27  ;;  %v5702_v12 = vshrl.u32 %v5341_v63, 16  ;;  %v20055_v24 = vld [vmem:[#allocation52_spill] sm:$0xff] }
 0x477   :  { %v5360_v16 = vperm.slane %v5356_v41, %v14363_v19  ;;  %5827 = vrot.lane.b32.xlu2 %v20044_v46, %s12919_s7  ;;  %v15516_v52 = vperm.slane %v2020_v10, %v14331_v61  ;;  %v15523_v41 = vperm.slane %v2023_v38, %v14331_v61  ;;  %v5305_v33 = vsel %vm2209_vm1, 0, %v5304_v18  ;;  %v20057_v38 = vld [vmem:[#allocation76_spill] sm:$0xff] }
 0x478   :  { %v5692_v35 = vpack.i.b16 %v5691_v32, %v5690_v54  ;;  %5891 = vrot.lane.b32.xlu1 %v20044_v46, %s12918_s27  ;;  %v7767_v39 = vunpack.c.l.b16 %v5689_v48  ;;  %v20056_v54 = vshrl.u32 %v20055_v24, 16  ;;  %v5323_v10 = vrot.slane %v5322_v7, 4 }
 0x479   :  { %v5701_v45 = vpack.i.b16 %v5360_v16, %v5341_v63  ;;  %v5703_v60 = vshrl.u32 %v5360_v16, 16  ;;  %v5342_v21 = vrot.slane %v5341_v63, 4  ;;  %v5361_v6 = vrot.slane %v5360_v16, 4 }
 0x47a   :  { %v15528_v32 = vpack.i.b16 %v2034_v36, %v20056_v54  ;;  %v7913_v47 = vunpack.c.l.b16 %v5692_v35  ;;  %v5324_v46 = vsel %vm2209_vm1, 0, %v5323_v10  ;;  %v5696_v4 = vshrl.u32 %v5305_v33, 16  ;;  %v20060_v10 = vld [vmem:[#allocation66_spill] sm:$0xff] }
 0x47b   :  { %v7768_v27 = vunpack.c.l.b16 %v5701_v45  ;;  %v5704_v51 = vpack.i.b16 %v5703_v60, %v5702_v12  ;;  %v5343_v9 = vsel %vm2209_vm1, 0, %v5342_v21  ;;  %v5215_v53 = vperm.slane %v20057_v38, %v14331_v61  ;;  %v20058_v60 = vld [vmem:[#allocation94_spill] sm:$0xff]  ;;  %v20059_v12 = vld [vmem:[#allocation83_spill] sm:$0xff] }
 0x47c   :  { %v5362_v30 = vsel %vm2209_vm1, 0, %v5361_v6  ;;  %v5695_v36 = vpack.i.b16 %v5324_v46, %v5305_v33  ;;  %v5697_v7 = vshrl.u32 %v5324_v46, 16  ;;  %v5708_v63 = vshrl.u32 %v5343_v9, 16  ;;  %v20062_v6 = vld [vmem:[#allocation95_spill] sm:$0xff]  ;;  %v20063_v33 = vld [vmem:[#allocation73_spill] sm:$0xff] }
 0x47d   :  { %v7779_v18 = vpack.c.b16 %v7768_v27, %v7767_v39  ;;  %v7914_v48 = vunpack.c.l.b16 %v5704_v51  ;;  %v5707_v54 = vpack.i.b16 %v5362_v30, %v5343_v9  ;;  %v5709_v45 = vshrl.u32 %v5362_v30, 16 }
 0x47e   :  { %5863 = vrot.lane.b32.xlu0 %v20058_v60, %s12902_s22  ;;  %v8058_v21 = vunpack.c.l.b16 %v5695_v36  ;;  %v20061_v28 = vrot.slane %v20060_v10, 4  ;;  %v5698_v46 = vpack.i.b16 %v5697_v7, %v5696_v4  ;;  %v20069_v10 = vld [vmem:[#allocation68_spill] sm:$0xff] }
 0x47f   :  { %v7821_v16 = vsel %vm7783_vm2, %v7779_v18, 0  ;;  %v7925_v35 = vpack.c.b16 %v7914_v48, %v7913_v47  ;;  %5861 = vrot.lane.b32.xlu2 %v20051_v62, %s12902_s22  ;;  %v8059_v51 = vunpack.c.l.b16 %v5707_v54  ;;  %v5710_v9 = vpack.i.b16 %v5709_v45, %v5708_v63  ;;  %v20064_v47 = vld [vmem:[#allocation63_spill] sm:$0xff]  ;;  %v20065_v18 = vld [vmem:[#allocation62_spill] sm:$0xff] }
 0x480   :  { %v5217_v27 = vsel %vm2209_vm1, %v20061_v28, %v20059_v12  ;;  %7835 = vmatpush.bf16.xpose.msrb.mxu3 %v7821_v16  ;;  %5833 = vrot.lane.b32.xlu1 %v20062_v6, %s12919_s7  ;;  %v5230_v38 = vsel %vm2209_vm1, %v20064_v47, %v20063_v33  ;;  %v20066_v28 = vld [vmem:[#allocation80_spill] sm:$0xff]  ;;  %v20068_v54 = vld [vmem:[#allocation67_spill] sm:$0xff]  ;;  %v8203_v63 = vunpack.c.l.b16 %v5698_v46  ;;  %v20070_v33 = vld [vmem:[#allocation69_spill] sm:$0xff]  ;;  %v1975_v46 = vpop.permute.xlu1 %1974 }
 0x481   :  { %v5221_v30 = vperm.slane %v5217_v27, %v14331_v61  ;;  %v7966_v39 = vsel %vm7783_vm2, %v7925_v35, 0  ;;  %v20067_v48 = vrot.slane %v20066_v28, 4  ;;  %v5253_v4 = vperm.slane %v20068_v54, %v14331_v61  ;;  %v20071_v47 = vld [vmem:[#allocation74_spill] sm:$0xff] }
 0x482   :  { %7980 = vmatpush.bf16.xpose.msrb.mxu0 %v7966_v39  ;;  %v8070_v7 = vpack.c.b16 %v8059_v51, %v8058_v21  ;;  %v8204_v45 = vunpack.c.l.b16 %v5710_v9  ;;  %v5234_v12 = vperm.slane %v5230_v38, %v14331_v61  ;;  %v5259_v27 = vperm.slane %v20069_v10, %v14331_v61  ;;  %v20072_v38 = vld [vmem:[#allocation61_spill] sm:$0xff] }
 0x483   :  { %v5236_v36 = vsel %vm2209_vm1, %v20067_v48, %v20065_v18  ;;  %v5222_v16 = vrot.slane %v5221_v30, 4  ;;  %v5268_v28 = vsel %vm2209_vm1, %v20071_v47, %v20070_v33  ;;  %v1977_v18 = vpop.permute.xlu0 %1976 }
 0x484   :  { %v5240_v35 = vperm.slane %v5236_v36, %v14331_v61  ;;  %v8111_v48 = vsel %vm7783_vm2, %v8070_v7, 0  ;;  %v8215_v54 = vpack.c.b16 %v8204_v45, %v8203_v63  ;;  %v5272_v51 = vperm.slane %v5268_v28, %v14331_v61  ;;  %v20073_v36 = vld [vmem:[#allocation65_spill] sm:$0xff] }
 0x485   :  { %v5223_v21 = vsel %vm2209_vm1, %v5222_v16, %v5215_v53  ;;  %8125 = vmatpush.bf16.xpose.msra.mxu1 %v8111_v48  ;;  %v5260_v39 = vrot.slane %v5259_v27, 4  ;;  %v20074_v10 = vrot.slane %v20073_v36, 4  ;;  %v2026_v53 = vpack.i.b16 %v1977_v18, %v15442_v2 }
 0x486   :  { %v15568_v9 = vperm.slane %v5223_v21, %v14363_v19  ;;  %v5241_v30 = vrot.slane %v5240_v35, 4  ;;  %v8256_v47 = vsel %vm7783_vm2, %v8215_v54, 0  ;;  %v2028_v63 = vshrl.u32 %v1977_v18, 16  ;;  %5897 = vrot.lane.b32.xlu0 %v20062_v6, %s12918_s27 }
 0x487   :  { %v5274_v33 = vsel %vm2209_vm1, %v20074_v10, %v20072_v38  ;;  %v2263_v45 = vrot.slane %v15516_v52, 4  ;;  %8270 = vmatpush.bf16.xpose.msra.mxu2 %v8256_v47  ;;  %v5261_v35 = vsel %vm2209_vm1, %v5260_v39, %v5253_v4  ;;  %v2014_v27 = vpack.i.b16 %v1975_v46, %v15499_v0  ;;  %5831 = vrot.lane.b32.xlu2 %v20058_v60, %s12919_s7 }
 0x488   :  { %v5278_v7 = vperm.slane %v5274_v33, %v14331_v61  ;;  %v5242_v16 = vsel %vm2209_vm1, %v5241_v30, %v5234_v12  ;;  %v15589_v18 = vperm.slane %v5261_v35, %v14363_v19  ;;  %v20075_v54 = vshrl.u32 %v15442_v2, 16  ;;  %5895 = vrot.lane.b32.xlu1 %v20058_v60, %s12918_s27 }
 0x489   :  { %v15586_v28 = vperm.slane %v5242_v16, %v14363_v19  ;;  %v2289_v4 = vrot.slane %v15523_v41, 4  ;;  %v20076_v12 = vpack.i.b16 %v15495_v44, %v20055_v24  ;;  %v5666_v39 = vshrl.u32 %v15568_v9, 16 }
 0x48a   :  { %v5279_v48 = vrot.slane %v5278_v7, 4  ;;  %v2029_v21 = vpack.i.b16 %v2028_v63, %v20075_v54  ;;  %v2260_v38 = vperm.slane %v2026_v53, %v14331_v61  ;;  %v2016_v33 = vshrl.u32 %v1975_v46, 16 }
 0x48b   :  { %v15600_v30 = vperm.slane %v20076_v12, %v14331_v61  ;;  %v5665_v2 = vpack.i.b16 %v15586_v28, %v15568_v9  ;;  %v5667_v10 = vshrl.u32 %v15586_v28, 16  ;;  %v5678_v16 = vshrl.u32 %v15589_v18, 16 }
 0x48c   :  { %v5280_v36 = vsel %vm2209_vm1, %v5279_v48, %v5272_v51  ;;  %v2261_v7 = vrot.slane %v2260_v38, 4  ;;  %v2264_v44 = vsel %vm2209_vm1, %v2260_v38, %v2263_v45  ;;  %v2286_v24 = vperm.slane %v2029_v21, %v14331_v61  ;;  %v20077_v38 = vld [vmem:[#allocation98_spill] sm:$0xff] }
 0x48d   :  { %v15609_v47 = vperm.slane %v5280_v36, %v14363_v19  ;;  %v5668_v63 = vpack.i.b16 %v5667_v10, %v5666_v39  ;;  %v2272_v53 = vperm.slane %v2264_v44, %v14363_v19  ;;  %v2207_v51 = vperm.slane %v2014_v27, %v14331_v61 }
 0x48e   :  { %v2262_v48 = vsel %vm2209_vm1, %v2261_v7, %v15516_v52  ;;  %v2287_v54 = vrot.slane %v2286_v24, 4  ;;  %v7765_v12 = vunpack.c.l.b16 %v5665_v2  ;;  %v2290_v39 = vsel %vm2209_vm1, %v2286_v24, %v2289_v4  ;;  %5867 = vrot.lane.b32.xlu0 %v20077_v38, %s12902_s22 }
 0x48f   :  { %v5677_v35 = vpack.i.b16 %v15609_v47, %v15589_v18  ;;  %v5679_v46 = vshrl.u32 %v15609_v47, 16  ;;  %v2268_v45 = vperm.slane %v2262_v48, %v14363_v19  ;;  %v2275_v21 = vrot.slane %v2272_v53, 4  ;;  %5865 = vrot.lane.b32.xlu2 %v20062_v6, %s12902_s22  ;;  %v20079_v53 = vld [vmem:[#allocation99_spill] sm:$0xff] }
 0x490   :  { %v2288_v10 = vsel %vm2209_vm1, %v2287_v54, %v15523_v41  ;;  %v2298_v44 = vperm.slane %v2290_v39, %v14363_v19  ;;  %v20078_v4 = vshrl.u32 %v15499_v0, 16  ;;  %5837 = vrot.lane.b32.xlu1 %v20079_v53, %s12919_s7  ;;  %v2208_v6 = vrot.slane %v2207_v51, 4 }
 0x491   :  { %v7766_v36 = vunpack.c.l.b16 %v5677_v35  ;;  %v5680_v27 = vpack.i.b16 %v5679_v46, %v5678_v16  ;;  %v2273_v52 = vrot.slane %v2268_v45, 4  ;;  %v2276_v2 = vsel %vm2209_vm1, 0, %v2275_v21 }
 0x492   :  { %v2294_v7 = vperm.slane %v2288_v10, %v14363_v19  ;;  %v2017_v24 = vpack.i.b16 %v2016_v33, %v20078_v4  ;;  %v7911_v35 = vunpack.c.l.b16 %v5668_v63  ;;  %v2301_v41 = vrot.slane %v2298_v44, 4 }
 0x493   :  { %v7778_v16 = vpack.c.b16 %v7766_v36, %v7765_v12  ;;  %v7912_v46 = vunpack.c.l.b16 %v5680_v27  ;;  %v2274_v48 = vsel %vm2209_vm1, 0, %v2273_v52  ;;  %v3074_v39 = vrot.slane %v2276_v2, 4 }
 0x494   :  { %v2299_v54 = vrot.slane %v2294_v7, 4  ;;  %v20080_v60 = vrot.slane %v15484_v25, 4  ;;  %v2302_v10 = vsel %vm2209_vm1, 0, %v2301_v41  ;;  %v15646_v63 = vperm.slane %v15528_v32, %v14331_v61 }
 0x495   :  { %v7818_v0 = vsel %vm7783_vm2, %v7778_v16, 0  ;;  %v7924_v33 = vpack.c.b16 %v7912_v46, %v7911_v35  ;;  %v3075_v36 = vsel %vm2209_vm1, %v3074_v39, %v2274_v48  ;;  %v3093_v27 = vrot.slane %v2302_v10, 4  ;;  %v15661_v48 = vpop.permute.xlu2 %1948 }
 0x496   :  { %v15640_v62 = vsel %vm2209_vm1, 0, %v20080_v60  ;;  %7836 = vmatpush.bf16.xpose.msrb.mxu3 %v7818_v0  ;;  %v2300_v12 = vsel %vm2209_vm1, 0, %v2299_v54  ;;  %v3079_v60 = vperm.slane %v3075_v36, %v14331_v61  ;;  %v2210_v52 = vsel %vm2209_vm1, %v2208_v6, %v15363_v43  ;;  %5901 = vrot.lane.b32.xlu0 %v20079_v53, %s12918_s27 }
 0x497   :  { %v7963_v44 = vsel %vm7783_vm2, %v7924_v33, 0  ;;  %v20081_v2 = vrot.slane %v15363_v43, 4  ;;  %v2216_v16 = vperm.slane %v2210_v52, %v14363_v19  ;;  %v2234_v46 = vperm.slane %v2017_v24, %v14331_v61  ;;  %5835 = vrot.lane.b32.xlu2 %v20077_v38, %s12919_s7 }
 0x498   :  { %7981 = vmatpush.bf16.xpose.msrb.mxu0 %v7963_v44  ;;  %v3069_v54 = vsel %vm2209_vm1, %v2275_v21, %v2268_v45  ;;  %v3080_v39 = vrot.slane %v3079_v60, 4  ;;  %v3094_v6 = vsel %vm2209_vm1, %v3093_v27, %v2300_v12  ;;  %v5247_v43 = vrot.slane %v15586_v28, 4  ;;  %5899 = vrot.lane.b32.xlu1 %v20077_v38, %s12918_s27 }
 0x499   :  { %v2212_v4 = vsel %vm2209_vm1, %v2207_v51, %v20081_v2  ;;  %v2221_v51 = vrot.slane %v2216_v16, 4  ;;  %v2235_v33 = vrot.slane %v2234_v46, 4  ;;  %v20082_v24 = vrot.slane %v15367_v13, 4 }
 0x49a   :  { %v2220_v35 = vperm.slane %v2212_v4, %v14363_v19  ;;  %v5228_v12 = vrot.slane %v15568_v9, 4  ;;  %v3073_v36 = vperm.slane %v3069_v54, %v14331_v61  ;;  %v3098_v27 = vperm.slane %v3094_v6, %v14331_v61 }
 0x49b   :  { %v2238_v10 = vsel %vm2209_vm1, %v2234_v46, %v20082_v24  ;;  %v2236_v60 = vsel %vm2209_vm1, %v2235_v33, %v15367_v13  ;;  %v3088_v52 = vsel %vm2209_vm1, %v2301_v41, %v2294_v7  ;;  %v2222_v2 = vsel %vm2209_vm1, 0, %v2221_v51 }
 0x49c   :  { %v2223_v0 = vrot.slane %v2220_v35, 4  ;;  %v2246_v28 = vperm.slane %v2238_v10, %v14363_v19  ;;  %v2242_v4 = vperm.slane %v2236_v60, %v14363_v19  ;;  %v3081_v46 = vsel %vm2209_vm1, %v3080_v39, %v3073_v36  ;;  %v20083_v36 = vld [vmem:[#allocation91_spill] sm:$0xff] }
 0x49d   :  { %v5248_v9 = vsel %vm2209_vm1, 0, %v5247_v43  ;;  %v5266_v54 = vrot.slane %v15589_v18, 4  ;;  %v5229_v45 = vsel %vm2209_vm1, 0, %v5228_v12  ;;  %v5285_v13 = vrot.slane %v15609_v47, 4 }
 0x49e   :  { %v2224_v44 = vsel %vm2209_vm1, 0, %v2223_v0  ;;  %v2249_v35 = vrot.slane %v2246_v28, 4  ;;  %v2247_v6 = vrot.slane %v2242_v4, 4  ;;  %v3099_v7 = vrot.slane %v3098_v27, 4  ;;  %5871 = vrot.lane.b32.xlu0 %v20083_v36, %s12902_s22  ;;  %v20084_v27 = vld [vmem:[#allocation92_spill] sm:$0xff] }
 0x49f   :  { %v3036_v24 = vrot.slane %v2224_v44, 4  ;;  %v15694_v41 = vsel %vm2209_vm1, %v2223_v0, %v2216_v16  ;;  %v5267_v43 = vsel %vm2209_vm1, 0, %v5266_v54  ;;  %v5286_v18 = vsel %vm2209_vm1, 0, %v5285_v13  ;;  %5869 = vrot.lane.b32.xlu2 %v20079_v53, %s12902_s22 }
 0x4a0   :  { %v2250_v10 = vsel %vm2209_vm1, 0, %v2249_v35  ;;  %v2248_v39 = vsel %vm2209_vm1, 0, %v2247_v6  ;;  %v5671_v28 = vpack.i.b16 %v5248_v9, %v5229_v45  ;;  %v5683_v16 = vpack.i.b16 %v5286_v18, %v5267_v43  ;;  %5841 = vrot.lane.b32.xlu1 %v20084_v27, %s12919_s7 }
 0x4a1   :  { %v3037_v51 = vsel %vm2209_vm1, %v3036_v24, %v2222_v2  ;;  %v3055_v33 = vrot.slane %v2250_v10, 4  ;;  %v5672_v0 = vshrl.u32 %v5229_v45, 16  ;;  %v5673_v12 = vshrl.u32 %v5248_v9, 16 }
 0x4a2   :  { %v3041_v47 = vperm.slane %v3037_v51, %v14331_v61  ;;  %v15708_v44 = vperm.slane %v3081_v46, %v14363_v19  ;;  %v3092_v60 = vperm.slane %v3088_v52, %v14331_v61  ;;  %v8056_v24 = vunpack.c.l.b16 %v5671_v28 }
 0x4a3   :  { %v3056_v2 = vsel %vm2209_vm1, %v3055_v33, %v2248_v39  ;;  %v8057_v54 = vunpack.c.l.b16 %v5683_v16  ;;  %v5674_v6 = vpack.i.b16 %v5673_v12, %v5672_v0  ;;  %v5684_v10 = vshrl.u32 %v5267_v43, 16  ;;  %v20086_v43 = vld [vmem:[#allocation120_spill] sm:$0xff]  ;;  %v20087_v16 = vld [vmem:[#allocation122_spill] sm:$0xff] }
 0x4a4   :  { %v5685_v13 = vshrl.u32 %v5286_v18, 16  ;;  %v15713_v51 = vsel %vm2209_vm1, %v3099_v7, %v3092_v60  ;;  %v3035_v45 = vperm.slane %v15694_v41, %v14331_v61  ;;  %v15718_v9 = vsel %vm2209_vm1, %v2249_v35, %v2242_v4  ;;  %v1917_v60 = vpop.permute.xlu1 %1916 }
 0x4a5   :  { %v20085_v46 = vrot.slane %v14953_v14, 4  ;;  %v3042_v33 = vrot.slane %v3041_v47, 4  ;;  %v8069_v39 = vpack.c.b16 %v8057_v54, %v8056_v24  ;;  %v5154_v18 = vsel %vm2209_vm1, %v20086_v43, %v14943_v42 }
 0x4a6   :  { %v5686_v28 = vpack.i.b16 %v5685_v13, %v5684_v10  ;;  %v3060_v7 = vperm.slane %v3056_v2, %v14331_v61  ;;  %v5139_v41 = vperm.slane %v20087_v16, %v14331_v61  ;;  %v20088_v35 = vrot.slane %v14961_v56, 4  ;;  %5905 = vrot.lane.b32.xlu0 %v20084_v27, %s12918_s27 }
 0x4a7   :  { %v5141_v52 = vsel %vm2209_vm1, %v20085_v46, %v14976_v11  ;;  %v8108_v11 = vsel %vm7783_vm2, %v8069_v39, 0  ;;  %v8201_v47 = vunpack.c.l.b16 %v5674_v6  ;;  %v5158_v2 = vperm.slane %v5154_v18, %v14331_v61  ;;  %v20091_v46 = vld [vmem:[#allocation121_spill] sm:$0xff]  ;;  %5839 = vrot.lane.b32.xlu2 %v20083_v36, %s12919_s7 }
 0x4a8   :  { %v5145_v4 = vperm.slane %v5141_v52, %v14331_v61  ;;  %v5160_v14 = vsel %vm2209_vm1, %v20088_v35, %v14994_v3  ;;  %v8202_v0 = vunpack.c.l.b16 %v5686_v28  ;;  %8126 = vmatpush.bf16.xpose.msra.mxu1 %v8108_v11  ;;  %v20089_v24 = vrot.slane %v14979_v40, 4  ;;  %v20092_v52 = vld [vmem:[#allocation123_spill] sm:$0xff]  ;;  %5903 = vrot.lane.b32.xlu1 %v20083_v36, %s12918_s27  ;;  %v20094_v28 = vld [vmem:[#allocation53_spill] sm:$0xff] }
 0x4a9   :  { %v5164_v12 = vperm.slane %v5160_v14, %v14331_v61  ;;  %v20090_v56 = vrot.slane %v15034_v26, 4  ;;  %v5192_v39 = vsel %vm2209_vm1, %v20092_v52, %v20091_v46  ;;  %v2044_v43 = vpack.i.b16 %v1917_v60, %v20094_v28 }
 0x4aa   :  { %v5146_v42 = vrot.slane %v5145_v4, 4  ;;  %v5179_v54 = vsel %vm2209_vm1, %v20089_v24, %v14987_v20  ;;  %v8214_v6 = vpack.c.b16 %v8202_v0, %v8201_v47  ;;  %v20093_v20 = vld [vmem:[#allocation124_spill] sm:$0xff]  ;;  %v5196_v11 = vperm.slane %v5192_v39, %v14331_v61  ;;  %v15766_v0 = vpop.permute.xlu2 %1918 }
 0x4ab   :  { %v5198_v3 = vsel %vm2209_vm1, %v20090_v56, %v15013_v37  ;;  %v5165_v10 = vrot.slane %v5164_v12, 4  ;;  %v5183_v13 = vperm.slane %v5179_v54, %v14331_v61  ;;  %v5177_v37 = vperm.slane %v20093_v20, %v14331_v61  ;;  %v20096_v20 = vld [vmem:[#allocation96_spill] sm:$0xff] }
 0x4ac   :  { %v5147_v40 = vsel %vm2209_vm1, %v5146_v42, %v5139_v41  ;;  %v5202_v26 = vperm.slane %v5198_v3, %v14331_v61  ;;  %v8253_v18 = vsel %vm7783_vm2, %v8214_v6, 0  ;;  %v2046_v47 = vshrl.u32 %v1917_v60, 16 }
 0x4ad   :  { %v5151_v16 = vperm.slane %v5147_v40, %v14363_v19  ;;  %v5166_v4 = vsel %vm2209_vm1, %v5165_v10, %v5158_v2  ;;  %v5184_v35 = vrot.slane %v5183_v13, 4  ;;  %8271 = vmatpush.bf16.xpose.msra.mxu2 %v8253_v18  ;;  %v3043_v12 = vsel %vm2209_vm1, %v3042_v33, %v3035_v45 }
 0x4ae   :  { %v5170_v14 = vperm.slane %v5166_v4, %v14363_v19  ;;  %v5203_v41 = vrot.slane %v5202_v26, 4  ;;  %v15771_v54 = vperm.slane %v2044_v43, %v14331_v61  ;;  %v20095_v13 = vshrl.u32 %v20094_v28, 16  ;;  %5875 = vrot.lane.b32.xlu0 %v20096_v20, %s12902_s22  ;;  %v20097_v28 = vld [vmem:[#allocation97_spill] sm:$0xff]  ;;  %v15795_v4 = vpop.permute.xlu0 %1946 }
 0x4af   :  { %v5185_v42 = vsel %vm2209_vm1, %v5184_v35, %v5177_v37  ;;  %v5642_v24 = vshrl.u32 %v5151_v16, 16  ;;  %v2058_v33 = vshrl.u32 %v15766_v0, 16  ;;  %v15782_v46 = vperm.slane %v3043_v12, %v14363_v19  ;;  %5873 = vrot.lane.b32.xlu2 %v20084_v27, %s12902_s22  ;;  %v20098_v35 = vld [vmem:[#allocation54_spill] sm:$0xff] }
 0x4b0   :  { %v5189_v2 = vperm.slane %v5185_v42, %v14363_v19  ;;  %v5204_v56 = vsel %vm2209_vm1, %v5203_v41, %v5196_v11  ;;  %v5641_v3 = vpack.i.b16 %v5170_v14, %v5151_v16  ;;  %v5643_v6 = vshrl.u32 %v5170_v14, 16  ;;  %5845 = vrot.lane.b32.xlu1 %v20097_v28, %s12919_s7 }
 0x4b1   :  { %v5208_v60 = vperm.slane %v5204_v56, %v14363_v19  ;;  %v2047_v45 = vpack.i.b16 %v2046_v47, %v20095_v13  ;;  %v15784_v52 = vrot.slane %v3060_v7, 4  ;;  %v5152_v41 = vrot.slane %v5151_v16, 4 }
 0x4b2   :  { %v7763_v39 = vunpack.c.l.b16 %v5641_v3  ;;  %v5644_v40 = vpack.i.b16 %v5643_v6, %v5642_v24  ;;  %v5654_v26 = vshrl.u32 %v5189_v2, 16  ;;  %v5171_v47 = vrot.slane %v5170_v14, 4 }
 0x4b3   :  { %v5653_v37 = vpack.i.b16 %v5208_v60, %v5189_v2  ;;  %v5655_v43 = vshrl.u32 %v5208_v60, 16  ;;  %v15789_v18 = vperm.slane %v2047_v45, %v14331_v61  ;;  %v20099_v56 = vshrl.u32 %v20098_v35, 16 }
 0x4b4   :  { %v7909_v24 = vunpack.c.l.b16 %v5644_v40  ;;  %v5153_v6 = vsel %vm2209_vm1, 0, %v5152_v41  ;;  %v5172_v13 = vsel %vm2209_vm1, 0, %v5171_v47  ;;  %v5190_v45 = vrot.slane %v5189_v2, 4 }
 0x4b5   :  { %v7764_v12 = vunpack.c.l.b16 %v5653_v37  ;;  %v5656_v42 = vpack.i.b16 %v5655_v43, %v5654_v26  ;;  %v15802_v3 = vpack.i.b16 %v2058_v33, %v20099_v56  ;;  %v5209_v32 = vrot.slane %v5208_v60, 4  ;;  %v20102_v56 = vld [vmem:[#allocation125_spill] sm:$0xff] }
 0x4b6   :  { %v2393_v21 = vrot.slane %v15789_v18, 4  ;;  %v5647_v11 = vpack.i.b16 %v5172_v13, %v5153_v6  ;;  %v5191_v16 = vsel %vm2209_vm1, 0, %v5190_v45  ;;  %v5648_v40 = vshrl.u32 %v5153_v6, 16  ;;  %5909 = vrot.lane.b32.xlu0 %v20097_v28, %s12918_s27 }
 0x4b7   :  { %v7777_v10 = vpack.c.b16 %v7764_v12, %v7763_v39  ;;  %v7910_v7 = vunpack.c.l.b16 %v5656_v42  ;;  %v5210_v14 = vsel %vm2209_vm1, 0, %v5209_v32  ;;  %v5649_v37 = vshrl.u32 %v5172_v13, 16  ;;  %5843 = vrot.lane.b32.xlu2 %v20096_v20, %s12919_s7 }
 0x4b8   :  { %v5659_v43 = vpack.i.b16 %v5210_v14, %v5191_v16  ;;  %v8054_v41 = vunpack.c.l.b16 %v5647_v11  ;;  %v5660_v2 = vshrl.u32 %v5191_v16, 16  ;;  %v5661_v60 = vshrl.u32 %v5210_v14, 16  ;;  %5907 = vrot.lane.b32.xlu1 %v20096_v20, %s12918_s27 }
 0x4b9   :  { %v7815_v33 = vsel %vm7783_vm2, %v7777_v10, 0  ;;  %v7923_v26 = vpack.c.b16 %v7910_v7, %v7909_v24  ;;  %v5650_v47 = vpack.i.b16 %v5649_v37, %v5648_v40  ;;  %v20100_v39 = vrot.slane %v15117_v1, 4  ;;  %v20101_v24 = vld [vmem:[#allocation127_spill] sm:$0xff]  ;;  %v20104_v40 = vld [vmem:[#allocation126_spill] sm:$0xff] }
 0x4ba   :  { %7837 = vmatpush.bf16.xpose.msrb.mxu3 %v7815_v33  ;;  %v8055_v42 = vunpack.c.l.b16 %v5659_v43  ;;  %v5078_v7 = vsel %vm2209_vm1, %v15110_v17, %v15108_v57  ;;  %v5662_v1 = vpack.i.b16 %v5661_v60, %v5660_v2  ;;  %v5063_v11 = vperm.slane %v15136_v58, %v14331_v61 }
 0x4bb   :  { %v5065_v12 = vsel %vm2209_vm1, %v20100_v39, %v15140_v59  ;;  %v7960_v32 = vsel %vm7783_vm2, %v7923_v26, 0  ;;  %v8199_v59 = vunpack.c.l.b16 %v5650_v47  ;;  %v20103_v6 = vrot.slane %v20102_v56, 4 }
 0x4bc   :  { %v5069_v10 = vperm.slane %v5065_v12, %v14331_v61  ;;  %7982 = vmatpush.bf16.xpose.msrb.mxu0 %v7960_v32  ;;  %v8068_v45 = vpack.c.b16 %v8055_v42, %v8054_v41  ;;  %v5082_v57 = vperm.slane %v5078_v7, %v14331_v61  ;;  %v8200_v14 = vunpack.c.l.b16 %v5662_v1  ;;  %v1981_v41 = vpop.permute.xlu0 %1980 }
 0x4bd   :  { %v5084_v13 = vsel %vm2209_vm1, %v20103_v6, %v20101_v24  ;;  %v20105_v37 = vrot.slane %v15154_v15, 4  ;;  %v5116_v58 = vsel %vm2209_vm1, %v15183_v34, %v15165_v23  ;;  %v20106_v26 = vrot.slane %v15222_v22, 4 }
 0x4be   :  { %v5070_v16 = vrot.slane %v5069_v10, 4  ;;  %v5088_v17 = vperm.slane %v5084_v13, %v14331_v61  ;;  %v8105_v47 = vsel %vm7783_vm2, %v8068_v45, 0  ;;  %v8213_v15 = vpack.c.b16 %v8200_v14, %v8199_v59 }
 0x4bf   :  { %v5103_v33 = vsel %vm2209_vm1, %v20105_v37, %v20104_v40  ;;  %v5122_v43 = vsel %vm2209_vm1, %v20106_v26, %v15243_v49  ;;  %8127 = vmatpush.bf16.xpose.msra.mxu1 %v8105_v47  ;;  %v5101_v23 = vperm.slane %v15235_v50, %v14331_v61  ;;  %v2050_v32 = vpack.i.b16 %v1981_v41, %v15661_v48 }
 0x4c0   :  { %v5071_v2 = vsel %vm2209_vm1, %v5070_v16, %v5063_v11  ;;  %v5089_v60 = vrot.slane %v5088_v17, 4  ;;  %v5107_v39 = vperm.slane %v5103_v33, %v14331_v61  ;;  %v5126_v34 = vperm.slane %v5122_v43, %v14331_v61  ;;  %5877 = vrot.lane.b32.xlu2 %v20097_v28, %s12902_s22  ;;  %s11355_s22 = sshll.u32 %s12923_s13, 4  ;;  %s11356_s22 = int_to_ptr.vmem [resolvable:$true] %s11355_s22 }
 0x4c1   :  { %v15848_v12 = vperm.slane %v5071_v2, %v14363_v19  ;;  %v2052_v42 = vshrl.u32 %v1981_v41, 16  ;;  %v8250_v10 = vsel %vm7783_vm2, %v8213_v15, 0  ;;  %v5120_v1 = vperm.slane %v5116_v58, %v14331_v61 }
 0x4c2   :  { %v5090_v22 = vsel %vm2209_vm1, %v5089_v60, %v5082_v57  ;;  %v5108_v49 = vrot.slane %v5107_v39, 4  ;;  %v5127_v59 = vrot.slane %v5126_v34, 4  ;;  %8272 = vmatpush.bf16.xpose.msra.mxu2 %v8250_v10  ;;  %v20107_v24 = vshrl.u32 %v15661_v48, 16 }
 0x4c3   :  { %v15857_v7 = vperm.slane %v5090_v22, %v14363_v19  ;;  %v5618_v50 = vshrl.u32 %v15848_v12, 16  ;;  %v2364_v6 = vperm.slane %v2050_v32, %v14331_v61  ;;  %v20108_v14 = vrot.slane %v15771_v54, 4  ;;  %v1979_v22 = vpop.permute.xlu1 %1978 }
 0x4c4   :  { %v5109_v11 = vsel %vm2209_vm1, %v5108_v49, %v5101_v23  ;;  %v2053_v56 = vpack.i.b16 %v2052_v42, %v20107_v24  ;;  %v5128_v45 = vsel %vm2209_vm1, %v5127_v59, %v5120_v1 }
 0x4c5   :  { %v15866_v13 = vperm.slane %v5109_v11, %v14363_v19  ;;  %v5617_v16 = vpack.i.b16 %v15857_v7, %v15848_v12  ;;  %v5619_v57 = vshrl.u32 %v15857_v7, 16  ;;  %v15875_v17 = vperm.slane %v5128_v45, %v14363_v19 }
 0x4c6   :  { %v2365_v48 = vrot.slane %v2364_v6, 4  ;;  %v2368_v40 = vsel %vm2209_vm1, %v2364_v6, %v20108_v14  ;;  %v2390_v37 = vperm.slane %v2053_v56, %v14331_v61  ;;  %v2038_v6 = vpack.i.b16 %v1979_v22, %v15795_v4 }
 0x4c7   :  { %v7761_v33 = vunpack.c.l.b16 %v5617_v16  ;;  %v5620_v58 = vpack.i.b16 %v5619_v57, %v5618_v50  ;;  %v5630_v26 = vshrl.u32 %v15866_v13, 16  ;;  %v2376_v43 = vperm.slane %v2368_v40, %v14363_v19 }
 0x4c8   :  { %v5629_v41 = vpack.i.b16 %v15875_v17, %v15866_v13  ;;  %v5631_v47 = vshrl.u32 %v15875_v17, 16  ;;  %v2366_v2 = vsel %vm2209_vm1, %v2365_v48, %v15771_v54  ;;  %v2391_v60 = vrot.slane %v2390_v37, 4 }
 0x4c9   :  { %v7907_v39 = vunpack.c.l.b16 %v5620_v58  ;;  %v2372_v15 = vperm.slane %v2366_v2, %v14363_v19  ;;  %v2379_v23 = vrot.slane %v2376_v43, 4  ;;  %v2394_v34 = vsel %vm2209_vm1, %v2390_v37, %v2393_v21 }
 0x4ca   :  { %v7762_v49 = vunpack.c.l.b16 %v5629_v41  ;;  %v5632_v32 = vpack.i.b16 %v5631_v47, %v5630_v26  ;;  %v2392_v42 = vsel %vm2209_vm1, %v2391_v60, %v15789_v18  ;;  %v2402_v10 = vperm.slane %v2394_v34, %v14363_v19 }
 0x4cb   :  { %v20109_v54 = vpack.i.b16 %v15766_v0, %v20098_v35  ;;  %v2377_v59 = vrot.slane %v2372_v15, 4  ;;  %v2380_v11 = vsel %vm2209_vm1, 0, %v2379_v23  ;;  %v2398_v50 = vperm.slane %v2392_v42, %v14363_v19 }
 0x4cc   :  { %v7776_v21 = vpack.c.b16 %v7762_v49, %v7761_v33  ;;  %v7908_v24 = vunpack.c.l.b16 %v5632_v32  ;;  %v2405_v56 = vrot.slane %v2402_v10, 4  ;;  %v3150_v16 = vrot.slane %v2380_v11, 4 }
 0x4cd   :  { %v15899_v1 = vperm.slane %v20109_v54, %v14331_v61  ;;  %v2378_v18 = vsel %vm2209_vm1, 0, %v2377_v59  ;;  %v2403_v45 = vrot.slane %v2398_v50, 4  ;;  %v2040_v57 = vshrl.u32 %v1979_v22, 16 }
 0x4ce   :  { %v20110_v0 = vperm.slane %v15718_v9, %v14331_v61  ;;  %v2039_v48 = vshrl.u32 %v15795_v4, 16  ;;  %v7812_v14 = vsel %vm7783_vm2, %v7776_v21, 0  ;;  %v7922_v40 = vpack.c.b16 %v7908_v24, %v7907_v39 }
 0x4cf   :  { %v2419_v37 = vrot.slane %v15899_v1, 4  ;;  %v15917_v33 = vperm.slane %v15802_v3, %v14331_v61  ;;  %7838 = vmatpush.bf16.xpose.msrb.mxu3 %v7812_v14  ;;  %v2406_v58 = vsel %vm2209_vm1, 0, %v2405_v56  ;;  %v15921_v9 = vsel %vm2209_vm1, %v2379_v23, %v2372_v15 }
 0x4d0   :  { %v15910_v35 = vsel %vm2209_vm1, %v15784_v52, %v20110_v0  ;;  %v7957_v52 = vsel %vm7783_vm2, %v7922_v40, 0  ;;  %v3151_v26 = vsel %vm2209_vm1, %v3150_v16, %v2378_v18  ;;  %v2041_v4 = vpack.i.b16 %v2040_v57, %v2039_v48  ;;  %v15957_v57 = vpop.permute.xlu2 %1952 }
 0x4d1   :  { %v2312_v43 = vperm.slane %v2038_v6, %v14331_v61  ;;  %7983 = vmatpush.bf16.xpose.msrb.mxu0 %v7957_v52  ;;  %v2404_v41 = vsel %vm2209_vm1, 0, %v2403_v45  ;;  %v15928_v47 = vsel %vm2209_vm1, %v2405_v56, %v2398_v50  ;;  %v5076_v3 = vrot.slane %v15848_v12, 4 }
 0x4d2   :  { %v5095_v2 = vrot.slane %v15857_v7, 4  ;;  %v3169_v60 = vrot.slane %v2406_v58, 4  ;;  %v20111_v15 = vrot.slane %v15600_v30, 4  ;;  %v2338_v34 = vperm.slane %v2041_v4, %v14331_v61 }
 0x4d3   :  { %v2313_v39 = vrot.slane %v2312_v43, 4  ;;  %v3155_v22 = vperm.slane %v3151_v26, %v14331_v61  ;;  %v5114_v42 = vrot.slane %v15866_v13, 4  ;;  %v20112_v10 = vrot.slane %v15646_v63, 4 }
 0x4d4   :  { %v2316_v23 = vsel %vm2209_vm1, %v2312_v43, %v20111_v15  ;;  %v5096_v32 = vsel %vm2209_vm1, 0, %v5095_v2  ;;  %v2339_v7 = vrot.slane %v2338_v34, 4  ;;  %v5133_v59 = vrot.slane %v15875_v17, 4 }
 0x4d5   :  { %v2324_v49 = vperm.slane %v2316_v23, %v14363_v19  ;;  %v2314_v12 = vsel %vm2209_vm1, %v2313_v39, %v15600_v30  ;;  %v2342_v54 = vsel %vm2209_vm1, %v2338_v34, %v20112_v10  ;;  %v5077_v24 = vsel %vm2209_vm1, 0, %v5076_v3 }
 0x4d6   :  { %v2320_v11 = vperm.slane %v2314_v12, %v14363_v19  ;;  %v2350_v21 = vperm.slane %v2342_v54, %v14363_v19  ;;  %v2340_v13 = vsel %vm2209_vm1, %v2339_v7, %v15646_v63  ;;  %v5115_v56 = vsel %vm2209_vm1, 0, %v5114_v42 }
 0x4d7   :  { %v2327_v50 = vrot.slane %v2324_v49, 4  ;;  %v5134_v30 = vsel %vm2209_vm1, 0, %v5133_v59  ;;  %v5623_v6 = vpack.i.b16 %v5096_v32, %v5077_v24  ;;  %v15955_v17 = vperm.slane %v2340_v13, %v14363_v19 }
 0x4d8   :  { %v2325_v18 = vrot.slane %v2320_v11, 4  ;;  %v2353_v16 = vrot.slane %v2350_v21, 4  ;;  %v2445_v0 = vrot.slane %v15917_v33, 4  ;;  %v3149_v48 = vperm.slane %v15921_v9, %v14331_v61 }
 0x4d9   :  { %v2328_v45 = vsel %vm2209_vm1, 0, %v2327_v50  ;;  %v5635_v63 = vpack.i.b16 %v5134_v30, %v5115_v56  ;;  %v8052_v14 = vunpack.c.l.b16 %v5623_v6  ;;  %v3168_v40 = vperm.slane %v15928_v47, %v14331_v61 }
 0x4da   :  { %v15965_v58 = vsel %vm2209_vm1, %v3169_v60, %v2404_v41  ;;  %v15968_v52 = vsel %vm2209_vm1, %v2327_v50, %v2320_v11  ;;  %v3112_v26 = vrot.slane %v2328_v45, 4  ;;  %v15970_v4 = vrot.slane %v3155_v22, 4 }
 0x4db   :  { %v2326_v43 = vsel %vm2209_vm1, 0, %v2325_v18  ;;  %v2075_v3 = vshrl.u32 %v15957_v57, 16  ;;  %v8053_v2 = vunpack.c.l.b16 %v5635_v63  ;;  %v2351_v39 = vrot.slane %v15955_v17, 4 }
 0x4dc   :  { %v15976_v15 = vsel %vm2209_vm1, 0, %v2353_v16  ;;  %v5624_v23 = vshrl.u32 %v5077_v24, 16  ;;  %v5625_v34 = vshrl.u32 %v5096_v32, 16  ;;  %v3111_v41 = vperm.slane %v15968_v52, %v14331_v61 }
 0x4dd   :  { %v8067_v60 = vpack.c.b16 %v8053_v2, %v8052_v14  ;;  %v5636_v49 = vshrl.u32 %v5115_v56, 16  ;;  %v5637_v42 = vshrl.u32 %v5134_v30, 16  ;;  %v15981_v22 = vsel %vm2209_vm1, %v3112_v26, %v2326_v43  ;;  %v20114_v56 = vld [vmem:[#allocation109_spill] sm:$0xff]  ;;  %v20121_v2 = vld [vmem:[#allocation116_spill] sm:$0xff] }
 0x4de   :  { %v15985_v12 = vsel %vm2209_vm1, %v2353_v16, %v15955_v17  ;;  %v5626_v7 = vpack.i.b16 %v5625_v34, %v5624_v23  ;;  %v20113_v10 = vrot.slane %v15389_v8, 4  ;;  %v5002_v50 = vsel %vm2209_vm1, %v15377_v5, %v15375_v55  ;;  %v20115_v8 = vld [vmem:[#allocation113_spill] sm:$0xff]  ;;  %v20117_v17 = vld [vmem:[#allocation110_spill] sm:$0xff]  ;;  %v20118_v16 = vld [vmem:[#allocation108_spill] sm:$0xff]  ;;  %v1921_v5 = vpop.permute.xlu1 %1920 }
 0x4df   :  { %v8102_v32 = vsel %vm7783_vm2, %v8067_v60, 0  ;;  %v5638_v59 = vpack.i.b16 %v5637_v42, %v5636_v49  ;;  %v3131_v21 = vrot.slane %v15976_v15, 4  ;;  %v4987_v13 = vperm.slane %v15407_v31, %v14331_v61  ;;  %v20120_v31 = vld [vmem:[#allocation111_spill] sm:$0xff] }
 0x4e0   :  { %v4989_v54 = vsel %vm2209_vm1, %v20113_v10, %v15404_v29  ;;  %8128 = vmatpush.bf16.xpose.msra.mxu1 %v8102_v32  ;;  %v8197_v24 = vunpack.c.l.b16 %v5626_v7  ;;  %v20116_v30 = vrot.slane %v20115_v8, 4  ;;  %v20119_v63 = vrot.slane %v20118_v16, 4  ;;  %v20123_v7 = vld [vmem:[#allocation114_spill] sm:$0xff] }
 0x4e1   :  { %v4993_v11 = vperm.slane %v4989_v54, %v14331_v61  ;;  %v8198_v6 = vunpack.c.l.b16 %v5638_v59  ;;  %v5006_v14 = vperm.slane %v5002_v50, %v14331_v61  ;;  %v5040_v43 = vsel %vm2209_vm1, %v20120_v31, %v15484_v25  ;;  %v1923_v54 = vpop.permute.xlu2 %1922  ;;  %v20124_v50 = vld [vmem:[#allocation55_spill] sm:$0xff] }
 0x4e2   :  { %v5008_v29 = vsel %vm2209_vm1, %v20116_v30, %v20114_v56  ;;  %v5027_v55 = vsel %vm2209_vm1, %v20119_v63, %v20117_v17  ;;  %v20122_v23 = vrot.slane %v20121_v2, 4  ;;  %v5025_v10 = vperm.slane %v20123_v7, %v14331_v61 }
 0x4e3   :  { %v4994_v18 = vrot.slane %v4993_v11, 4  ;;  %v5012_v45 = vperm.slane %v5008_v29, %v14331_v61  ;;  %v5031_v26 = vperm.slane %v5027_v55, %v14331_v61  ;;  %v8212_v60 = vpack.c.b16 %v8198_v6, %v8197_v24  ;;  %v16028_v6 = vpop.permute.xlu0 %1950 }
 0x4e4   :  { %v5046_v34 = vsel %vm2209_vm1, %v20122_v23, %v15640_v62  ;;  %v2068_v25 = vpack.i.b16 %v1921_v5, %v20124_v50  ;;  %v5044_v62 = vperm.slane %v5040_v43, %v14331_v61  ;;  %v2070_v24 = vshrl.u32 %v1921_v5, 16 }
 0x4e5   :  { %v4995_v49 = vsel %vm2209_vm1, %v4994_v18, %v4987_v13  ;;  %v5013_v42 = vrot.slane %v5012_v45, 4  ;;  %v5032_v59 = vrot.slane %v5031_v26, 4  ;;  %v5050_v11 = vperm.slane %v5046_v34, %v14331_v61  ;;  %v20125_v18 = vld [vmem:[#allocation56_spill] sm:$0xff] }
 0x4e6   :  { %v4999_v32 = vperm.slane %v4995_v49, %v14363_v19  ;;  %v8247_v56 = vsel %vm7783_vm2, %v8212_v60, 0  ;;  %v2080_v45 = vpack.i.b16 %v1923_v54, %v20125_v18  ;;  %v16032_v17 = vsel %vm2209_vm1, 0, %v2351_v39 }
 0x4e7   :  { %v5014_v8 = vsel %vm2209_vm1, %v5013_v42, %v5006_v14  ;;  %8273 = vmatpush.bf16.xpose.msra.mxu2 %v8247_v56  ;;  %v5033_v30 = vsel %vm2209_vm1, %v5032_v59, %v5025_v10  ;;  %v5051_v29 = vrot.slane %v5050_v11, 4  ;;  %v16036_v55 = vperm.slane %v2068_v25, %v14331_v61 }
 0x4e8   :  { %v5018_v13 = vperm.slane %v5014_v8, %v14363_v19  ;;  %v5037_v16 = vperm.slane %v5033_v30, %v14363_v19  ;;  %v5594_v63 = vshrl.u32 %v4999_v32, 16  ;;  %v20126_v31 = vshrl.u32 %v20124_v50, 16 }
 0x4e9   :  { %v5052_v5 = vsel %vm2209_vm1, %v5051_v29, %v5044_v62  ;;  %v3117_v2 = vperm.slane %v15981_v22, %v14331_v61  ;;  %v2063_v39 = vshrl.u32 %v16028_v6, 16  ;;  %v2082_v34 = vshrl.u32 %v1923_v54, 16 }
 0x4ea   :  { %v5593_v14 = vpack.i.b16 %v5018_v13, %v4999_v32  ;;  %v5595_v26 = vshrl.u32 %v5018_v13, 16  ;;  %v2071_v43 = vpack.i.b16 %v2070_v24, %v20126_v31  ;;  %v5056_v23 = vperm.slane %v5052_v5, %v14363_v19 }
 0x4eb   :  { %v5606_v49 = vshrl.u32 %v5037_v16, 16  ;;  %v2471_v42 = vrot.slane %v16036_v55, 4  ;;  %v16047_v7 = vperm.slane %v2080_v45, %v14331_v61  ;;  %v5000_v50 = vrot.slane %v4999_v32, 4 }
 0x4ec   :  { %v5596_v60 = vpack.i.b16 %v5595_v26, %v5594_v63  ;;  %v5605_v10 = vpack.i.b16 %v5056_v23, %v5037_v16  ;;  %v7759_v59 = vunpack.c.l.b16 %v5593_v14  ;;  %v5607_v11 = vshrl.u32 %v5056_v23, 16 }
 0x4ed   :  { %v16050_v56 = vperm.slane %v2071_v43, %v14331_v61  ;;  %v5019_v8 = vrot.slane %v5018_v13, 4  ;;  %v5038_v62 = vrot.slane %v5037_v16, 4  ;;  %v5001_v54 = vsel %vm2209_vm1, 0, %v5000_v50 }
 0x4ee   :  { %v7905_v25 = vunpack.c.l.b16 %v5596_v60  ;;  %v7760_v24 = vunpack.c.l.b16 %v5605_v10  ;;  %v5608_v30 = vpack.i.b16 %v5607_v11, %v5606_v49  ;;  %v5057_v29 = vrot.slane %v5056_v23, 4 }
 0x4ef   :  { %v20127_v63 = vshrl.u32 %v20125_v18, 16  ;;  %v5020_v45 = vsel %vm2209_vm1, 0, %v5019_v8  ;;  %v5039_v14 = vsel %vm2209_vm1, 0, %v5038_v62  ;;  %v5600_v32 = vshrl.u32 %v5001_v54, 16 }
 0x4f0   :  { %v7775_v26 = vpack.c.b16 %v7760_v24, %v7759_v59  ;;  %v7906_v31 = vunpack.c.l.b16 %v5608_v30  ;;  %v5058_v43 = vsel %vm2209_vm1, 0, %v5057_v29  ;;  %v5599_v13 = vpack.i.b16 %v5020_v45, %v5001_v54 }
 0x4f1   :  { %v16055_v5 = vpack.i.b16 %v2082_v34, %v20127_v63  ;;  %v5611_v16 = vpack.i.b16 %v5058_v43, %v5039_v14  ;;  %v5601_v60 = vshrl.u32 %v5020_v45, 16  ;;  %v5612_v49 = vshrl.u32 %v5039_v14, 16 }
 0x4f2   :  { %v5613_v10 = vshrl.u32 %v5058_v43, 16  ;;  %v7809_v23 = vsel %vm7783_vm2, %v7775_v26, 0  ;;  %v7921_v11 = vpack.c.b16 %v7906_v31, %v7905_v25  ;;  %v8050_v18 = vunpack.c.l.b16 %v5599_v13 }
 0x4f3   :  { %v3066_v34 = vperm.slane %v15910_v35, %v14363_v19  ;;  %7839 = vmatpush.bf16.xpose.msrb.mxu3 %v7809_v23  ;;  %v8051_v50 = vunpack.c.l.b16 %v5611_v16  ;;  %v5602_v8 = vpack.i.b16 %v5601_v60, %v5600_v32  ;;  %v3104_v59 = vperm.slane %v15713_v51, %v14363_v19  ;;  %v1985_v60 = vpop.permute.xlu0 %1984 }
 0x4f4   :  { %v5614_v62 = vpack.i.b16 %v5613_v10, %v5612_v49  ;;  %v7954_v24 = vsel %vm7783_vm2, %v7921_v11, 0  ;;  %v3642_v54 = vshrl.u32 %v15782_v46, 16  ;;  %v3654_v32 = vshrl.u32 %v15708_v44, 16 }
 0x4f5   :  { %v3641_v30 = vpack.i.b16 %v3066_v34, %v15782_v46  ;;  %v3643_v29 = vshrl.u32 %v3066_v34, 16  ;;  %7984 = vmatpush.bf16.xpose.msrb.mxu0 %v7954_v24  ;;  %v8066_v25 = vpack.c.b16 %v8051_v50, %v8050_v18  ;;  %v8195_v63 = vunpack.c.l.b16 %v5602_v8  ;;  %v1983_v18 = vpop.permute.xlu1 %1982 }
 0x4f6   :  { %v8196_v45 = vunpack.c.l.b16 %v5614_v62  ;;  %v3653_v35 = vpack.i.b16 %v3104_v59, %v15708_v44  ;;  %v3655_v31 = vshrl.u32 %v3104_v59, 16  ;;  %v3048_v16 = vrot.slane %v15782_v46, 4 }
 0x4f7   :  { %v7735_v14 = vunpack.c.l.b16 %v3641_v30  ;;  %v3644_v26 = vpack.i.b16 %v3643_v29, %v3642_v54  ;;  %v8099_v51 = vsel %vm7783_vm2, %v8066_v25, 0  ;;  %v3067_v23 = vrot.slane %v3066_v34, 4 }
 0x4f8   :  { %v8211_v43 = vpack.c.b16 %v8196_v45, %v8195_v63  ;;  %v7736_v13 = vunpack.c.l.b16 %v3653_v35  ;;  %8129 = vmatpush.bf16.xpose.msra.mxu1 %v8099_v51  ;;  %v3656_v49 = vpack.i.b16 %v3655_v31, %v3654_v32  ;;  %v3086_v11 = vrot.slane %v15708_v44, 4 }
 0x4f9   :  { %v7881_v10 = vunpack.c.l.b16 %v3644_v26  ;;  %v16075_v62 = vsel %vm2209_vm1, 0, %v3048_v16  ;;  %v3105_v24 = vrot.slane %v3104_v59, 4  ;;  %v16078_v54 = vsel %vm2209_vm1, 0, %v3067_v23 }
 0x4fa   :  { %v8244_v50 = vsel %vm7783_vm2, %v8211_v43, 0  ;;  %v7751_v8 = vpack.c.b16 %v7736_v13, %v7735_v14  ;;  %v7882_v30 = vunpack.c.l.b16 %v3656_v49  ;;  %v16081_v46 = vsel %vm2209_vm1, 0, %v3086_v11 }
 0x4fb   :  { %8274 = vmatpush.bf16.xpose.msra.mxu2 %v8244_v50  ;;  %v2074_v34 = vpack.i.b16 %v1985_v60, %v15957_v57  ;;  %v16086_v44 = vsel %vm2209_vm1, 0, %v3105_v24  ;;  %v3647_v29 = vpack.i.b16 %v16078_v54, %v16075_v62  ;;  %v2076_v25 = vshrl.u32 %v1985_v60, 16  ;;  %v16115_v24 = vpop.permute.xlu2 %1956 }
 0x4fc   :  { %11555 = vmatmul.msk.bf16.vlgmr.msrb.gmra.mxu3 %vm7783_vm2, %v7751_v8  ;;  %v2062_v59 = vpack.i.b16 %v1983_v18, %v16028_v6  ;;  %v7897_v63 = vpack.c.b16 %v7882_v30, %v7881_v10  ;;  %v3659_v45 = vpack.i.b16 %v16086_v44, %v16081_v46  ;;  %v2064_v14 = vshrl.u32 %v1983_v18, 16 }
 0x4fd   :  { %v2468_v35 = vperm.slane %v2074_v34, %v14331_v61  ;;  %v2497_v26 = vrot.slane %v16050_v56, 4  ;;  %v8026_v32 = vunpack.c.l.b16 %v3647_v29  ;;  %v2077_v31 = vpack.i.b16 %v2076_v25, %v2075_v3 }
 0x4fe   :  { %v2416_v51 = vperm.slane %v2062_v59, %v14331_v61  ;;  %11563 = vmatmul.msk.bf16.vlgmr.msrb.gmra.mxu0 %vm7783_vm2, %v7897_v63  ;;  %v8027_v43 = vunpack.c.l.b16 %v3659_v45  ;;  %v2065_v60 = vpack.i.b16 %v2064_v14, %v2063_v39  ;;  %v16119_v30 = vperm.slane %v16055_v5, %v14331_v61 }
 0x4ff   :  { %v2469_v13 = vrot.slane %v2468_v35, 4  ;;  %v2472_v16 = vsel %vm2209_vm1, %v2468_v35, %v2471_v42  ;;  %v2494_v10 = vperm.slane %v2077_v31, %v14331_v61  ;;  %v3130_v45 = vperm.slane %v15985_v12, %v14331_v61 }
 0x500   :  { %v2480_v49 = vperm.slane %v2472_v16, %v14363_v19  ;;  %v2417_v23 = vrot.slane %v2416_v51, 4  ;;  %v2420_v57 = vsel %vm2209_vm1, %v2416_v51, %v2419_v37  ;;  %v8042_v3 = vpack.c.b16 %v8027_v43, %v8026_v32 }
 0x501   :  { %v2470_v11 = vsel %vm2209_vm1, %v2469_v13, %v16036_v55  ;;  %v2428_v18 = vperm.slane %v2420_v57, %v14363_v19  ;;  %v2442_v42 = vperm.slane %v2065_v60, %v14331_v61  ;;  %v2495_v50 = vrot.slane %v2494_v10, 4 }
 0x502   :  { %v2476_v6 = vperm.slane %v2470_v11, %v14363_v19  ;;  %v2483_v39 = vrot.slane %v2480_v49, 4  ;;  %v2498_v8 = vsel %vm2209_vm1, %v2494_v10, %v2497_v26  ;;  %11571 = vmatmul.msk.bf16.vlgmr.msra.gmra.mxu1 %vm7783_vm2, %v8042_v3  ;;  %v2418_v55 = vsel %vm2209_vm1, %v2417_v23, %v15899_v1  ;;  %v16157_v10 = vpop.permute.xlu0 %1954 }
 0x503   :  { %v2506_v37 = vperm.slane %v2498_v8, %v14363_v19  ;;  %v2443_v34 = vrot.slane %v2442_v42, 4  ;;  %v2496_v59 = vsel %vm2209_vm1, %v2495_v50, %v16050_v56  ;;  %v2431_v63 = vrot.slane %v2428_v18, 4 }
 0x504   :  { %v2481_v29 = vrot.slane %v2476_v6, 4  ;;  %v2484_v25 = vsel %vm2209_vm1, 0, %v2483_v39  ;;  %v2502_v5 = vperm.slane %v2496_v59, %v14363_v19  ;;  %v3132_v1 = vsel %vm2209_vm1, %v3131_v21, %v16032_v17  ;;  %v1925_v59 = vpop.permute.xlu1 %1924 }
 0x505   :  { %v2509_v35 = vrot.slane %v2506_v37, 4  ;;  %v3226_v14 = vrot.slane %v2484_v25, 4  ;;  %v2424_v32 = vperm.slane %v2418_v55, %v14363_v19  ;;  %v2444_v56 = vsel %vm2209_vm1, %v2443_v34, %v15917_v33  ;;  %v1927_v37 = vpop.permute.xlu2 %1926 }
 0x506   :  { %v2482_v26 = vsel %vm2209_vm1, 0, %v2481_v29  ;;  %v3118_v31 = vrot.slane %v3117_v2, 4  ;;  %v2507_v51 = vrot.slane %v2502_v5, 4  ;;  %v2523_v15 = vrot.slane %v16047_v7, 4 }
 0x507   :  { %v2510_v43 = vsel %vm2209_vm1, 0, %v2509_v35  ;;  %v3227_v13 = vsel %vm2209_vm1, %v3226_v14, %v2482_v26  ;;  %v2549_v21 = vrot.slane %v16119_v30, 4  ;;  %v2429_v17 = vrot.slane %v2424_v32, 4  ;;  %v20128_v26 = vld [vmem:[#allocation57_spill] sm:$0xff] }
 0x508   :  { %v2432_v16 = vsel %vm2209_vm1, 0, %v2431_v63  ;;  %v16148_v60 = vsel %vm2209_vm1, %v2483_v39, %v2476_v6  ;;  %v16151_v49 = vsel %vm2209_vm1, %v2509_v35, %v2502_v5  ;;  %v2446_v22 = vsel %vm2209_vm1, %v2442_v42, %v2445_v0 }
 0x509   :  { %v2450_v2 = vperm.slane %v2444_v56, %v14363_v19  ;;  %v2508_v23 = vsel %vm2209_vm1, 0, %v2507_v51  ;;  %v3231_v57 = vperm.slane %v3227_v13, %v14331_v61  ;;  %v3245_v3 = vrot.slane %v2510_v43, 4  ;;  %v20129_v43 = vld [vmem:[#allocation78_spill] sm:$0xff] }
 0x50a   :  { %v2454_v11 = vperm.slane %v2446_v22, %v14363_v19  ;;  %v2430_v18 = vsel %vm2209_vm1, 0, %v2429_v17  ;;  %v16164_v39 = vsel %vm2209_vm1, %v2431_v63, %v2424_v32  ;;  %v3188_v33 = vrot.slane %v2432_v16, 4 }
 0x50b   :  { %v2455_v6 = vrot.slane %v2450_v2, 4  ;;  %v3648_v0 = vshrl.u32 %v16075_v62, 16  ;;  %v3649_v42 = vshrl.u32 %v16078_v54, 16  ;;  %v3661_v8 = vshrl.u32 %v16086_v44, 16 }
 0x50c   :  { %v2457_v50 = vrot.slane %v2454_v11, 4  ;;  %v3225_v55 = vperm.slane %v16148_v60, %v14331_v61  ;;  %v3244_v34 = vperm.slane %v16151_v49, %v14331_v61  ;;  %v2099_v29 = vshrl.u32 %v16115_v24, 16 }
 0x50d   :  { %v3660_v25 = vshrl.u32 %v16081_v46, 16  ;;  %v16175_v63 = vrot.slane %v3231_v57, 4  ;;  %v16178_v62 = vsel %vm2209_vm1, %v3245_v3, %v2508_v23  ;;  %v16181_v54 = vsel %vm2209_vm1, %v3188_v33, %v2430_v18 }
 0x50e   :  { %v3650_v44 = vpack.i.b16 %v3649_v42, %v3648_v0  ;;  %v16184_v5 = vsel %vm2209_vm1, 0, %v2457_v50  ;;  %v3187_v35 = vperm.slane %v16164_v39, %v14331_v61  ;;  %v2104_v32 = vpack.i.b16 %v1927_v37, %v20128_v26  ;;  %v1989_v42 = vpop.permute.xlu0 %1988 }
 0x50f   :  { %v3662_v14 = vpack.i.b16 %v3661_v8, %v3660_v25  ;;  %v16190_v46 = vsel %vm2209_vm1, 0, %v2455_v6  ;;  %v2106_v51 = vshrl.u32 %v1927_v37, 16  ;;  %v2092_v13 = vpack.i.b16 %v1925_v59, %v20129_v43 }
 0x510   :  { %v8171_v56 = vunpack.c.l.b16 %v3650_v44  ;;  %v3193_v17 = vperm.slane %v16181_v54, %v14331_v61  ;;  %v16196_v16 = vsel %vm2209_vm1, %v2457_v50, %v2450_v2  ;;  %v2094_v23 = vshrl.u32 %v1925_v59, 16 }
 0x511   :  { %v8172_v22 = vunpack.c.l.b16 %v3662_v14  ;;  %v3207_v57 = vrot.slane %v16184_v5, 4  ;;  %v2567_v3 = vperm.slane %v2092_v13, %v14331_v61  ;;  %v3119_v11 = vsel %vm2209_vm1, %v3118_v31, %v3111_v41 }
 0x512   :  { %v3136_v18 = vperm.slane %v3132_v1, %v14331_v61  ;;  %v16206_v33 = vperm.slane %v2104_v32, %v14331_v61  ;;  %v20130_v2 = vshrl.u32 %v20129_v43, 16  ;;  %v3123_v0 = vperm.slane %v3119_v11, %v14363_v19 }
 0x513   :  { %v8187_v6 = vpack.c.b16 %v8172_v22, %v8171_v56  ;;  %v20131_v8 = vshrl.u32 %v20128_v26, 16  ;;  %v3157_v52 = vsel %vm2209_vm1, %v15970_v4, %v3149_v48  ;;  %v3174_v41 = vperm.slane %v15965_v58, %v14331_v61 }
 0x514   :  { %v2095_v50 = vpack.i.b16 %v2094_v23, %v20130_v2  ;;  %v3137_v25 = vrot.slane %v3136_v18, 4  ;;  %v2575_v1 = vrot.slane %v2567_v3, 4  ;;  %v3161_v59 = vperm.slane %v3157_v52, %v14363_v19 }
 0x515   :  { %v2107_v37 = vpack.i.b16 %v2106_v51, %v20131_v8  ;;  %11579 = vmatmul.msk.bf16.vlgmr.msra.gmra.mxu2 %vm7783_vm2, %v8187_v6  ;;  %v3666_v44 = vshrl.u32 %v3123_v0, 16  ;;  %v3175_v9 = vrot.slane %v3174_v41, 4  ;;  %v3124_v26 = vrot.slane %v3123_v0, 4 }
 0x516   :  { %v2593_v31 = vperm.slane %v2095_v50, %v14331_v61  ;;  %v3138_v14 = vsel %vm2209_vm1, %v3137_v25, %v3130_v45  ;;  %v2098_v48 = vpack.i.b16 %v1989_v42, %v16115_v24  ;;  %v3678_v32 = vshrl.u32 %v3161_v59, 16 }
 0x517   :  { %v3142_v58 = vperm.slane %v3138_v14, %v14363_v19  ;;  %v3162_v56 = vrot.slane %v3161_v59, 4  ;;  %v3176_v51 = vsel %vm2209_vm1, %v3175_v9, %v3168_v40  ;;  %v16234_v43 = vsel %vm2209_vm1, 0, %v3124_v26 }
 0x518   :  { %v2601_v4 = vrot.slane %v2593_v31, 4  ;;  %v2100_v12 = vshrl.u32 %v1989_v42, 16  ;;  %v2572_v45 = vperm.slane %v2098_v48, %v14331_v61  ;;  %v3180_v13 = vperm.slane %v3176_v51, %v14363_v19  ;;  %v16253_v51 = vpop.permute.xlu2 %1960 }
 0x519   :  { %v3665_v22 = vpack.i.b16 %v3142_v58, %v3123_v0  ;;  %v3667_v24 = vshrl.u32 %v3142_v58, 16  ;;  %v3143_v23 = vrot.slane %v3142_v58, 4  ;;  %v16239_v11 = vsel %vm2209_vm1, 0, %v3162_v56 }
 0x51a   :  { %v2101_v18 = vpack.i.b16 %v2100_v12, %v2099_v29  ;;  %v2573_v6 = vrot.slane %v2572_v45, 4  ;;  %v2576_v47 = vsel %vm2209_vm1, %v2572_v45, %v2575_v1  ;;  %v3677_v2 = vpack.i.b16 %v3180_v13, %v3161_v59 }
 0x51b   :  { %v7737_v40 = vunpack.c.l.b16 %v3665_v22  ;;  %v3668_v50 = vpack.i.b16 %v3667_v24, %v3666_v44  ;;  %v3679_v8 = vshrl.u32 %v3180_v13, 16  ;;  %v3144_v42 = vsel %vm2209_vm1, 0, %v3143_v23 }
 0x51c   :  { %v3181_v25 = vrot.slane %v3180_v13, 4  ;;  %v2574_v52 = vsel %vm2209_vm1, %v2573_v6, %v2567_v3  ;;  %v2584_v0 = vperm.slane %v2576_v47, %v14363_v19  ;;  %v7738_v41 = vunpack.c.l.b16 %v3677_v2  ;;  %v1987_v6 = vpop.permute.xlu1 %1986 }
 0x51d   :  { %v3680_v14 = vpack.i.b16 %v3679_v8, %v3678_v32  ;;  %v7883_v9 = vunpack.c.l.b16 %v3668_v50  ;;  %v3671_v26 = vpack.i.b16 %v3144_v42, %v16234_v43  ;;  %v2580_v1 = vperm.slane %v2574_v52, %v14363_v19 }
 0x51e   :  { %v16247_v29 = vsel %vm2209_vm1, 0, %v3181_v25  ;;  %v2587_v59 = vrot.slane %v2584_v0, 4  ;;  %v2598_v44 = vperm.slane %v2101_v18, %v14331_v61  ;;  %v7752_v48 = vpack.c.b16 %v7738_v41, %v7737_v40 }
 0x51f   :  { %v7884_v58 = vunpack.c.l.b16 %v3680_v14  ;;  %v3683_v3 = vpack.i.b16 %v16247_v29, %v16239_v11  ;;  %v8028_v56 = vunpack.c.l.b16 %v3671_v26  ;;  %v2585_v32 = vrot.slane %v2580_v1, 4 }
 0x520   :  { %v2588_v12 = vsel %vm2209_vm1, 0, %v2587_v59  ;;  %v2599_v45 = vrot.slane %v2598_v44, 4  ;;  %v2602_v13 = vsel %vm2209_vm1, %v2598_v44, %v2601_v4  ;;  %v16258_v22 = vperm.slane %v2107_v37, %v14331_v61  ;;  %11556 = vmatmul.msk.bf16.gmra.mxu3 %vm7783_vm2, %v7752_v48 }
 0x521   :  { %v7898_v24 = vpack.c.b16 %v7884_v58, %v7883_v9  ;;  %v8029_v23 = vunpack.c.l.b16 %v3683_v3  ;;  %v2610_v18 = vperm.slane %v2602_v13, %v14363_v19  ;;  %v2087_v47 = vshrl.u32 %v16157_v10, 16 }
 0x522   :  { %v2586_v2 = vsel %vm2209_vm1, 0, %v2585_v32  ;;  %v2600_v40 = vsel %vm2209_vm1, %v2599_v45, %v2593_v31  ;;  %v3302_v50 = vrot.slane %v2588_v12, 4  ;;  %v3206_v4 = vperm.slane %v16196_v16, %v14331_v61 }
 0x523   :  { %11564 = vmatmul.msk.bf16.gmra.mxu0 %vm7783_vm2, %v7898_v24  ;;  %v8043_v37 = vpack.c.b16 %v8029_v23, %v8028_v56  ;;  %v2606_v8 = vperm.slane %v2600_v40, %v14363_v19  ;;  %v2613_v25 = vrot.slane %v2610_v18, 4  ;;  %v16272_v52 = vrot.slane %v3193_v17, 4  ;;  %v1931_v23 = vpop.permute.xlu2 %1930 }
 0x524   :  { %v3303_v0 = vsel %vm2209_vm1, %v3302_v50, %v2586_v2  ;;  %v2086_v41 = vpack.i.b16 %v1987_v6, %v16157_v10  ;;  %v2088_v31 = vshrl.u32 %v1987_v6, 16  ;;  %v16280_v14 = vsel %vm2209_vm1, %v3207_v57, %v16190_v46  ;;  %v20132_v50 = vld [vmem:[#allocation79_spill] sm:$0xff] }
 0x525   :  { %v2627_v9 = vrot.slane %v16206_v33, 4  ;;  %v2653_v26 = vrot.slane %v16258_v22, 4  ;;  %11572 = vmatmul.msk.bf16.gmra.mxu1 %vm7783_vm2, %v8043_v37  ;;  %v2614_v54 = vsel %vm2209_vm1, 0, %v2613_v25  ;;  %v2611_v17 = vrot.slane %v2606_v8, 4 }
 0x526   :  { %v16287_v44 = vsel %vm2209_vm1, %v2587_v59, %v2580_v1  ;;  %v2089_v10 = vpack.i.b16 %v2088_v31, %v2087_v47  ;;  %v2520_v48 = vperm.slane %v2086_v41, %v14331_v61  ;;  %v3307_v5 = vperm.slane %v3303_v0, %v14331_v61  ;;  %v16299_v59 = vpop.permute.xlu0 %1958 }
 0x527   :  { %v16292_v46 = vsel %vm2209_vm1, %v2613_v25, %v2606_v8  ;;  %v3672_v57 = vshrl.u32 %v16234_v43, 16  ;;  %v3673_v58 = vshrl.u32 %v3144_v42, 16  ;;  %v3321_v3 = vrot.slane %v2614_v54, 4 }
 0x528   :  { %v2521_v56 = vrot.slane %v2520_v48, 4  ;;  %v2524_v32 = vsel %vm2209_vm1, %v2520_v48, %v2523_v15  ;;  %v2546_v1 = vperm.slane %v2089_v10, %v14331_v61  ;;  %v3684_v13 = vshrl.u32 %v16239_v11, 16  ;;  %v1929_v10 = vpop.permute.xlu1 %1928 }
 0x529   :  { %v2532_v12 = vperm.slane %v2524_v32, %v14363_v19  ;;  %v3674_v45 = vpack.i.b16 %v3673_v58, %v3672_v57  ;;  %v3685_v24 = vshrl.u32 %v16247_v29, 16  ;;  %v2612_v43 = vsel %vm2209_vm1, 0, %v2611_v17 }
 0x52a   :  { %v2522_v42 = vsel %vm2209_vm1, %v2521_v56, %v16047_v7  ;;  %v2547_v18 = vrot.slane %v2546_v1, 4  ;;  %v2550_v15 = vsel %vm2209_vm1, %v2546_v1, %v2549_v21  ;;  %v2128_v37 = vpack.i.b16 %v1931_v23, %v20132_v50 }
 0x52b   :  { %v2528_v6 = vperm.slane %v2522_v42, %v14363_v19  ;;  %v2535_v47 = vrot.slane %v2532_v12, 4  ;;  %v2558_v2 = vperm.slane %v2550_v15, %v14363_v19  ;;  %v3686_v40 = vpack.i.b16 %v3685_v24, %v3684_v13  ;;  %v20134_v42 = vld [vmem:[#allocation58_spill] sm:$0xff] }
 0x52c   :  { %v2548_v11 = vsel %vm2209_vm1, %v2547_v18, %v16119_v30  ;;  %v8173_v29 = vunpack.c.l.b16 %v3674_v45  ;;  %v2130_v8 = vshrl.u32 %v1931_v23, 16  ;;  %v3301_v21 = vperm.slane %v16287_v44, %v14331_v61 }
 0x52d   :  { %v2533_v25 = vrot.slane %v2528_v6, 4  ;;  %v2536_v7 = vsel %vm2209_vm1, 0, %v2535_v47  ;;  %v2554_v0 = vperm.slane %v2548_v11, %v14363_v19  ;;  %v2561_v41 = vrot.slane %v2558_v2, 4 }
 0x52e   :  { %v16320_v31 = vsel %vm2209_vm1, %v2535_v47, %v2528_v6  ;;  %v3264_v54 = vrot.slane %v2536_v7, 4  ;;  %v8174_v17 = vunpack.c.l.b16 %v3686_v40  ;;  %v16322_v30 = vrot.slane %v3307_v5, 4  ;;  %v1993_v6 = vpop.permute.xlu0 %1992 }
 0x52f   :  { %v3320_v48 = vperm.slane %v16292_v46, %v14331_v61  ;;  %v2123_v57 = vshrl.u32 %v16253_v51, 16  ;;  %v2534_v58 = vsel %vm2209_vm1, 0, %v2533_v25  ;;  %v16329_v56 = vsel %vm2209_vm1, %v3321_v3, %v2612_v43 }
 0x530   :  { %v2559_v32 = vrot.slane %v2554_v0, 4  ;;  %v16332_v1 = vsel %vm2209_vm1, 0, %v2561_v41  ;;  %v8188_v12 = vpack.c.b16 %v8174_v17, %v8173_v29  ;;  %v3263_v45 = vperm.slane %v16320_v31, %v14331_v61 }
 0x531   :  { %v2111_v5 = vshrl.u32 %v16299_v59, 16  ;;  %v20133_v13 = vshrl.u32 %v20132_v50, 16  ;;  %v16342_v23 = vperm.slane %v2128_v37, %v14331_v61  ;;  %v16345_v3 = vsel %vm2209_vm1, %v3264_v54, %v2534_v58 }
 0x532   :  { %v16348_v43 = vsel %vm2209_vm1, %v2561_v41, %v2554_v0  ;;  %11580 = vmatmul.msk.bf16.gmra.mxu2 %vm7783_vm2, %v8188_v12  ;;  %v2116_v18 = vpack.i.b16 %v1929_v10, %v20134_v42  ;;  %v2118_v15 = vshrl.u32 %v1929_v10, 16  ;;  %v3283_v47 = vrot.slane %v16332_v1, 4 }
 0x533   :  { %v16339_v24 = vpack.i.b16 %v2130_v8, %v20133_v13  ;;  %v3195_v2 = vsel %vm2209_vm1, %v16272_v52, %v3187_v35  ;;  %v3212_v40 = vperm.slane %v16280_v14, %v14331_v61  ;;  %v3233_v11 = vsel %vm2209_vm1, %v16175_v63, %v3225_v55 }
 0x534   :  { %v16366_v29 = vsel %vm2209_vm1, 0, %v2559_v32  ;;  %v20135_v50 = vshrl.u32 %v20134_v42, 16  ;;  %v2671_v39 = vperm.slane %v2116_v18, %v14331_v61  ;;  %v3199_v8 = vperm.slane %v3195_v2, %v14363_v19  ;;  %v16384_v32 = vpop.permute.xlu1 %1990 }
 0x535   :  { %v3213_v35 = vrot.slane %v3212_v40, 4  ;;  %v3237_v52 = vperm.slane %v3233_v11, %v14363_v19  ;;  %v3250_v14 = vperm.slane %v16178_v62, %v14331_v61  ;;  %v2122_v60 = vpack.i.b16 %v1993_v6, %v16253_v51 }
 0x536   :  { %v2119_v37 = vpack.i.b16 %v2118_v15, %v20135_v50  ;;  %v3269_v55 = vperm.slane %v16345_v3, %v14331_v61  ;;  %v2679_v63 = vrot.slane %v2671_v39, 4  ;;  %v3200_v7 = vrot.slane %v3199_v8, 4 }
 0x537   :  { %v3214_v0 = vsel %vm2209_vm1, %v3213_v35, %v3206_v4  ;;  %v3251_v41 = vrot.slane %v3250_v14, 4  ;;  %v3690_v54 = vshrl.u32 %v3199_v8, 16  ;;  %v3238_v17 = vrot.slane %v3237_v52, 4 }
 0x538   :  { %v2697_v25 = vperm.slane %v2119_v37, %v14331_v61  ;;  %v3218_v62 = vperm.slane %v3214_v0, %v14363_v19  ;;  %v3702_v58 = vshrl.u32 %v3237_v52, 16  ;;  %v2124_v51 = vshrl.u32 %v1993_v6, 16 }
 0x539   :  { %v3252_v12 = vsel %vm2209_vm1, %v3251_v41, %v3244_v34  ;;  %v16391_v13 = vsel %vm2209_vm1, 0, %v3200_v7  ;;  %v16394_v16 = vsel %vm2209_vm1, 0, %v3238_v17  ;;  %v2676_v4 = vperm.slane %v2122_v60, %v14331_v61 }
 0x53a   :  { %v2705_v10 = vrot.slane %v2697_v25, 4  ;;  %v3256_v42 = vperm.slane %v3252_v12, %v14363_v19  ;;  %v3689_v18 = vpack.i.b16 %v3218_v62, %v3199_v8  ;;  %v3691_v15 = vshrl.u32 %v3218_v62, 16 }
 0x53b   :  { %v3219_v6 = vrot.slane %v3218_v62, 4  ;;  %v2125_v2 = vpack.i.b16 %v2124_v51, %v2123_v57  ;;  %v2677_v40 = vrot.slane %v2676_v4, 4  ;;  %v2680_v11 = vsel %vm2209_vm1, %v2676_v4, %v2679_v63 }
 0x53c   :  { %v2110_v49 = vpack.i.b16 %v16384_v32, %v16299_v59  ;;  %v3701_v34 = vpack.i.b16 %v3256_v42, %v3237_v52  ;;  %v7739_v50 = vunpack.c.l.b16 %v3689_v18  ;;  %v3692_v37 = vpack.i.b16 %v3691_v15, %v3690_v54 }
 0x53d   :  { %v3703_v35 = vshrl.u32 %v3256_v42, 16  ;;  %v3220_v14 = vsel %vm2209_vm1, 0, %v3219_v6  ;;  %v3257_v7 = vrot.slane %v3256_v42, 4  ;;  %v2678_v60 = vsel %vm2209_vm1, %v2677_v40, %v2671_v39  ;;  %v16414_v6 = vpop.permute.xlu2 %1964 }
 0x53e   :  { %v2688_v8 = vperm.slane %v2680_v11, %v14363_v19  ;;  %v7740_v0 = vunpack.c.l.b16 %v3701_v34  ;;  %v7885_v57 = vunpack.c.l.b16 %v3692_v37  ;;  %v3695_v17 = vpack.i.b16 %v3220_v14, %v16391_v13 }
 0x53f   :  { %v3704_v41 = vpack.i.b16 %v3703_v35, %v3702_v58  ;;  %v16406_v63 = vsel %vm2209_vm1, 0, %v3257_v7  ;;  %v2684_v52 = vperm.slane %v2678_v60, %v14363_v19  ;;  %v2702_v54 = vperm.slane %v2125_v2, %v14331_v61 }
 0x540   :  { %v2691_v62 = vrot.slane %v2688_v8, 4  ;;  %v7753_v51 = vpack.c.b16 %v7740_v0, %v7739_v50  ;;  %v3707_v39 = vpack.i.b16 %v16406_v63, %v16394_v16  ;;  %v8030_v4 = vunpack.c.l.b16 %v3695_v17 }
 0x541   :  { %v7886_v12 = vunpack.c.l.b16 %v3704_v41  ;;  %v2689_v42 = vrot.slane %v2684_v52, 4  ;;  %v2703_v18 = vrot.slane %v2702_v54, 4  ;;  %v2706_v15 = vsel %vm2209_vm1, %v2702_v54, %v2705_v10 }
 0x542   :  { %v2692_v58 = vsel %vm2209_vm1, 0, %v2691_v62  ;;  %v16418_v40 = vperm.slane %v16339_v24, %v14331_v61  ;;  %11557 = vmatmul.msk.bf16.gmra.mxu3 %vm7783_vm2, %v7753_v51  ;;  %v8031_v11 = vunpack.c.l.b16 %v3707_v39  ;;  %v2714_v34 = vperm.slane %v2706_v15, %v14363_v19 }
 0x543   :  { %v7899_v2 = vpack.c.b16 %v7886_v12, %v7885_v57  ;;  %v3282_v50 = vperm.slane %v16348_v43, %v14331_v61  ;;  %v2690_v37 = vsel %vm2209_vm1, 0, %v2689_v42  ;;  %v2704_v35 = vsel %vm2209_vm1, %v2703_v18, %v2697_v25 }
 0x544   :  { %v3378_v10 = vrot.slane %v2692_v58, 4  ;;  %v8044_v7 = vpack.c.b16 %v8031_v11, %v8030_v4  ;;  %v2710_v24 = vperm.slane %v2704_v35, %v14363_v19  ;;  %v2717_v60 = vrot.slane %v2714_v34, 4  ;;  %v16462_v58 = vpop.permute.xlu0 %1962  ;;  %v1933_v11 = vpop.permute.xlu1 %1932 }
 0x545   :  { %11565 = vmatmul.msk.bf16.gmra.mxu0 %vm7783_vm2, %v7899_v2  ;;  %v2112_v8 = vshrl.u32 %v16384_v32, 16  ;;  %v2731_v0 = vrot.slane %v16342_v23, 4  ;;  %v2624_v57 = vperm.slane %v2110_v49, %v14331_v61  ;;  %v3697_v17 = vshrl.u32 %v3220_v14, 16  ;;  %v1935_v2 = vpop.permute.xlu2 %1934 }
 0x546   :  { %v3379_v41 = vsel %vm2209_vm1, %v3378_v10, %v2690_v37  ;;  %v3270_v25 = vrot.slane %v3269_v55, 4  ;;  %v16439_v54 = vsel %vm2209_vm1, %v3283_v47, %v16366_v29  ;;  %v2757_v51 = vrot.slane %v16418_v40, 4  ;;  %11573 = vmatmul.msk.bf16.gmra.mxu1 %vm7783_vm2, %v8044_v7 }
 0x547   :  { %v3696_v32 = vshrl.u32 %v16391_v13, 16  ;;  %v2715_v12 = vrot.slane %v2710_v24, 4  ;;  %v2718_v49 = vsel %vm2209_vm1, 0, %v2717_v60  ;;  %v2113_v14 = vpack.i.b16 %v2112_v8, %v2111_v5 }
 0x548   :  { %v2625_v3 = vrot.slane %v2624_v57, 4  ;;  %v16448_v55 = vsel %vm2209_vm1, %v2691_v62, %v2684_v52  ;;  %v3383_v1 = vperm.slane %v3379_v41, %v14331_v61  ;;  %v2147_v47 = vshrl.u32 %v16414_v6, 16 }
 0x549   :  { %v2628_v29 = vsel %vm2209_vm1, %v2624_v57, %v2627_v9  ;;  %v2650_v59 = vperm.slane %v2113_v14, %v14331_v61  ;;  %v3698_v5 = vpack.i.b16 %v3697_v17, %v3696_v32  ;;  %v3397_v4 = vrot.slane %v2718_v49, 4 }
 0x54a   :  { %v2626_v13 = vsel %vm2209_vm1, %v2625_v3, %v16206_v33  ;;  %v2636_v39 = vperm.slane %v2628_v29, %v14363_v19  ;;  %v3708_v62 = vshrl.u32 %v16394_v16, 16  ;;  %v3709_v42 = vshrl.u32 %v16406_v63, 16  ;;  %v20137_v29 = vld [vmem:[#allocation59_spill] sm:$0xff] }
 0x54b   :  { %v2632_v52 = vperm.slane %v2626_v13, %v14363_v19  ;;  %v2716_v18 = vsel %vm2209_vm1, 0, %v2715_v12  ;;  %v2651_v15 = vrot.slane %v2650_v59, 4  ;;  %v2654_v33 = vsel %vm2209_vm1, %v2650_v59, %v2653_v26 }
 0x54c   :  { %v2639_v9 = vrot.slane %v2636_v39, 4  ;;  %v16469_v34 = vsel %vm2209_vm1, %v2717_v60, %v2710_v24  ;;  %v2662_v16 = vperm.slane %v2654_v33, %v14363_v19  ;;  %v3710_v35 = vpack.i.b16 %v3709_v42, %v3708_v62  ;;  %v20136_v60 = vld [vmem:[#allocation82_spill] sm:$0xff] }
 0x54d   :  { %v2637_v37 = vrot.slane %v2632_v52, 4  ;;  %v3377_v63 = vperm.slane %v16448_v55, %v14331_v61  ;;  %v2652_v7 = vsel %vm2209_vm1, %v2651_v15, %v16258_v22  ;;  %v8175_v8 = vunpack.c.l.b16 %v3698_v5 }
 0x54e   :  { %v2640_v10 = vsel %vm2209_vm1, 0, %v2639_v9  ;;  %v16478_v26 = vsel %vm2209_vm1, %v3397_v4, %v2716_v18  ;;  %v2658_v41 = vperm.slane %v2652_v7, %v14363_v19  ;;  %v2665_v24 = vrot.slane %v2662_v16, 4 }
 0x54f   :  { %v2152_v57 = vpack.i.b16 %v1935_v2, %v20136_v60  ;;  %v3396_v17 = vperm.slane %v16469_v34, %v14331_v61  ;;  %v16485_v32 = vsel %vm2209_vm1, %v2639_v9, %v2632_v52  ;;  %v3340_v12 = vrot.slane %v2640_v10, 4  ;;  %v1997_v10 = vpop.permute.xlu0 %1996 }
 0x550   :  { %v8176_v49 = vunpack.c.l.b16 %v3710_v35  ;;  %v16487_v14 = vrot.slane %v3383_v1, 4  ;;  %v2638_v22 = vsel %vm2209_vm1, 0, %v2637_v37  ;;  %v16491_v3 = vsel %vm2209_vm1, %v2665_v24, %v2658_v41 }
 0x551   :  { %v2140_v13 = vpack.i.b16 %v1933_v11, %v20137_v29  ;;  %v3402_v39 = vperm.slane %v16478_v26, %v14331_v61  ;;  %v2663_v59 = vrot.slane %v2658_v41, 4  ;;  %v16497_v5 = vsel %vm2209_vm1, 0, %v2665_v24 }
 0x552   :  { %v8189_v4 = vpack.c.b16 %v8176_v49, %v8175_v8  ;;  %v3339_v52 = vperm.slane %v16485_v32, %v14331_v61  ;;  %v2135_v1 = vshrl.u32 %v16462_v58, 16  ;;  %v2154_v62 = vshrl.u32 %v1935_v2, 16 }
 0x553   :  { %v16503_v42 = vperm.slane %v2152_v57, %v14331_v61  ;;  %v16506_v18 = vsel %vm2209_vm1, %v3340_v12, %v2638_v22  ;;  %v3358_v9 = vperm.slane %v16491_v3, %v14331_v61  ;;  %v2142_v15 = vshrl.u32 %v1933_v11, 16 }
 0x554   :  { %11581 = vmatmul.msk.bf16.gmra.mxu2 %vm7783_vm2, %v8189_v4  ;;  %v3271_v33 = vsel %vm2209_vm1, %v3270_v25, %v3263_v45  ;;  %v3359_v37 = vrot.slane %v16497_v5, 4  ;;  %v2775_v2 = vperm.slane %v2140_v13, %v14331_v61  ;;  %v3288_v35 = vperm.slane %v16439_v54, %v14331_v61  ;;  %v1995_v25 = vpop.permute.xlu1 %1994 }
 0x555   :  { %v16518_v16 = vperm.slane %v3271_v33, %v14363_v19  ;;  %v2664_v7 = vsel %vm2209_vm1, 0, %v2663_v59  ;;  %v20138_v11 = vshrl.u32 %v20137_v29, 16  ;;  %v3309_v31 = vsel %vm2209_vm1, %v16322_v30, %v3301_v21 }
 0x556   :  { %v3326_v45 = vperm.slane %v16329_v56, %v14331_v61  ;;  %v3345_v41 = vperm.slane %v16506_v18, %v14331_v61  ;;  %v20139_v54 = vshrl.u32 %v20136_v60, 16  ;;  %v3289_v57 = vrot.slane %v3288_v35, 4 }
 0x557   :  { %v2143_v8 = vpack.i.b16 %v2142_v15, %v20138_v11  ;;  %v16537_v12 = vperm.slane %v3309_v31, %v14363_v19  ;;  %v2146_v22 = vpack.i.b16 %v1997_v10, %v16414_v6  ;;  %v2148_v21 = vshrl.u32 %v1997_v10, 16 }
 0x558   :  { %v2155_v24 = vpack.i.b16 %v2154_v62, %v20139_v54  ;;  %v3327_v44 = vrot.slane %v3326_v45, 4  ;;  %v2783_v30 = vrot.slane %v2775_v2, 4  ;;  %v3290_v56 = vsel %vm2209_vm1, %v3289_v57, %v3282_v50 }
 0x559   :  { %v2801_v49 = vperm.slane %v2143_v8, %v14331_v61  ;;  %v3714_v29 = vshrl.u32 %v16518_v16, 16  ;;  %v2134_v60 = vpack.i.b16 %v1995_v25, %v16462_v58  ;;  %v16548_v13 = vperm.slane %v3290_v56, %v14363_v19 }
 0x55a   :  { %v3328_v59 = vsel %vm2209_vm1, %v3327_v44, %v3320_v48  ;;  %v3726_v5 = vshrl.u32 %v16537_v12, 16  ;;  %v2149_v4 = vpack.i.b16 %v2148_v21, %v2147_v47  ;;  %v2780_v62 = vperm.slane %v2146_v22, %v14331_v61 }
 0x55b   :  { %v2809_v43 = vrot.slane %v2801_v49, 4  ;;  %v16558_v50 = vperm.slane %v3328_v59, %v14363_v19  ;;  %v2136_v18 = vshrl.u32 %v1995_v25, 16  ;;  %v3713_v15 = vpack.i.b16 %v16548_v13, %v16518_v16 }
 0x55c   :  { %v3715_v33 = vshrl.u32 %v16548_v13, 16  ;;  %v2806_v46 = vperm.slane %v2149_v4, %v14331_v61  ;;  %v2728_v48 = vperm.slane %v2134_v60, %v14331_v61  ;;  %v2781_v35 = vrot.slane %v2780_v62, 4 }
 0x55d   :  { %v3725_v6 = vpack.i.b16 %v16558_v50, %v16537_v12  ;;  %v3727_v47 = vshrl.u32 %v16558_v50, 16  ;;  %v2784_v10 = vsel %vm2209_vm1, %v2780_v62, %v2783_v30  ;;  %v7741_v11 = vunpack.c.l.b16 %v3713_v15 }
 0x55e   :  { %v3716_v8 = vpack.i.b16 %v3715_v33, %v3714_v29  ;;  %v2792_v31 = vperm.slane %v2784_v10, %v14363_v19  ;;  %v2807_v45 = vrot.slane %v2806_v46, 4  ;;  %v2782_v57 = vsel %vm2209_vm1, %v2781_v35, %v2775_v2 }
 0x55f   :  { %v7742_v25 = vunpack.c.l.b16 %v3725_v6  ;;  %v3728_v54 = vpack.i.b16 %v3727_v47, %v3726_v5  ;;  %v2810_v44 = vsel %vm2209_vm1, %v2806_v46, %v2809_v43  ;;  %v2788_v21 = vperm.slane %v2782_v57, %v14363_v19  ;;  %v16586_v46 = vpop.permute.xlu2 %1968 }
 0x560   :  { %v7887_v22 = vunpack.c.l.b16 %v3716_v8  ;;  %v2795_v56 = vrot.slane %v2792_v31, 4  ;;  %v2808_v60 = vsel %vm2209_vm1, %v2807_v45, %v2801_v49  ;;  %v2818_v29 = vperm.slane %v2810_v44, %v14363_v19 }
 0x561   :  { %v7754_v59 = vpack.c.b16 %v7742_v25, %v7741_v11  ;;  %v7888_v4 = vunpack.c.l.b16 %v3728_v54  ;;  %v2814_v30 = vperm.slane %v2808_v60, %v14363_v19  ;;  %v2835_v62 = vrot.slane %v16503_v42, 4  ;;  %v20141_v60 = vld [vmem:[#allocation60_spill] sm:$0xff] }
 0x562   :  { %v16579_v5 = vperm.slane %v2155_v24, %v14331_v61  ;;  %v2793_v2 = vrot.slane %v2788_v21, 4  ;;  %v2796_v43 = vsel %vm2209_vm1, 0, %v2795_v56  ;;  %v16583_v15 = vsel %vm2209_vm1, %v3359_v37, %v2664_v7 }
 0x563   :  { %11558 = vmatmul.msk.bf16.gmra.mxu3 %vm7783_vm2, %v7754_v59  ;;  %v7900_v49 = vpack.c.b16 %v7888_v4, %v7887_v22  ;;  %v2821_v33 = vrot.slane %v2818_v29, 4  ;;  %v2137_v6 = vpack.i.b16 %v2136_v18, %v2135_v1  ;;  %v16590_v47 = vrot.slane %v3345_v41, 4 }
 0x564   :  { %v3454_v35 = vrot.slane %v2796_v43, 4  ;;  %v2729_v24 = vrot.slane %v2728_v48, 4  ;;  %v2732_v10 = vsel %vm2209_vm1, %v2728_v48, %v2731_v0  ;;  %v2794_v37 = vsel %vm2209_vm1, 0, %v2793_v2 }
 0x565   :  { %11566 = vmatmul.msk.bf16.gmra.mxu0 %vm7783_vm2, %v7900_v49  ;;  %v2819_v7 = vrot.slane %v2814_v30, 4  ;;  %v16598_v11 = vsel %vm2209_vm1, %v2795_v56, %v2788_v21  ;;  %v2740_v8 = vperm.slane %v2732_v10, %v14363_v19  ;;  %v2861_v58 = vrot.slane %v16579_v5, 4 }
 0x566   :  { %v2822_v1 = vsel %vm2209_vm1, 0, %v2821_v33  ;;  %v2171_v41 = vshrl.u32 %v16586_v46, 16  ;;  %v2730_v18 = vsel %vm2209_vm1, %v2729_v24, %v16342_v23  ;;  %v16607_v0 = vsel %vm2209_vm1, %v2821_v33, %v2814_v30 }
 0x567   :  { %v2736_v48 = vperm.slane %v2730_v18, %v14363_v19  ;;  %v2743_v31 = vrot.slane %v2740_v8, 4  ;;  %v2754_v45 = vperm.slane %v2137_v6, %v14331_v61  ;;  %v3453_v25 = vperm.slane %v16598_v11, %v14331_v61 }
 0x568   :  { %v3455_v54 = vsel %vm2209_vm1, %v3454_v35, %v2794_v37  ;;  %v3276_v57 = vrot.slane %v16518_v16, 4  ;;  %v3295_v44 = vrot.slane %v16548_v13, 4  ;;  %v2820_v22 = vsel %vm2209_vm1, 0, %v2819_v7  ;;  %v16632_v35 = vpop.permute.xlu0 %1966 }
 0x569   :  { %v3473_v23 = vrot.slane %v2822_v1, 4  ;;  %v2741_v21 = vrot.slane %v2736_v48, 4  ;;  %v2744_v56 = vsel %vm2209_vm1, 0, %v2743_v31  ;;  %v2755_v59 = vrot.slane %v2754_v45, 4 }
 0x56a   :  { %v2758_v4 = vsel %vm2209_vm1, %v2754_v45, %v2757_v51  ;;  %v3314_v30 = vrot.slane %v16537_v12, 4  ;;  %v3459_v16 = vperm.slane %v3455_v54, %v14331_v61  ;;  %v3416_v29 = vrot.slane %v2744_v56, 4  ;;  %v1937_v54 = vpop.permute.xlu1 %1936 }
 0x56b   :  { %v2766_v13 = vperm.slane %v2758_v4, %v14363_v19  ;;  %v3296_v2 = vsel %vm2209_vm1, 0, %v3295_v44  ;;  %v2742_v43 = vsel %vm2209_vm1, 0, %v2741_v21  ;;  %v2756_v49 = vsel %vm2209_vm1, %v2755_v59, %v16418_v40 }
 0x56c   :  { %v3277_v33 = vsel %vm2209_vm1, 0, %v3276_v57  ;;  %v3333_v6 = vrot.slane %v16558_v50, 4  ;;  %v16635_v51 = vsel %vm2209_vm1, %v3473_v23, %v2820_v22  ;;  %v2762_v12 = vperm.slane %v2756_v49, %v14363_v19  ;;  %v1939_v22 = vpop.permute.xlu2 %1938  ;;  %v20140_v49 = vld [vmem:[#allocation64_spill] sm:$0xff] }
 0x56d   :  { %v2769_v24 = vrot.slane %v2766_v13, 4  ;;  %v3719_v10 = vpack.i.b16 %v3296_v2, %v3277_v33  ;;  %v16639_v37 = vsel %vm2209_vm1, %v2743_v31, %v2736_v48  ;;  %v3315_v7 = vsel %vm2209_vm1, 0, %v3314_v30 }
 0x56e   :  { %v3334_v40 = vsel %vm2209_vm1, 0, %v3333_v6  ;;  %v3721_v8 = vshrl.u32 %v3296_v2, 16  ;;  %v2767_v1 = vrot.slane %v2762_v12, 4  ;;  %v16645_v18 = vsel %vm2209_vm1, %v3416_v29, %v2742_v43 }
 0x56f   :  { %v2770_v50 = vsel %vm2209_vm1, 0, %v2769_v24  ;;  %v3720_v45 = vshrl.u32 %v3277_v33, 16  ;;  %v16647_v57 = vrot.slane %v3459_v16, 4  ;;  %v3478_v44 = vperm.slane %v16635_v51, %v14331_v61 }
 0x570   :  { %v3731_v48 = vpack.i.b16 %v3334_v40, %v3315_v7  ;;  %v8032_v31 = vunpack.c.l.b16 %v3719_v10  ;;  %v3415_v23 = vperm.slane %v16639_v37, %v14331_v61  ;;  %v3732_v56 = vshrl.u32 %v3315_v7, 16 }
 0x571   :  { %v3722_v21 = vpack.i.b16 %v3721_v8, %v3720_v45  ;;  %v3733_v59 = vshrl.u32 %v3334_v40, 16  ;;  %v3421_v4 = vperm.slane %v16645_v18, %v14331_v61  ;;  %v16656_v30 = vsel %vm2209_vm1, %v2769_v24, %v2762_v12 }
 0x572   :  { %v3435_v16 = vrot.slane %v2770_v50, 4  ;;  %v8033_v13 = vunpack.c.l.b16 %v3731_v48  ;;  %v2768_v29 = vsel %vm2209_vm1, 0, %v2767_v1  ;;  %v2176_v33 = vpack.i.b16 %v1939_v22, %v20140_v49  ;;  %v2001_v48 = vpop.permute.xlu0 %2000 }
 0x573   :  { %v3734_v2 = vpack.i.b16 %v3733_v59, %v3732_v56  ;;  %v8177_v43 = vunpack.c.l.b16 %v3722_v21  ;;  %v2178_v10 = vshrl.u32 %v1939_v22, 16  ;;  %v2165_v8 = vshrl.u32 %v20141_v60, 16 }
 0x574   :  { %v8045_v6 = vpack.c.b16 %v8033_v13, %v8032_v31  ;;  %v2164_v7 = vpack.i.b16 %v1937_v54, %v20141_v60  ;;  %v2166_v45 = vshrl.u32 %v1937_v54, 16  ;;  %v3347_v12 = vsel %vm2209_vm1, %v16590_v47, %v3339_v52  ;;  %v1999_v13 = vpop.permute.xlu1 %1998 }
 0x575   :  { %v8178_v40 = vunpack.c.l.b16 %v3734_v2  ;;  %v3364_v24 = vperm.slane %v16583_v15, %v14331_v61  ;;  %v16670_v1 = vsel %vm2209_vm1, %v3435_v16, %v2768_v29  ;;  %v2159_v50 = vshrl.u32 %v16632_v35, 16 }
 0x576   :  { %11574 = vmatmul.msk.bf16.gmra.mxu1 %vm7783_vm2, %v8045_v6  ;;  %v2879_v60 = vperm.slane %v2164_v7, %v14331_v61  ;;  %v16676_v54 = vperm.slane %v3347_v12, %v14363_v19  ;;  %v2167_v31 = vpack.i.b16 %v2166_v45, %v2165_v8  ;;  %v3385_v52 = vsel %vm2209_vm1, %v16487_v14, %v3377_v63 }
 0x577   :  { %v8190_v32 = vpack.c.b16 %v8178_v40, %v8177_v43  ;;  %v3365_v22 = vrot.slane %v3364_v24, 4  ;;  %v20142_v15 = vshrl.u32 %v20140_v49, 16  ;;  %v16686_v21 = vperm.slane %v2176_v33, %v14331_v61 }
 0x578   :  { %v16689_v56 = vperm.slane %v3385_v52, %v14363_v19  ;;  %v3403_v59 = vrot.slane %v3402_v39, 4  ;;  %v2887_v16 = vrot.slane %v2879_v60, 4  ;;  %v2905_v55 = vperm.slane %v2167_v31, %v14331_v61 }
 0x579   :  { %v2179_v47 = vpack.i.b16 %v2178_v10, %v20142_v15  ;;  %11582 = vmatmul.msk.bf16.gmra.mxu2 %vm7783_vm2, %v8190_v32  ;;  %v3366_v63 = vsel %vm2209_vm1, %v3365_v22, %v3358_v9  ;;  %v2170_v14 = vpack.i.b16 %v2001_v48, %v16586_v46  ;;  %v3738_v39 = vshrl.u32 %v16676_v54, 16 }
 0x57a   :  { %v16702_v29 = vperm.slane %v3366_v63, %v14363_v19  ;;  %v3404_v26 = vsel %vm2209_vm1, %v3403_v59, %v3396_v17  ;;  %v2172_v2 = vshrl.u32 %v2001_v48, 16  ;;  %v2913_v43 = vrot.slane %v2905_v55, 4 }
 0x57b   :  { %v16710_v49 = vperm.slane %v3404_v26, %v14363_v19  ;;  %v3750_v3 = vshrl.u32 %v16689_v56, 16  ;;  %v2884_v9 = vperm.slane %v2170_v14, %v14331_v61  ;;  %v2158_v17 = vpack.i.b16 %v1999_v13, %v16632_v35 }
 0x57c   :  { %v3737_v33 = vpack.i.b16 %v16702_v29, %v16676_v54  ;;  %v3739_v6 = vshrl.u32 %v16702_v29, 16  ;;  %v2173_v34 = vpack.i.b16 %v2172_v2, %v2171_v41  ;;  %v2160_v41 = vshrl.u32 %v1999_v13, 16 }
 0x57d   :  { %v3749_v10 = vpack.i.b16 %v16710_v49, %v16689_v56  ;;  %v3751_v8 = vshrl.u32 %v16710_v49, 16  ;;  %v2885_v7 = vrot.slane %v2884_v9, 4  ;;  %v2888_v40 = vsel %vm2209_vm1, %v2884_v9, %v2887_v16 }
 0x57e   :  { %v7743_v45 = vunpack.c.l.b16 %v3737_v33  ;;  %v3740_v12 = vpack.i.b16 %v3739_v6, %v3738_v39  ;;  %v2896_v24 = vperm.slane %v2888_v40, %v14363_v19  ;;  %v2910_v48 = vperm.slane %v2173_v34, %v14331_v61 }
 0x57f   :  { %v7744_v32 = vunpack.c.l.b16 %v3749_v10  ;;  %v3752_v31 = vpack.i.b16 %v3751_v8, %v3750_v3  ;;  %v2886_v46 = vsel %vm2209_vm1, %v2885_v7, %v2879_v60  ;;  %v2161_v14 = vpack.i.b16 %v2160_v41, %v2159_v50 }
 0x580   :  { %v7889_v35 = vunpack.c.l.b16 %v3740_v12  ;;  %v2892_v22 = vperm.slane %v2886_v46, %v14363_v19  ;;  %v2899_v52 = vrot.slane %v2896_v24, 4  ;;  %v2911_v15 = vrot.slane %v2910_v48, 4  ;;  %v16757_v12 = vpop.permute.xlu2 %1972 }
 0x581   :  { %v7755_v59 = vpack.c.b16 %v7744_v32, %v7743_v45  ;;  %v7890_v63 = vunpack.c.l.b16 %v3752_v31  ;;  %v2914_v16 = vsel %vm2209_vm1, %v2910_v48, %v2913_v43  ;;  %v16733_v60 = vperm.slane %v2179_v47, %v14331_v61 }
 0x582   :  { %v2897_v26 = vrot.slane %v2892_v22, 4  ;;  %v2900_v39 = vsel %vm2209_vm1, 0, %v2899_v52  ;;  %v2912_v2 = vsel %vm2209_vm1, %v2911_v15, %v2905_v55  ;;  %v2922_v3 = vperm.slane %v2914_v16, %v14363_v19 }
 0x583   :  { %11559 = vmatmul.msk.bf16.gmra.mxu3 %vm7783_vm2, %v7755_v59  ;;  %v7901_v13 = vpack.c.b16 %v7890_v63, %v7889_v35  ;;  %v2918_v9 = vperm.slane %v2912_v2, %v14363_v19  ;;  %v3530_v33 = vrot.slane %v2900_v39, 4  ;;  %v16740_v50 = vrot.slane %v3421_v4, 4 }
 0x584   :  { %v2898_v43 = vsel %vm2209_vm1, 0, %v2897_v26  ;;  %v2925_v6 = vrot.slane %v2922_v3, 4  ;;  %v2832_v55 = vperm.slane %v2158_v17, %v14331_v61  ;;  %v3434_v47 = vperm.slane %v16656_v30, %v14331_v61 }
 0x585   :  { %v3440_v34 = vperm.slane %v16670_v1, %v14331_v61  ;;  %11567 = vmatmul.msk.bf16.gmra.mxu0 %vm7783_vm2, %v7901_v13  ;;  %v2923_v10 = vrot.slane %v2918_v9, 4  ;;  %v2858_v8 = vperm.slane %v2161_v14, %v14331_v61  ;;  %v2939_v18 = vrot.slane %v16686_v21, 4 }
 0x586   :  { %v2926_v4 = vsel %vm2209_vm1, 0, %v2925_v6  ;;  %v3531_v7 = vsel %vm2209_vm1, %v3530_v33, %v2898_v43  ;;  %v2833_v40 = vrot.slane %v2832_v55, 4  ;;  %v2965_v17 = vrot.slane %v16733_v60, 4 }
 0x587   :  { %v16755_v45 = vsel %vm2209_vm1, %v2899_v52, %v2892_v22  ;;  %v2836_v24 = vsel %vm2209_vm1, %v2832_v55, %v2835_v62  ;;  %v3352_v48 = vrot.slane %v16676_v54, 4  ;;  %v3549_v32 = vrot.slane %v2926_v4, 4 }
 0x588   :  { %v2834_v31 = vsel %vm2209_vm1, %v2833_v40, %v16503_v42  ;;  %v2844_v46 = vperm.slane %v2836_v24, %v14363_v19  ;;  %v2859_v41 = vrot.slane %v2858_v8, 4  ;;  %v2924_v35 = vsel %vm2209_vm1, 0, %v2923_v10 }
 0x589   :  { %v3535_v22 = vperm.slane %v3531_v7, %v14331_v61  ;;  %v2840_v52 = vperm.slane %v2834_v31, %v14363_v19  ;;  %v2862_v15 = vsel %vm2209_vm1, %v2858_v8, %v2861_v58  ;;  %v16773_v62 = vsel %vm2209_vm1, %v2925_v6, %v2918_v9  ;;  %v1941_v31 = vpop.permute.xlu1 %1940 }
 0x58a   :  { %v2847_v54 = vrot.slane %v2844_v46, 4  ;;  %v2860_v42 = vsel %vm2209_vm1, %v2859_v41, %v16579_v5  ;;  %v2870_v59 = vperm.slane %v2862_v15, %v14363_v19  ;;  %v3371_v14 = vrot.slane %v16702_v29, 4  ;;  %v16792_v29 = vpop.permute.xlu0 %1970 }
 0x58b   :  { %v2845_v63 = vrot.slane %v2840_v52, 4  ;;  %v2866_v16 = vperm.slane %v2860_v42, %v14363_v19  ;;  %v3390_v26 = vrot.slane %v16689_v56, 4  ;;  %v16782_v39 = vsel %vm2209_vm1, %v3549_v32, %v2924_v35 }
 0x58c   :  { %v2848_v58 = vsel %vm2209_vm1, 0, %v2847_v54  ;;  %v2873_v2 = vrot.slane %v2870_v59, 4  ;;  %v3409_v3 = vrot.slane %v16710_v49, 4  ;;  %v3529_v5 = vperm.slane %v16755_v45, %v14331_v61 }
 0x58d   :  { %v2195_v13 = vshrl.u32 %v16757_v12, 16  ;;  %v16790_v9 = vsel %vm2209_vm1, %v2847_v54, %v2840_v52  ;;  %v3492_v33 = vrot.slane %v2848_v58, 4  ;;  %v2846_v43 = vsel %vm2209_vm1, 0, %v2845_v63 }
 0x58e   :  { %v3353_v6 = vsel %vm2209_vm1, 0, %v3352_v48  ;;  %v3372_v49 = vsel %vm2209_vm1, 0, %v3371_v14  ;;  %v16799_v55 = vrot.slane %v3535_v22, 4  ;;  %v3554_v10 = vperm.slane %v16782_v39, %v14331_v61  ;;  %v5816_v22 = vpop.permute.xlu2 %5815 }
 0x58f   :  { %v2871_v8 = vrot.slane %v2866_v16, 4  ;;  %v3391_v4 = vsel %vm2209_vm1, 0, %v3390_v26  ;;  %v2874_v7 = vsel %vm2209_vm1, 0, %v2873_v2  ;;  %v3491_v40 = vperm.slane %v16790_v9, %v14331_v61 }
 0x590   :  { %v3410_v24 = vsel %vm2209_vm1, 0, %v3409_v3  ;;  %v3743_v32 = vpack.i.b16 %v3372_v49, %v3353_v6  ;;  %v16809_v48 = vsel %vm2209_vm1, %v3492_v33, %v2846_v43  ;;  %v3744_v41 = vshrl.u32 %v3353_v6, 16  ;;  %v20143_v43 = vld [vmem:[#allocation71_spill] sm:$0xff] }
 0x591   :  { %v3755_v46 = vpack.i.b16 %v3410_v24, %v3391_v4  ;;  %v3745_v35 = vshrl.u32 %v3372_v49, 16  ;;  %v16812_v52 = vsel %vm2209_vm1, %v2873_v2, %v2866_v16  ;;  %v3756_v54 = vshrl.u32 %v3391_v4, 16  ;;  %v20144_v4 = vld [vmem:[#allocation84_spill] sm:$0xff] }
 0x592   :  { %v8034_v15 = vunpack.c.l.b16 %v3743_v32  ;;  %v3757_v42 = vshrl.u32 %v3410_v24, 16  ;;  %v2872_v59 = vsel %vm2209_vm1, 0, %v2871_v8  ;;  %v3511_v63 = vrot.slane %v2874_v7, 4 }
 0x593   :  { %v8035_v14 = vunpack.c.l.b16 %v3755_v46  ;;  %v3746_v26 = vpack.i.b16 %v3745_v35, %v3744_v41  ;;  %v3497_v58 = vperm.slane %v16809_v48, %v14331_v61  ;;  %v5915_v33 = vshrl.u32 %v5816_v22, 16 }
 0x594   :  { %v3758_v3 = vpack.i.b16 %v3757_v42, %v3756_v54  ;;  %v2188_v6 = vpack.i.b16 %v1941_v31, %v20143_v43  ;;  %v2189_v16 = vshrl.u32 %v20143_v43, 16  ;;  %v2190_v2 = vshrl.u32 %v1941_v31, 16 }
 0x595   :  { %v8046_v49 = vpack.c.b16 %v8035_v14, %v8034_v15  ;;  %v8179_v56 = vunpack.c.l.b16 %v3746_v26  ;;  %v5913_v24 = vpack.i.b16 %v5816_v22, %v20144_v4  ;;  %v20145_v8 = vshrl.u32 %v20144_v4, 16  ;;  %v2005_v22 = vpop.permute.xlu0 %2004 }
 0x596   :  { %v8180_v32 = vunpack.c.l.b16 %v3758_v3  ;;  %v3423_v46 = vsel %vm2209_vm1, %v16740_v50, %v3415_v23  ;;  %v2191_v41 = vpack.i.b16 %v2190_v2, %v2189_v16  ;;  %v2983_v35 = vperm.slane %v2188_v6, %v14331_v61 }
 0x597   :  { %v5916_v7 = vpack.i.b16 %v5915_v33, %v20145_v8  ;;  %11575 = vmatmul.msk.bf16.gmra.mxu1 %vm7783_vm2, %v8046_v49  ;;  %v16830_v15 = vperm.slane %v3423_v46, %v14363_v19  ;;  %v3441_v31 = vrot.slane %v3440_v34, 4  ;;  %v16836_v54 = vsel %vm2209_vm1, %v3511_v63, %v2872_v59 }
 0x598   :  { %v8191_v37 = vpack.c.b16 %v8180_v32, %v8179_v56  ;;  %v2183_v42 = vshrl.u32 %v16792_v29, 16  ;;  %v3461_v23 = vsel %vm2209_vm1, %v16647_v57, %v3453_v25  ;;  %v3009_v50 = vperm.slane %v2191_v41, %v14331_v61 }
 0x599   :  { %v3442_v1 = vsel %vm2209_vm1, %v3441_v31, %v3434_v47  ;;  %v16850_v34 = vperm.slane %v3461_v23, %v14363_v19  ;;  %v3479_v56 = vrot.slane %v3478_v44, 4  ;;  %v16857_v11 = vperm.slane %v5913_v24, %v14331_v61  ;;  %v2003_v47 = vpop.permute.xlu1 %2002 }
 0x59a   :  { %11583 = vmatmul.msk.bf16.gmra.mxu2 %vm7783_vm2, %v8191_v37  ;;  %v16860_v25 = vperm.slane %v5916_v7, %v14331_v61  ;;  %v16863_v57 = vperm.slane %v3442_v1, %v14363_v19  ;;  %v2194_v30 = vpack.i.b16 %v2005_v22, %v16757_v12  ;;  %v2991_v59 = vrot.slane %v2983_v35, 4 }
 0x59b   :  { %v20146_v63 = vperm.slane %v16607_v0, %v14331_v61  ;;  %v3762_v44 = vshrl.u32 %v16830_v15, 16  ;;  %v2196_v14 = vshrl.u32 %v2005_v22, 16  ;;  %v3017_v6 = vrot.slane %v3009_v50, 4 }
 0x59c   :  { %v3761_v3 = vpack.i.b16 %v16863_v57, %v16830_v15  ;;  %v3763_v33 = vshrl.u32 %v16863_v57, 16  ;;  %v2988_v43 = vperm.slane %v2194_v30, %v14331_v61  ;;  %v3774_v49 = vshrl.u32 %v16850_v34, 16 }
 0x59d   :  { %v3480_v51 = vsel %vm2209_vm1, %v3479_v56, %v20146_v63  ;;  %v2197_v0 = vpack.i.b16 %v2196_v14, %v2195_v13  ;;  %v2182_v16 = vpack.i.b16 %v2003_v47, %v16792_v29  ;;  %v2184_v41 = vshrl.u32 %v2003_v47, 16 }
 0x59e   :  { %v16872_v26 = vperm.slane %v3480_v51, %v14363_v19  ;;  %v7745_v32 = vunpack.c.l.b16 %v3761_v3  ;;  %v3764_v4 = vpack.i.b16 %v3763_v33, %v3762_v44  ;;  %v2989_v8 = vrot.slane %v2988_v43, 4 }
 0x59f   :  { %v2992_v7 = vsel %vm2209_vm1, %v2988_v43, %v2991_v59  ;;  %v3014_v46 = vperm.slane %v2197_v0, %v14331_v61  ;;  %v2936_v1 = vperm.slane %v2182_v16, %v14331_v61  ;;  %v2185_v0 = vpack.i.b16 %v2184_v41, %v2183_v42  ;;  %v11948_v41 = vld [vmem:[#allocation17 + $0x8] sm:$0xff] }
 0x5a0   :  { %v3773_v2 = vpack.i.b16 %v16872_v26, %v16850_v34  ;;  %v3775_v24 = vshrl.u32 %v16872_v26, 16  ;;  %v7891_v37 = vunpack.c.l.b16 %v3764_v4  ;;  %v3000_v12 = vperm.slane %v2992_v7, %v14363_v19  ;;  %8977 = vmatpush.bf16.msra.mxu3 %v11948_v41 }
 0x5a1   :  { %v2990_v13 = vsel %vm2209_vm1, %v2989_v8, %v2983_v35  ;;  %v3015_v29 = vrot.slane %v3014_v46, 4  ;;  %v3018_v23 = vsel %vm2209_vm1, %v3014_v46, %v3017_v6  ;;  %v2937_v44 = vrot.slane %v2936_v1, 4 }
 0x5a2   :  { %v7746_v31 = vunpack.c.l.b16 %v3773_v2  ;;  %v3776_v22 = vpack.i.b16 %v3775_v24, %v3774_v49  ;;  %v2996_v63 = vperm.slane %v2990_v13, %v14363_v19  ;;  %v3003_v59 = vrot.slane %v3000_v12, 4 }
 0x5a3   :  { %v3016_v51 = vsel %vm2209_vm1, %v3015_v29, %v3009_v50  ;;  %v3026_v47 = vperm.slane %v3018_v23, %v14363_v19  ;;  %v2940_v14 = vsel %vm2209_vm1, %v2936_v1, %v2939_v18  ;;  %v3510_v6 = vperm.slane %v16812_v52, %v14331_v61  ;;  %v16902_v50 = vpop.permute.xlu2 %5849 }
 0x5a4   :  { %v7756_v56 = vpack.c.b16 %v7746_v31, %v7745_v32  ;;  %v7892_v30 = vunpack.c.l.b16 %v3776_v22  ;;  %v3001_v3 = vrot.slane %v2996_v63, 4  ;;  %v3004_v33 = vsel %vm2209_vm1, 0, %v3003_v59 }
 0x5a5   :  { %v3022_v43 = vperm.slane %v3016_v51, %v14363_v19  ;;  %v3029_v49 = vrot.slane %v3026_v47, 4  ;;  %v2938_v16 = vsel %vm2209_vm1, %v2937_v44, %v16686_v21  ;;  %v16909_v18 = vrot.slane %v3497_v58, 4 }
 0x5a6   :  { %11560 = vmatmul.msk.bf16.gmra.mxu3 %vm7783_vm2, %v7756_v56  ;;  %v7902_v35 = vpack.c.b16 %v7892_v30, %v7891_v37  ;;  %v16913_v2 = vsel %vm2209_vm1, %v3003_v59, %v2996_v63  ;;  %v3606_v32 = vrot.slane %v3004_v33, 4  ;;  %v2944_v4 = vperm.slane %v2938_v16, %v14363_v19 }
 0x5a7   :  { %v3516_v24 = vperm.slane %v16836_v54, %v14331_v61  ;;  %v3002_v42 = vsel %vm2209_vm1, 0, %v3001_v3  ;;  %v3030_v21 = vsel %vm2209_vm1, 0, %v3029_v49  ;;  %v2948_v8 = vperm.slane %v2940_v14, %v14363_v19 }
 0x5a8   :  { %11568 = vmatmul.msk.bf16.gmra.mxu0 %vm7783_vm2, %v7902_v35  ;;  %v6115_v48 = vrot.slane %v16857_v11, 4  ;;  %v6141_v58 = vrot.slane %v16860_v25, 4  ;;  %v3027_v7 = vrot.slane %v3022_v43, 4  ;;  %v5932_v46 = vshrl.u32 %v16902_v50, 16 }
 0x5a9   :  { %v3605_v31 = vperm.slane %v16913_v2, %v14331_v61  ;;  %v2949_v22 = vrot.slane %v2944_v4, 4  ;;  %v2951_v37 = vrot.slane %v2948_v8, 4  ;;  %v2962_v12 = vperm.slane %v2185_v0, %v14331_v61  ;;  %v16949_v0 = vpop.permute.xlu0 %5847 }
 0x5aa   :  { %v3607_v13 = vsel %vm2209_vm1, %v3606_v32, %v3002_v42  ;;  %v3625_v29 = vrot.slane %v3030_v21, 4  ;;  %v3428_v23 = vrot.slane %v16830_v15, 4  ;;  %v3447_v1 = vrot.slane %v16863_v57, 4 }
 0x5ab   :  { %v2950_v56 = vsel %vm2209_vm1, 0, %v2949_v22  ;;  %v2952_v30 = vsel %vm2209_vm1, 0, %v2951_v37  ;;  %v2963_v63 = vrot.slane %v2962_v12, 4  ;;  %v3466_v59 = vrot.slane %v16850_v34, 4 }
 0x5ac   :  { %v3028_v51 = vsel %vm2209_vm1, 0, %v3027_v7  ;;  %v16935_v47 = vsel %vm2209_vm1, %v3029_v49, %v3022_v43  ;;  %v2966_v44 = vsel %vm2209_vm1, %v2962_v12, %v2965_v17  ;;  %v3568_v15 = vrot.slane %v2952_v30, 4 }
 0x5ad   :  { %v3611_v57 = vperm.slane %v3607_v13, %v14331_v61  ;;  %v2964_v14 = vsel %vm2209_vm1, %v2963_v63, %v16733_v60  ;;  %v2974_v35 = vperm.slane %v2966_v44, %v14363_v19  ;;  %v3448_v3 = vsel %vm2209_vm1, 0, %v3447_v1 }
 0x5ae   :  { %v2970_v34 = vperm.slane %v2964_v14, %v14363_v19  ;;  %v3569_v33 = vsel %vm2209_vm1, %v3568_v15, %v2950_v56  ;;  %v3429_v43 = vsel %vm2209_vm1, 0, %v3428_v23  ;;  %v3485_v49 = vrot.slane %v16872_v26, 4  ;;  %v5818_v56 = vpop.permute.xlu1 %5817 }
 0x5af   :  { %v16952_v17 = vsel %vm2209_vm1, %v3625_v29, %v3028_v51  ;;  %v2977_v16 = vrot.slane %v2974_v35, 4  ;;  %v3467_v60 = vsel %vm2209_vm1, 0, %v3466_v59  ;;  %v3767_v32 = vpack.i.b16 %v3448_v3, %v3429_v43 }
 0x5b0   :  { %v16956_v42 = vsel %vm2209_vm1, %v2951_v37, %v2944_v4  ;;  %v3573_v21 = vperm.slane %v3569_v33, %v14331_v61  ;;  %v3486_v8 = vsel %vm2209_vm1, 0, %v3485_v49  ;;  %v3769_v7 = vshrl.u32 %v3448_v3, 16 }
 0x5b1   :  { %v2975_v41 = vrot.slane %v2970_v34, 4  ;;  %v2978_v26 = vsel %vm2209_vm1, 0, %v2977_v16  ;;  %v3779_v22 = vpack.i.b16 %v3486_v8, %v3467_v60  ;;  %v3768_v12 = vshrl.u32 %v3429_v43, 16  ;;  %v20147_v43 = vld [vmem:[#allocation85_spill] sm:$0xff] }
 0x5b2   :  { %v16961_v13 = vrot.slane %v3611_v57, 4  ;;  %v3624_v29 = vperm.slane %v16935_v47, %v14331_v61  ;;  %v8036_v23 = vunpack.c.l.b16 %v3767_v32  ;;  %v3780_v1 = vshrl.u32 %v3467_v60, 16  ;;  %v16981_v32 = vpop.permute.xlu2 %5819 }
 0x5b3   :  { %v16966_v4 = vsel %vm2209_vm1, %v2977_v16, %v2970_v34  ;;  %v8037_v37 = vunpack.c.l.b16 %v3779_v22  ;;  %v3770_v30 = vpack.i.b16 %v3769_v7, %v3768_v12  ;;  %v3781_v63 = vshrl.u32 %v3486_v8, 16 }
 0x5b4   :  { %v3630_v59 = vperm.slane %v16952_v17, %v14331_v61  ;;  %v3567_v51 = vperm.slane %v16956_v42, %v14331_v61  ;;  %v16972_v44 = vrot.slane %v3573_v21, 4  ;;  %v3587_v15 = vrot.slane %v2978_v26, 4  ;;  %v20148_v26 = vld [vmem:[#allocation86_spill] sm:$0xff] }
 0x5b5   :  { %v2976_v57 = vsel %vm2209_vm1, 0, %v2975_v41  ;;  %v8047_v14 = vpack.c.b16 %v8037_v37, %v8036_v23  ;;  %v3782_v35 = vpack.i.b16 %v3781_v63, %v3780_v1  ;;  %v8181_v3 = vunpack.c.l.b16 %v3770_v30  ;;  %v5882_v1 = vpop.permute.xlu0 %5881 }
 0x5b6   :  { %v3586_v34 = vperm.slane %v16966_v4, %v14331_v61  ;;  %v5920_v33 = vshrl.u32 %v16949_v0, 16  ;;  %v5926_v49 = vshrl.u32 %v20147_v43, 16  ;;  %v5925_v16 = vpack.i.b16 %v5818_v56, %v20147_v43 }
 0x5b7   :  { %11576 = vmatmul.msk.bf16.gmra.mxu1 %vm7783_vm2, %v8047_v14  ;;  %v8182_v60 = vunpack.c.l.b16 %v3782_v35  ;;  %v5927_v21 = vshrl.u32 %v5818_v56, 16  ;;  %v3499_v8 = vsel %vm2209_vm1, %v16909_v18, %v3491_v40  ;;  %v3517_v7 = vrot.slane %v3516_v24, 4  ;;  %v5880_v14 = vpop.permute.xlu1 %5879 }
 0x5b8   :  { %v16992_v41 = vsel %vm2209_vm1, %v3587_v15, %v2976_v57  ;;  %v5938_v22 = vshrl.u32 %v20148_v26, 16  ;;  %v6159_v12 = vperm.slane %v5925_v16, %v14331_v61  ;;  %v16997_v23 = vperm.slane %v3499_v8, %v14363_v19 }
 0x5b9   :  { %v8192_v56 = vpack.c.b16 %v8182_v60, %v8181_v3  ;;  %v5928_v9 = vpack.i.b16 %v5927_v21, %v5926_v49  ;;  %v3518_v40 = vsel %vm2209_vm1, %v3517_v7, %v3510_v6  ;;  %v3537_v54 = vsel %vm2209_vm1, %v16799_v55, %v3529_v5 }
 0x5ba   :  { %v5937_v18 = vpack.i.b16 %v16981_v32, %v20148_v26  ;;  %v5939_v24 = vshrl.u32 %v16981_v32, 16  ;;  %v17012_v37 = vperm.slane %v3518_v40, %v14363_v19  ;;  %v17015_v30 = vperm.slane %v3537_v54, %v14363_v19  ;;  %v11954_v26 = vld [vmem:[#allocation17 + $0x38] sm:$0xff] }
 0x5bb   :  { %11584 = vmatmul.msk.bf16.gmra.mxu2 %vm7783_vm2, %v8192_v56  ;;  %v6167_v52 = vrot.slane %v6159_v12, 4  ;;  %v6185_v6 = vperm.slane %v5928_v9, %v14331_v61  ;;  %v3555_v45 = vrot.slane %v3554_v10, 4  ;;  %v5931_v5 = vpack.i.b16 %v5882_v1, %v16902_v50  ;;  %v11950_v54 = vld [vmem:[#allocation17 + $0x18] sm:$0xff] }
 0x5bc   :  { %v3785_v55 = vpack.i.b16 %v17012_v37, %v16997_v23  ;;  %v3786_v63 = vshrl.u32 %v16997_v23, 16  ;;  %v3787_v15 = vshrl.u32 %v17012_v37, 16  ;;  %v5933_v57 = vshrl.u32 %v5882_v1, 16  ;;  %9304 = vmatpush.bf16.msrb.mxu2 %v11954_v26  ;;  %9086 = vmatpush.bf16.msra.mxu0 %v11950_v54 }
 0x5bd   :  { %v6193_v35 = vrot.slane %v6185_v6, 4  ;;  %v20149_v3 = vperm.slane %v16773_v62, %v14331_v61  ;;  %v3798_v39 = vshrl.u32 %v17015_v30, 16  ;;  %v6164_v10 = vperm.slane %v5931_v5, %v14331_v61 }
 0x5be   :  { %v7747_v16 = vunpack.c.l.b16 %v3785_v55  ;;  %v3788_v60 = vpack.i.b16 %v3787_v15, %v3786_v63  ;;  %v5934_v32 = vpack.i.b16 %v5933_v57, %v5932_v46  ;;  %v5919_v7 = vpack.i.b16 %v5880_v14, %v16949_v0 }
 0x5bf   :  { %v3556_v43 = vsel %vm2209_vm1, %v3555_v45, %v20149_v3  ;;  %v6165_v21 = vrot.slane %v6164_v10, 4  ;;  %v6168_v8 = vsel %vm2209_vm1, %v6164_v10, %v6167_v52  ;;  %v5921_v62 = vshrl.u32 %v5880_v14, 16 }
 0x5c0   :  { %v17034_v49 = vperm.slane %v3556_v43, %v14363_v19  ;;  %v7893_v9 = vunpack.c.l.b16 %v3788_v60  ;;  %v6176_v40 = vperm.slane %v6168_v8, %v14363_v19  ;;  %v6190_v50 = vperm.slane %v5934_v32, %v14331_v61 }
 0x5c1   :  { %v6166_v45 = vsel %vm2209_vm1, %v6165_v21, %v6159_v12  ;;  %v5922_v46 = vpack.i.b16 %v5921_v62, %v5920_v33  ;;  %v6112_v52 = vperm.slane %v5919_v7, %v14331_v61  ;;  %v17054_v60 = vperm.slane %v5937_v18, %v14331_v61 }
 0x5c2   :  { %v3797_v1 = vpack.i.b16 %v17034_v49, %v17015_v30  ;;  %v3799_v56 = vshrl.u32 %v17034_v49, 16  ;;  %v6172_v55 = vperm.slane %v6166_v45, %v14363_v19  ;;  %v6179_v63 = vrot.slane %v6176_v40, 4 }
 0x5c3   :  { %v6191_v15 = vrot.slane %v6190_v50, 4  ;;  %v6194_v57 = vsel %vm2209_vm1, %v6190_v50, %v6193_v35  ;;  %v6113_v14 = vrot.slane %v6112_v52, 4  ;;  %v6116_v12 = vsel %vm2209_vm1, %v6112_v52, %v6115_v48 }
 0x5c4   :  { %v7748_v0 = vunpack.c.l.b16 %v3797_v1  ;;  %v3800_v5 = vpack.i.b16 %v3799_v56, %v3798_v39  ;;  %v6177_v33 = vrot.slane %v6172_v55, 4  ;;  %v6180_v10 = vsel %vm2209_vm1, 0, %v6179_v63  ;;  %v11952_v56 = vld [vmem:[#allocation17 + $0x28] sm:$0xff] }
 0x5c5   :  { %v6192_v39 = vsel %vm2209_vm1, %v6191_v15, %v6185_v6  ;;  %v6202_v32 = vperm.slane %v6194_v57, %v14363_v19  ;;  %v6978_v21 = vrot.slane %v6180_v10, 4  ;;  %v5940_v8 = vpack.i.b16 %v5939_v24, %v5938_v22  ;;  %9195 = vmatpush.bf16.msrb.mxu1 %v11952_v56 }
 0x5c6   :  { %v7757_v3 = vpack.c.b16 %v7748_v0, %v7747_v16  ;;  %v7894_v43 = vunpack.c.l.b16 %v3800_v5  ;;  %v6178_v7 = vsel %vm2209_vm1, 0, %v6177_v33  ;;  %v6198_v48 = vperm.slane %v6192_v39, %v14363_v19 }
 0x5c7   :  { %v6205_v16 = vrot.slane %v6202_v32, 4  ;;  %v6979_v62 = vsel %vm2209_vm1, %v6978_v21, %v6178_v7  ;;  %v6114_v18 = vsel %vm2209_vm1, %v6113_v14, %v16857_v11  ;;  %v6124_v26 = vperm.slane %v6116_v12, %v14363_v19 }
 0x5c8   :  { %11561 = vmatmul.msk.bf16.gmra.mxu3 %vm7783_vm2, %v7757_v3  ;;  %v7903_v35 = vpack.c.b16 %v7894_v43, %v7893_v9  ;;  %v6203_v6 = vrot.slane %v6198_v48, 4  ;;  %v6983_v22 = vperm.slane %v6979_v62, %v14331_v61  ;;  %v6120_v24 = vperm.slane %v6114_v18, %v14363_v19  ;;  %v17084_v43 = vpop.permute.xlu2 %5853 }
 0x5c9   :  { %v6138_v1 = vperm.slane %v5922_v46, %v14331_v61  ;;  %v3592_v9 = vperm.slane %v16992_v41, %v14331_v61  ;;  %v6219_v40 = vrot.slane %v17054_v60, 4  ;;  %v6206_v54 = vsel %vm2209_vm1, 0, %v6205_v16 }
 0x5ca   :  { %11569 = vmatmul.msk.bf16.gmra.mxu0 %vm7783_vm2, %v7903_v35  ;;  %v6127_v11 = vrot.slane %v6124_v26, 4  ;;  %v17074_v45 = vperm.slane %v5940_v8, %v14331_v61  ;;  %v6204_v50 = vsel %vm2209_vm1, 0, %v6203_v6  ;;  %v6973_v52 = vsel %vm2209_vm1, %v6179_v63, %v6172_v55 }
 0x5cb   :  { %v6997_v0 = vrot.slane %v6206_v54, 4  ;;  %v6125_v5 = vrot.slane %v6120_v24, 4  ;;  %v6139_v15 = vrot.slane %v6138_v1, 4  ;;  %v6142_v57 = vsel %vm2209_vm1, %v6138_v1, %v6141_v58 }
 0x5cc   :  { %v6128_v46 = vsel %vm2209_vm1, 0, %v6127_v11  ;;  %v6984_v14 = vrot.slane %v6983_v22, 4  ;;  %v6992_v12 = vsel %vm2209_vm1, %v6205_v16, %v6198_v48  ;;  %v6150_v33 = vperm.slane %v6142_v57, %v14363_v19 }
 0x5cd   :  { %v6998_v3 = vsel %vm2209_vm1, %v6997_v0, %v6204_v50  ;;  %v6126_v63 = vsel %vm2209_vm1, 0, %v6125_v5  ;;  %v6140_v10 = vsel %vm2209_vm1, %v6139_v15, %v16860_v25  ;;  %v3504_v39 = vrot.slane %v16997_v23, 4  ;;  %v17107_v50 = vpop.permute.xlu0 %5851 }
 0x5ce   :  { %v7002_v55 = vperm.slane %v6998_v3, %v14331_v61  ;;  %v6977_v58 = vperm.slane %v6973_v52, %v14331_v61  ;;  %v6146_v32 = vperm.slane %v6140_v10, %v14363_v19  ;;  %v6153_v21 = vrot.slane %v6150_v33, 4 }
 0x5cf   :  { %v6940_v8 = vrot.slane %v6128_v46, 4  ;;  %v6996_v35 = vperm.slane %v6992_v12, %v14331_v61  ;;  %v3523_v48 = vrot.slane %v17012_v37, 4  ;;  %v3542_v16 = vrot.slane %v17015_v30, 4 }
 0x5d0   :  { %v7003_v7 = vrot.slane %v7002_v55, 4  ;;  %v6985_v62 = vsel %vm2209_vm1, %v6984_v14, %v6977_v58  ;;  %v6151_v18 = vrot.slane %v6146_v32, 4  ;;  %v6154_v25 = vsel %vm2209_vm1, 0, %v6153_v21  ;;  %v5822_v14 = vpop.permute.xlu1 %5821  ;;  %v17120_v58 = vpop.permute.xlu2 %5823 }
 0x5d1   :  { %v6941_v23 = vsel %vm2209_vm1, %v6940_v8, %v6126_v63  ;;  %v6935_v26 = vsel %vm2209_vm1, %v6127_v11, %v6120_v24  ;;  %v6959_v22 = vrot.slane %v6154_v25, 4  ;;  %v3505_v1 = vsel %vm2209_vm1, 0, %v3504_v39 }
 0x5d2   :  { %v6945_v6 = vperm.slane %v6941_v23, %v14331_v61  ;;  %v7004_v56 = vsel %vm2209_vm1, %v7003_v7, %v6996_v35  ;;  %v6152_v37 = vsel %vm2209_vm1, 0, %v6151_v18  ;;  %v6954_v30 = vsel %vm2209_vm1, %v6153_v21, %v6146_v32 }
 0x5d3   :  { %v3524_v54 = vsel %vm2209_vm1, 0, %v3523_v48  ;;  %v6960_v52 = vsel %vm2209_vm1, %v6959_v22, %v6152_v37  ;;  %v3543_v0 = vsel %vm2209_vm1, 0, %v3542_v16  ;;  %v3561_v24 = vrot.slane %v17034_v49, 4 }
 0x5d4   :  { %v3791_v11 = vpack.i.b16 %v3524_v54, %v3505_v1  ;;  %v6946_v5 = vrot.slane %v6945_v6, 4  ;;  %v6964_v46 = vperm.slane %v6960_v52, %v14331_v61  ;;  %v3792_v15 = vshrl.u32 %v3505_v1, 16 }
 0x5d5   :  { %v3793_v57 = vshrl.u32 %v3524_v54, 16  ;;  %v6245_v12 = vrot.slane %v17074_v45, 4  ;;  %v17115_v3 = vperm.slane %v6985_v62, %v14363_v19  ;;  %v5956_v33 = vshrl.u32 %v17084_v43, 16  ;;  %v20151_v54 = vld [vmem:[#allocation88_spill] sm:$0xff] }
 0x5d6   :  { %v3562_v55 = vsel %vm2209_vm1, 0, %v3561_v24  ;;  %v6939_v63 = vperm.slane %v6935_v26, %v14331_v61  ;;  %v8038_v49 = vunpack.c.l.b16 %v3791_v11  ;;  %v17123_v32 = vperm.slane %v7004_v56, %v14363_v19  ;;  %v20150_v26 = vld [vmem:[#allocation87_spill] sm:$0xff] }
 0x5d7   :  { %v3803_v10 = vpack.i.b16 %v3562_v55, %v3543_v0  ;;  %v3794_v39 = vpack.i.b16 %v3793_v57, %v3792_v15  ;;  %v6958_v21 = vperm.slane %v6954_v30, %v14331_v61  ;;  %v3804_v8 = vshrl.u32 %v3543_v0, 16 }
 0x5d8   :  { %v3805_v35 = vshrl.u32 %v3562_v55, 16  ;;  %v17127_v7 = vsel %vm2209_vm1, %v6946_v5, %v6939_v63  ;;  %v6965_v48 = vrot.slane %v6964_v46, 4  ;;  %v5944_v62 = vshrl.u32 %v17107_v50, 16 }
 0x5d9   :  { %v8039_v16 = vunpack.c.l.b16 %v3803_v10  ;;  %v8183_v25 = vunpack.c.l.b16 %v3794_v39  ;;  %v5963_v23 = vshrl.u32 %v17120_v58, 16  ;;  %v5950_v6 = vshrl.u32 %v20150_v26, 16  ;;  %v11947_v39 = vld [vmem:[#allocation17] sm:$0xff] }
 0x5da   :  { %v3806_v18 = vpack.i.b16 %v3805_v35, %v3804_v8  ;;  %v5949_v1 = vpack.i.b16 %v5822_v14, %v20150_v26  ;;  %v5951_v56 = vshrl.u32 %v5822_v14, 16  ;;  %v3575_v37 = vsel %vm2209_vm1, %v16972_v44, %v3567_v51  ;;  %v5886_v44 = vpop.permute.xlu0 %5885  ;;  %8978 = vmatpush.bf16.msra.mxu3 %v11947_v39 }
 0x5db   :  { %v8048_v22 = vpack.c.b16 %v8039_v16, %v8038_v49  ;;  %v5962_v52 = vshrl.u32 %v20151_v54, 16  ;;  %v5961_v0 = vpack.i.b16 %v17120_v58, %v20151_v54  ;;  %v17142_v24 = vperm.slane %v3575_v37, %v14363_v19 }
 0x5dc   :  { %v8184_v30 = vunpack.c.l.b16 %v3806_v18  ;;  %v5952_v11 = vpack.i.b16 %v5951_v56, %v5950_v6  ;;  %v6263_v5 = vperm.slane %v5949_v1, %v14331_v61  ;;  %v3593_v42 = vrot.slane %v3592_v9, 4 }
 0x5dd   :  { %11577 = vmatmul.msk.bf16.gmra.mxu1 %vm7783_vm2, %v8048_v22  ;;  %v3613_v51 = vsel %vm2209_vm1, %v16961_v13, %v3605_v31  ;;  %v17155_v46 = vsel %vm2209_vm1, %v6965_v48, %v6958_v21  ;;  %v3631_v14 = vrot.slane %v3630_v59, 4  ;;  %v5964_v41 = vpack.i.b16 %v5963_v23, %v5962_v52  ;;  %v5884_v31 = vpop.permute.xlu1 %5883 }
 0x5de   :  { %v8193_v15 = vpack.c.b16 %v8184_v30, %v8183_v25  ;;  %v17158_v57 = vperm.slane %v3613_v51, %v14363_v19  ;;  %v6271_v9 = vrot.slane %v6263_v5, 4  ;;  %v6289_v55 = vperm.slane %v5952_v11, %v14331_v61  ;;  %v11951_v11 = vld [vmem:[#allocation17 + $0x20] sm:$0xff] }
 0x5df   :  { %v3594_v2 = vsel %vm2209_vm1, %v3593_v42, %v3586_v34  ;;  %v3632_v17 = vsel %vm2209_vm1, %v3631_v14, %v3624_v29  ;;  %v3810_v59 = vshrl.u32 %v17142_v24, 16  ;;  %v5955_v63 = vpack.i.b16 %v5886_v44, %v17084_v43  ;;  %9196 = vmatpush.bf16.msrb.mxu1 %v11951_v11 }
 0x5e0   :  { %11585 = vmatmul.msk.bf16.gmra.mxu2 %vm7783_vm2, %v8193_v15  ;;  %v17170_v13 = vperm.slane %v3594_v2, %v14363_v19  ;;  %v6297_v10 = vrot.slane %v6289_v55, 4  ;;  %v17179_v4 = vperm.slane %v3632_v17, %v14363_v19  ;;  %v3822_v34 = vshrl.u32 %v17158_v57, 16 }
 0x5e1   :  { %v5957_v49 = vshrl.u32 %v5886_v44, 16  ;;  %v6268_v47 = vperm.slane %v5955_v63, %v14331_v61  ;;  %v5943_v29 = vpack.i.b16 %v5884_v31, %v17107_v50  ;;  %v5945_v16 = vshrl.u32 %v5884_v31, 16  ;;  %v11949_v50 = vld [vmem:[#allocation17 + $0x10] sm:$0xff] }
 0x5e2   :  { %v3809_v21 = vpack.i.b16 %v17170_v13, %v17142_v24  ;;  %v3811_v8 = vshrl.u32 %v17170_v13, 16  ;;  %v3821_v43 = vpack.i.b16 %v17179_v4, %v17158_v57  ;;  %v3823_v35 = vshrl.u32 %v17179_v4, 16  ;;  %9087 = vmatpush.bf16.msra.mxu0 %v11949_v50 }
 0x5e3   :  { %v5958_v48 = vpack.i.b16 %v5957_v49, %v5956_v33  ;;  %v6269_v23 = vrot.slane %v6268_v47, 4  ;;  %v6272_v26 = vsel %vm2209_vm1, %v6268_v47, %v6271_v9  ;;  %v5946_v52 = vpack.i.b16 %v5945_v16, %v5944_v62  ;;  %v11953_v49 = vld [vmem:[#allocation17 + $0x30] sm:$0xff] }
 0x5e4   :  { %v7749_v18 = vunpack.c.l.b16 %v3809_v21  ;;  %v3812_v25 = vpack.i.b16 %v3811_v8, %v3810_v59  ;;  %v7750_v6 = vunpack.c.l.b16 %v3821_v43  ;;  %v3824_v22 = vpack.i.b16 %v3823_v35, %v3822_v34  ;;  %9305 = vmatpush.bf16.msrb.mxu2 %v11953_v49  ;;  %v17231_v35 = vpop.permute.xlu2 %5857 }
 0x5e5   :  { %v6280_v1 = vperm.slane %v6272_v26, %v14363_v19  ;;  %v6294_v56 = vperm.slane %v5958_v48, %v14331_v61  ;;  %v6270_v30 = vsel %vm2209_vm1, %v6269_v23, %v6263_v5  ;;  %v6216_v33 = vperm.slane %v5943_v29, %v14331_v61 }
 0x5e6   :  { %v7895_v37 = vunpack.c.l.b16 %v3812_v25  ;;  %v7758_v42 = vpack.c.b16 %v7750_v6, %v7749_v18  ;;  %v7896_v51 = vunpack.c.l.b16 %v3824_v22  ;;  %v6276_v44 = vperm.slane %v6270_v30, %v14363_v19 }
 0x5e7   :  { %v6283_v15 = vrot.slane %v6280_v1, 4  ;;  %v6295_v14 = vrot.slane %v6294_v56, 4  ;;  %v6298_v9 = vsel %vm2209_vm1, %v6294_v56, %v6297_v10  ;;  %v6217_v2 = vrot.slane %v6216_v33, 4 }
 0x5e8   :  { %v6220_v31 = vsel %vm2209_vm1, %v6216_v33, %v6219_v40  ;;  %11562 = vmatmul.msk.bf16.gmra.mxu3 %vm7783_vm2, %v7758_v42  ;;  %v7904_v62 = vpack.c.b16 %v7896_v51, %v7895_v37  ;;  %v6281_v5 = vrot.slane %v6276_v44, 4  ;;  %v6306_v59 = vperm.slane %v6298_v9, %v14363_v19 }
 0x5e9   :  { %v6284_v17 = vsel %vm2209_vm1, 0, %v6283_v15  ;;  %v17207_v63 = vperm.slane %v5961_v0, %v14331_v61  ;;  %v6296_v10 = vsel %vm2209_vm1, %v6295_v14, %v6289_v55  ;;  %v6218_v40 = vsel %vm2209_vm1, %v6217_v2, %v17054_v60 }
 0x5ea   :  { %v7054_v34 = vrot.slane %v6284_v17, 4  ;;  %v17213_v39 = vperm.slane %v5964_v41, %v14331_v61  ;;  %11570 = vmatmul.msk.bf16.gmra.mxu0 %vm7783_vm2, %v7904_v62  ;;  %v6282_v21 = vsel %vm2209_vm1, 0, %v6281_v5  ;;  %v6302_v8 = vperm.slane %v6296_v10, %v14363_v19 }
 0x5eb   :  { %v6309_v47 = vrot.slane %v6306_v59, 4  ;;  %v17220_v58 = vperm.slane %v17127_v7, %v14363_v19  ;;  %v6224_v54 = vperm.slane %v6218_v40, %v14363_v19  ;;  %v6228_v0 = vperm.slane %v6220_v31, %v14363_v19 }
 0x5ec   :  { %v6242_v60 = vperm.slane %v5946_v52, %v14331_v61  ;;  %v17227_v41 = vperm.slane %v17155_v46, %v14363_v19  ;;  %v6307_v55 = vrot.slane %v6302_v8, 4  ;;  %v7055_v43 = vsel %vm2209_vm1, %v7054_v34, %v6282_v21  ;;  %v17283_v21 = vpop.permute.xlu0 %5855 }
 0x5ed   :  { %v6310_v29 = vsel %vm2209_vm1, 0, %v6309_v47  ;;  %v6323_v7 = vrot.slane %v17207_v63, 4  ;;  %v6229_v16 = vrot.slane %v6224_v54, 4  ;;  %v6231_v18 = vrot.slane %v6228_v0, 4 }
 0x5ee   :  { %v7073_v48 = vrot.slane %v6310_v29, 4  ;;  %v6349_v25 = vrot.slane %v17213_v39, 4  ;;  %v6308_v23 = vsel %vm2209_vm1, 0, %v6307_v55  ;;  %v6243_v26 = vrot.slane %v6242_v60, 4  ;;  %v5826_v55 = vpop.permute.xlu1 %5825 }
 0x5ef   :  { %v6246_v46 = vsel %vm2209_vm1, %v6242_v60, %v6245_v12  ;;  %v17240_v6 = vsel %vm2209_vm1, %v6283_v15, %v6276_v44  ;;  %v7059_v22 = vperm.slane %v7055_v43, %v14331_v61  ;;  %v6232_v1 = vsel %vm2209_vm1, 0, %v6231_v18 }
 0x5f0   :  { %v6254_v56 = vperm.slane %v6246_v46, %v14363_v19  ;;  %v17246_v50 = vsel %vm2209_vm1, %v6309_v47, %v6302_v8  ;;  %v6230_v37 = vsel %vm2209_vm1, 0, %v6229_v16  ;;  %v6244_v30 = vsel %vm2209_vm1, %v6243_v26, %v17074_v45  ;;  %v5828_v8 = vpop.permute.xlu2 %5827  ;;  %v20152_v26 = vld [vmem:[#allocation90_spill] sm:$0xff] }
 0x5f1   :  { %v7016_v52 = vrot.slane %v6232_v1, 4  ;;  %v17252_v12 = vsel %vm2209_vm1, %v7073_v48, %v6308_v23  ;;  %v17255_v11 = vsel %vm2209_vm1, %v6231_v18, %v6224_v54  ;;  %v3580_v42 = vrot.slane %v17142_v24, 4 }
 0x5f2   :  { %v6257_v33 = vrot.slane %v6254_v56, 4  ;;  %v6250_v51 = vperm.slane %v6244_v30, %v14363_v19  ;;  %v3599_v44 = vrot.slane %v17170_v13, 4  ;;  %v3618_v15 = vrot.slane %v17158_v57, 4 }
 0x5f3   :  { %v3637_v14 = vrot.slane %v17179_v4, 4  ;;  %v7053_v45 = vperm.slane %v17240_v6, %v14331_v61  ;;  %v7072_v9 = vperm.slane %v17246_v50, %v14331_v61  ;;  %v5980_v2 = vshrl.u32 %v17231_v35, 16 }
 0x5f4   :  { %v17268_v31 = vsel %vm2209_vm1, %v7016_v52, %v6230_v37  ;;  %v17270_v24 = vrot.slane %v7059_v22, 4  ;;  %v7078_v13 = vperm.slane %v17252_v12, %v14331_v61  ;;  %v3581_v57 = vsel %vm2209_vm1, 0, %v3580_v42 }
 0x5f5   :  { %v3600_v4 = vsel %vm2209_vm1, 0, %v3599_v44  ;;  %v6258_v62 = vsel %vm2209_vm1, 0, %v6257_v33  ;;  %v7015_v5 = vperm.slane %v17255_v11, %v14331_v61  ;;  %v3619_v17 = vsel %vm2209_vm1, 0, %v3618_v15  ;;  %v20153_v15 = vld [vmem:[#allocation89_spill] sm:$0xff] }
 0x5f6   :  { %v3638_v59 = vsel %vm2209_vm1, 0, %v3637_v14  ;;  %v6255_v10 = vrot.slane %v6250_v51, 4  ;;  %v7021_v34 = vperm.slane %v17268_v31, %v14331_v61  ;;  %v3815_v40 = vpack.i.b16 %v3600_v4, %v3581_v57 }
 0x5f7   :  { %v3827_v49 = vpack.i.b16 %v3638_v59, %v3619_v17  ;;  %v3816_v47 = vshrl.u32 %v3581_v57, 16  ;;  %v3817_v54 = vshrl.u32 %v3600_v4, 16  ;;  %v3828_v0 = vshrl.u32 %v3619_v17, 16 }
 0x5f8   :  { %v3829_v60 = vshrl.u32 %v3638_v59, 16  ;;  %v17286_v29 = vsel %vm2209_vm1, %v6257_v33, %v6250_v51  ;;  %v7035_v43 = vrot.slane %v6258_v62, 4  ;;  %v8040_v48 = vunpack.c.l.b16 %v3815_v40 }
 0x5f9   :  { %v8041_v16 = vunpack.c.l.b16 %v3827_v49  ;;  %v3818_v18 = vpack.i.b16 %v3817_v54, %v3816_v47  ;;  %v5986_v46 = vshrl.u32 %v20152_v26, 16  ;;  %v5987_v22 = vshrl.u32 %v5828_v8, 16 }
 0x5fa   :  { %v3830_v23 = vpack.i.b16 %v3829_v60, %v3828_v0  ;;  %v6256_v1 = vsel %vm2209_vm1, 0, %v6255_v10  ;;  %v5985_v37 = vpack.i.b16 %v5828_v8, %v20152_v26  ;;  %v5975_v30 = vshrl.u32 %v5826_v55, 16  ;;  %v7986_v8 = vpop.f32.mrf.mxu0  ;;  %v8131_v0 = vpop.f32.mrf.mxu1 }
 0x5fb   :  { %v8049_v56 = vpack.c.b16 %v8041_v16, %v8040_v48  ;;  %v8185_v52 = vunpack.c.l.b16 %v3818_v18  ;;  %v5988_v44 = vpack.i.b16 %v5987_v22, %v5986_v46  ;;  %v5973_v33 = vpack.i.b16 %v5826_v55, %v20153_v15  ;;  %v7841_v26 = vpop.f32.mrf.mxu3  ;;  %v5890_v46 = vpop.permute.xlu0 %5889 }
 0x5fc   :  { %v8186_v42 = vunpack.c.l.b16 %v3830_v23  ;;  %v7034_v51 = vperm.slane %v17286_v29, %v14331_v61  ;;  %v5974_v14 = vshrl.u32 %v20153_v15, 16  ;;  %v8316_v57 = vlaneseq }
 0x5fd   :  { %11578 = vmatmul.msk.bf16.gmra.mxu1 %vm7783_vm2, %v8049_v56  ;;  %v7545_v4 = vpack.i.b16 %v17227_v41, %v17220_v58  ;;  %v17299_v62 = vsel %vm2209_vm1, %v7035_v43, %v6256_v1  ;;  %v5968_v59 = vshrl.u32 %v17283_v21, 16  ;;  %v7557_v10 = vpack.i.b16 %v17123_v32, %v17115_v3 }
 0x5fe   :  { %v8194_v17 = vpack.c.b16 %v8186_v42, %v8185_v52  ;;  %v17305_v40 = vperm.slane %v5985_v37, %v14331_v61  ;;  %v5976_v49 = vpack.i.b16 %v5975_v30, %v5974_v14  ;;  %v17307_v47 = vshrl.u32 %v8316_v57, 7  ;;  %v5888_v30 = vpop.permute.xlu1 %5887 }
 0x5ff   :  { %v17309_v54 = vand.u32 127, %v8316_v57  ;;  %v17313_v60 = vperm.slane %v5988_v44, %v14331_v61  ;;  %v6367_v55 = vperm.slane %v5973_v33, %v14331_v61  ;;  %v8911_v43 = vunpack.c.l.b16 %v7545_v4 }
 0x600   :  { %11586 = vmatmul.msk.bf16.gmra.mxu2 %vm7783_vm2, %v8194_v17  ;;  %v8912_v48 = vunpack.c.l.b16 %v7557_v10  ;;  %v7546_v16 = vshrl.u32 %v17220_v58, 16  ;;  %v7547_v18 = vshrl.u32 %v17227_v41, 16  ;;  %v7558_v23 = vshrl.u32 %v17115_v3, 16 }
 0x601   :  { %vm8335_vm3 = vcmp.ge.s32.totalorder %v17307_v47, %v17309_v54  ;;  %v7559_v37 = vshrl.u32 %v17123_v32, 16  ;;  %v6393_v52 = vperm.slane %v5976_v49, %v14331_v61  ;;  %v5979_v57 = vpack.i.b16 %v5890_v46, %v17231_v35 }
 0x602   :  { %v8399_v22 = vsel %vm8335_vm3, %v7986_v8, -inf  ;;  %v8415_v1 = vsel %vm8335_vm3, %v8131_v0, -inf  ;;  %v8927_v56 = vpack.c.b16 %v8912_v48, %v8911_v43  ;;  %v7548_v15 = vpack.i.b16 %v7547_v18, %v7546_v16 }
 0x603   :  { %v8479_v42 = vmul.f32 1.442695, %v8399_v22  ;;  %v8511_v44 = vmul.f32 1.442695, %v8415_v1  ;;  %v7560_v33 = vpack.i.b16 %v7559_v37, %v7558_v23  ;;  %v8383_v14 = vsel %vm8335_vm3, %v7841_v26, -inf }
 0x604   :  { %11595 = vmatmul.msk.bf16.vlgmr.msra.gmra.mxu3 %vm7783_vm2, %v8927_v56  ;;  %v5981_v4 = vshrl.u32 %v5890_v46, 16  ;;  %v6375_v17 = vrot.slane %v6367_v55, 4  ;;  %v9020_v10 = vunpack.c.l.b16 %v7548_v15  ;;  %v5967_v8 = vpack.i.b16 %v5888_v30, %v17283_v21 }
 0x605   :  { %12292 = vpow2.f32 %v8479_v42  ;;  %v9021_v49 = vunpack.c.l.b16 %v7560_v33  ;;  %v6372_v43 = vperm.slane %v5979_v57, %v14331_v61  ;;  %v6401_v48 = vrot.slane %v6393_v52, 4 }
 0x606   :  { %12294 = vpow2.f32 %v8511_v44  ;;  %v5982_v0 = vpack.i.b16 %v5981_v4, %v5980_v2  ;;  %v8447_v16 = vmul.f32 1.442695, %v8383_v14  ;;  %v5969_v18 = vshrl.u32 %v5888_v30, 16 }
 0x607   :  { %v6320_v23 = vperm.slane %v5967_v8, %v14331_v61  ;;  %v9036_v26 = vpack.c.b16 %v9021_v49, %v9020_v10  ;;  %v6373_v22 = vrot.slane %v6372_v43, 4  ;;  %v6376_v46 = vsel %vm2209_vm1, %v6372_v43, %v6375_v17 }
 0x608   :  { %v6398_v1 = vperm.slane %v5982_v0, %v14331_v61  ;;  %v6384_v21 = vperm.slane %v6376_v46, %v14363_v19  ;;  %v5970_v56 = vpack.i.b16 %v5969_v18, %v5968_v59  ;;  %12296 = vpow2.f32 %v8447_v16 }
 0x609   :  { %v6321_v37 = vrot.slane %v6320_v23, 4  ;;  %v6324_v35 = vsel %vm2209_vm1, %v6320_v23, %v6323_v7  ;;  %11611 = vmatmul.msk.bf16.vlgmr.msra.gmra.mxu0 %vm7783_vm2, %v9036_v26  ;;  %v6374_v2 = vsel %vm2209_vm1, %v6373_v22, %v6367_v55  ;;  %v7040_v18 = vperm.slane %v17299_v62, %v14331_v61  ;;  %v17373_v22 = vpop.permute.xlu2 %5861 }
 0x60a   :  { %v6399_v30 = vrot.slane %v6398_v1, 4  ;;  %v6402_v42 = vsel %vm2209_vm1, %v6398_v1, %v6401_v48  ;;  %v6332_v44 = vperm.slane %v6324_v35, %v14363_v19  ;;  %v6380_v33 = vperm.slane %v6374_v2, %v14363_v19 }
 0x60b   :  { %v17349_v15 = vpop.eup %12292  ;;  %v6387_v14 = vrot.slane %v6384_v21, 4  ;;  %v6410_v59 = vperm.slane %v6402_v42, %v14363_v19  ;;  %v6322_v57 = vsel %vm2209_vm1, %v6321_v37, %v17207_v63  ;;  %v6346_v10 = vperm.slane %v5970_v56, %v14331_v61 }
 0x60c   :  { %v17355_v7 = vpop.eup %12294  ;;  %v6400_v4 = vsel %vm2209_vm1, %v6399_v30, %v6393_v52  ;;  %v6328_v55 = vperm.slane %v6322_v57, %v14363_v19  ;;  %v6335_v17 = vrot.slane %v6332_v44, 4  ;;  %8607 = vadd.xlane.f32.xlu1 %v17349_v15  ;;  %v6385_v8 = vrot.slane %v6380_v33, 4 }
 0x60d   :  { %20154 = vst [vmem:[#allocation119_spill] sm:$0xff] %v17355_v7  ;;  %v6388_v49 = vsel %vm2209_vm1, 0, %v6387_v14  ;;  %v6406_v0 = vperm.slane %v6400_v4, %v14363_v19  ;;  %v6413_v43 = vrot.slane %v6410_v59, 4  ;;  %8639 = vadd.xlane.f32.xlu2 %v17355_v7  ;;  %v17367_v63 = vrot.slane %v7021_v34, 4 }
 0x60e   :  { %v7130_v52 = vrot.slane %v6388_v49, 4  ;;  %v6333_v48 = vrot.slane %v6328_v55, 4  ;;  %v6386_v26 = vsel %vm2209_vm1, 0, %v6385_v8  ;;  %v6336_v46 = vsel %vm2209_vm1, 0, %v6335_v17  ;;  %v17395_v4 = vpop.eup %12296 }
 0x60f   :  { %v6411_v21 = vrot.slane %v6406_v0, 4  ;;  %v6414_v31 = vsel %vm2209_vm1, 0, %v6413_v43  ;;  %v17380_v16 = vsel %vm2209_vm1, %v6387_v14, %v6380_v33  ;;  %v6347_v37 = vrot.slane %v6346_v10, 4  ;;  %20155 = vst [vmem:[#allocation112_spill] sm:$0xff] %v17395_v4 }
 0x610   :  { %v7131_v34 = vsel %vm2209_vm1, %v7130_v52, %v6386_v26  ;;  %v6334_v56 = vsel %vm2209_vm1, 0, %v6333_v48  ;;  %v6952_v35 = vrot.slane %v17220_v58, 4  ;;  %v17385_v2 = vsel %vm2209_vm1, %v6413_v43, %v6406_v0  ;;  %v8276_v52 = vpop.f32.mrf.mxu2 }
 0x611   :  { %v6350_v42 = vsel %vm2209_vm1, %v6346_v10, %v6349_v25  ;;  %v7092_v44 = vrot.slane %v6336_v46, 4  ;;  %v7135_v59 = vperm.slane %v7131_v34, %v14331_v61  ;;  %v7149_v57 = vrot.slane %v6414_v31, 4 }
 0x612   :  { %v6348_v33 = vsel %vm2209_vm1, %v6347_v37, %v17213_v39  ;;  %v6358_v14 = vperm.slane %v6350_v42, %v14363_v19  ;;  %v6412_v58 = vsel %vm2209_vm1, 0, %v6411_v21  ;;  %v6953_v0 = vsel %vm2209_vm1, 0, %v6952_v35 }
 0x613   :  { %v6354_v49 = vperm.slane %v6348_v33, %v14363_v19  ;;  %v7093_v25 = vsel %vm2209_vm1, %v7092_v44, %v6334_v56  ;;  %v6971_v43 = vrot.slane %v17227_v41, 4  ;;  %v6990_v39 = vrot.slane %v17115_v3, 4  ;;  %v8133_v44 = vpop.f32.mrf.mxu1 }
 0x614   :  { %v6361_v10 = vrot.slane %v6358_v14, 4  ;;  %v7009_v46 = vrot.slane %v17123_v32, 4  ;;  %v8318_v21 = vadd.s32 8, %v17307_v47  ;;  %v17410_v31 = vrot.slane %v7135_v59, 4  ;;  %v7988_v32 = vpop.f32.mrf.mxu0 }
 0x615   :  { %8575 = vadd.xlane.f32.xlu2 %v17395_v4  ;;  %v6359_v26 = vrot.slane %v6354_v49, 4  ;;  %v17413_v34 = vsel %vm2209_vm1, %v7149_v57, %v6412_v58  ;;  %v17416_v41 = vsel %vm2209_vm1, %v6335_v17, %v6328_v55  ;;  %v6972_v3 = vsel %vm2209_vm1, 0, %v6971_v43  ;;  %v7843_v43 = vpop.f32.mrf.mxu3 }
 0x616   :  { %v6362_v56 = vsel %vm2209_vm1, 0, %v6361_v10  ;;  %v7097_v37 = vperm.slane %v7093_v25, %v14331_v61  ;;  %v6991_v35 = vsel %vm2209_vm1, 0, %v6990_v39  ;;  %v7552_v42 = vshrl.u32 %v6953_v0, 16 }
 0x617   :  { %v6360_v59 = vsel %vm2209_vm1, 0, %v6359_v26  ;;  %v7010_v33 = vsel %vm2209_vm1, 0, %v7009_v46  ;;  %v7551_v57 = vpack.i.b16 %v6972_v3, %v6953_v0  ;;  %v7553_v14 = vshrl.u32 %v6972_v3, 16 }
 0x618   :  { %v7563_v58 = vpack.i.b16 %v7010_v33, %v6991_v35  ;;  %v7564_v55 = vshrl.u32 %v6991_v35, 16  ;;  %v7565_v17 = vshrl.u32 %v7010_v33, 16  ;;  %vm8336_vm4 = vcmp.ge.s32.totalorder %v8318_v21, %v17309_v54  ;;  %v17434_v35 = vpop.permute.xlu0 %5859 }
 0x619   :  { %v7111_v48 = vrot.slane %v6362_v56, 4  ;;  %v9129_v8 = vunpack.c.l.b16 %v7551_v57  ;;  %v7554_v25 = vpack.i.b16 %v7553_v14, %v7552_v42  ;;  %v8400_v39 = vsel %vm8336_vm4, %v7988_v32, -inf  ;;  %v5830_v57 = vpop.permute.xlu1 %5829 }
 0x61a   :  { %v9130_v1 = vunpack.c.l.b16 %v7563_v58  ;;  %v7566_v23 = vpack.i.b16 %v7565_v17, %v7564_v55  ;;  %v8481_v30 = vmul.f32 1.442695, %v8400_v39  ;;  %v8416_v26 = vsel %vm8336_vm4, %v8133_v44, -inf  ;;  %v8278_v55 = vpop.f32.mrf.mxu2 }
 0x61b   :  { %v9238_v0 = vunpack.c.l.b16 %v7554_v25  ;;  %v8513_v46 = vmul.f32 1.442695, %v8416_v26  ;;  %v8431_v3 = vsel %vm8335_vm3, %v8276_v52, -inf  ;;  %v8384_v56 = vsel %vm8336_vm4, %v7843_v43, -inf  ;;  %v5832_v52 = vpop.permute.xlu2 %5831  ;;  %v20157_v26 = vld [vmem:[#allocation94_spill] sm:$0xff] }
 0x61c   :  { %v9145_v32 = vpack.c.b16 %v9130_v1, %v9129_v8  ;;  %v9239_v33 = vunpack.c.l.b16 %v7566_v23  ;;  %12298 = vpow2.f32 %v8481_v30  ;;  %v17440_v14 = vrot.slane %v7097_v37, 4  ;;  %v20156_v8 = vld [vmem:[#allocation93_spill] sm:$0xff] }
 0x61d   :  { %12300 = vpow2.f32 %v8513_v46  ;;  %v8543_v58 = vmul.f32 1.442695, %v8431_v3  ;;  %v17443_v17 = vsel %vm2209_vm1, %v6361_v10, %v6354_v49  ;;  %v17446_v43 = vsel %vm2209_vm1, %v7111_v48, %v6360_v59  ;;  %v7991_v10 = vpop.f32.mrf.mxu0  ;;  %v8136_v59 = vpop.f32.mrf.mxu1 }
 0x61e   :  { %11627 = vmatmul.msk.bf16.vlgmr.msrb.gmra.mxu1 %vm7783_vm2, %v9145_v32  ;;  %v9254_v23 = vpack.c.b16 %v9239_v33, %v9238_v0  ;;  %v8449_v1 = vmul.f32 1.442695, %v8384_v56  ;;  %v5998_v25 = vshrl.u32 %v20156_v8, 16  ;;  %v5997_v37 = vpack.i.b16 %v5830_v57, %v20156_v8 }
 0x61f   :  { %v5999_v39 = vshrl.u32 %v5830_v57, 16  ;;  %v6009_v46 = vpack.i.b16 %v5832_v52, %v20157_v26  ;;  %v6011_v49 = vshrl.u32 %v5832_v52, 16  ;;  %v17455_v48 = vadd.s32 16, %v17307_v47 }
 0x620   :  { %11643 = vmatmul.msk.bf16.vlgmr.msrb.gmra.mxu2 %vm7783_vm2, %v9254_v23  ;;  %v8432_v0 = vsel %vm8336_vm4, %v8278_v55, -inf  ;;  %12302 = vpow2.f32 %v8543_v58  ;;  %v7023_v32 = vsel %vm2209_vm1, %v17367_v63, %v7015_v5  ;;  %v6010_v57 = vshrl.u32 %v20157_v26, 16  ;;  %v7846_v55 = vpop.f32.mrf.mxu3 }
 0x621   :  { %v6000_v3 = vpack.i.b16 %v5999_v39, %v5998_v25  ;;  %v8545_v56 = vmul.f32 1.442695, %v8432_v0  ;;  %12304 = vpow2.f32 %v8449_v1  ;;  %v17468_v52 = vperm.slane %v5997_v37, %v14331_v61 }
 0x622   :  { %v17464_v33 = vpop.eup %12298  ;;  %vm8337_vm5 = vcmp.ge.s32.totalorder %v17455_v48, %v17309_v54  ;;  %v17484_v63 = vperm.slane %v7023_v32, %v14363_v19  ;;  %v17487_v23 = vpack.i.b16 %v6011_v49, %v6010_v57  ;;  %v17490_v1 = vperm.slane %v6009_v46, %v14331_v61  ;;  %v5894_v46 = vpop.permute.xlu0 %5893 }
 0x623   :  { %v17472_v21 = vpop.eup %12300  ;;  %v17475_v58 = vperm.slane %v6000_v3, %v14331_v61  ;;  %v8401_v11 = vsel %vm8337_vm5, %v7991_v10, -inf  ;;  %v8417_v5 = vsel %vm8337_vm5, %v8136_v59, -inf  ;;  %8609 = vadd.xlane.f32.xlu0 %v17464_v33  ;;  %12306 = vpow2.f32 %v8545_v56 }
 0x624   :  { %20158 = vst [vmem:[#allocation115_spill] sm:$0xff] %v17472_v21  ;;  %v8483_v8 = vmul.f32 1.442695, %v8401_v11  ;;  %v8515_v25 = vmul.f32 1.442695, %v8417_v5  ;;  %8641 = vadd.xlane.f32.xlu1 %v17472_v21  ;;  %v7041_v37 = vrot.slane %v7040_v18, 4  ;;  %v7061_v39 = vsel %vm2209_vm1, %v17270_v24, %v7053_v45  ;;  %v5892_v18 = vpop.permute.xlu1 %5891 }
 0x625   :  { %v7079_v26 = vrot.slane %v7078_v13, 4  ;;  %v6479_v49 = vrot.slane %v17468_v52, 4  ;;  %v17506_v10 = vperm.slane %v7061_v39, %v14363_v19  ;;  %v8385_v62 = vsel %vm8337_vm5, %v7846_v55, -inf }
 0x626   :  { %12308 = vpow2.f32 %v8483_v8  ;;  %v17511_v6 = vpop.eup %12302  ;;  %v6505_v45 = vrot.slane %v17475_v58, 4  ;;  %v7042_v12 = vsel %vm2209_vm1, %v7041_v37, %v7034_v51  ;;  %v7570_v13 = vshrl.u32 %v17484_v63, 16 }
 0x627   :  { %20159 = vst [vmem:[#allocation117_spill] sm:$0xff] %v17511_v6  ;;  %v7080_v24 = vsel %vm2209_vm1, %v7079_v26, %v7072_v9  ;;  %v17523_v59 = vpop.eup %12304  ;;  %12310 = vpow2.f32 %v8515_v25  ;;  %v17526_v0 = vperm.slane %v7042_v12, %v14363_v19  ;;  %v6003_v29 = vpack.i.b16 %v5894_v46, %v17373_v22 }
 0x628   :  { %20160 = vst [vmem:[#allocation118_spill] sm:$0xff] %v17523_v59  ;;  %v17529_v3 = vperm.slane %v7080_v24, %v14363_v19  ;;  %v7582_v51 = vshrl.u32 %v17506_v10, 16  ;;  %v8451_v56 = vmul.f32 1.442695, %v8385_v62  ;;  %v6005_v32 = vshrl.u32 %v5894_v46, 16 }
 0x629   :  { %v5991_v50 = vpack.i.b16 %v5892_v18, %v17434_v35  ;;  %v7569_v9 = vpack.i.b16 %v17526_v0, %v17484_v63  ;;  %v7571_v11 = vshrl.u32 %v17526_v0, 16  ;;  %v17540_v55 = vpop.eup %12306  ;;  %v20162_v8 = vshrl.u32 %v17373_v22, 16 }
 0x62a   :  { %v7581_v57 = vpack.i.b16 %v17529_v3, %v17506_v10  ;;  %v7583_v5 = vshrl.u32 %v17529_v3, 16  ;;  %20161 = vst [vmem:[#allocation81_spill] sm:$0xff] %v17540_v55  ;;  %v6476_v37 = vperm.slane %v6003_v29, %v14331_v61  ;;  %v5993_v39 = vshrl.u32 %v5892_v18, 16 }
 0x62b   :  { %v6006_v25 = vpack.i.b16 %v6005_v32, %v20162_v8  ;;  %v6424_v26 = vperm.slane %v5991_v50, %v14331_v61  ;;  %8671 = vadd.xlane.f32.xlu0 %v17511_v6  ;;  %v8913_v62 = vunpack.c.l.b16 %v7569_v9  ;;  %v7572_v24 = vpack.i.b16 %v7571_v11, %v7570_v13 }
 0x62c   :  { %v17547_v46 = vpop.eup %12308  ;;  %v8914_v12 = vunpack.c.l.b16 %v7581_v57  ;;  %v7584_v42 = vpack.i.b16 %v7583_v5, %v7582_v51  ;;  %8577 = vadd.xlane.f32.xlu1 %v17523_v59  ;;  %v6477_v44 = vrot.slane %v6476_v37, 4  ;;  %v6480_v30 = vsel %vm2209_vm1, %v6476_v37, %v6479_v49 }
 0x62d   :  { %20163 = vst [vmem:[#allocation72_spill] sm:$0xff] %v17547_v46  ;;  %v6502_v22 = vperm.slane %v6006_v25, %v14331_v61  ;;  %v20164_v29 = vshrl.u32 %v17434_v35, 16  ;;  %8611 = vadd.xlane.f32.xlu2 %v17547_v46  ;;  %v17555_v32 = vpop.eup %12310  ;;  %v9022_v8 = vunpack.c.l.b16 %v7572_v24  ;;  %v6488_v13 = vperm.slane %v6480_v30, %v14363_v19 }
 0x62e   :  { %20165 = vst [vmem:[#allocation75_spill] sm:$0xff] %v17555_v32  ;;  %v8928_v50 = vpack.c.b16 %v8914_v12, %v8913_v62  ;;  %v9023_v9 = vunpack.c.l.b16 %v7584_v42  ;;  %v6478_v51 = vsel %vm2209_vm1, %v6477_v44, %v17468_v52  ;;  %v6425_v11 = vrot.slane %v6424_v26, 4 }
 0x62f   :  { %v5994_v18 = vpack.i.b16 %v5993_v39, %v20164_v29  ;;  %v6503_v57 = vrot.slane %v6502_v22, 4  ;;  %v6506_v49 = vsel %vm2209_vm1, %v6502_v22, %v6505_v45  ;;  %v6484_v5 = vperm.slane %v6478_v51, %v14363_v19 }
 0x630   :  { %11596 = vmatmul.msk.bf16.gmra.mxu3 %vm7783_vm2, %v8928_v50  ;;  %v9037_v35 = vpack.c.b16 %v9023_v9, %v9022_v8  ;;  %v6491_v25 = vrot.slane %v6488_v13, 4  ;;  %v6514_v37 = vperm.slane %v6506_v49, %v14363_v19  ;;  %v17566_v42 = vperm.slane %v17487_v23, %v14331_v61 }
 0x631   :  { %v6504_v30 = vsel %vm2209_vm1, %v6503_v57, %v17475_v58  ;;  %v6426_v44 = vsel %vm2209_vm1, %v6425_v11, %v17305_v40  ;;  %v20166_v52 = vrot.slane %v17305_v40, 4  ;;  %v6489_v39 = vrot.slane %v6484_v5, 4 }
 0x632   :  { %11612 = vmatmul.msk.bf16.gmra.mxu0 %vm7783_vm2, %v9037_v35  ;;  %v6492_v62 = vsel %vm2209_vm1, 0, %v6491_v25  ;;  %v6510_v12 = vperm.slane %v6504_v30, %v14363_v19  ;;  %v6517_v24 = vrot.slane %v6514_v37, 4  ;;  %v6432_v22 = vperm.slane %v6426_v44, %v14363_v19 }
 0x633   :  { %v6428_v45 = vsel %vm2209_vm1, %v6424_v26, %v20166_v52  ;;  %v7206_v23 = vrot.slane %v6492_v62, 4  ;;  %v6450_v29 = vperm.slane %v5994_v18, %v14331_v61  ;;  %8643 = vadd.xlane.f32.xlu0 %v17555_v32  ;;  %12312 = vpow2.f32 %v8451_v56 }
 0x634   :  { %v6436_v58 = vperm.slane %v6428_v45, %v14363_v19  ;;  %v6490_v40 = vsel %vm2209_vm1, 0, %v6489_v39  ;;  %v6515_v26 = vrot.slane %v6510_v12, 4  ;;  %v6518_v50 = vsel %vm2209_vm1, 0, %v6517_v24  ;;  %v17603_v39 = vpop.permute.xlu2 %5865 }
 0x635   :  { %v7207_v13 = vsel %vm2209_vm1, %v7206_v23, %v6490_v40  ;;  %v7225_v51 = vrot.slane %v6518_v50, 4  ;;  %8673 = vadd.xlane.f32.xlu2 %v17540_v55  ;;  %v6437_v57 = vrot.slane %v6432_v22, 4  ;;  %v17594_v35 = vsel %vm2209_vm1, %v6491_v25, %v6484_v5 }
 0x636   :  { %v6516_v56 = vsel %vm2209_vm1, 0, %v6515_v26  ;;  %v6439_v49 = vrot.slane %v6436_v58, 4  ;;  %v6451_v37 = vrot.slane %v6450_v29, 4  ;;  %v20167_v30 = vrot.slane %v17313_v60, 4 }
 0x637   :  { %v7211_v52 = vperm.slane %v7207_v13, %v14331_v61  ;;  %v17601_v45 = vsel %vm2209_vm1, %v6517_v24, %v6510_v12  ;;  %v17608_v58 = vsel %vm2209_vm1, %v7225_v51, %v6516_v56  ;;  %v6438_v12 = vsel %vm2209_vm1, 0, %v6437_v57  ;;  %v7993_v13 = vpop.f32.mrf.mxu0 }
 0x638   :  { %v6454_v44 = vsel %vm2209_vm1, %v6450_v29, %v20167_v30  ;;  %v6440_v62 = vsel %vm2209_vm1, 0, %v6439_v49  ;;  %v6452_v5 = vsel %vm2209_vm1, %v6451_v37, %v17313_v60  ;;  %v7028_v29 = vrot.slane %v17484_v63, 4  ;;  %v8281_v37 = vpop.f32.mrf.mxu2 }
 0x639   :  { %v6462_v23 = vperm.slane %v6454_v44, %v14363_v19  ;;  %v7168_v25 = vrot.slane %v6440_v62, 4  ;;  %v17613_v40 = vpop.eup %12312  ;;  %v6458_v24 = vperm.slane %v6452_v5, %v14363_v19  ;;  %v7047_v50 = vrot.slane %v17526_v0, 4 }
 0x63a   :  { %20168 = vst [vmem:[#allocation70_spill] sm:$0xff] %v17613_v40  ;;  %v7066_v56 = vrot.slane %v17506_v10, 4  ;;  %v7085_v60 = vrot.slane %v17529_v3, 4  ;;  %v17624_v63 = vrot.slane %v7211_v52, 4  ;;  %v7029_v30 = vsel %vm2209_vm1, 0, %v7028_v29 }
 0x63b   :  { %v6465_v26 = vrot.slane %v6462_v23, 4  ;;  %8579 = vadd.xlane.f32.xlu0 %v17613_v40  ;;  %v17632_v44 = vsel %vm2209_vm1, %v6439_v49, %v6432_v22  ;;  %v7169_v10 = vsel %vm2209_vm1, %v7168_v25, %v6438_v12  ;;  %v7048_v3 = vsel %vm2209_vm1, 0, %v7047_v50  ;;  %v8138_v49 = vpop.f32.mrf.mxu1 }
 0x63c   :  { %v7067_v62 = vsel %vm2209_vm1, 0, %v7066_v56  ;;  %v6463_v23 = vrot.slane %v6458_v24, 4  ;;  %v7086_v5 = vsel %vm2209_vm1, 0, %v7085_v60  ;;  %v7575_v57 = vpack.i.b16 %v7048_v3, %v7029_v30 }
 0x63d   :  { %v6466_v52 = vsel %vm2209_vm1, 0, %v6465_v26  ;;  %v17640_v0 = vsel %vm2209_vm1, %v6465_v26, %v6458_v24  ;;  %v7587_v29 = vpack.i.b16 %v7086_v5, %v7067_v62  ;;  %v7576_v11 = vshrl.u32 %v7029_v30, 16 }
 0x63e   :  { %v7577_v22 = vshrl.u32 %v7048_v3, 16  ;;  %v7173_v25 = vperm.slane %v7169_v10, %v14331_v61  ;;  %v9131_v12 = vunpack.c.l.b16 %v7575_v57  ;;  %v7588_v50 = vshrl.u32 %v7067_v62, 16  ;;  %v7848_v10 = vpop.f32.mrf.mxu3  ;;  %v17651_v57 = vpop.permute.xlu0 %5863 }
 0x63f   :  { %v7589_v18 = vshrl.u32 %v7086_v5, 16  ;;  %v9132_v56 = vunpack.c.l.b16 %v7587_v29  ;;  %v8320_v8 = vadd.s32 24, %v17307_v47  ;;  %v8433_v60 = vsel %vm8337_vm5, %v8281_v37, -inf  ;;  %v5836_v29 = vpop.permute.xlu2 %5835 }
 0x640   :  { %v7578_v51 = vpack.i.b16 %v7577_v22, %v7576_v11  ;;  %v7187_v30 = vrot.slane %v6466_v52, 4  ;;  %v6464_v62 = vsel %vm2209_vm1, 0, %v6463_v23  ;;  %v8547_v26 = vmul.f32 1.442695, %v8433_v60  ;;  %v5834_v52 = vpop.permute.xlu1 %5833 }
 0x641   :  { %v7590_v3 = vpack.i.b16 %v7589_v18, %v7588_v50  ;;  %v9146_v11 = vpack.c.b16 %v9132_v56, %v9131_v12  ;;  %vm8338_vm6 = vcmp.ge.s32.totalorder %v8320_v8, %v17309_v54  ;;  %v17659_v18 = vrot.slane %v7173_v25, 4  ;;  %v8283_v12 = vpop.f32.mrf.mxu2 }
 0x642   :  { %v9240_v5 = vunpack.c.l.b16 %v7578_v51  ;;  %v8402_v37 = vsel %vm8338_vm6, %v7993_v13, -inf  ;;  %v8418_v22 = vsel %vm8338_vm6, %v8138_v49, -inf  ;;  %v8386_v51 = vsel %vm8338_vm6, %v7848_v10, -inf  ;;  %v20169_v49 = vld [vmem:[#allocation95_spill] sm:$0xff] }
 0x643   :  { %v9241_v48 = vunpack.c.l.b16 %v7590_v3  ;;  %11628 = vmatmul.msk.bf16.gmra.mxu1 %vm7783_vm2, %v9146_v11  ;;  %v8485_v50 = vmul.f32 1.442695, %v8402_v37  ;;  %v8517_v23 = vmul.f32 1.442695, %v8418_v22  ;;  %v17665_v56 = vsel %vm2209_vm1, %v7187_v30, %v6464_v62  ;;  %v7996_v37 = vpop.f32.mrf.mxu0 }
 0x644   :  { %v6033_v13 = vpack.i.b16 %v5836_v29, %v20077_v38  ;;  %v6035_v24 = vshrl.u32 %v5836_v29, 16  ;;  %v6022_v60 = vshrl.u32 %v20169_v49, 16  ;;  %v6021_v25 = vpack.i.b16 %v5834_v52, %v20169_v49 }
 0x645   :  { %v9255_v3 = vpack.c.b16 %v9241_v48, %v9240_v5  ;;  %12314 = vpow2.f32 %v8485_v50  ;;  %v6023_v9 = vshrl.u32 %v5834_v52, 16  ;;  %v8453_v11 = vmul.f32 1.442695, %v8386_v51  ;;  %v8141_v48 = vpop.f32.mrf.mxu1 }
 0x646   :  { %12316 = vpow2.f32 %v8517_v23  ;;  %v17672_v10 = vadd.s32 32, %v17307_v47  ;;  %v8434_v30 = vsel %vm8338_vm6, %v8283_v12, -inf  ;;  %v6034_v5 = vshrl.u32 %v20077_v38, 16  ;;  %v7851_v62 = vpop.f32.mrf.mxu3 }
 0x647   :  { %11644 = vmatmul.msk.bf16.gmra.mxu2 %vm7783_vm2, %v9255_v3  ;;  %12318 = vpow2.f32 %v8547_v26  ;;  %v6024_v29 = vpack.i.b16 %v6023_v9, %v6022_v60  ;;  %v17679_v22 = vperm.slane %v6033_v13, %v14331_v61  ;;  %v20170_v52 = vperm.slane %v17416_v41, %v14331_v61  ;;  %v5898_v3 = vpop.permute.xlu0 %5897 }
 0x648   :  { %vm8339_vm7 = vcmp.ge.s32.totalorder %v17672_v10, %v17309_v54  ;;  %v20171_v26 = vperm.slane %v17446_v43, %v14331_v61  ;;  %v6036_v23 = vpack.i.b16 %v6035_v24, %v6034_v5  ;;  %v6575_v38 = vperm.slane %v6021_v25, %v14331_v61 }
 0x649   :  { %v7099_v8 = vsel %vm2209_vm1, %v17440_v14, %v20170_v52  ;;  %v8403_v9 = vsel %vm8339_vm7, %v7996_v37, -inf  ;;  %v8549_v51 = vmul.f32 1.442695, %v8434_v30  ;;  %12320 = vpow2.f32 %v8453_v11 }
 0x64a   :  { %v7117_v50 = vrot.slane %v20171_v26, 4  ;;  %v8487_v12 = vmul.f32 1.442695, %v8403_v9  ;;  %v8419_v41 = vsel %vm8339_vm7, %v8141_v48, -inf  ;;  %v17699_v14 = vperm.slane %v7099_v8, %v14363_v19  ;;  %v5896_v8 = vpop.permute.xlu1 %5895 }
 0x64b   :  { %v17701_v43 = vpop.eup %12314  ;;  %v17704_v24 = vperm.slane %v6024_v29, %v14331_v61  ;;  %v8519_v13 = vmul.f32 1.442695, %v8419_v41  ;;  %v20173_v49 = vperm.slane %v17443_v17, %v14331_v61  ;;  %v20174_v25 = vperm.slane %v17380_v16, %v14331_v61 }
 0x64c   :  { %20172 = vst [vmem:[#allocation77_spill] sm:$0xff] %v17701_v43  ;;  %v17715_v37 = vpop.eup %12316  ;;  %12322 = vpow2.f32 %v8487_v12  ;;  %v20176_v17 = vperm.slane %v17413_v34, %v14331_v61  ;;  %8613 = vadd.xlane.f32.xlu1 %v17701_v43  ;;  %v17730_v16 = vperm.slane %v6036_v23, %v14331_v61  ;;  %v6027_v52 = vpack.i.b16 %v5898_v3, %v17603_v39 }
 0x64d   :  { %v7118_v60 = vsel %vm2209_vm1, %v7117_v50, %v20173_v49  ;;  %v7137_v11 = vsel %vm2209_vm1, %v17410_v31, %v20174_v25  ;;  %20175 = vst [vmem:[#allocation103_spill] sm:$0xff] %v17715_v37  ;;  %v17727_v48 = vpop.eup %12318  ;;  %v6583_v31 = vrot.slane %v6575_v38, 4  ;;  %12324 = vpow2.f32 %v8549_v51  ;;  %8645 = vadd.xlane.f32.xlu2 %v17715_v37 }
 0x64e   :  { %v17718_v30 = vperm.slane %v7118_v60, %v14363_v19  ;;  %v17721_v5 = vperm.slane %v7137_v11, %v14363_v19  ;;  %v7155_v29 = vrot.slane %v20176_v17, 4  ;;  %20177 = vst [vmem:[#allocation101_spill] sm:$0xff] %v17727_v48  ;;  %v20178_v26 = vperm.slane %v17385_v2, %v14331_v61 }
 0x64f   :  { %v7594_v9 = vshrl.u32 %v17699_v14, 16  ;;  %v6609_v12 = vrot.slane %v17704_v24, 4  ;;  %v6029_v41 = vshrl.u32 %v5898_v3, 16  ;;  %v6580_v49 = vperm.slane %v6027_v52, %v14331_v61  ;;  %v17747_v60 = vpop.eup %12320 }
 0x650   :  { %v7156_v34 = vsel %vm2209_vm1, %v7155_v29, %v20178_v26  ;;  %v7593_v50 = vpack.i.b16 %v17718_v30, %v17699_v14  ;;  %v7595_v23 = vshrl.u32 %v17718_v30, 16  ;;  %20179 = vst [vmem:[#allocation106_spill] sm:$0xff] %v17747_v60  ;;  %12326 = vpow2.f32 %v8519_v13 }
 0x651   :  { %v17744_v51 = vperm.slane %v7156_v34, %v14363_v19  ;;  %v7606_v25 = vshrl.u32 %v17721_v5, 16  ;;  %v6015_v11 = vpack.i.b16 %v5896_v8, %v17651_v57  ;;  %v20180_v34 = vshrl.u32 %v17603_v39, 16 }
 0x652   :  { %v7596_v2 = vpack.i.b16 %v7595_v23, %v7594_v9  ;;  %v8915_v29 = vunpack.c.l.b16 %v7593_v50  ;;  %v17756_v40 = vpop.eup %12322  ;;  %v6581_v32 = vrot.slane %v6580_v49, 4  ;;  %v6584_v13 = vsel %vm2209_vm1, %v6580_v49, %v6583_v31 }
 0x653   :  { %v7605_v17 = vpack.i.b16 %v17744_v51, %v17721_v5  ;;  %v7607_v26 = vshrl.u32 %v17744_v51, 16  ;;  %v6030_v3 = vpack.i.b16 %v6029_v41, %v20180_v34  ;;  %20181 = vst [vmem:[#allocation107_spill] sm:$0xff] %v17756_v40  ;;  %v6017_v9 = vshrl.u32 %v5896_v8, 16  ;;  %v17759_v23 = vpop.eup %12324  ;;  %8615 = vadd.xlane.f32.xlu0 %v17756_v40 }
 0x654   :  { %v9024_v52 = vunpack.c.l.b16 %v7596_v2  ;;  %20182 = vst [vmem:[#allocation100_spill] sm:$0xff] %v17759_v23  ;;  %v6592_v46 = vperm.slane %v6584_v13, %v14363_v19  ;;  %v8387_v39 = vsel %vm8339_vm7, %v7851_v62, -inf  ;;  %v6582_v41 = vsel %vm2209_vm1, %v6581_v32, %v6575_v38  ;;  %8675 = vadd.xlane.f32.xlu1 %v17727_v48 }
 0x655   :  { %v8916_v37 = vunpack.c.l.b16 %v7605_v17  ;;  %v7608_v43 = vpack.i.b16 %v7607_v26, %v7606_v25  ;;  %v6606_v50 = vperm.slane %v6030_v3, %v14331_v61  ;;  %v20183_v2 = vshrl.u32 %v17651_v57, 16  ;;  %8581 = vadd.xlane.f32.xlu2 %v17747_v60 }
 0x656   :  { %v6528_v8 = vperm.slane %v6015_v11, %v14331_v61  ;;  %v6588_v17 = vperm.slane %v6582_v41, %v14363_v19  ;;  %v6595_v26 = vrot.slane %v6592_v46, 4  ;;  %v17774_v34 = vpop.eup %12326  ;;  %v20185_v57 = vrot.slane %v17490_v1, 4 }
 0x657   :  { %v6018_v31 = vpack.i.b16 %v6017_v9, %v20183_v2  ;;  %v8929_v49 = vpack.c.b16 %v8916_v37, %v8915_v29  ;;  %v9025_v25 = vunpack.c.l.b16 %v7608_v43  ;;  %20184 = vst [vmem:[#allocation102_spill] sm:$0xff] %v17774_v34  ;;  %v6607_v3 = vrot.slane %v6606_v50, 4 }
 0x658   :  { %v6610_v62 = vsel %vm2209_vm1, %v6606_v50, %v6609_v12  ;;  %v6529_v32 = vrot.slane %v6528_v8, 4  ;;  %v6532_v38 = vsel %vm2209_vm1, %v6528_v8, %v20185_v57  ;;  %v6593_v37 = vrot.slane %v6588_v17, 4  ;;  %v8143_v8 = vpop.f32.mrf.mxu1 }
 0x659   :  { %11597 = vmatmul.msk.bf16.gmra.mxu3 %vm7783_vm2, %v8929_v49  ;;  %v9038_v11 = vpack.c.b16 %v9025_v25, %v9024_v52  ;;  %v6596_v43 = vsel %vm2209_vm1, 0, %v6595_v26  ;;  %v6618_v46 = vperm.slane %v6610_v62, %v14363_v19  ;;  %v8455_v29 = vmul.f32 1.442695, %v8387_v39 }
 0x65a   :  { %v6608_v13 = vsel %vm2209_vm1, %v6607_v3, %v17704_v24  ;;  %v7282_v9 = vrot.slane %v6596_v43, 4  ;;  %v6530_v12 = vsel %vm2209_vm1, %v6529_v32, %v17490_v1  ;;  %v6594_v52 = vsel %vm2209_vm1, 0, %v6593_v37 }
 0x65b   :  { %11613 = vmatmul.msk.bf16.gmra.mxu0 %vm7783_vm2, %v9038_v11  ;;  %v6614_v41 = vperm.slane %v6608_v13, %v14363_v19  ;;  %v6621_v2 = vrot.slane %v6618_v46, 4  ;;  %v6536_v39 = vperm.slane %v6530_v12, %v14363_v19  ;;  %v6540_v24 = vperm.slane %v6532_v38, %v14363_v19  ;;  %8677 = vadd.xlane.f32.xlu0 %v17759_v23  ;;  %v17803_v11 = vpop.permute.xlu2 %5869 }
 0x65c   :  { %v6554_v49 = vperm.slane %v6018_v31, %v14331_v61  ;;  %v7283_v62 = vsel %vm2209_vm1, %v7282_v9, %v6594_v52  ;;  %12328 = vpow2.f32 %v8455_v29  ;;  %v17801_v32 = vsel %vm2209_vm1, %v6595_v26, %v6588_v17  ;;  %8647 = vadd.xlane.f32.xlu1 %v17774_v34 }
 0x65d   :  { %v6619_v25 = vrot.slane %v6614_v41, 4  ;;  %v6622_v3 = vsel %vm2209_vm1, 0, %v6621_v2  ;;  %v6543_v37 = vrot.slane %v6540_v24, 4  ;;  %v6541_v38 = vrot.slane %v6536_v39, 4 }
 0x65e   :  { %v7301_v57 = vrot.slane %v6622_v3, 4  ;;  %v6555_v43 = vrot.slane %v6554_v49, 4  ;;  %v20186_v46 = vrot.slane %v17566_v42, 4  ;;  %v7287_v9 = vperm.slane %v7283_v62, %v14331_v61 }
 0x65f   :  { %v6620_v31 = vsel %vm2209_vm1, 0, %v6619_v25  ;;  %v6544_v29 = vsel %vm2209_vm1, 0, %v6543_v37  ;;  %v7104_v26 = vrot.slane %v17699_v14, 4  ;;  %v17815_v12 = vsel %vm2209_vm1, %v6621_v2, %v6614_v41 }
 0x660   :  { %v6558_v13 = vsel %vm2209_vm1, %v6554_v49, %v20186_v46  ;;  %v17818_v52 = vsel %vm2209_vm1, %v7301_v57, %v6620_v31  ;;  %v6556_v25 = vsel %vm2209_vm1, %v6555_v43, %v17566_v42  ;;  %v7244_v46 = vrot.slane %v6544_v29, 4  ;;  %v8286_v31 = vpop.f32.mrf.mxu2  ;;  %v7998_v49 = vpop.f32.mrf.mxu0 }
 0x661   :  { %v6566_v17 = vperm.slane %v6558_v13, %v14363_v19  ;;  %v6562_v3 = vperm.slane %v6556_v25, %v14363_v19  ;;  %v6542_v14 = vsel %vm2209_vm1, 0, %v6541_v38  ;;  %v7123_v41 = vrot.slane %v17718_v30, 4 }
 0x662   :  { %v7142_v2 = vrot.slane %v17721_v5, 4  ;;  %v7161_v57 = vrot.slane %v17744_v51, 4  ;;  %v17830_v13 = vpop.eup %12328  ;;  %v17832_v1 = vrot.slane %v7287_v9, 4  ;;  %v7105_v29 = vsel %vm2209_vm1, 0, %v7104_v26 }
 0x663   :  { %v6569_v62 = vrot.slane %v6566_v17, 4  ;;  %20187 = vst [vmem:[#allocation105_spill] sm:$0xff] %v17830_v13  ;;  %v17841_v30 = vsel %vm2209_vm1, %v6543_v37, %v6536_v39  ;;  %v7124_v5 = vsel %vm2209_vm1, 0, %v7123_v41  ;;  %v6567_v17 = vrot.slane %v6562_v3, 4  ;;  %v5840_v10 = vpop.permute.xlu2 %5839 }
 0x664   :  { %v7143_v51 = vsel %vm2209_vm1, 0, %v7142_v2  ;;  %v17846_v9 = vsel %vm2209_vm1, %v7244_v46, %v6542_v14  ;;  %v7162_v25 = vsel %vm2209_vm1, 0, %v7161_v57  ;;  %v7599_v42 = vpack.i.b16 %v7124_v5, %v7105_v29  ;;  %8583 = vadd.xlane.f32.xlu1 %v17830_v13 }
 0x665   :  { %v6570_v38 = vsel %vm2209_vm1, 0, %v6569_v62  ;;  %v17851_v26 = vsel %vm2209_vm1, %v6569_v62, %v6562_v3  ;;  %v7611_v43 = vpack.i.b16 %v7162_v25, %v7143_v51  ;;  %v7600_v39 = vshrl.u32 %v7105_v29, 16 }
 0x666   :  { %v7601_v37 = vshrl.u32 %v7124_v5, 16  ;;  %v7263_v41 = vrot.slane %v6570_v38, 4  ;;  %v9133_v24 = vunpack.c.l.b16 %v7599_v42  ;;  %v7612_v2 = vshrl.u32 %v7143_v51, 16  ;;  %v7853_v42 = vpop.f32.mrf.mxu3  ;;  %v17862_v38 = vpop.permute.xlu0 %5867 }
 0x667   :  { %v7613_v50 = vshrl.u32 %v7162_v25, 16  ;;  %v9134_v34 = vunpack.c.l.b16 %v7611_v43  ;;  %v8322_v14 = vadd.s32 40, %v17307_v47  ;;  %v8435_v57 = vsel %vm8339_vm7, %v8286_v31, -inf }
 0x668   :  { %v7602_v46 = vpack.i.b16 %v7601_v37, %v7600_v39  ;;  %v6568_v13 = vsel %vm2209_vm1, 0, %v6567_v17  ;;  %v8551_v39 = vmul.f32 1.442695, %v8435_v57  ;;  %v6059_v3 = vshrl.u32 %v5840_v10, 16 }
 0x669   :  { %v7614_v29 = vpack.i.b16 %v7613_v50, %v7612_v2  ;;  %v9147_v5 = vpack.c.b16 %v9134_v34, %v9133_v24  ;;  %vm8340_vm8 = vcmp.ge.s32.totalorder %v8322_v14, %v17309_v54  ;;  %v5838_v50 = vpop.permute.xlu1 %5837  ;;  %v17872_v37 = vsel %vm2209_vm1, %v7263_v41, %v6568_v13 }
 0x66a   :  { %v9242_v51 = vunpack.c.l.b16 %v7602_v46  ;;  %v8404_v17 = vsel %vm8340_vm8, %v7998_v49, -inf  ;;  %v8420_v25 = vsel %vm8340_vm8, %v8143_v8, -inf  ;;  %v8388_v24 = vsel %vm8340_vm8, %v7853_v42, -inf  ;;  %v8288_v46 = vpop.f32.mrf.mxu2 }
 0x66b   :  { %v9243_v31 = vunpack.c.l.b16 %v7614_v29  ;;  %11629 = vmatmul.msk.bf16.gmra.mxu1 %vm7783_vm2, %v9147_v5  ;;  %v8489_v2 = vmul.f32 1.442695, %v8404_v17  ;;  %v8521_v34 = vmul.f32 1.442695, %v8420_v25  ;;  %v6057_v49 = vpack.i.b16 %v5840_v10, %v20083_v36  ;;  %v8001_v5 = vpop.f32.mrf.mxu0  ;;  %v8146_v25 = vpop.f32.mrf.mxu1 }
 0x66c   :  { %v6046_v8 = vshrl.u32 %v20079_v53, 16  ;;  %v6045_v13 = vpack.i.b16 %v5838_v50, %v20079_v53  ;;  %v6047_v41 = vshrl.u32 %v5838_v50, 16  ;;  %v8457_v57 = vmul.f32 1.442695, %v8388_v24 }
 0x66d   :  { %v9256_v29 = vpack.c.b16 %v9243_v31, %v9242_v51  ;;  %12330 = vpow2.f32 %v8489_v2  ;;  %v17883_v42 = vadd.s32 48, %v17307_v47  ;;  %v8436_v51 = vsel %vm8340_vm8, %v8288_v46, -inf }
 0x66e   :  { %12332 = vpow2.f32 %v8521_v34  ;;  %v6058_v10 = vshrl.u32 %v20083_v36, 16  ;;  %v6048_v31 = vpack.i.b16 %v6047_v41, %v6046_v8  ;;  %v6679_v17 = vperm.slane %v6045_v13, %v14331_v61 }
 0x66f   :  { %11645 = vmatmul.msk.bf16.gmra.mxu2 %vm7783_vm2, %v9256_v29  ;;  %12334 = vpow2.f32 %v8551_v39  ;;  %v17890_v53 = vperm.slane %v6057_v49, %v14331_v61  ;;  %vm8341_vm9 = vcmp.ge.s32.totalorder %v17883_v42, %v17309_v54  ;;  %v20188_v50 = vperm.slane %v17632_v44, %v14331_v61 }
 0x670   :  { %v20189_v39 = vperm.slane %v17665_v56, %v14331_v61  ;;  %v17902_v2 = vpack.i.b16 %v6059_v3, %v6058_v10  ;;  %v17905_v34 = vperm.slane %v6048_v31, %v14331_v61  ;;  %v8405_v24 = vsel %vm8341_vm9, %v8001_v5, -inf  ;;  %v5902_v56 = vpop.permute.xlu0 %5901 }
 0x671   :  { %v7175_v14 = vsel %vm2209_vm1, %v17659_v18, %v20188_v50  ;;  %v8553_v46 = vmul.f32 1.442695, %v8436_v51  ;;  %12336 = vpow2.f32 %v8457_v57  ;;  %v8491_v29 = vmul.f32 1.442695, %v8405_v24 }
 0x672   :  { %v7193_v36 = vrot.slane %v20189_v39, 4  ;;  %v8421_v44 = vsel %vm8341_vm9, %v8146_v25, -inf  ;;  %v17914_v18 = vperm.slane %v7175_v14, %v14363_v19  ;;  %v6687_v49 = vrot.slane %v6679_v17, 4  ;;  %v5900_v39 = vpop.permute.xlu1 %5899 }
 0x673   :  { %v17916_v3 = vpop.eup %12330  ;;  %v8523_v8 = vmul.f32 1.442695, %v8421_v44  ;;  %v20191_v13 = vperm.slane %v17640_v0, %v14331_v61  ;;  %v20192_v57 = vperm.slane %v17594_v35, %v14331_v61  ;;  %12338 = vpow2.f32 %v8491_v29 }
 0x674   :  { %20190 = vst [vmem:[#allocation104_spill] sm:$0xff] %v17916_v3  ;;  %v17927_v51 = vpop.eup %12332  ;;  %v20194_v0 = vperm.slane %v17608_v58, %v14331_v61  ;;  %8617 = vadd.xlane.f32.xlu2 %v17916_v3  ;;  %v6713_v35 = vrot.slane %v17905_v34, 4  ;;  %12340 = vpow2.f32 %v8553_v46  ;;  %v6053_v14 = vshrl.u32 %v5902_v56, 16 }
 0x675   :  { %v7194_v41 = vsel %vm2209_vm1, %v7193_v36, %v20191_v13  ;;  %v7213_v5 = vsel %vm2209_vm1, %v17624_v63, %v20192_v57  ;;  %20193 = vst [vmem:[#allocation51_spill] sm:$0xff] %v17927_v51  ;;  %v17939_v50 = vpop.eup %12334  ;;  %v6051_v63 = vpack.i.b16 %v5902_v56, %v17803_v11  ;;  %8649 = vadd.xlane.f32.xlu0 %v17927_v51  ;;  %v7618_v29 = vshrl.u32 %v17914_v18, 16 }
 0x676   :  { %v17930_v10 = vperm.slane %v7194_v41, %v14363_v19  ;;  %v17933_v31 = vperm.slane %v7213_v5, %v14363_v19  ;;  %v7231_v25 = vrot.slane %v20194_v0, 4  ;;  %20195 = vst [vmem:[#allocation52_spill] sm:$0xff] %v17939_v50  ;;  %v20196_v36 = vperm.slane %v17601_v45, %v14331_v61 }
 0x677   :  { %12342 = vpow2.f32 %v8523_v8  ;;  %v20197_v56 = vshrl.u32 %v17803_v11, 16  ;;  %v6684_v41 = vperm.slane %v6051_v63, %v14331_v61  ;;  %v17958_v57 = vpop.eup %12336 }
 0x678   :  { %v7232_v24 = vsel %vm2209_vm1, %v7231_v25, %v20196_v36  ;;  %v7617_v58 = vpack.i.b16 %v17930_v10, %v17914_v18  ;;  %v7619_v44 = vshrl.u32 %v17930_v10, 16  ;;  %20198 = vst [vmem:[#allocation76_spill] sm:$0xff] %v17958_v57  ;;  %v7630_v0 = vshrl.u32 %v17933_v31, 16 }
 0x679   :  { %v17953_v46 = vperm.slane %v7232_v24, %v14363_v19  ;;  %v6054_v13 = vpack.i.b16 %v6053_v14, %v20197_v56  ;;  %v6039_v25 = vpack.i.b16 %v5900_v39, %v17862_v38  ;;  %v6685_v24 = vrot.slane %v6684_v41, 4  ;;  %v17966_v11 = vpop.eup %12338 }
 0x67a   :  { %v8917_v45 = vunpack.c.l.b16 %v7617_v58  ;;  %v7620_v5 = vpack.i.b16 %v7619_v44, %v7618_v29  ;;  %v6688_v62 = vsel %vm2209_vm1, %v6684_v41, %v6687_v49  ;;  %20199 = vst [vmem:[#allocation83_spill] sm:$0xff] %v17966_v11  ;;  %v6041_v29 = vshrl.u32 %v5900_v39, 16  ;;  %v17970_v44 = vpop.eup %12340  ;;  %8619 = vadd.xlane.f32.xlu1 %v17966_v11 }
 0x67b   :  { %v7629_v36 = vpack.i.b16 %v17953_v46, %v17933_v31  ;;  %v7631_v8 = vshrl.u32 %v17953_v46, 16  ;;  %v6696_v63 = vperm.slane %v6688_v62, %v14363_v19  ;;  %v6710_v58 = vperm.slane %v6054_v13, %v14331_v61  ;;  %20200 = vst [vmem:[#allocation66_spill] sm:$0xff] %v17970_v44 }
 0x67c   :  { %v9026_v14 = vunpack.c.l.b16 %v7620_v5  ;;  %v6686_v51 = vsel %vm2209_vm1, %v6685_v24, %v6679_v17  ;;  %v6632_v40 = vperm.slane %v6039_v25, %v14331_v61  ;;  %8679 = vadd.xlane.f32.xlu2 %v17939_v50  ;;  %v17984_v17 = vperm.slane %v17902_v2, %v14331_v61 }
 0x67d   :  { %v8918_v56 = vunpack.c.l.b16 %v7629_v36  ;;  %v7632_v43 = vpack.i.b16 %v7631_v8, %v7630_v0  ;;  %v6692_v49 = vperm.slane %v6686_v51, %v14363_v19  ;;  %v6699_v41 = vrot.slane %v6696_v63, 4  ;;  %v17978_v62 = vpop.eup %12342  ;;  %8585 = vadd.xlane.f32.xlu0 %v17958_v57 }
 0x67e   :  { %v6711_v3 = vrot.slane %v6710_v58, 4  ;;  %v6714_v5 = vsel %vm2209_vm1, %v6710_v58, %v6713_v35  ;;  %20201 = vst [vmem:[#allocation73_spill] sm:$0xff] %v17978_v62  ;;  %v6633_v36 = vrot.slane %v6632_v40, 4  ;;  %v20202_v24 = vshrl.u32 %v17862_v38, 16 }
 0x67f   :  { %v8930_v39 = vpack.c.b16 %v8918_v56, %v8917_v45  ;;  %v9027_v13 = vunpack.c.l.b16 %v7632_v43  ;;  %v6722_v0 = vperm.slane %v6714_v5, %v14363_v19  ;;  %v6697_v51 = vrot.slane %v6692_v49, 4 }
 0x680   :  { %v6700_v25 = vsel %vm2209_vm1, 0, %v6699_v41  ;;  %v6712_v35 = vsel %vm2209_vm1, %v6711_v3, %v17905_v34  ;;  %v6042_v63 = vpack.i.b16 %v6041_v29, %v20202_v24  ;;  %v6634_v2 = vsel %vm2209_vm1, %v6633_v36, %v17679_v22 }
 0x681   :  { %11598 = vmatmul.msk.bf16.gmra.mxu3 %vm7783_vm2, %v8930_v39  ;;  %v9039_v8 = vpack.c.b16 %v9027_v13, %v9026_v14  ;;  %v6718_v43 = vperm.slane %v6712_v35, %v14363_v19  ;;  %v6725_v45 = vrot.slane %v6722_v0, 4  ;;  %v6698_v58 = vsel %vm2209_vm1, 0, %v6697_v51  ;;  %v7856_v39 = vpop.f32.mrf.mxu3 }
 0x682   :  { %v7358_v56 = vrot.slane %v6700_v25, 4  ;;  %v20203_v5 = vrot.slane %v17679_v22, 4  ;;  %v20204_v34 = vperm.slane %v17846_v9, %v14331_v61  ;;  %v6640_v29 = vperm.slane %v6634_v2, %v14363_v19  ;;  %8681 = vadd.xlane.f32.xlu1 %v17970_v44 }
 0x683   :  { %11614 = vmatmul.msk.bf16.gmra.mxu0 %vm7783_vm2, %v9039_v8  ;;  %v6723_v14 = vrot.slane %v6718_v43, 4  ;;  %v6726_v38 = vsel %vm2209_vm1, 0, %v6725_v45  ;;  %v6658_v25 = vperm.slane %v6042_v63, %v14331_v61  ;;  %v18017_v8 = vsel %vm2209_vm1, %v6699_v41, %v6692_v49  ;;  %v18031_v49 = vpop.permute.xlu2 %5873 }
 0x684   :  { %v6636_v11 = vsel %vm2209_vm1, %v6632_v40, %v20203_v5  ;;  %v18002_v3 = vrot.slane %v20204_v34, 4  ;;  %v7359_v22 = vsel %vm2209_vm1, %v7358_v56, %v6698_v58  ;;  %v7377_v0 = vrot.slane %v6726_v38, 4  ;;  %8651 = vadd.xlane.f32.xlu2 %v17978_v62  ;;  %v18075_v62 = vpop.permute.xlu0 %5871 }
 0x685   :  { %v6644_v40 = vperm.slane %v6636_v11, %v14363_v19  ;;  %v6724_v36 = vsel %vm2209_vm1, 0, %v6723_v14  ;;  %v6645_v51 = vrot.slane %v6640_v29, 4  ;;  %v8389_v58 = vsel %vm8341_vm9, %v7856_v39, -inf }
 0x686   :  { %v7363_v11 = vperm.slane %v7359_v22, %v14331_v61  ;;  %v18025_v56 = vsel %vm2209_vm1, %v6725_v45, %v6718_v43  ;;  %v6659_v63 = vrot.slane %v6658_v25, 4  ;;  %v7180_v2 = vrot.slane %v17914_v18, 4 }
 0x687   :  { %v6647_v24 = vrot.slane %v6644_v40, 4  ;;  %v18029_v5 = vsel %vm2209_vm1, %v7377_v0, %v6724_v36  ;;  %v20205_v34 = vrot.slane %v17730_v16, 4  ;;  %v8459_v38 = vmul.f32 1.442695, %v8389_v58 }
 0x688   :  { %v6646_v39 = vsel %vm2209_vm1, 0, %v6645_v51  ;;  %v6660_v43 = vsel %vm2209_vm1, %v6659_v63, %v17730_v16  ;;  %v7199_v40 = vrot.slane %v17930_v10, 4  ;;  %v7218_v58 = vrot.slane %v17933_v31, 4 }
 0x689   :  { %v6648_v41 = vsel %vm2209_vm1, 0, %v6647_v24  ;;  %v6662_v14 = vsel %vm2209_vm1, %v6658_v25, %v20205_v34  ;;  %v6666_v22 = vperm.slane %v6660_v43, %v14363_v19  ;;  %v18043_v0 = vsel %vm2209_vm1, %v6647_v24, %v6640_v29  ;;  %v8291_v24 = vpop.f32.mrf.mxu2 }
 0x68a   :  { %v6670_v45 = vperm.slane %v6662_v14, %v14363_v19  ;;  %v7320_v18 = vrot.slane %v6648_v41, 4  ;;  %12344 = vpow2.f32 %v8459_v38  ;;  %v7181_v25 = vsel %vm2209_vm1, 0, %v7180_v2 }
 0x68b   :  { %v7237_v51 = vrot.slane %v17953_v46, 4  ;;  %v7200_v29 = vsel %vm2209_vm1, 0, %v7199_v40  ;;  %v18055_v34 = vrot.slane %v7363_v11, 4  ;;  %v7219_v31 = vsel %vm2209_vm1, 0, %v7218_v58  ;;  %v8148_v40 = vpop.f32.mrf.mxu1 }
 0x68c   :  { %v6673_v36 = vrot.slane %v6670_v45, 4  ;;  %v18058_v10 = vsel %vm2209_vm1, %v7320_v18, %v6646_v39  ;;  %v6671_v14 = vrot.slane %v6666_v22, 4  ;;  %v7624_v43 = vshrl.u32 %v7181_v25, 16  ;;  %v8003_v45 = vpop.f32.mrf.mxu0 }
 0x68d   :  { %v7238_v46 = vsel %vm2209_vm1, 0, %v7237_v51  ;;  %v7623_v63 = vpack.i.b16 %v7200_v29, %v7181_v25  ;;  %v7625_v39 = vshrl.u32 %v7200_v29, 16  ;;  %v7636_v51 = vshrl.u32 %v7219_v31, 16 }
 0x68e   :  { %v6674_v11 = vsel %vm2209_vm1, 0, %v6673_v36  ;;  %v7635_v16 = vpack.i.b16 %v7238_v46, %v7219_v31  ;;  %v7637_v35 = vshrl.u32 %v7238_v46, 16  ;;  %v8324_v2 = vadd.s32 56, %v17307_v47  ;;  %v5844_v46 = vpop.permute.xlu2 %5843 }
 0x68f   :  { %v18073_v9 = vsel %vm2209_vm1, %v6673_v36, %v6666_v22  ;;  %v9135_v38 = vunpack.c.l.b16 %v7623_v63  ;;  %v7626_v13 = vpack.i.b16 %v7625_v39, %v7624_v43  ;;  %v7339_v25 = vrot.slane %v6674_v11, 4  ;;  %v7858_v39 = vpop.f32.mrf.mxu3 }
 0x690   :  { %v18067_v18 = vpop.eup %12344  ;;  %v9136_v41 = vunpack.c.l.b16 %v7635_v16  ;;  %v7638_v29 = vpack.i.b16 %v7637_v35, %v7636_v51  ;;  %vm8342_vm10 = vcmp.ge.s32.totalorder %v8324_v2, %v17309_v54  ;;  %v8437_v31 = vsel %vm8341_vm9, %v8291_v24, -inf  ;;  %v5842_v16 = vpop.permute.xlu1 %5841 }
 0x691   :  { %20206 = vst [vmem:[#allocation63_spill] sm:$0xff] %v18067_v18  ;;  %8587 = vadd.xlane.f32.xlu2 %v18067_v18  ;;  %v9244_v44 = vunpack.c.l.b16 %v7626_v13  ;;  %v8406_v22 = vsel %vm8342_vm10, %v8003_v45, -inf  ;;  %v8422_v36 = vsel %vm8342_vm10, %v8148_v40, -inf  ;;  %v6672_v63 = vsel %vm2209_vm1, 0, %v6671_v14  ;;  %v8293_v51 = vpop.f32.mrf.mxu2 }
 0x692   :  { %v9148_v58 = vpack.c.b16 %v9136_v41, %v9135_v38  ;;  %v9245_v43 = vunpack.c.l.b16 %v7638_v29  ;;  %v8493_v35 = vmul.f32 1.442695, %v8406_v22  ;;  %v8525_v11 = vmul.f32 1.442695, %v8422_v36 }
 0x693   :  { %v8555_v42 = vmul.f32 1.442695, %v8437_v31  ;;  %v6081_v24 = vpack.i.b16 %v5844_v46, %v20096_v20  ;;  %v6083_v41 = vshrl.u32 %v5844_v46, 16  ;;  %v6070_v13 = vshrl.u32 %v20084_v27, 16  ;;  %v8151_v36 = vpop.f32.mrf.mxu1 }
 0x694   :  { %11630 = vmatmul.msk.bf16.gmra.mxu1 %vm7783_vm2, %v9148_v58  ;;  %v9257_v38 = vpack.c.b16 %v9245_v43, %v9244_v44  ;;  %12346 = vpow2.f32 %v8493_v35  ;;  %v6069_v45 = vpack.i.b16 %v5842_v16, %v20084_v27  ;;  %v6071_v40 = vshrl.u32 %v5842_v16, 16  ;;  %v8006_v22 = vpop.f32.mrf.mxu0 }
 0x695   :  { %v18092_v14 = vsel %vm2209_vm1, %v7339_v25, %v6672_v63  ;;  %12348 = vpow2.f32 %v8525_v11  ;;  %v6082_v29 = vshrl.u32 %v20096_v20, 16  ;;  %v8390_v58 = vsel %vm8342_vm10, %v7858_v39, -inf }
 0x696   :  { %11646 = vmatmul.msk.bf16.gmra.mxu2 %vm7783_vm2, %v9257_v38  ;;  %v6072_v31 = vpack.i.b16 %v6071_v40, %v6070_v13  ;;  %v18099_v46 = vperm.slane %v6069_v45, %v14331_v61  ;;  %v8461_v44 = vmul.f32 1.442695, %v8390_v58  ;;  %v18102_v27 = vadd.s32 64, %v17307_v47 }
 0x697   :  { %12350 = vpow2.f32 %v8555_v42  ;;  %v6064_v25 = vshrl.u32 %v18075_v62, 16  ;;  %v8438_v20 = vsel %vm8342_vm10, %v8293_v51, -inf  ;;  %v20207_v16 = vperm.slane %v17841_v30, %v14331_v61  ;;  %v5906_v42 = vpop.permute.xlu0 %5905 }
 0x698   :  { %v18112_v43 = vpack.i.b16 %v6083_v41, %v6082_v29  ;;  %v18115_v35 = vperm.slane %v6081_v24, %v14331_v61  ;;  %v18118_v11 = vperm.slane %v6072_v31, %v14331_v61  ;;  %vm8343_vm11 = vcmp.ge.s32.totalorder %v18102_v27, %v17309_v54 }
 0x699   :  { %v7251_v63 = vsel %vm2209_vm1, %v18002_v3, %v20207_v16  ;;  %v6791_v2 = vrot.slane %v18099_v46, 4  ;;  %v8407_v30 = vsel %vm8343_vm11, %v8006_v22, -inf  ;;  %v8423_v3 = vsel %vm8343_vm11, %v8151_v36, -inf }
 0x69a   :  { %v8557_v39 = vmul.f32 1.442695, %v8438_v20  ;;  %v18129_v24 = vpop.eup %12346  ;;  %12352 = vpow2.f32 %v8461_v44  ;;  %v8495_v41 = vmul.f32 1.442695, %v8407_v30  ;;  %v8527_v13 = vmul.f32 1.442695, %v8423_v3  ;;  %v5904_v20 = vpop.permute.xlu1 %5903 }
 0x69b   :  { %20208 = vst [vmem:[#allocation62_spill] sm:$0xff] %v18129_v24  ;;  %v18132_v38 = vperm.slane %v7251_v63, %v14363_v19  ;;  %v18134_v45 = vpop.eup %12348  ;;  %v20210_v40 = vperm.slane %v17872_v37, %v14331_v61  ;;  %v20211_v29 = vperm.slane %v17801_v32, %v14331_v61  ;;  %v20212_v31 = vperm.slane %v17818_v52, %v14331_v61 }
 0x69c   :  { %20209 = vst [vmem:[#allocation80_spill] sm:$0xff] %v18134_v45  ;;  %12354 = vpow2.f32 %v8557_v39  ;;  %8621 = vadd.xlane.f32.xlu0 %v18129_v24  ;;  %v6817_v22 = vrot.slane %v18118_v11, 4  ;;  %v6075_v37 = vpack.i.b16 %v5906_v42, %v18031_v49  ;;  %8653 = vadd.xlane.f32.xlu1 %v18134_v45  ;;  %v20215_v16 = vperm.slane %v17815_v12, %v14331_v61 }
 0x69d   :  { %v7269_v51 = vrot.slane %v20210_v40, 4  ;;  %v7289_v58 = vsel %vm2209_vm1, %v17832_v1, %v20211_v29  ;;  %v7307_v44 = vrot.slane %v20212_v31, 4  ;;  %12356 = vpow2.f32 %v8495_v41  ;;  %v18154_v32 = vpop.eup %12350 }
 0x69e   :  { %v18150_v36 = vperm.slane %v7289_v58, %v14363_v19  ;;  %20213 = vst [vmem:[#allocation67_spill] sm:$0xff] %v18154_v32  ;;  %v20214_v1 = vperm.slane %v17851_v26, %v14331_v61  ;;  %v7642_v30 = vshrl.u32 %v18132_v38, 16  ;;  %v6077_v3 = vshrl.u32 %v5906_v42, 16 }
 0x69f   :  { %v7308_v63 = vsel %vm2209_vm1, %v7307_v44, %v20215_v16  ;;  %12358 = vpow2.f32 %v8527_v13  ;;  %v6788_v40 = vperm.slane %v6075_v37, %v14331_v61  ;;  %v6063_v12 = vpack.i.b16 %v5904_v20, %v18075_v62 }
 0x6a0   :  { %v7270_v52 = vsel %vm2209_vm1, %v7269_v51, %v20214_v1  ;;  %v18169_v41 = vperm.slane %v7308_v63, %v14363_v19  ;;  %v7654_v26 = vshrl.u32 %v18150_v36, 16  ;;  %v20216_v51 = vshrl.u32 %v18031_v49, 16  ;;  %v18176_v31 = vpop.eup %12352 }
 0x6a1   :  { %v18166_v39 = vperm.slane %v7270_v52, %v14363_v19  ;;  %v6065_v58 = vshrl.u32 %v5904_v20, 16  ;;  %20217 = vst [vmem:[#allocation68_spill] sm:$0xff] %v18176_v31  ;;  %v6789_v52 = vrot.slane %v6788_v40, 4  ;;  %v6792_v49 = vsel %vm2209_vm1, %v6788_v40, %v6791_v2 }
 0x6a2   :  { %v6078_v29 = vpack.i.b16 %v6077_v3, %v20216_v51  ;;  %v7653_v13 = vpack.i.b16 %v18169_v41, %v18150_v36  ;;  %v7655_v37 = vshrl.u32 %v18169_v41, 16  ;;  %v18184_v1 = vpop.eup %12354  ;;  %v6800_v24 = vperm.slane %v6792_v49, %v14363_v19 }
 0x6a3   :  { %v7641_v42 = vpack.i.b16 %v18166_v39, %v18132_v38  ;;  %v7643_v44 = vshrl.u32 %v18166_v39, 16  ;;  %20218 = vst [vmem:[#allocation69_spill] sm:$0xff] %v18184_v1  ;;  %v6066_v20 = vpack.i.b16 %v6065_v58, %v6064_v25  ;;  %v18188_v16 = vpop.eup %12356  ;;  %v6790_v45 = vsel %vm2209_vm1, %v6789_v52, %v18099_v46 }
 0x6a4   :  { %v6814_v62 = vperm.slane %v6078_v29, %v14331_v61  ;;  %20219 = vst [vmem:[#allocation74_spill] sm:$0xff] %v18188_v16  ;;  %v8920_v3 = vunpack.c.l.b16 %v7653_v13  ;;  %v7656_v18 = vpack.i.b16 %v7655_v37, %v7654_v26  ;;  %8683 = vadd.xlane.f32.xlu0 %v18154_v32  ;;  %8623 = vadd.xlane.f32.xlu2 %v18188_v16  ;;  %v6803_v26 = vrot.slane %v6800_v24, 4 }
 0x6a5   :  { %v8919_v63 = vunpack.c.l.b16 %v7641_v42  ;;  %v7644_v51 = vpack.i.b16 %v7643_v44, %v7642_v30  ;;  %v18196_v2 = vpop.eup %12358  ;;  %v6796_v30 = vperm.slane %v6790_v45, %v14363_v19  ;;  %8589 = vadd.xlane.f32.xlu1 %v18176_v31  ;;  %v18206_v42 = vperm.slane %v18112_v43, %v14331_v61 }
 0x6a6   :  { %v6815_v50 = vrot.slane %v6814_v62, 4  ;;  %v6818_v57 = vsel %vm2209_vm1, %v6814_v62, %v6817_v22  ;;  %20220 = vst [vmem:[#allocation61_spill] sm:$0xff] %v18196_v2  ;;  %v9029_v29 = vunpack.c.l.b16 %v7656_v18  ;;  %v6736_v22 = vperm.slane %v6063_v12, %v14331_v61 }
 0x6a7   :  { %v8931_v25 = vpack.c.b16 %v8920_v3, %v8919_v63  ;;  %v9028_v40 = vunpack.c.l.b16 %v7644_v51  ;;  %v6826_v58 = vperm.slane %v6818_v57, %v14363_v19  ;;  %v6801_v18 = vrot.slane %v6796_v30, 4  ;;  %v7861_v51 = vpop.f32.mrf.mxu3 }
 0x6a8   :  { %v6816_v46 = vsel %vm2209_vm1, %v6815_v50, %v18118_v11  ;;  %v6804_v44 = vsel %vm2209_vm1, 0, %v6803_v26  ;;  %v6737_v37 = vrot.slane %v6736_v22, 4  ;;  %v6762_v50 = vperm.slane %v6066_v20, %v14331_v61  ;;  %v18226_v20 = vpop.permute.xlu2 %5877 }
 0x6a9   :  { %11599 = vmatmul.msk.bf16.gmra.mxu3 %vm7783_vm2, %v8931_v25  ;;  %v9040_v13 = vpack.c.b16 %v9029_v29, %v9028_v40  ;;  %v6822_v45 = vperm.slane %v6816_v46, %v14363_v19  ;;  %v6829_v24 = vrot.slane %v6826_v58, 4  ;;  %v20221_v57 = vperm.slane %v18058_v10, %v14331_v61 }
 0x6aa   :  { %v6802_v12 = vsel %vm2209_vm1, 0, %v6801_v18  ;;  %v7434_v52 = vrot.slane %v6804_v44, 4  ;;  %v18224_v62 = vsel %vm2209_vm1, %v6803_v26, %v6796_v30  ;;  %v6738_v10 = vsel %vm2209_vm1, %v6737_v37, %v17890_v53 }
 0x6ab   :  { %v18215_v11 = vrot.slane %v20221_v57, 4  ;;  %11615 = vmatmul.msk.bf16.gmra.mxu0 %vm7783_vm2, %v9040_v13  ;;  %v20222_v63 = vrot.slane %v17890_v53, 4  ;;  %v6830_v29 = vsel %vm2209_vm1, 0, %v6829_v24  ;;  %v6827_v30 = vrot.slane %v6822_v45, 4 }
 0x6ac   :  { %v7435_v46 = vsel %vm2209_vm1, %v7434_v52, %v6802_v12  ;;  %v6744_v26 = vperm.slane %v6738_v10, %v14363_v19  ;;  %v6763_v13 = vrot.slane %v6762_v50, 4  ;;  %8655 = vadd.xlane.f32.xlu0 %v18196_v2  ;;  %8685 = vadd.xlane.f32.xlu2 %v18184_v1  ;;  %v20223_v18 = vrot.slane %v17984_v17, 4 }
 0x6ad   :  { %v6740_v3 = vsel %vm2209_vm1, %v6736_v22, %v20222_v63  ;;  %v8391_v37 = vsel %vm8343_vm11, %v7861_v51, -inf  ;;  %v7439_v57 = vperm.slane %v7435_v46, %v14331_v61  ;;  %v7453_v12 = vrot.slane %v6830_v29, 4 }
 0x6ae   :  { %v6748_v58 = vperm.slane %v6740_v3, %v14363_v19  ;;  %v6766_v44 = vsel %vm2209_vm1, %v6762_v50, %v20223_v18  ;;  %v6749_v52 = vrot.slane %v6744_v26, 4  ;;  %v6764_v63 = vsel %vm2209_vm1, %v6763_v13, %v17984_v17  ;;  %v8008_v17 = vpop.f32.mrf.mxu0  ;;  %v8296_v13 = vpop.f32.mrf.mxu2 }
 0x6af   :  { %v6774_v3 = vperm.slane %v6766_v44, %v14363_v19  ;;  %v8463_v53 = vmul.f32 1.442695, %v8391_v37  ;;  %v7256_v40 = vrot.slane %v18132_v38, 4  ;;  %v6828_v25 = vsel %vm2209_vm1, 0, %v6827_v30 }
 0x6b0   :  { %v6751_v10 = vrot.slane %v6748_v58, 4  ;;  %v18257_v50 = vsel %vm2209_vm1, %v6829_v24, %v6822_v45  ;;  %v6770_v46 = vperm.slane %v6764_v63, %v14363_v19  ;;  %v6750_v29 = vsel %vm2209_vm1, 0, %v6749_v52 }
 0x6b1   :  { %v6777_v58 = vrot.slane %v6774_v3, 4  ;;  %12360 = vpow2.f32 %v8463_v53  ;;  %v7275_v37 = vrot.slane %v18166_v39, 4  ;;  %v7294_v38 = vrot.slane %v18150_v36, 4  ;;  %v8153_v53 = vpop.f32.mrf.mxu1 }
 0x6b2   :  { %v6752_v51 = vsel %vm2209_vm1, 0, %v6751_v10  ;;  %v6775_v44 = vrot.slane %v6770_v46, 4  ;;  %v7313_v30 = vrot.slane %v18169_v41, 4  ;;  %v18265_v45 = vrot.slane %v7439_v57, 4 }
 0x6b3   :  { %v7396_v18 = vrot.slane %v6752_v51, 4  ;;  %v18270_v63 = vsel %vm2209_vm1, %v7453_v12, %v6828_v25  ;;  %v7257_v52 = vsel %vm2209_vm1, 0, %v7256_v40  ;;  %v18274_v3 = vsel %vm2209_vm1, 0, %v6777_v58  ;;  %v7863_v51 = vpop.f32.mrf.mxu3 }
 0x6b4   :  { %v18277_v39 = vsel %vm2209_vm1, %v6751_v10, %v6744_v26  ;;  %v18283_v41 = vsel %vm2209_vm1, %v6777_v58, %v6770_v46  ;;  %v7276_v57 = vsel %vm2209_vm1, 0, %v7275_v37  ;;  %v7295_v25 = vsel %vm2209_vm1, 0, %v7294_v38 }
 0x6b5   :  { %v18280_v36 = vsel %vm2209_vm1, %v7396_v18, %v6750_v29  ;;  %v7314_v12 = vsel %vm2209_vm1, 0, %v7313_v30  ;;  %v8326_v40 = vadd.s32 72, %v17307_v47  ;;  %v18290_v24 = vsel %vm2209_vm1, 0, %v6775_v44  ;;  %v18292_v29 = vpop.permute.xlu0 %5875 }
 0x6b6   :  { %v7647_v26 = vpack.i.b16 %v7276_v57, %v7257_v52  ;;  %v7659_v10 = vpack.i.b16 %v7314_v12, %v7295_v25  ;;  %v7648_v22 = vshrl.u32 %v7257_v52, 16  ;;  %v7649_v58 = vshrl.u32 %v7276_v57, 16 }
 0x6b7   :  { %v18294_v18 = vpop.eup %12360  ;;  %v7660_v37 = vshrl.u32 %v7295_v25, 16  ;;  %v7661_v38 = vshrl.u32 %v7314_v12, 16  ;;  %vm8344_vm12 = vcmp.ge.s32.totalorder %v8326_v40, %v17309_v54  ;;  %v8439_v44 = vsel %vm8343_vm11, %v8296_v13, -inf  ;;  %v5846_v25 = vpop.permute.xlu1 %5845 }
 0x6b8   :  { %20224 = vst [vmem:[#allocation65_spill] sm:$0xff] %v18294_v18  ;;  %v9137_v30 = vunpack.c.l.b16 %v7647_v26  ;;  %v9138_v43 = vunpack.c.l.b16 %v7659_v10  ;;  %8591 = vadd.xlane.f32.xlu0 %v18294_v18  ;;  %v7650_v52 = vpack.i.b16 %v7649_v58, %v7648_v22  ;;  %v8408_v2 = vsel %vm8344_vm12, %v8008_v17, -inf  ;;  %v8011_v18 = vpop.f32.mrf.mxu0  ;;  %v8298_v22 = vpop.f32.mrf.mxu2 }
 0x6b9   :  { %v7662_v49 = vpack.i.b16 %v7661_v38, %v7660_v37  ;;  %v8424_v57 = vsel %vm8344_vm12, %v8153_v53, -inf  ;;  %v8497_v10 = vmul.f32 1.442695, %v8408_v2  ;;  %v8559_v27 = vmul.f32 1.442695, %v8439_v44 }
 0x6ba   :  { %v9149_v26 = vpack.c.b16 %v9138_v43, %v9137_v30  ;;  %v8529_v46 = vmul.f32 1.442695, %v8424_v57  ;;  %v9246_v16 = vunpack.c.l.b16 %v7650_v52  ;;  %v6094_v13 = vshrl.u32 %v20097_v28, 16 }
 0x6bb   :  { %v9247_v32 = vunpack.c.l.b16 %v7662_v49  ;;  %12362 = vpow2.f32 %v8497_v10  ;;  %v6093_v17 = vpack.i.b16 %v5846_v25, %v20097_v28  ;;  %v6095_v58 = vshrl.u32 %v5846_v25, 16  ;;  %v8156_v49 = vpop.f32.mrf.mxu1 }
 0x6bc   :  { %11631 = vmatmul.msk.bf16.gmra.mxu1 %vm7783_vm2, %v9149_v26  ;;  %v8392_v53 = vsel %vm8344_vm12, %v7863_v51, -inf  ;;  %12364 = vpow2.f32 %v8529_v46  ;;  %v18314_v43 = vadd.s32 80, %v17307_v47  ;;  %v6088_v38 = vshrl.u32 %v18292_v29, 16  ;;  %v18330_v46 = vpop.f32.mrf.mxu3 }
 0x6bd   :  { %v9258_v37 = vpack.c.b16 %v9247_v32, %v9246_v16  ;;  %v8465_v2 = vmul.f32 1.442695, %v8392_v53  ;;  %v6096_v30 = vpack.i.b16 %v6095_v58, %v6094_v13  ;;  %v18318_v44 = vperm.slane %v6093_v17, %v14331_v61  ;;  %v5910_v25 = vpop.permute.xlu0 %5909 }
 0x6be   :  { %v8440_v28 = vsel %vm8344_vm12, %v8298_v22, -inf  ;;  %12366 = vpow2.f32 %v8559_v27  ;;  %vm8345_vm13 = vcmp.ge.s32.totalorder %v18314_v43, %v17309_v54  ;;  %v20225_v16 = vperm.slane %v18043_v0, %v14331_v61 }
 0x6bf   :  { %11647 = vmatmul.msk.bf16.gmra.mxu2 %vm7783_vm2, %v9258_v37  ;;  %v8561_v32 = vmul.f32 1.442695, %v8440_v28  ;;  %v18333_v52 = vperm.slane %v6096_v30, %v14331_v61  ;;  %12368 = vpow2.f32 %v8465_v2  ;;  %v8409_v40 = vsel %vm8345_vm13, %v8011_v18, -inf  ;;  %v5908_v30 = vpop.permute.xlu1 %5907 }
 0x6c0   :  { %v7327_v51 = vsel %vm2209_vm1, %v18215_v11, %v20225_v16  ;;  %v8425_v57 = vsel %vm8345_vm13, %v8156_v49, -inf  ;;  %v6895_v0 = vrot.slane %v18318_v44, 4  ;;  %v8499_v26 = vmul.f32 1.442695, %v8409_v40 }
 0x6c1   :  { %v8531_v10 = vmul.f32 1.442695, %v8425_v57  ;;  %v18343_v11 = vperm.slane %v7327_v51, %v14363_v19  ;;  %v18345_v27 = vpop.eup %12362  ;;  %12370 = vpow2.f32 %v8561_v32  ;;  %v20227_v13 = vperm.slane %v18092_v14, %v14331_v61 }
 0x6c2   :  { %20226 = vst [vmem:[#allocation98_spill] sm:$0xff] %v18345_v27  ;;  %v20228_v18 = vperm.slane %v18017_v8, %v14331_v61  ;;  %v20229_v58 = vperm.slane %v18029_v5, %v14331_v61  ;;  %v18358_v37 = vpop.eup %12364  ;;  %v6921_v2 = vrot.slane %v18333_v52, 4  ;;  %12372 = vpow2.f32 %v8499_v26  ;;  %8625 = vadd.xlane.f32.xlu1 %v18345_v27  ;;  %v18385_v26 = vpop.f32.mrf.mxu0 }
 0x6c3   :  { %v7345_v22 = vrot.slane %v20227_v13, 4  ;;  %20230 = vst [vmem:[#allocation99_spill] sm:$0xff] %v18358_v37  ;;  %v6099_v14 = vpack.i.b16 %v5910_v25, %v18226_v20  ;;  %v20231_v8 = vperm.slane %v18073_v9, %v14331_v61  ;;  %v20232_v5 = vperm.slane %v18025_v56, %v14331_v61  ;;  %8657 = vadd.xlane.f32.xlu2 %v18358_v37  ;;  %v18407_v27 = vpop.f32.mrf.mxu1 }
 0x6c4   :  { %v7365_v17 = vsel %vm2209_vm1, %v18055_v34, %v20228_v18  ;;  %v7383_v53 = vrot.slane %v20229_v58, 4  ;;  %v7666_v32 = vshrl.u32 %v18343_v11, 16  ;;  %v6101_v16 = vshrl.u32 %v5910_v25, 16  ;;  %v18376_v51 = vpop.eup %12366  ;;  %v18409_v1 = vpop.f32.mrf.mxu3 }
 0x6c5   :  { %v18362_v49 = vperm.slane %v7365_v17, %v14363_v19  ;;  %v7346_v34 = vsel %vm2209_vm1, %v7345_v22, %v20231_v8  ;;  %20233 = vst [vmem:[#allocation91_spill] sm:$0xff] %v18376_v51  ;;  %12374 = vpow2.f32 %v8531_v10  ;;  %v6892_v57 = vperm.slane %v6099_v14, %v14331_v61  ;;  %v18387_v56 = vpop.eup %12368 }
 0x6c6   :  { %v7384_v28 = vsel %vm2209_vm1, %v7383_v53, %v20232_v5  ;;  %v18379_v40 = vperm.slane %v7346_v34, %v14363_v19  ;;  %20234 = vst [vmem:[#allocation92_spill] sm:$0xff] %v18387_v56  ;;  %v20235_v25 = vshrl.u32 %v18226_v20, 16  ;;  %v6087_v18 = vpack.i.b16 %v5908_v30, %v18292_v29  ;;  %v18403_v29 = vpop.f32.mrf.mxu2 }
 0x6c7   :  { %v18382_v9 = vperm.slane %v7384_v28, %v14363_v19  ;;  %v7678_v13 = vshrl.u32 %v18362_v49, 16  ;;  %v6089_v10 = vshrl.u32 %v5908_v30, 16  ;;  %v18399_v8 = vpop.eup %12370  ;;  %v6893_v34 = vrot.slane %v6892_v57, 4 }
 0x6c8   :  { %v6102_v22 = vpack.i.b16 %v6101_v16, %v20235_v25  ;;  %v7665_v17 = vpack.i.b16 %v18379_v40, %v18343_v11  ;;  %v7667_v53 = vshrl.u32 %v18379_v40, 16  ;;  %20236 = vst [vmem:[#allocation120_spill] sm:$0xff] %v18399_v8  ;;  %v6896_v5 = vsel %vm2209_vm1, %v6892_v57, %v6895_v0  ;;  %v18405_v30 = vpop.eup %12372 }
 0x6c9   :  { %v7677_v58 = vpack.i.b16 %v18382_v9, %v18362_v49  ;;  %v7679_v14 = vshrl.u32 %v18382_v9, 16  ;;  %v6090_v28 = vpack.i.b16 %v6089_v10, %v6088_v38  ;;  %20237 = vst [vmem:[#allocation122_spill] sm:$0xff] %v18405_v30  ;;  %v6894_v31 = vsel %vm2209_vm1, %v6893_v34, %v18318_v44  ;;  %8627 = vadd.xlane.f32.xlu0 %v18405_v30 }
 0x6ca   :  { %v6918_v20 = vperm.slane %v6102_v22, %v14331_v61  ;;  %v8921_v16 = vunpack.c.l.b16 %v7665_v17  ;;  %v7668_v12 = vpack.i.b16 %v7667_v53, %v7666_v32  ;;  %v6904_v0 = vperm.slane %v6896_v5, %v14363_v19  ;;  %8687 = vadd.xlane.f32.xlu1 %v18376_v51 }
 0x6cb   :  { %v8922_v25 = vunpack.c.l.b16 %v7677_v58  ;;  %v7680_v37 = vpack.i.b16 %v7679_v14, %v7678_v13  ;;  %v18416_v22 = vpop.eup %12374  ;;  %v6900_v13 = vperm.slane %v6894_v31, %v14363_v19  ;;  %v6840_v14 = vperm.slane %v6087_v18, %v14331_v61  ;;  %8593 = vadd.xlane.f32.xlu2 %v18387_v56 }
 0x6cc   :  { %v6919_v57 = vrot.slane %v6918_v20, 4  ;;  %v6922_v38 = vsel %vm2209_vm1, %v6918_v20, %v6921_v2  ;;  %20238 = vst [vmem:[#allocation121_spill] sm:$0xff] %v18416_v22  ;;  %v9030_v17 = vunpack.c.l.b16 %v7668_v12  ;;  %v6907_v58 = vrot.slane %v6904_v0, 4  ;;  %v18442_v0 = vpop.f32.mrf.mxu0 }
 0x6cd   :  { %v8932_v10 = vpack.c.b16 %v8922_v25, %v8921_v16  ;;  %v9031_v32 = vunpack.c.l.b16 %v7680_v37  ;;  %v6930_v53 = vperm.slane %v6922_v38, %v14363_v19  ;;  %v20239_v2 = vrot.slane %v18274_v3, 4 }
 0x6ce   :  { %v6920_v44 = vsel %vm2209_vm1, %v6919_v57, %v18333_v52  ;;  %v6905_v37 = vrot.slane %v6900_v13, 4  ;;  %v6908_v52 = vsel %vm2209_vm1, 0, %v6907_v58  ;;  %v6841_v20 = vrot.slane %v6840_v14, 4 }
 0x6cf   :  { %v18429_v12 = vsel %vm2209_vm1, %v20239_v2, %v18290_v24  ;;  %11600 = vmatmul.msk.bf16.gmra.mxu3 %vm7783_vm2, %v8932_v10  ;;  %v9041_v31 = vpack.c.b16 %v9031_v32, %v9030_v17  ;;  %v6926_v34 = vperm.slane %v6920_v44, %v14363_v19  ;;  %v6933_v5 = vrot.slane %v6930_v53, 4 }
 0x6d0   :  { %v6866_v18 = vperm.slane %v6090_v28, %v14331_v61  ;;  %v7510_v25 = vrot.slane %v6908_v52, 4  ;;  %v6906_v57 = vsel %vm2209_vm1, 0, %v6905_v37  ;;  %v6842_v38 = vsel %vm2209_vm1, %v6841_v20, %v18115_v35 }
 0x6d1   :  { %11616 = vmatmul.msk.bf16.gmra.mxu0 %vm7783_vm2, %v9041_v31  ;;  %v20240_v28 = vrot.slane %v18115_v35, 4  ;;  %v8393_v17 = vsel %vm8345_vm13, %v18330_v46, -inf  ;;  %v20241_v32 = vperm.slane %v18280_v36, %v14331_v61  ;;  %v6931_v2 = vrot.slane %v6926_v34, 4  ;;  %v18467_v46 = vpop.f32.mrf.mxu2  ;;  %8689 = vadd.xlane.f32.xlu0 %v18399_v8 }
 0x6d2   :  { %v6934_v31 = vsel %vm2209_vm1, 0, %v6933_v5  ;;  %v18463_v35 = vsel %vm2209_vm1, %v6907_v58, %v6900_v13  ;;  %v6867_v52 = vrot.slane %v6866_v18, 4  ;;  %v7511_v36 = vsel %vm2209_vm1, %v7510_v25, %v6906_v57  ;;  %v18475_v13 = vpop.f32.mrf.mxu1  ;;  %v18477_v58 = vpop.f32.mrf.mxu3  ;;  %8659 = vadd.xlane.f32.xlu1 %v18416_v22 }
 0x6d3   :  { %v6844_v10 = vsel %vm2209_vm1, %v6840_v14, %v20240_v28  ;;  %v18457_v44 = vrot.slane %v20241_v32, 4  ;;  %v6848_v14 = vperm.slane %v6842_v38, %v14363_v19  ;;  %v20242_v20 = vrot.slane %v18206_v42, 4 }
 0x6d4   :  { %v6852_v37 = vperm.slane %v6844_v10, %v14363_v19  ;;  %v8467_v32 = vmul.f32 1.442695, %v8393_v17  ;;  %v7332_v24 = vrot.slane %v18343_v11, 4  ;;  %v18481_v38 = vsel %vm2209_vm1, %v6933_v5, %v6926_v34 }
 0x6d5   :  { %v6870_v28 = vsel %vm2209_vm1, %v6866_v18, %v20242_v20  ;;  %v7529_v10 = vrot.slane %v6934_v31, 4  ;;  %v6853_v16 = vrot.slane %v6848_v14, 4  ;;  %v6932_v25 = vsel %vm2209_vm1, 0, %v6931_v2 }
 0x6d6   :  { %v6855_v53 = vrot.slane %v6852_v37, 4  ;;  %v6868_v18 = vsel %vm2209_vm1, %v6867_v52, %v18206_v42  ;;  %v6878_v57 = vperm.slane %v6870_v28, %v14363_v19  ;;  %12376 = vpow2.f32 %v8467_v32 }
 0x6d7   :  { %v7515_v11 = vperm.slane %v7511_v36, %v14331_v61  ;;  %v6854_v17 = vsel %vm2209_vm1, 0, %v6853_v16  ;;  %v18491_v34 = vperm.slane %v6868_v18, %v14363_v19  ;;  %v7333_v2 = vsel %vm2209_vm1, 0, %v7332_v24 }
 0x6d8   :  { %v6856_v20 = vsel %vm2209_vm1, 0, %v6855_v53  ;;  %v18493_v5 = vrot.slane %v6878_v57, 4  ;;  %v7351_v37 = vrot.slane %v18379_v40, 4  ;;  %v18498_v42 = vsel %vm2209_vm1, %v7529_v10, %v6932_v25  ;;  %v18510_v40 = vpop.f32.mrf.mxu0 }
 0x6d9   :  { %v7472_v31 = vrot.slane %v6856_v20, 4  ;;  %v6879_v52 = vrot.slane %v18491_v34, 4  ;;  %v7370_v36 = vrot.slane %v18362_v49, 4  ;;  %v7389_v16 = vrot.slane %v18382_v9, 4 }
 0x6da   :  { %v6882_v28 = vsel %vm2209_vm1, 0, %v18493_v5  ;;  %v18506_v32 = vsel %vm2209_vm1, %v6855_v53, %v6848_v14  ;;  %v7352_v24 = vsel %vm2209_vm1, 0, %v7351_v37  ;;  %v18512_v10 = vrot.slane %v7515_v11, 4 }
 0x6db   :  { %v7473_v18 = vsel %vm2209_vm1, %v7472_v31, %v6854_v17  ;;  %v7491_v57 = vrot.slane %v6882_v28, 4  ;;  %v7672_v49 = vshrl.u32 %v7333_v2, 16  ;;  %v7371_v9 = vsel %vm2209_vm1, 0, %v7370_v36 }
 0x6dc   :  { %v7477_v25 = vperm.slane %v7473_v18, %v14331_v61  ;;  %v18515_v20 = vpop.eup %12376  ;;  %v7390_v3 = vsel %vm2209_vm1, 0, %v7389_v16  ;;  %v7671_v53 = vpack.i.b16 %v7352_v24, %v7333_v2  ;;  %v7673_v14 = vshrl.u32 %v7352_v24, 16  ;;  %v18524_v18 = vpop.f32.mrf.mxu2 }
 0x6dd   :  { %20243 = vst [vmem:[#allocation123_spill] sm:$0xff] %v18515_v20  ;;  %v6880_v31 = vsel %vm2209_vm1, 0, %v6879_v52  ;;  %v7683_v37 = vpack.i.b16 %v7390_v3, %v7371_v9  ;;  %8595 = vadd.xlane.f32.xlu1 %v18515_v20  ;;  %v7684_v36 = vshrl.u32 %v7371_v9, 16  ;;  %v7685_v30 = vshrl.u32 %v7390_v3, 16  ;;  %v18527_v16 = vpop.f32.mrf.mxu1  ;;  %v18529_v2 = vpop.f32.mrf.mxu3 }
 0x6de   :  { %v9139_v28 = vunpack.c.l.b16 %v7671_v53  ;;  %v7674_v22 = vpack.i.b16 %v7673_v14, %v7672_v49  ;;  %v8328_v17 = vadd.s32 88, %v17307_v47  ;;  %v8441_v52 = vsel %vm8345_vm13, %v18403_v29, -inf }
 0x6df   :  { %v9140_v24 = vunpack.c.l.b16 %v7683_v37  ;;  %v18537_v11 = vadd.s32 96, %v17307_v47  ;;  %v18539_v20 = vrot.slane %v7477_v25, 4  ;;  %v18542_v49 = vsel %vm2209_vm1, %v7491_v57, %v6880_v31 }
 0x6e0   :  { %v7686_v3 = vpack.i.b16 %v7685_v30, %v7684_v36  ;;  %v9248_v9 = vunpack.c.l.b16 %v7674_v22  ;;  %vm8346_vm14 = vcmp.ge.s32.totalorder %v8328_v17, %v17309_v54  ;;  %v20244_v43 = vperm.slane %v18277_v39, %v14331_v61 }
 0x6e1   :  { %v9150_v53 = vpack.c.b16 %v9140_v24, %v9139_v28  ;;  %vm8347_vm15 = vcmp.ge.s32.totalorder %v18537_v11, %v17309_v54  ;;  %v8410_v25 = vsel %vm8346_vm14, %v18385_v26, -inf  ;;  %v8426_v30 = vsel %vm8346_vm14, %v18407_v27, -inf  ;;  %v18567_v27 = vpop.f32.mrf.mxu0 }
 0x6e2   :  { %v7403_v29 = vsel %vm2209_vm1, %v18457_v44, %v20244_v43  ;;  %v9249_v14 = vunpack.c.l.b16 %v7686_v3  ;;  %v8563_v22 = vmul.f32 1.442695, %v8441_v52  ;;  %v8501_v57 = vmul.f32 1.442695, %v8410_v25 }
 0x6e3   :  { %11632 = vmatmul.msk.bf16.gmra.mxu1 %vm7783_vm2, %v9150_v53  ;;  %v8533_v31 = vmul.f32 1.442695, %v8426_v30  ;;  %v8394_v39 = vsel %vm8346_vm14, %v18409_v1, -inf  ;;  %v8411_v44 = vsel %vm8347_vm15, %v18442_v0, -inf  ;;  %v7407_v36 = vperm.slane %v7403_v29, %v14363_v19 }
 0x6e4   :  { %v9259_v37 = vpack.c.b16 %v9249_v14, %v9248_v9  ;;  %v8469_v26 = vmul.f32 1.442695, %v8394_v39  ;;  %v8503_v28 = vmul.f32 1.442695, %v8411_v44  ;;  %12378 = vpow2.f32 %v8501_v57  ;;  %v18595_v14 = vpop.f32.mrf.mxu2 }
 0x6e5   :  { %v8427_v24 = vsel %vm8347_vm15, %v18475_v13, -inf  ;;  %v8442_v1 = vsel %vm8346_vm14, %v18467_v46, -inf  ;;  %v20245_v0 = vperm.slane %v18429_v12, %v14331_v61  ;;  %12380 = vpow2.f32 %v8533_v31  ;;  %v18602_v30 = vpop.f32.mrf.mxu1 }
 0x6e6   :  { %11648 = vmatmul.msk.bf16.gmra.mxu2 %vm7783_vm2, %v9259_v37  ;;  %v8565_v3 = vmul.f32 1.442695, %v8442_v1  ;;  %v20246_v9 = vperm.slane %v18224_v62, %v14331_v61  ;;  %v20247_v13 = vperm.slane %v18270_v63, %v14331_v61  ;;  %12382 = vpow2.f32 %v8563_v22  ;;  %v18604_v22 = vpop.f32.mrf.mxu3 }
 0x6e7   :  { %v7421_v52 = vrot.slane %v20245_v0, 4  ;;  %v20248_v12 = vperm.slane %v18283_v41, %v14331_v61  ;;  %12384 = vpow2.f32 %v8469_v26  ;;  %v8535_v62 = vmul.f32 1.442695, %v8427_v24 }
 0x6e8   :  { %v7441_v53 = vsel %vm2209_vm1, %v18265_v45, %v20246_v9  ;;  %v7459_v43 = vrot.slane %v20247_v13, 4  ;;  %v20249_v63 = vperm.slane %v18257_v50, %v14331_v61  ;;  %12386 = vpow2.f32 %v8503_v28 }
 0x6e9   :  { %v7422_v17 = vsel %vm2209_vm1, %v7421_v52, %v20248_v12  ;;  %v7445_v29 = vperm.slane %v7441_v53, %v14363_v19  ;;  %v7690_v57 = vshrl.u32 %v7407_v36, 16  ;;  %v8395_v31 = vsel %vm8347_vm15, %v18477_v58, -inf }
 0x6ea   :  { %v7426_v45 = vperm.slane %v7422_v17, %v14363_v19  ;;  %v7460_v25 = vsel %vm2209_vm1, %v7459_v43, %v20249_v63  ;;  %12388 = vpow2.f32 %v8565_v3  ;;  %v7408_v37 = vrot.slane %v7407_v36, 4  ;;  %v18611_v50 = vpop.eup %12378 }
 0x6eb   :  { %v7464_v41 = vperm.slane %v7460_v25, %v14363_v19  ;;  %20250 = vst [vmem:[#allocation124_spill] sm:$0xff] %v18611_v50  ;;  %v7702_v24 = vshrl.u32 %v7445_v29, 16  ;;  %v18613_v52 = vpop.eup %12380  ;;  %v7446_v13 = vrot.slane %v7445_v29, 4  ;;  %8629 = vadd.xlane.f32.xlu2 %v18611_v50  ;;  %12390 = vpow2.f32 %v8535_v62 }
 0x6ec   :  { %v7689_v39 = vpack.i.b16 %v7426_v45, %v7407_v36  ;;  %v7691_v44 = vshrl.u32 %v7426_v45, 16  ;;  %v7427_v0 = vrot.slane %v7426_v45, 4  ;;  %20251 = vst [vmem:[#allocation53_spill] sm:$0xff] %v18613_v52  ;;  %v7409_v53 = vsel %vm2209_vm1, 0, %v7408_v37  ;;  %v18617_v58 = vpop.eup %12382  ;;  %8661 = vadd.xlane.f32.xlu0 %v18613_v52 }
 0x6ed   :  { %v7701_v26 = vpack.i.b16 %v7464_v41, %v7445_v29  ;;  %v7703_v1 = vshrl.u32 %v7464_v41, 16  ;;  %20252 = vst [vmem:[#allocation96_spill] sm:$0xff] %v18617_v58  ;;  %v7465_v12 = vrot.slane %v7464_v41, 4  ;;  %v18621_v17 = vpop.eup %12384  ;;  %v7447_v63 = vsel %vm2209_vm1, 0, %v7446_v13 }
 0x6ee   :  { %v8923_v28 = vunpack.c.l.b16 %v7689_v39  ;;  %v7692_v9 = vpack.i.b16 %v7691_v44, %v7690_v57  ;;  %v7428_v36 = vsel %vm2209_vm1, 0, %v7427_v0  ;;  %20253 = vst [vmem:[#allocation97_spill] sm:$0xff] %v18621_v17  ;;  %v7696_v57 = vshrl.u32 %v7409_v53, 16  ;;  %v18624_v39 = vpop.f32.mrf.mxu0  ;;  %v18626_v29 = vpop.eup %12386 }
 0x6ef   :  { %v8924_v3 = vunpack.c.l.b16 %v7701_v26  ;;  %v7704_v43 = vpack.i.b16 %v7703_v1, %v7702_v24  ;;  %v7695_v25 = vpack.i.b16 %v7428_v36, %v7409_v53  ;;  %20254 = vst [vmem:[#allocation54_spill] sm:$0xff] %v18626_v29  ;;  %v7466_v26 = vsel %vm2209_vm1, 0, %v7465_v12 }
 0x6f0   :  { %v9032_v45 = vunpack.c.l.b16 %v7692_v9  ;;  %v7697_v24 = vshrl.u32 %v7428_v36, 16  ;;  %v18629_v1 = vpop.eup %12388  ;;  %v7707_v41 = vpack.i.b16 %v7466_v26, %v7447_v63  ;;  %v7708_v46 = vshrl.u32 %v7447_v63, 16  ;;  %v18645_v63 = vpop.f32.mrf.mxu3 }
 0x6f1   :  { %v8933_v44 = vpack.c.b16 %v8924_v3, %v8923_v28  ;;  %v9033_v37 = vunpack.c.l.b16 %v7704_v43  ;;  %20255 = vst [vmem:[#allocation127_spill] sm:$0xff] %v18629_v1  ;;  %v9141_v0 = vunpack.c.l.b16 %v7695_v25  ;;  %v7709_v52 = vshrl.u32 %v7466_v26, 16  ;;  %v18637_v3 = vpop.f32.mrf.mxu2  ;;  %8693 = vadd.xlane.f32.xlu1 %v18629_v1 }
 0x6f2   :  { %v7698_v13 = vpack.i.b16 %v7697_v24, %v7696_v57  ;;  %v8330_v53 = vadd.s32 104, %v17307_v47  ;;  %v8443_v28 = vsel %vm8347_vm15, %v18524_v18, -inf  ;;  %v7486_v43 = vsel %vm2209_vm1, %v18493_v5, %v18491_v34 }
 0x6f3   :  { %11601 = vmatmul.msk.bf16.gmra.mxu3 %vm7783_vm2, %v8933_v44  ;;  %v9042_v9 = vpack.c.b16 %v9033_v37, %v9032_v45  ;;  %v9142_v36 = vunpack.c.l.b16 %v7707_v41  ;;  %v7710_v12 = vpack.i.b16 %v7709_v52, %v7708_v46  ;;  %v18643_v45 = vpop.f32.mrf.mxu1  ;;  %v8471_v25 = vmul.f32 1.442695, %v8395_v31  ;;  %8691 = vadd.xlane.f32.xlu2 %v18617_v58 }
 0x6f4   :  { %v9250_v11 = vunpack.c.l.b16 %v7698_v13  ;;  %vm8348_vm0 = vcmp.ge.s32.totalorder %v8330_v53, %v17309_v54  ;;  %v8567_v18 = vmul.f32 1.442695, %v8443_v28  ;;  %v20256_v5 = vperm.slane %v18506_v32, %v14331_v61  ;;  %8597 = vadd.xlane.f32.xlu0 %v18621_v17 }
 0x6f5   :  { %11617 = vmatmul.msk.bf16.gmra.mxu0 %vm7783_vm2, %v9042_v9  ;;  %v9151_v57 = vpack.c.b16 %v9142_v36, %v9141_v0  ;;  %v9251_v44 = vunpack.c.l.b16 %v7710_v12  ;;  %v8412_v34 = vsel %vm8348_vm0, %v18510_v40, -inf  ;;  %v8428_v31 = vsel %vm8348_vm0, %v18527_v16, -inf }
 0x6f6   :  { %v7479_v46 = vsel %vm2209_vm1, %v18539_v20, %v20256_v5  ;;  %v8505_v62 = vmul.f32 1.442695, %v8412_v34  ;;  %v8396_v52 = vsel %vm8348_vm0, %v18529_v2, -inf  ;;  %v20257_v40 = vperm.slane %v18542_v49, %v14331_v61  ;;  %v18677_v49 = vpop.eup %12390  ;;  %v18684_v13 = vpop.f32.mrf.mxu0 }
 0x6f7   :  { %11633 = vmatmul.msk.bf16.gmra.mxu1 %vm7783_vm2, %v9151_v57  ;;  %v9260_v32 = vpack.c.b16 %v9251_v44, %v9250_v11  ;;  %v8473_v20 = vmul.f32 1.442695, %v8396_v52  ;;  %v18670_v26 = vadd.s32 112, %v17307_v47  ;;  %v7509_v16 = vperm.slane %v18463_v35, %v14331_v61  ;;  %20258 = vst [vmem:[#allocation125_spill] sm:$0xff] %v18677_v49 }
 0x6f8   :  { %v7497_v37 = vrot.slane %v20257_v40, 4  ;;  %v7528_v24 = vperm.slane %v18481_v38, %v14331_v61  ;;  %v7490_v2 = vperm.slane %v7486_v43, %v14331_v61  ;;  %12392 = vpow2.f32 %v8505_v62  ;;  %v18707_v34 = vpop.f32.mrf.mxu3 }
 0x6f9   :  { %12394 = vpow2.f32 %v8471_v25  ;;  %11649 = vmatmul.msk.bf16.gmra.mxu2 %vm7783_vm2, %v9260_v32  ;;  %v8537_v41 = vmul.f32 1.442695, %v8428_v31  ;;  %v8444_v0 = vsel %vm8348_vm0, %v18595_v14, -inf  ;;  %v7483_v9 = vperm.slane %v7479_v46, %v14363_v19  ;;  %8631 = vadd.xlane.f32.xlu1 %v18626_v29 }
 0x6fa   :  { %12396 = vpow2.f32 %v8567_v18  ;;  %v7498_v35 = vsel %vm2209_vm1, %v7497_v37, %v7490_v2  ;;  %v7517_v38 = vsel %vm2209_vm1, %v18512_v10, %v7509_v16  ;;  %v20259_v28 = vperm.slane %v18498_v42, %v14331_v61  ;;  %v18698_v10 = vpop.f32.mrf.mxu2 }
 0x6fb   :  { %12398 = vpow2.f32 %v8473_v20  ;;  %vm8349_vm3 = vcmp.ge.s32.totalorder %v18670_v26, %v17309_v54  ;;  %v7502_v14 = vperm.slane %v7498_v35, %v14363_v19  ;;  %v7521_v53 = vperm.slane %v7517_v38, %v14363_v19  ;;  %v18705_v44 = vpop.f32.mrf.mxu1  ;;  %8663 = vadd.xlane.f32.xlu2 %v18677_v49 }
 0x6fc   :  { %v7535_v43 = vrot.slane %v20259_v28, 4  ;;  %v8569_v36 = vmul.f32 1.442695, %v8444_v0  ;;  %v7714_v25 = vshrl.u32 %v7483_v9, 16  ;;  %v7484_v11 = vrot.slane %v7483_v9, 4 }
 0x6fd   :  { %v7713_v42 = vpack.i.b16 %v7502_v14, %v7483_v9  ;;  %v7715_v18 = vshrl.u32 %v7502_v14, 16  ;;  %v8397_v57 = vsel %vm8349_vm3, %v18604_v22, -inf  ;;  %12400 = vpow2.f32 %v8537_v41 }
 0x6fe   :  { %v7536_v12 = vsel %vm2209_vm1, %v7535_v43, %v7528_v24  ;;  %v18710_v5 = vpop.eup %12392  ;;  %v7726_v46 = vshrl.u32 %v7521_v53, 16  ;;  %v7485_v62 = vsel %vm2209_vm1, 0, %v7484_v11  ;;  %v8475_v20 = vmul.f32 1.442695, %v8397_v57 }
 0x6ff   :  { %v7540_v61 = vperm.slane %v7536_v12, %v14363_v19  ;;  %20260 = vst [vmem:[#allocation126_spill] sm:$0xff] %v18710_v5  ;;  %v7503_v19 = vrot.slane %v7502_v14, 4  ;;  %v18713_v31 = vpop.eup %12394  ;;  %v8925_v40 = vunpack.c.l.b16 %v7713_v42  ;;  %v7716_v37 = vpack.i.b16 %v7715_v18, %v7714_v25  ;;  %8633 = vadd.xlane.f32.xlu0 %v18710_v5 }
 0x700   :  { %20261 = vst [vmem:[#allocation109_spill] sm:$0xff] %v18713_v31  ;;  %v18716_v22 = vpop.eup %12396  ;;  %v7522_v24 = vrot.slane %v7521_v53, 4  ;;  %v7720_v14 = vshrl.u32 %v7485_v62, 16  ;;  %12402 = vpow2.f32 %v8569_v36 }
 0x701   :  { %v7725_v52 = vpack.i.b16 %v7540_v61, %v7521_v53  ;;  %v7727_v32 = vshrl.u32 %v7540_v61, 16  ;;  %20262 = vst [vmem:[#allocation113_spill] sm:$0xff] %v18716_v22  ;;  %v7504_v16 = vsel %vm2209_vm1, 0, %v7503_v19  ;;  %v7541_v2 = vrot.slane %v7540_v61, 4  ;;  %v18719_v41 = vpop.eup %12398  ;;  %v18724_v53 = vpop.f32.mrf.mxu0 }
 0x702   :  { %20263 = vst [vmem:[#allocation110_spill] sm:$0xff] %v18719_v41  ;;  %v9034_v35 = vunpack.c.l.b16 %v7716_v37  ;;  %v7719_v38 = vpack.i.b16 %v7504_v16, %v7485_v62  ;;  %v7523_v28 = vsel %vm2209_vm1, 0, %v7522_v24  ;;  %v7721_v12 = vshrl.u32 %v7504_v16, 16  ;;  %8601 = vadd.xlane.f32.xlu1 %v18719_v41  ;;  %v18735_v24 = vpop.f32.mrf.mxu2 }
 0x703   :  { %v8926_v0 = vunpack.c.l.b16 %v7725_v52  ;;  %v7728_v9 = vpack.i.b16 %v7727_v32, %v7726_v46  ;;  %v7542_v43 = vsel %vm2209_vm1, 0, %v7541_v2  ;;  %v18726_v61 = vpop.eup %12400  ;;  %v7732_v46 = vshrl.u32 %v7523_v28, 16  ;;  %8599 = vadd.xlane.f32.xlu2 %v18713_v31  ;;  %20265 = vst [vmem:[#allocation111_spill] sm:$0xff] %v18735_v24 }
 0x704   :  { %v7731_v42 = vpack.i.b16 %v7542_v43, %v7523_v28  ;;  %v9143_v18 = vunpack.c.l.b16 %v7719_v38  ;;  %20264 = vst [vmem:[#allocation108_spill] sm:$0xff] %v18726_v61  ;;  %v7722_v57 = vpack.i.b16 %v7721_v12, %v7720_v14  ;;  %v7733_v19 = vshrl.u32 %v7542_v43, 16 }
 0x705   :  { %v8934_v25 = vpack.c.b16 %v8926_v0, %v8925_v40  ;;  %v9035_v11 = vunpack.c.l.b16 %v7728_v9  ;;  %v8332_v52 = vadd.s32 120, %v17307_v47  ;;  %v8445_v40 = vsel %vm8349_vm3, %v18637_v3, -inf  ;;  %v18742_v9 = vpop.f32.mrf.mxu1 }
 0x706   :  { %v9144_v62 = vunpack.c.l.b16 %v7731_v42  ;;  %v7734_v32 = vpack.i.b16 %v7733_v19, %v7732_v46  ;;  %v9252_v16 = vunpack.c.l.b16 %v7722_v57  ;;  %v8413_v47 = vsel %vm8349_vm3, %v18567_v27, -inf  ;;  %v18753_v28 = vpop.eup %12402 }
 0x707   :  { %11602 = vmatmul.msk.bf16.gmra.mxu3 %vm7783_vm2, %v8934_v25  ;;  %v9043_v37 = vpack.c.b16 %v9035_v11, %v9034_v35  ;;  %v8571_v0 = vmul.f32 1.442695, %v8445_v40  ;;  %v18744_v35 = vpop.f32.mrf.mxu3  ;;  %8695 = vadd.xlane.f32.xlu0 %v18716_v22  ;;  %12404 = vpow2.f32 %v8475_v20  ;;  %vm8350_vm1 = vcmp.ge.s32.totalorder %v8332_v52, %v17309_v54  ;;  %20266 = vst [vmem:[#allocation116_spill] sm:$0xff] %v18753_v28 }
 0x708   :  { %v9152_v2 = vpack.c.b16 %v9144_v62, %v9143_v18  ;;  %v9253_v3 = vunpack.c.l.b16 %v7734_v32  ;;  %v8446_v27 = vsel %vm8350_vm1, %v18698_v10, -inf  ;;  %v8507_v36 = vmul.f32 1.442695, %v8413_v47 }
 0x709   :  { %11618 = vmatmul.msk.bf16.gmra.mxu0 %vm7783_vm2, %v9043_v37  ;;  %12406 = vpow2.f32 %v8571_v0  ;;  %v8414_v20 = vsel %vm8350_vm1, %v18624_v39, -inf  ;;  %v8573_v43 = vmul.f32 1.442695, %v8446_v27  ;;  %v18759_v14 = vpop.f32.mrf.mxu0  ;;  %v8398_v25 = vsel %vm8350_vm1, %v18645_v63, -inf }
 0x70a   :  { %11634 = vmatmul.msk.bf16.gmra.mxu1 %vm7783_vm2, %v9152_v2  ;;  %v9261_v38 = vpack.c.b16 %v9253_v3, %v9252_v16  ;;  %8665 = vadd.xlane.f32.xlu1 %v18726_v61  ;;  %12408 = vpow2.f32 %v8507_v36  ;;  %v8509_v10 = vmul.f32 1.442695, %v8414_v20  ;;  %v18768_v11 = vpop.f32.mrf.mxu2  ;;  %v8429_v39 = vsel %vm8349_vm3, %v18602_v30, -inf }
 0x70b   :  { %8697 = vadd.xlane.f32.xlu2 %v18753_v28  ;;  %12410 = vpow2.f32 %v8573_v43  ;;  %20268 = vst [vmem:[#allocation55_spill] sm:$0xff] %v18768_v11  ;;  %v8477_v46 = vmul.f32 1.442695, %v8398_v25  ;;  %v8539_v19 = vmul.f32 1.442695, %v8429_v39  ;;  %v8430_v30 = vsel %vm8350_vm1, %v18643_v45, -inf  ;;  %v18828_v25 = vpop.xlane.xlu2 %8639 }
 0x70c   :  { %11650 = vmatmul.msk.bf16.gmra.mxu2 %vm7783_vm2, %v9261_v38  ;;  %12412 = vpow2.f32 %v8509_v10  ;;  %v8541_v40 = vmul.f32 1.442695, %v8430_v30  ;;  %v8608_v30 = vpop.xlane.xlu1 %8607  ;;  %v9364_v7 = vpack.c.bf16 %v18724_v53, %v18724_v53 }
 0x70d   :  { %v18762_v12 = vpop.eup %12404  ;;  %v18776_v18 = vpop.f32.mrf.mxu1  ;;  %12414 = vpow2.f32 %v8477_v46 }
 0x70e   :  { %20267 = vst [vmem:[#allocation114_spill] sm:$0xff] %v18762_v12  ;;  %12416 = vpow2.f32 %v8539_v19 }
 0x70f   :  { %8603 = vadd.xlane.f32.xlu0 %v18762_v12  ;;  %v18770_v42 = vpop.eup %12406  ;;  %v18778_v57 = vpop.f32.mrf.mxu3  ;;  %12418 = vpow2.f32 %v8541_v40 }
 0x710   :  { %20269 = vst [vmem:[#allocation56_spill] sm:$0xff] %v18770_v42  ;;  %v18781_v63 = vpop.eup %12408  ;;  %12420 = vrcp.f32 %v8608_v30  ;;  %v9363_v30 = vpack.c.bf16 %v18684_v13, %v18684_v13  ;;  %v9365_v13 = vpack.c.bf16 %v18759_v14, %v18759_v14  ;;  %v9349_v53 = vpack.c.bf16 %v18778_v57, %v18778_v57 }
 0x711   :  { %20270 = vst [vmem:[#allocation57_spill] sm:$0xff] %v18781_v63  ;;  %v18784_v37 = vpop.eup %12410  ;;  %v18789_v26 = vpop.f32.mrf.mxu0  ;;  %v18958_v14 = vunpack.c.l.b16 %v9364_v7 }
 0x712   :  { %8699 = vadd.xlane.f32.xlu1 %v18770_v42  ;;  %20271 = vst [vmem:[#allocation78_spill] sm:$0xff] %v18784_v37  ;;  %v18792_v62 = vpop.eup %12412  ;;  %v18794_v32 = vpop.f32.mrf.mxu2 }
 0x713   :  { %8635 = vadd.xlane.f32.xlu2 %v18781_v63  ;;  %20272 = vst [vmem:[#allocation79_spill] sm:$0xff] %v18792_v62  ;;  %v18801_v2 = vpop.eup %12414  ;;  %v18838_v42 = vpop.xlane.xlu2 %8575 }
 0x714   :  { %20273 = vst [vmem:[#allocation58_spill] sm:$0xff] %v18794_v32  ;;  %v18804_v54 = vpop.eup %12416 }
 0x715   :  { %v18797_v16 = vpop.f32.mrf.mxu1  ;;  %20274 = vst [vmem:[#allocation82_spill] sm:$0xff] %v18801_v2  ;;  %v18809_v52 = vpop.eup %12418 }
 0x716   :  { %20275 = vst [vmem:[#allocation59_spill] sm:$0xff] %v18804_v54 }
 0x717   :  { %8701 = vadd.xlane.f32.xlu0 %v18784_v37  ;;  %v18799_v47 = vpop.f32.mrf.mxu3  ;;  %20276 = vst [vmem:[#allocation64_spill] sm:$0xff] %v18809_v52 }
 0x718   :  { %20302 = vst [vmem:[#allocation141_spill] sm:$0xff] %v18958_v14 }
 0x719   :  { %v18807_v45 = vpop.f32.mrf.mxu0 }
 0x71a   :  { %8637 = vadd.xlane.f32.xlu1 %v18792_v62  ;;  %v18811_v0 = vpop.f32.mrf.mxu2 }
 0x71b   :  { %8605 = vadd.xlane.f32.xlu2 %v18801_v2  ;;  %20277 = vst [vmem:[#allocation60_spill] sm:$0xff] %v18811_v0  ;;  %v18848_v63 = vpop.xlane.xlu2 %8611 }
 0x71c   :  { %20282 = vst [vmem:[#allocation87_spill] sm:$0xff] %v18848_v63 }
 0x71d   :  { %v18813_v3 = vpop.f32.mrf.mxu1 }
 0x71f   :  { %8667 = vadd.xlane.f32.xlu0 %v18804_v54  ;;  %v18815_v27 = vpop.f32.mrf.mxu3  ;;  %v8610_v54 = vpop.xlane.xlu0 %8609 }
 0x720   :  { %20278 = vst [vmem:[#allocation71_spill] sm:$0xff] %v18815_v27  ;;  %12422 = vrcp.f32 %v8610_v54 }
 0x721   :  { %v18818_v36 = vpop.f32.mrf.mxu0  ;;  %12424 = vrcp.f32 %v18828_v25 }
 0x722   :  { %v18820_v38 = vpop.f32.mrf.mxu2 }
 0x723   :  { %8669 = vadd.xlane.f32.xlu2 %v18809_v52  ;;  %20279 = vst [vmem:[#allocation84_spill] sm:$0xff] %v18820_v38  ;;  %v8642_v52 = vpop.xlane.xlu1 %8641  ;;  %v18860_v29 = vpop.xlane.xlu2 %8673 }
 0x724   :  { %20284 = vst [vmem:[#allocation90_spill] sm:$0xff] %v18860_v29  ;;  %12426 = vrcp.f32 %v8642_v52 }
 0x725   :  { %v18822_v20 = vpop.f32.mrf.mxu1 }
 0x727   :  { %v18824_v43 = vpop.f32.mrf.mxu3  ;;  %v8672_v31 = vpop.xlane.xlu0 %8671 }
 0x728   :  { %12428 = vrcp.f32 %v8672_v31 }
 0x729   :  { %v18826_v10 = vpop.f32.mrf.mxu0  ;;  %12430 = vrcp.f32 %v18838_v42 }
 0x72a   :  { %v18830_v39 = vpop.f32.mrf.mxu2 }
 0x72b   :  { %20280 = vst [vmem:[#allocation85_spill] sm:$0xff] %v18830_v39  ;;  %v18856_v49 = vpop.xlane.xlu1 %8577  ;;  %v18874_v8 = vpop.xlane.xlu2 %8645 }
 0x72c   :  { %20287 = vst [vmem:[#allocation94_spill] sm:$0xff] %v18874_v8  ;;  %12432 = vrcp.f32 %v18856_v49 }
 0x72d   :  { %v18832_v46 = vpop.f32.mrf.mxu1 }
 0x72f   :  { %v18834_v19 = vpop.f32.mrf.mxu3  ;;  %v18868_v17 = vpop.xlane.xlu0 %8643 }
 0x730   :  { %20285 = vst [vmem:[#allocation89_spill] sm:$0xff] %v18868_v17 }
 0x731   :  { %v18836_v40 = vpop.f32.mrf.mxu0 }
 0x732   :  { %v18840_v37 = vpop.f32.mrf.mxu2 }
 0x733   :  { %20281 = vst [vmem:[#allocation86_spill] sm:$0xff] %v18840_v37  ;;  %v18870_v50 = vpop.xlane.xlu1 %8613  ;;  %v18888_v55 = vpop.xlane.xlu2 %8581 }
 0x734   :  { %20286 = vst [vmem:[#allocation93_spill] sm:$0xff] %v18870_v50  ;;  %v12421_v37 = vpop.eup %12420 }
 0x735   :  { %v18842_v12 = vpop.f32.mrf.mxu1  ;;  %20290 = vst [vmem:[#allocation129_spill] sm:$0xff] %v18888_v55 }
 0x737   :  { %v18844_v2 = vpop.f32.mrf.mxu3  ;;  %v18882_v60 = vpop.xlane.xlu0 %8579 }
 0x738   :  { %20288 = vst [vmem:[#allocation95_spill] sm:$0xff] %v18882_v60 }
 0x739   :  { %v18846_v62 = vpop.f32.mrf.mxu0 }
 0x73a   :  { %v18850_v22 = vpop.f32.mrf.mxu2 }
 0x73b   :  { %20283 = vst [vmem:[#allocation88_spill] sm:$0xff] %v18850_v22  ;;  %v18884_v6 = vpop.xlane.xlu1 %8675  ;;  %v18904_v60 = vpop.xlane.xlu2 %8617 }
 0x73c   :  { %20289 = vst [vmem:[#allocation128_spill] sm:$0xff] %v18884_v6 }
 0x73d   :  { %v18852_v28 = vpop.f32.mrf.mxu1  ;;  %20293 = vst [vmem:[#allocation132_spill] sm:$0xff] %v18904_v60  ;;  %v8783_v60 = vmul.f32 %v12421_v37, %v17349_v15  ;;  %v9348_v15 = vpack.c.bf16 %v18744_v35, %v18744_v35 }
 0x73f   :  { %v18854_v41 = vpop.f32.mrf.mxu3  ;;  %v18896_v8 = vpop.xlane.xlu0 %8615  ;;  %v8847_v27 = vpack.c.bf16 %v8783_v60, %v8783_v60 }
 0x740   :  { %20291 = vst [vmem:[#allocation130_spill] sm:$0xff] %v18896_v8 }
 0x741   :  { %v18858_v61 = vpop.f32.mrf.mxu0 }
 0x742   :  { %v18862_v5 = vpop.f32.mrf.mxu2 }
 0x743   :  { %v18898_v50 = vpop.xlane.xlu1 %8647  ;;  %v18920_v29 = vpop.xlane.xlu2 %8679 }
 0x744   :  { %20292 = vst [vmem:[#allocation131_spill] sm:$0xff] %v18898_v50 }
 0x745   :  { %v18864_v1 = vpop.f32.mrf.mxu1  ;;  %20296 = vst [vmem:[#allocation135_spill] sm:$0xff] %v18920_v29  ;;  %v9380_v29 = vpack.c.bf16 %v18742_v9, %v18742_v9  ;;  %v9366_v9 = vpack.c.bf16 %v18789_v26, %v18789_v26 }
 0x747   :  { %v18866_v58 = vpop.f32.mrf.mxu3  ;;  %v18910_v55 = vpop.xlane.xlu0 %8677  ;;  %v18964_v52 = vunpack.c.l.b16 %v9380_v29  ;;  %v18980_v29 = vunpack.c.l.b16 %v9349_v53 }
 0x748   :  { %20294 = vst [vmem:[#allocation133_spill] sm:$0xff] %v18910_v55  ;;  %v9379_v55 = vpack.c.bf16 %v18705_v44, %v18705_v44  ;;  %v9381_v44 = vpack.c.bf16 %v18776_v18, %v18776_v18  ;;  %v9382_v18 = vpack.c.bf16 %v18797_v16, %v18797_v16  ;;  %v18978_v16 = vpop.eup %12422 }
 0x749   :  { %20304 = vst [vmem:[#allocation143_spill] sm:$0xff] %v18964_v52 }
 0x74a   :  { %v18876_v56 = vpop.f32.mrf.mxu2  ;;  %v18948_v60 = vunpack.c.l.b16 %v9379_v55  ;;  %v18962_v55 = vunpack.c.l.b16 %v8847_v27  ;;  %v18974_v7 = vunpack.c.l.b16 %v9381_v44  ;;  %20308 = vst [vmem:[#allocation147_spill] sm:$0xff] %v18980_v29  ;;  %v18982_v27 = vunpack.c.l.b16 %v9366_v9 }
 0x74b   :  { %v18914_v4 = vpop.xlane.xlu1 %8583  ;;  %v18969_v57 = vpop.xlane.xlu2 %8651  ;;  %v18992_v44 = vunpack.c.l.b16 %v9382_v18 }
 0x74c   :  { %20295 = vst [vmem:[#allocation134_spill] sm:$0xff] %v18914_v4  ;;  %v9347_v4 = vpack.c.bf16 %v18707_v34, %v18707_v34 }
 0x74d   :  { %20299 = vst [vmem:[#allocation138_spill] sm:$0xff] %v18948_v60 }
 0x74e   :  { %v18872_v51 = vpop.f32.mrf.mxu0  ;;  %v18956_v25 = vunpack.c.l.b16 %v9347_v4  ;;  %20303 = vst [vmem:[#allocation142_spill] sm:$0xff] %v18962_v55  ;;  %v18972_v4 = vunpack.c.l.b16 %v9365_v13  ;;  %v18990_v13 = vpop.eup %12424 }
 0x74f   :  { %v18925_v22 = vpop.xlane.xlu0 %8649  ;;  %20306 = vst [vmem:[#allocation145_spill] sm:$0xff] %v18969_v57  ;;  %v18998_v57 = vpop.eup %12426 }
 0x750   :  { %20297 = vst [vmem:[#allocation136_spill] sm:$0xff] %v18925_v22  ;;  %v18939_v22 = vunpack.c.l.b16 %v9363_v30  ;;  %v18966_v30 = vunpack.c.l.b16 %v9348_v15  ;;  %v9370_v15 = vpack.c.bf16 %v18836_v40, %v18836_v40  ;;  %v19008_v31 = vpop.eup %12428 }
 0x751   :  { %20301 = vst [vmem:[#allocation140_spill] sm:$0xff] %v18956_v25 }
 0x752   :  { %v18880_v23 = vpop.f32.mrf.mxu3  ;;  %20298 = vst [vmem:[#allocation137_spill] sm:$0xff] %v18939_v22  ;;  %v19016_v40 = vunpack.c.l.b16 %v9370_v15 }
 0x753   :  { %v18954_v35 = vpop.xlane.xlu1 %8619  ;;  %20305 = vst [vmem:[#allocation144_spill] sm:$0xff] %v18966_v30  ;;  %v19014_v30 = vpop.eup %12430 }
 0x754   :  { %20300 = vst [vmem:[#allocation139_spill] sm:$0xff] %v18954_v35  ;;  %v9371_v35 = vpack.c.bf16 %v18846_v62, %v18846_v62 }
 0x755   :  { %20307 = vst [vmem:[#allocation146_spill] sm:$0xff] %v18974_v7 }
 0x756   :  { %v18886_v24 = vpop.f32.mrf.mxu0  ;;  %20310 = vst [vmem:[#allocation149_spill] sm:$0xff] %v18992_v44 }
 0x757   :  { %v18988_v49 = vpop.xlane.xlu0 %8585  ;;  %20311 = vst [vmem:[#allocation150_spill] sm:$0xff] %v19008_v31  ;;  %v9374_v15 = vpack.c.bf16 %v18886_v24, %v18886_v24 }
 0x758   :  { %20309 = vst [vmem:[#allocation148_spill] sm:$0xff] %v18988_v49 }
 0x75a   :  { %v18894_v0 = vpop.f32.mrf.mxu3 }
 0x75b   :  { %v19026_v55 = vpop.xlane.xlu1 %8681 }
 0x75c   :  { %20312 = vst [vmem:[#allocation151_spill] sm:$0xff] %v19026_v55 }
 0x760   :  { %v18878_v48 = vpop.f32.mrf.mxu1 }
 0x768   :  { %v18890_v17 = vpop.f32.mrf.mxu1 }
 0x769   :  { %v18892_v32 = vpop.f32.mrf.mxu2  ;;  %v9390_v24 = vpack.c.bf16 %v18890_v17, %v18890_v17  ;;  %v9358_v17 = vpack.c.bf16 %v18894_v0, %v18894_v0 }
 0x771   :  { %v18902_v63 = vpop.f32.mrf.mxu2 }
 0x772   :  { %v18900_v38 = vpop.f32.mrf.mxu0 }
 0x774   :  { %v18906_v6 = vpop.f32.mrf.mxu1 }
 0x775   :  { %v9391_v62 = vpack.c.bf16 %v18906_v6, %v18906_v6 }
 0x776   :  { %v18908_v39 = vpop.f32.mrf.mxu3 }
 0x777   :  { %v9359_v6 = vpack.c.bf16 %v18908_v39, %v18908_v39 }
 0x77a   :  { %v18912_v59 = vpop.f32.mrf.mxu0 }
 0x77b   :  { %v9376_v18 = vpack.c.bf16 %v18912_v59, %v18912_v59  ;;  %v9375_v59 = vpack.c.bf16 %v18900_v38, %v18900_v38 }
 0x77c   :  { %v18916_v8 = vpop.f32.mrf.mxu1  ;;  %v18918_v50 = vpop.f32.mrf.mxu2 }
 0x77d   :  { %v9392_v25 = vpack.c.bf16 %v18916_v8, %v18916_v8  ;;  %v9633_v38 = vunpack.c.l.b16 %v9376_v18  ;;  %v9632_v55 = vunpack.c.l.b16 %v9375_v59  ;;  %v9777_v59 = vunpack.c.l.b16 %v9391_v62 }
 0x77e   :  { %v18922_v21 = vpop.f32.mrf.mxu3  ;;  %v9486_v62 = vunpack.c.l.b16 %v9358_v17 }
 0x77f   :  { %v9360_v8 = vpack.c.bf16 %v18922_v21, %v18922_v21  ;;  %v9778_v18 = vunpack.c.l.b16 %v9392_v25  ;;  %v9642_v25 = vpack.c.b16 %v9633_v38, %v9632_v55  ;;  %v9356_v55 = vpack.c.bf16 %v18866_v58, %v18866_v58 }
 0x780   :  { %v9355_v58 = vpack.c.bf16 %v18854_v41, %v18854_v41 }
 0x781   :  { %v9787_v0 = vpack.c.b16 %v9778_v18, %v9777_v59  ;;  %v9484_v17 = vunpack.c.l.b16 %v9356_v55 }
 0x784   :  { %v18946_v34 = vpop.f32.mrf.mxu2 }
 0x786   :  { %v9124_v37 = vpop.f32.mrf.mxu0 }
 0x787   :  { %v9233_v54 = vpop.f32.mrf.mxu1  ;;  %v9377_v9 = vpack.c.bf16 %v9124_v37, %v9124_v37  ;;  %v19024_v37 = vpop.eup %12432 }
 0x788   :  { %v9393_v11 = vpack.c.bf16 %v9233_v54, %v9233_v54 }
 0x789   :  { %v9634_v52 = vunpack.c.l.b16 %v9377_v9 }
 0x78a   :  { %v9015_v26 = vpop.f32.mrf.mxu3  ;;  %v9779_v22 = vunpack.c.l.b16 %v9393_v11  ;;  %v19042_v11 = vpop.xlane.xlu0 %8621 }
 0x78b   :  { %v9361_v53 = vpack.c.bf16 %v9015_v26, %v9015_v26 }
 0x78d   :  { %v9489_v44 = vunpack.c.l.b16 %v9361_v53 }
 0x78e   :  { %v9126_v49 = vpop.f32.mrf.mxu0 }
 0x78f   :  { %v9378_v42 = vpack.c.bf16 %v9126_v49, %v9126_v49  ;;  %v9235_v31 = vpop.f32.mrf.mxu1  ;;  %v9342_v60 = vpop.f32.mrf.mxu2 }
 0x790   :  { %v9394_v49 = vpack.c.bf16 %v9235_v31, %v9235_v31  ;;  %v9373_v31 = vpack.c.bf16 %v18872_v51, %v18872_v51  ;;  %v9389_v51 = vpack.c.bf16 %v18878_v48, %v18878_v48  ;;  %v9357_v48 = vpack.c.bf16 %v18880_v23, %v18880_v23 }
 0x791   :  { %v9635_v54 = vunpack.c.l.b16 %v9378_v42  ;;  %v19034_v42 = vpop.xlane.xlu2 %8587  ;;  %v9628_v23 = vunpack.c.l.b16 %v9371_v35  ;;  %v9406_v35 = vpack.c.bf16 %v18902_v63, %v18902_v63  ;;  %v9405_v63 = vpack.c.bf16 %v18892_v32, %v18892_v32 }
 0x792   :  { %v9017_v14 = vpop.f32.mrf.mxu3  ;;  %v9780_v9 = vunpack.c.l.b16 %v9394_v49  ;;  %v9630_v53 = vunpack.c.l.b16 %v9373_v31  ;;  %v9776_v49 = vunpack.c.l.b16 %v9390_v24  ;;  %v9485_v18 = vunpack.c.l.b16 %v9357_v48 }
 0x793   :  { %v9643_v29 = vpack.c.b16 %v9635_v54, %v9634_v52  ;;  %v9362_v26 = vpack.c.bf16 %v9017_v14, %v9017_v14  ;;  %v9372_v14 = vpack.c.bf16 %v18858_v61, %v18858_v61  ;;  %v9631_v52 = vunpack.c.l.b16 %v9374_v15 }
 0x794   :  { %v9788_v21 = vpack.c.b16 %v9780_v9, %v9779_v22  ;;  %v9488_v54 = vunpack.c.l.b16 %v9360_v8  ;;  %v9387_v22 = vpack.c.bf16 %v18852_v28, %v18852_v28  ;;  %v9409_v61 = vpack.c.bf16 %v9342_v60, %v9342_v60  ;;  %v19060_v8 = vpop.xlane.xlu1 %8653 }
 0x795   :  { %v9490_v7 = vunpack.c.l.b16 %v9362_v26  ;;  %9652 = vmatpush.bf16.msrb.mxu0 %v9643_v29  ;;  %v9388_v29 = vpack.c.bf16 %v18864_v1, %v18864_v1  ;;  %v9487_v15 = vunpack.c.l.b16 %v9359_v6  ;;  %v9408_v28 = vpack.c.bf16 %v18946_v34, %v18946_v34 }
 0x796   :  { %9797 = vmatpush.bf16.msra.mxu1 %v9788_v21  ;;  %v9775_v1 = vunpack.c.l.b16 %v9389_v51  ;;  %v9641_v38 = vpack.c.b16 %v9631_v52, %v9630_v53  ;;  %v9407_v26 = vpack.c.bf16 %v18918_v50, %v18918_v50  ;;  %v9924_v31 = vunpack.c.l.b16 %v9409_v61 }
 0x797   :  { %v9498_v39 = vpack.c.b16 %v9490_v7, %v9489_v44  ;;  %v9344_v9 = vpop.f32.mrf.mxu2  ;;  %v9629_v7 = vunpack.c.l.b16 %v9372_v14  ;;  %v9497_v60 = vpack.c.b16 %v9488_v54, %v9487_v15  ;;  %v9774_v6 = vunpack.c.l.b16 %v9388_v29  ;;  %v19078_v29 = vpop.xlane.xlu0 %8683 }
 0x798   :  { %v9410_v44 = vpack.c.bf16 %v9344_v9, %v9344_v9  ;;  %v9786_v34 = vpack.c.b16 %v9776_v49, %v9775_v1  ;;  %v9354_v21 = vpack.c.bf16 %v18844_v2, %v18844_v2  ;;  %v9923_v51 = vunpack.c.l.b16 %v9408_v28 }
 0x799   :  { %9507 = vmatpush.bf16.msrb.mxu3 %v9498_v39  ;;  %9653 = vmatpush.bf16.msrb.mxu0 %v9642_v25  ;;  %v19068_v14 = vpop.xlane.xlu2 %8623  ;;  %v9773_v52 = vunpack.c.l.b16 %v9387_v22  ;;  %v9496_v59 = vpack.c.b16 %v9486_v62, %v9485_v18  ;;  %v9640_v41 = vpack.c.b16 %v9629_v7, %v9628_v23  ;;  %v20313_v54 = vpack.c.bf16 %v18818_v36, %v18818_v36  ;;  %v20318_v62 = vld [vmem:[#allocation71_spill] sm:$0xff]  ;;  %v20321_v23 = vld [vmem:[#allocation88_spill] sm:$0xff] }
 0x79a   :  { %9798 = vmatpush.bf16.msra.mxu1 %v9787_v0  ;;  %v9925_v24 = vunpack.c.l.b16 %v9410_v44  ;;  %v20314_v25 = vpack.c.bf16 %v18826_v10, %v18826_v10  ;;  %v9922_v53 = vunpack.c.l.b16 %v9407_v26  ;;  %v9353_v22 = vpack.c.bf16 %v18834_v19, %v18834_v19 }
 0x79b   :  { %v9625_v39 = vunpack.c.l.b16 %v20313_v54  ;;  %v20315_v61 = vpack.c.bf16 %v18842_v12, %v18842_v12  ;;  %v9483_v36 = vunpack.c.l.b16 %v9355_v58  ;;  %v9785_v49 = vpack.c.b16 %v9774_v6, %v9773_v52 }
 0x79c   :  { %v9933_v50 = vpack.c.b16 %v9925_v24, %v9924_v31  ;;  %v9626_v2 = vunpack.c.l.b16 %v20314_v25  ;;  %v9352_v10 = vpack.c.bf16 %v18824_v43, %v18824_v43  ;;  %v9404_v15 = vpack.c.bf16 %v18876_v56, %v18876_v56  ;;  %v20327_v25 = vld [vmem:[#allocation118_spill] sm:$0xff] }
 0x79d   :  { %9508 = vmatpush.bf16.msrb.mxu3 %v9497_v60  ;;  %9654 = vmatpush.bf16.msrb.mxu0 %v9641_v38  ;;  %v9772_v48 = vunpack.c.l.b16 %v20315_v61  ;;  %v9921_v32 = vunpack.c.l.b16 %v9406_v35  ;;  %v9932_v9 = vpack.c.b16 %v9923_v51, %v9922_v53  ;;  %v20316_v0 = vpack.c.bf16 %v18832_v46, %v18832_v46  ;;  %v20324_v51 = vld [vmem:[#allocation90_spill] sm:$0xff] }
 0x79e   :  { %9799 = vmatpush.bf16.msra.mxu1 %v9786_v34  ;;  %9942 = vmatpush.bf16.msra.mxu2 %v9933_v50  ;;  %v9482_v7 = vunpack.c.l.b16 %v9354_v21  ;;  %v9495_v12 = vpack.c.b16 %v9484_v17, %v9483_v36  ;;  %v9639_v55 = vpack.c.b16 %v19016_v40, %v9626_v2  ;;  %v8784_v28 = vmul.f32 %v18978_v16, %v17464_v33  ;;  %v20320_v16 = vld [vmem:[#allocation119_spill] sm:$0xff]  ;;  %v20328_v2 = vld [vmem:[#allocation85_spill] sm:$0xff] }
 0x79f   :  { %v9771_v19 = vunpack.c.l.b16 %v20316_v0  ;;  %v20317_v43 = vpack.c.bf16 %v18807_v45, %v18807_v45  ;;  %v9403_v56 = vpack.c.bf16 %v18862_v5, %v18862_v5  ;;  %v9920_v1 = vunpack.c.l.b16 %v9405_v63  ;;  %v19111_v5 = vpop.xlane.xlu1 %8589  ;;  %v20323_v21 = vld [vmem:[#allocation115_spill] sm:$0xff] }
 0x7a0   :  { %v9351_v46 = vpack.c.bf16 %v20318_v62, %v20318_v62  ;;  %v20319_v60 = vpack.c.bf16 %v18822_v20, %v18822_v20  ;;  %v9481_v40 = vunpack.c.l.b16 %v9353_v22  ;;  %v8799_v45 = vmul.f32 %v18990_v13, %v20320_v16  ;;  %v20325_v13 = vld [vmem:[#allocation86_spill] sm:$0xff]  ;;  %v19129_v22 = vpop.xlane.xlu0 %8655  ;;  %v20340_v16 = vld [vmem:[#allocation141_spill] sm:$0xff] }
 0x7a1   :  { %9509 = vmatpush.bf16.msrb.mxu3 %v9496_v59  ;;  %9655 = vmatpush.bf16.msrb.mxu0 %v9640_v41  ;;  %v9624_v44 = vunpack.c.l.b16 %v20317_v43  ;;  %v9784_v33 = vpack.c.b16 %v9772_v48, %v9771_v19  ;;  %v9402_v26 = vpack.c.bf16 %v20321_v23, %v20321_v23  ;;  %v9919_v31 = vunpack.c.l.b16 %v9404_v15  ;;  %v19121_v17 = vpop.xlane.xlu2 %8685  ;;  %v20326_v41 = vld [vmem:[#allocation112_spill] sm:$0xff]  ;;  %v20329_v48 = vld [vmem:[#allocation87_spill] sm:$0xff]  ;;  %v20336_v62 = vld [vmem:[#allocation58_spill] sm:$0xff] }
 0x7a2   :  { %9800 = vmatpush.bf16.msra.mxu1 %v9785_v49  ;;  %9943 = vmatpush.bf16.msra.mxu2 %v9932_v9  ;;  %v9770_v38 = vunpack.c.l.b16 %v20319_v60  ;;  %v9931_v24 = vpack.c.b16 %v9921_v32, %v9920_v1  ;;  %v20322_v58 = vpack.c.bf16 %v18813_v3, %v18813_v3  ;;  %v9480_v20 = vunpack.c.l.b16 %v9352_v10  ;;  %v20331_v32 = vld [vmem:[#allocation84_spill] sm:$0xff]  ;;  %v20337_v60 = vld [vmem:[#allocation94_spill] sm:$0xff] }
 0x7a3   :  { %v9494_v18 = vpack.c.b16 %v9482_v7, %v9481_v40  ;;  %v9638_v34 = vpack.c.b16 %v9625_v39, %v9624_v44  ;;  %v8800_v35 = vmul.f32 %v18998_v57, %v20323_v21  ;;  %12434 = vrcp.f32 %v20324_v51  ;;  %v20332_v7 = vld [vmem:[#allocation93_spill] sm:$0xff]  ;;  %v20345_v51 = vld [vmem:[#allocation138_spill] sm:$0xff] }
 0x7a4   :  { %v9769_v6 = vunpack.c.l.b16 %v20322_v58  ;;  %v9401_v50 = vpack.c.bf16 %v20325_v13, %v20325_v13  ;;  %v9918_v52 = vunpack.c.l.b16 %v9403_v56  ;;  %v8848_v59 = vpack.c.bf16 %v8784_v28, %v8784_v28  ;;  %v20335_v28 = vld [vmem:[#allocation149_spill] sm:$0xff]  ;;  %v20346_v13 = vld [vmem:[#allocation143_spill] sm:$0xff] }
 0x7a5   :  { %9510 = vmatpush.bf16.msrb.mxu3 %v9495_v12  ;;  %9656 = vmatpush.bf16.msrb.mxu0 %v9639_v55  ;;  %v8767_v3 = vmul.f32 %v19014_v30, %v20326_v41  ;;  %v9479_v54 = vunpack.c.l.b16 %v9351_v46  ;;  %v8768_v57 = vmul.f32 %v19024_v37, %v20327_v25  ;;  %v9400_v63 = vpack.c.bf16 %v20328_v2, %v20328_v2  ;;  %v20333_v12 = vld [vmem:[#allocation60_spill] sm:$0xff]  ;;  %v20347_v25 = vld [vmem:[#allocation111_spill] sm:$0xff]  ;;  %v20348_v2 = vld [vmem:[#allocation117_spill] sm:$0xff] }
 0x7a6   :  { %9801 = vmatpush.bf16.msra.mxu1 %v9784_v33  ;;  %9944 = vmatpush.bf16.msra.mxu2 %v9931_v24  ;;  %v9783_v39 = vpack.c.b16 %v9770_v38, %v9769_v6  ;;  %v9917_v53 = vunpack.c.l.b16 %v9402_v26  ;;  %v9930_v61 = vpack.c.b16 %v9919_v31, %v9918_v52  ;;  %12436 = vrcp.f32 %v20329_v48  ;;  %v20338_v38 = vld [vmem:[#allocation147_spill] sm:$0xff]  ;;  %v20339_v33 = vld [vmem:[#allocation137_spill] sm:$0xff]  ;;  %v20351_v48 = vld [vmem:[#allocation140_spill] sm:$0xff] }
 0x7a7   :  { %v20330_v36 = vpack.c.bf16 %v18799_v47, %v18799_v47  ;;  %v9493_v49 = vpack.c.b16 %v9480_v20, %v9479_v54  ;;  %v9637_v10 = vpack.c.b16 %v18982_v27, %v18972_v4  ;;  %v8863_v15 = vpack.c.bf16 %v8799_v45, %v8799_v45  ;;  %v20334_v47 = vld [vmem:[#allocation146_spill] sm:$0xff]  ;;  %v20341_v31 = vld [vmem:[#allocation89_spill] sm:$0xff]  ;;  %v19151_v58 = vpop.xlane.xlu1 %8625 }
 0x7a8   :  { %v8864_v37 = vpack.c.bf16 %v8800_v35, %v8800_v35  ;;  %v9399_v9 = vpack.c.bf16 %v20331_v32, %v20331_v32  ;;  %v9916_v0 = vunpack.c.l.b16 %v9401_v50  ;;  %v9573_v19 = vunpack.c.l.b16 %v8848_v59  ;;  %v20342_v20 = vld [vmem:[#allocation142_spill] sm:$0xff]  ;;  %v20344_v35 = vld [vmem:[#allocation129_spill] sm:$0xff]  ;;  %v20353_v32 = vld [vmem:[#allocation55_spill] sm:$0xff] }
 0x7a9   :  { %9511 = vmatpush.bf16.msrb.mxu3 %v9494_v18  ;;  %9657 = vmatpush.bf16.msrb.mxu0 %v9638_v34  ;;  %v9478_v30 = vunpack.c.l.b16 %v20330_v36  ;;  %12438 = vrcp.f32 %v20332_v7  ;;  %v9398_v55 = vpack.c.bf16 %v20333_v12, %v20333_v12  ;;  %v9782_v43 = vpack.c.b16 %v20335_v28, %v20334_v47  ;;  %v12435_v44 = vpop.eup %12434  ;;  %v20343_v34 = vld [vmem:[#allocation81_spill] sm:$0xff]  ;;  %v20352_v36 = vld [vmem:[#allocation144_spill] sm:$0xff] }
 0x7aa   :  { %9802 = vmatpush.bf16.msra.mxu1 %v9783_v39  ;;  %9945 = vmatpush.bf16.msra.mxu2 %v9930_v61  ;;  %v8831_v4 = vpack.c.bf16 %v8767_v3, %v8767_v3  ;;  %v8832_v27 = vpack.c.bf16 %v8768_v57, %v8768_v57  ;;  %v9915_v56 = vunpack.c.l.b16 %v9400_v63  ;;  %v9929_v1 = vpack.c.b16 %v9917_v53, %v9916_v0  ;;  %v19158_v3 = vpop.xlane.xlu2 %8657  ;;  %v20349_v63 = vld [vmem:[#allocation150_spill] sm:$0xff]  ;;  %v20350_v61 = vld [vmem:[#allocation95_spill] sm:$0xff]  ;;  %v20355_v47 = vld [vmem:[#allocation72_spill] sm:$0xff] }
 0x7ab   :  { %v9397_v46 = vpack.c.bf16 %v20336_v62, %v20336_v62  ;;  %12440 = vrcp.f32 %v20337_v60  ;;  %v9492_v40 = vpack.c.b16 %v9478_v30, %v20338_v38  ;;  %v9636_v45 = vpack.c.b16 %v20340_v16, %v20339_v33  ;;  %v20358_v62 = vld [vmem:[#allocation103_spill] sm:$0xff] }
 0x7ac   :  { %v9717_v23 = vunpack.c.l.b16 %v8863_v15  ;;  %v9718_v26 = vunpack.c.l.b16 %v8864_v37  ;;  %12442 = vrcp.f32 %v20341_v31  ;;  %v9914_v24 = vunpack.c.l.b16 %v9399_v9  ;;  %v12437_v6 = vpop.eup %12436  ;;  %v19167_v15 = vpop.xlane.xlu0 %8591 }
 0x7ad   :  { %9512 = vmatpush.bf16.msrb.mxu3 %v9493_v49  ;;  %9658 = vmatpush.bf16.msrb.mxu0 %v9637_v10  ;;  %v9588_v18 = vpack.c.b16 %v9573_v19, %v20342_v20  ;;  %v8816_v21 = vmul.f32 %v12435_v44, %v20343_v34  ;;  %12444 = vrcp.f32 %v20344_v35  ;;  %v9781_v50 = vpack.c.b16 %v20346_v13, %v20345_v51  ;;  %v20363_v35 = vld [vmem:[#allocation70_spill] sm:$0xff] }
 0x7ae   :  { %9803 = vmatpush.bf16.msra.mxu1 %v9782_v43  ;;  %9946 = vmatpush.bf16.msra.mxu2 %v9929_v1  ;;  %v9427_v52 = vunpack.c.l.b16 %v8831_v4  ;;  %v9428_v59 = vunpack.c.l.b16 %v8832_v27  ;;  %v9913_v41 = vunpack.c.l.b16 %v9398_v55  ;;  %v9928_v54 = vpack.c.b16 %v9915_v56, %v9914_v24  ;;  %v20356_v43 = vld [vmem:[#allocation77_spill] sm:$0xff]  ;;  %v20361_v24 = vld [vmem:[#allocation106_spill] sm:$0xff] }
 0x7af   :  { %v12439_v39 = vpop.eup %12438  ;;  %v9395_v57 = vpack.c.bf16 %v20347_v25, %v20347_v25  ;;  %v8815_v53 = vmul.f32 %v20349_v63, %v20348_v2  ;;  %12446 = vrcp.f32 %v20350_v61  ;;  %v9491_v30 = vpack.c.b16 %v20352_v36, %v20351_v48  ;;  %v20357_v1 = vld [vmem:[#allocation133_spill] sm:$0xff]  ;;  %v19177_v16 = vpop.xlane.xlu1 %8687  ;;  %v20365_v2 = vld [vmem:[#allocation136_spill] sm:$0xff]  ;;  %v20366_v63 = vld [vmem:[#allocation131_spill] sm:$0xff] }
 0x7b0   :  { %v9733_v49 = vpack.c.b16 %v9718_v26, %v9717_v23  ;;  %v9912_v10 = vunpack.c.l.b16 %v9397_v46  ;;  %v20354_v9 = vpack.c.bf16 %v20353_v32, %v20353_v32  ;;  %v8880_v19 = vpack.c.bf16 %v8816_v21, %v8816_v21  ;;  %v20360_v26 = vld [vmem:[#allocation75_spill] sm:$0xff]  ;;  %v20367_v48 = vld [vmem:[#allocation148_spill] sm:$0xff] }
 0x7b1   :  { %9513 = vmatpush.bf16.msrb.mxu3 %v9492_v40  ;;  %9659 = vmatpush.bf16.msrb.mxu0 %v9636_v45  ;;  %v12441_v37 = vpop.eup %12440  ;;  %v9443_v12 = vpack.c.b16 %v9428_v59, %v9427_v52  ;;  %v8785_v28 = vmul.f32 %v12437_v6, %v20355_v47  ;;  %v8786_v44 = vmul.f32 %v12439_v39, %v20356_v43  ;;  %v9910_v27 = vunpack.c.l.b16 %v9395_v57  ;;  %v20359_v40 = vld [vmem:[#allocation128_spill] sm:$0xff] }
 0x7b2   :  { %9804 = vmatpush.bf16.msra.mxu1 %v9781_v50  ;;  %9947 = vmatpush.bf16.msra.mxu2 %v9928_v54  ;;  %v9911_v0 = vunpack.c.l.b16 %v20354_v9  ;;  %v12443_v7 = vpop.eup %12442  ;;  %v9927_v55 = vpack.c.b16 %v9913_v41, %v9912_v10  ;;  %v8879_v56 = vpack.c.bf16 %v8815_v53, %v8815_v53  ;;  %12448 = vrcp.f32 %v20357_v1  ;;  %v19182_v34 = vpop.xlane.xlu2 %8593  ;;  %v20364_v50 = vld [vmem:[#allocation132_spill] sm:$0xff] }
 0x7b3   :  { %v12445_v4 = vpop.eup %12444  ;;  %v8802_v46 = vmul.f32 %v12441_v37, %v20358_v62  ;;  %v9863_v38 = vunpack.c.l.b16 %v8880_v19  ;;  %12450 = vrcp.f32 %v20359_v40  ;;  %v8849_v45 = vpack.c.bf16 %v8785_v28, %v8785_v28  ;;  %v20368_v36 = vld [vmem:[#allocation100_spill] sm:$0xff]  ;;  %v20370_v19 = vld [vmem:[#allocation101_spill] sm:$0xff] }
 0x7b4   :  { %9660 = vmatmul.bf16.vlgmr.msrb.gmra.mxu0 %v9588_v18  ;;  %v9926_v33 = vpack.c.b16 %v9911_v0, %v9910_v27  ;;  %v8850_v23 = vpack.c.bf16 %v8786_v44, %v8786_v44  ;;  %v8801_v31 = vmul.f32 %v12443_v7, %v20360_v26  ;;  %v8770_v6 = vmul.f32 %v12445_v4, %v20361_v24  ;;  %v20362_v18 = vld [vmem:[#allocation130_spill] sm:$0xff]  ;;  %v19186_v59 = vpop.xlane.xlu0 %8627 }
 0x7b5   :  { %9514 = vmatpush.bf16.msrb.mxu3 %v9491_v30  ;;  %9805 = vmatmul.bf16.vlgmr.msra.gmra.mxu1 %v9733_v49  ;;  %v12447_v60 = vpop.eup %12446  ;;  %v9862_v20 = vunpack.c.l.b16 %v8879_v56  ;;  %12452 = vrcp.f32 %v20362_v18  ;;  %v8866_v21 = vpack.c.bf16 %v8802_v46, %v8802_v46  ;;  %v9574_v41 = vunpack.c.l.b16 %v8849_v45  ;;  %v20369_v0 = vld [vmem:[#allocation134_spill] sm:$0xff]  ;;  %v20371_v56 = vld [vmem:[#allocation104_spill] sm:$0xff]  ;;  %v20372_v46 = vld [vmem:[#allocation135_spill] sm:$0xff] }
 0x7b6   :  { %9948 = vmatpush.bf16.msra.mxu2 %v9927_v55  ;;  %v8769_v51 = vmul.f32 %v12447_v60, %v20363_v35  ;;  %12454 = vrcp.f32 %v20364_v50  ;;  %v9575_v54 = vunpack.c.l.b16 %v8850_v23  ;;  %v8865_v39 = vpack.c.bf16 %v8801_v31, %v8801_v31  ;;  %v20375_v23 = vld [vmem:[#allocation51_spill] sm:$0xff] }
 0x7b7   :  { %v9878_v13 = vpack.c.b16 %v9863_v38, %v9862_v20  ;;  %v8834_v25 = vpack.c.bf16 %v8770_v6, %v8770_v6  ;;  %12456 = vrcp.f32 %v20365_v2  ;;  %v9720_v53 = vunpack.c.l.b16 %v8866_v21  ;;  %v20373_v38 = vld [vmem:[#allocation151_spill] sm:$0xff]  ;;  %v20376_v20 = vld [vmem:[#allocation102_spill] sm:$0xff]  ;;  %v20377_v21 = vld [vmem:[#allocation76_spill] sm:$0xff] }
 0x7b8   :  { %9515 = vmatmul.bf16.vlgmr.msrb.gmra.mxu3 %v9443_v12  ;;  %v12449_v52 = vpop.eup %12448  ;;  %12458 = vrcp.f32 %v20366_v63  ;;  %v8833_v61 = vpack.c.bf16 %v8769_v51, %v8769_v51  ;;  %v9589_v10 = vpack.c.b16 %v9575_v54, %v9574_v41  ;;  %v9719_v37 = vunpack.c.l.b16 %v8865_v39  ;;  %v19194_v12 = vpop.xlane.xlu1 %8659  ;;  %v20379_v41 = vld [vmem:[#allocation105_spill] sm:$0xff] }
 0x7b9   :  { %v12451_v57 = vpop.eup %12450  ;;  %12460 = vrcp.f32 %v20367_v48  ;;  %v8818_v30 = vmul.f32 %v12449_v52, %v20368_v36  ;;  %v9430_v32 = vunpack.c.l.b16 %v8834_v25  ;;  %v20380_v2 = vld [vmem:[#allocation145_spill] sm:$0xff] }
 0x7ba   :  { %9949 = vmatpush.bf16.msra.mxu2 %v9926_v33  ;;  %12462 = vrcp.f32 %v20369_v0  ;;  %v8817_v7 = vmul.f32 %v12451_v57, %v20370_v19  ;;  %v9734_v55 = vpack.c.b16 %v9720_v53, %v9719_v37  ;;  %v9429_v47 = vunpack.c.l.b16 %v8833_v61  ;;  %v19196_v4 = vpop.xlane.xlu2 %8629  ;;  %v20374_v33 = vld [vmem:[#allocation107_spill] sm:$0xff] }
 0x7bb   :  { %v12453_v49 = vpop.eup %12452  ;;  %v8882_v43 = vpack.c.bf16 %v8818_v30, %v8818_v30  ;;  %12464 = vrcp.f32 %v20372_v46 }
 0x7bc   :  { %v12455_v9 = vpop.eup %12454  ;;  %v9444_v27 = vpack.c.b16 %v9430_v32, %v9429_v47  ;;  %v8881_v60 = vpack.c.bf16 %v8817_v7, %v8817_v7  ;;  %12466 = vrcp.f32 %v20373_v38  ;;  %v19201_v40 = vpop.xlane.xlu0 %8689  ;;  %v8787_v45 = vmul.f32 %v12453_v49, %v20374_v33  ;;  %v20382_v32 = vld [vmem:[#allocation66_spill] sm:$0xff]  ;;  %v20384_v33 = vld [vmem:[#allocation83_spill] sm:$0xff] }
 0x7bd   :  { %9950 = vmatmul.bf16.vlgmr.msra.gmra.mxu2 %v9878_v13  ;;  %v12457_v28 = vpop.eup %12456  ;;  %v8788_v1 = vmul.f32 %v12455_v9, %v20371_v56  ;;  %v9865_v24 = vunpack.c.l.b16 %v8882_v43  ;;  %v20378_v13 = vld [vmem:[#allocation139_spill] sm:$0xff] }
 0x7be   :  { %v12459_v44 = vpop.eup %12458  ;;  %v8804_v26 = vmul.f32 %v12457_v28, %v20375_v23  ;;  %v9864_v51 = vunpack.c.l.b16 %v8881_v60  ;;  %12468 = vrcp.f32 %v20378_v13  ;;  %v8851_v50 = vpack.c.bf16 %v8787_v45, %v8787_v45  ;;  %v20385_v23 = vld [vmem:[#allocation73_spill] sm:$0xff]  ;;  %v20388_v13 = vld [vmem:[#allocation68_spill] sm:$0xff] }
 0x7bf   :  { %v12461_v62 = vpop.eup %12460  ;;  %v8852_v6 = vpack.c.bf16 %v8788_v1, %v8788_v1  ;;  %v8803_v18 = vmul.f32 %v12459_v44, %v20376_v20  ;;  %12470 = vrcp.f32 %v19042_v11  ;;  %v20381_v11 = vld [vmem:[#allocation52_spill] sm:$0xff] }
 0x7c0   :  { %v12463_v31 = vpop.eup %12462  ;;  %v8772_v35 = vmul.f32 %v12461_v62, %v20377_v21  ;;  %v8868_v52 = vpack.c.bf16 %v8804_v26, %v8804_v26  ;;  %v9879_v25 = vpack.c.b16 %v9865_v24, %v9864_v51  ;;  %12472 = vrcp.f32 %v20380_v2  ;;  %v19211_v63 = vpop.xlane.xlu1 %8595  ;;  %v20383_v62 = vld [vmem:[#allocation62_spill] sm:$0xff] }
 0x7c1   :  { %v8771_v54 = vmul.f32 %v12463_v31, %v20379_v41  ;;  %v12465_v39 = vpop.eup %12464  ;;  %v9577_v53 = vunpack.c.l.b16 %v8852_v6  ;;  %v8867_v61 = vpack.c.bf16 %v8803_v18, %v8803_v18  ;;  %12474 = vrcp.f32 %v19060_v8  ;;  %v20386_v31 = vld [vmem:[#allocation80_spill] sm:$0xff] }
 0x7c2   :  { %v12467_v57 = vpop.eup %12466  ;;  %v8836_v48 = vpack.c.bf16 %v8772_v35, %v8772_v35  ;;  %12476 = vrcp.f32 %v19034_v42  ;;  %v19215_v36 = vpop.xlane.xlu2 %8691  ;;  %v9576_v30 = vunpack.c.l.b16 %v8851_v50  ;;  %v9722_v49 = vunpack.c.l.b16 %v8868_v52  ;;  %v20387_v35 = vld [vmem:[#allocation63_spill] sm:$0xff] }
 0x7c3   :  { %12478 = vrcp.f32 %v19111_v5  ;;  %v8819_v37 = vmul.f32 %v12465_v39, %v20381_v11  ;;  %v8820_v9 = vmul.f32 %v12467_v57, %v20382_v32 }
 0x7c4   :  { %9665 = vmatmul.bf16.gmra.mxu0 %v9589_v10  ;;  %v8835_v10 = vpack.c.bf16 %v8771_v54, %v8771_v54  ;;  %v12469_v0 = vpop.eup %12468  ;;  %v19220_v19 = vpop.xlane.xlu0 %8661  ;;  %v9590_v7 = vpack.c.b16 %v9577_v53, %v9576_v30  ;;  %v9432_v8 = vunpack.c.l.b16 %v8836_v48  ;;  %12480 = vrcp.f32 %v19121_v17  ;;  %v20389_v30 = vld [vmem:[#allocation69_spill] sm:$0xff] }
 0x7c5   :  { %9810 = vmatmul.bf16.gmra.mxu1 %v9734_v55  ;;  %v9721_v55 = vunpack.c.l.b16 %v8867_v61  ;;  %v12471_v47 = vpop.eup %12470  ;;  %v8884_v56 = vpack.c.bf16 %v8820_v9, %v8820_v9  ;;  %v8789_v45 = vmul.f32 %v12469_v0, %v20384_v33  ;;  %12482 = vrcp.f32 %v19078_v29 }
 0x7c6   :  { %v12473_v28 = vpop.eup %12472  ;;  %v9431_v43 = vunpack.c.l.b16 %v8835_v10  ;;  %v8790_v46 = vmul.f32 %v12471_v47, %v20383_v62  ;;  %12484 = vrcp.f32 %v19068_v14 }
 0x7c7   :  { %v9735_v42 = vpack.c.b16 %v9722_v49, %v9721_v55  ;;  %v12475_v44 = vpop.eup %12474  ;;  %v8805_v26 = vmul.f32 %v12473_v28, %v20385_v23  ;;  %v9867_v20 = vunpack.c.l.b16 %v8884_v56  ;;  %v8853_v52 = vpack.c.bf16 %v8789_v45, %v8789_v45  ;;  %v20394_v45 = vld [vmem:[#allocation61_spill] sm:$0xff] }
 0x7c8   :  { %9520 = vmatmul.bf16.gmra.mxu3 %v9444_v27  ;;  %v8883_v27 = vpack.c.bf16 %v8819_v37, %v8819_v37  ;;  %v12477_v1 = vpop.eup %12476  ;;  %v9445_v5 = vpack.c.b16 %v9432_v8, %v9431_v43  ;;  %v19224_v38 = vpop.xlane.xlu1 %8693  ;;  %v8806_v24 = vmul.f32 %v12475_v44, %v20386_v31  ;;  %v8854_v21 = vpack.c.bf16 %v8790_v46, %v8790_v46  ;;  %v20392_v44 = vld [vmem:[#allocation98_spill] sm:$0xff] }
 0x7c9   :  { %v12479_v60 = vpop.eup %12478  ;;  %v8773_v51 = vmul.f32 %v12477_v1, %v20387_v35  ;;  %v8869_v41 = vpack.c.bf16 %v8805_v26, %v8805_v26  ;;  %12486 = vrcp.f32 %v19151_v58  ;;  %v9578_v61 = vunpack.c.l.b16 %v8853_v52  ;;  %v20395_v26 = vld [vmem:[#allocation92_spill] sm:$0xff] }
 0x7ca   :  { %v9866_v6 = vunpack.c.l.b16 %v8883_v27  ;;  %v19230_v18 = vpop.xlane.xlu2 %8663  ;;  %v8774_v17 = vmul.f32 %v12479_v60, %v20388_v13  ;;  %v8870_v54 = vpack.c.bf16 %v8806_v24, %v8806_v24  ;;  %v9579_v57 = vunpack.c.l.b16 %v8854_v21 }
 0x7cb   :  { %v8837_v29 = vpack.c.bf16 %v8773_v51, %v8773_v51  ;;  %12488 = vrcp.f32 %v19158_v3  ;;  %v9723_v14 = vunpack.c.l.b16 %v8869_v41  ;;  %v20390_v3 = vld [vmem:[#allocation67_spill] sm:$0xff] }
 0x7cc   :  { %v19235_v50 = vpop.xlane.xlu0 %8597  ;;  %v9880_v39 = vpack.c.b16 %v9867_v20, %v9866_v6  ;;  %v8838_v2 = vpack.c.bf16 %v8774_v17, %v8774_v17  ;;  %12490 = vrcp.f32 %v19129_v22  ;;  %v9724_v48 = vunpack.c.l.b16 %v8870_v54 }
 0x7cd   :  { %9955 = vmatmul.bf16.gmra.mxu2 %v9879_v25  ;;  %v12481_v25 = vpop.eup %12480  ;;  %12492 = vrcp.f32 %v19182_v34  ;;  %v9591_v11 = vpack.c.b16 %v9579_v57, %v9578_v61  ;;  %v9433_v37 = vunpack.c.l.b16 %v8837_v29 }
 0x7ce   :  { %v12483_v53 = vpop.eup %12482  ;;  %v8822_v49 = vmul.f32 %v12481_v25, %v20389_v30  ;;  %v9434_v32 = vunpack.c.l.b16 %v8838_v2  ;;  %12494 = vrcp.f32 %v19167_v15  ;;  %v9736_v22 = vpack.c.b16 %v9724_v48, %v9723_v14  ;;  %v20393_v15 = vld [vmem:[#allocation99_spill] sm:$0xff] }
 0x7cf   :  { %v12485_v10 = vpop.eup %12484  ;;  %v8821_v0 = vmul.f32 %v12483_v53, %v20390_v3  ;;  %12496 = vrcp.f32 %v19201_v40  ;;  %v20396_v40 = vld [vmem:[#allocation65_spill] sm:$0xff]  ;;  %v20398_v48 = vld [vmem:[#allocation91_spill] sm:$0xff] }
 0x7d0   :  { %v19242_v58 = vpop.xlane.xlu1 %8631  ;;  %v12487_v9 = vpop.eup %12486  ;;  %v8886_v8 = vpack.c.bf16 %v8822_v49, %v8822_v49  ;;  %v9446_v28 = vpack.c.b16 %v9434_v32, %v9433_v37  ;;  %12498 = vrcp.f32 %v19177_v16  ;;  %v20399_v32 = vld [vmem:[#allocation124_spill] sm:$0xff] }
 0x7d1   :  { %v12489_v55 = vpop.eup %12488  ;;  %v8792_v27 = vmul.f32 %v12487_v9, %v20392_v44  ;;  %v8885_v1 = vpack.c.bf16 %v8821_v0, %v8821_v0  ;;  %12500 = vrcp.f32 %v19186_v59 }
 0x7d2   :  { %v12491_v34 = vpop.eup %12490  ;;  %v9869_v46 = vunpack.c.l.b16 %v8886_v8  ;;  %12502 = vrcp.f32 %v19196_v4  ;;  %v20397_v4 = vld [vmem:[#allocation120_spill] sm:$0xff]  ;;  %v20401_v8 = vld [vmem:[#allocation53_spill] sm:$0xff] }
 0x7d3   :  { %v12493_v56 = vpop.eup %12492  ;;  %v8856_v33 = vpack.c.bf16 %v8792_v27, %v8792_v27  ;;  %v8807_v23 = vmul.f32 %v12491_v34, %v20394_v45  ;;  %v9868_v24 = vunpack.c.l.b16 %v8885_v1  ;;  %12504 = vrcp.f32 %v19220_v19  ;;  %v20402_v27 = vld [vmem:[#allocation121_spill] sm:$0xff] }
 0x7d4   :  { %9670 = vmatmul.bf16.gmra.mxu0 %v9590_v7  ;;  %v19246_v7 = vpop.xlane.xlu2 %8599  ;;  %v19248_v47 = vpop.xlane.xlu0 %8633  ;;  %v8776_v31 = vmul.f32 %v12493_v56, %v20395_v26  ;;  %12506 = vrcp.f32 %v19194_v12  ;;  %v20403_v1 = vld [vmem:[#allocation97_spill] sm:$0xff] }
 0x7d5   :  { %9815 = vmatmul.bf16.gmra.mxu1 %v9735_v42  ;;  %v20391_v42 = vld [vmem:[#allocation74_spill] sm:$0xff]  ;;  %v12495_v62 = vpop.eup %12494  ;;  %v9881_v35 = vpack.c.b16 %v9869_v46, %v9868_v24  ;;  %v9581_v17 = vunpack.c.l.b16 %v8856_v33  ;;  %v8871_v52 = vpack.c.bf16 %v8807_v23, %v8807_v23  ;;  %12508 = vrcp.f32 %v19235_v50  ;;  %v20404_v46 = vld [vmem:[#allocation123_spill] sm:$0xff] }
 0x7d6   :  { %v8791_v43 = vmul.f32 %v12485_v10, %v20391_v42  ;;  %v8775_v21 = vmul.f32 %v12495_v62, %v20396_v40  ;;  %v12497_v51 = vpop.eup %12496  ;;  %v8840_v41 = vpack.c.bf16 %v8776_v31, %v8776_v31  ;;  %12510 = vrcp.f32 %v19211_v63  ;;  %v20400_v63 = vld [vmem:[#allocation122_spill] sm:$0xff] }
 0x7d7   :  { %v12499_v54 = vpop.eup %12498  ;;  %v8824_v57 = vmul.f32 %v12497_v51, %v20397_v4  ;;  %v9725_v53 = vunpack.c.l.b16 %v8871_v52  ;;  %12512 = vrcp.f32 %v19215_v36 }
 0x7d8   :  { %9525 = vmatmul.bf16.gmra.mxu3 %v9445_v5  ;;  %v8808_v5 = vmul.f32 %v12489_v55, %v20393_v15  ;;  %v8855_v60 = vpack.c.bf16 %v8791_v43, %v8791_v43  ;;  %v19258_v6 = vpop.xlane.xlu1 %8601  ;;  %v8839_v25 = vpack.c.bf16 %v8775_v21, %v8775_v21  ;;  %v12501_v29 = vpop.eup %12500  ;;  %v9436_v61 = vunpack.c.l.b16 %v8840_v41  ;;  %v20406_v41 = vld [vmem:[#allocation127_spill] sm:$0xff] }
 0x7d9   :  { %v12503_v14 = vpop.eup %12502  ;;  %v8823_v19 = vmul.f32 %v12499_v54, %v20398_v48  ;;  %v8888_v10 = vpack.c.bf16 %v8824_v57, %v8824_v57  ;;  %v8793_v55 = vmul.f32 %v12501_v29, %v20400_v63  ;;  %12514 = vrcp.f32 %v19224_v38 }
 0x7da   :  { %v8872_v20 = vpack.c.bf16 %v8808_v5, %v8808_v5  ;;  %v9580_v13 = vunpack.c.l.b16 %v8855_v60  ;;  %v9435_v12 = vunpack.c.l.b16 %v8839_v25  ;;  %v12505_v49 = vpop.eup %12504  ;;  %v8794_v9 = vmul.f32 %v12503_v14, %v20399_v32 }
 0x7db   :  { %v8887_v0 = vpack.c.bf16 %v8823_v19, %v8823_v19  ;;  %v8810_v34 = vmul.f32 %v12505_v49, %v20401_v8  ;;  %v9871_v42 = vunpack.c.l.b16 %v8888_v10  ;;  %v8857_v36 = vpack.c.bf16 %v8793_v55, %v8793_v55  ;;  %v20412_v8 = vld [vmem:[#allocation110_spill] sm:$0xff] }
 0x7dc   :  { %v19262_v16 = vpop.xlane.xlu2 %8697  ;;  %v19266_v59 = vpop.xlane.xlu0 %8695  ;;  %v9592_v2 = vpack.c.b16 %v9581_v17, %v9580_v13  ;;  %v9447_v50 = vpack.c.b16 %v9436_v61, %v9435_v12  ;;  %v8858_v44 = vpack.c.bf16 %v8794_v9, %v8794_v9  ;;  %12516 = vrcp.f32 %v19248_v47  ;;  %v20405_v47 = vld [vmem:[#allocation96_spill] sm:$0xff]  ;;  %v20411_v9 = vld [vmem:[#allocation109_spill] sm:$0xff] }
 0x7dd   :  { %9960 = vmatmul.bf16.gmra.mxu2 %v9880_v39  ;;  %v9726_v39 = vunpack.c.l.b16 %v8872_v20  ;;  %v9870_v5 = vunpack.c.l.b16 %v8887_v0  ;;  %v8874_v62 = vpack.c.bf16 %v8810_v34, %v8810_v34  ;;  %12518 = vrcp.f32 %v19242_v58 }
 0x7de   :  { %v9583_v23 = vunpack.c.l.b16 %v8858_v44  ;;  %v9582_v20 = vunpack.c.l.b16 %v8857_v36 }
 0x7df   :  { %v9737_v30 = vpack.c.b16 %v9726_v39, %v9725_v53  ;;  %v9882_v33 = vpack.c.b16 %v9871_v42, %v9870_v5  ;;  %v9728_v40 = vunpack.c.l.b16 %v8874_v62  ;;  %v20407_v53 = vld [vmem:[#allocation126_spill] sm:$0xff] }
 0x7e0   :  { %v8666_v37 = vpop.xlane.xlu1 %8665  ;;  %v9593_v13 = vpack.c.b16 %v9583_v23, %v9582_v20 }
 0x7e1   :  { %12520 = vrcp.f32 %v8666_v37 }
 0x7e2   :  { %12522 = vrcp.f32 %v19230_v18 }
 0x7e3   :  { %12524 = vrcp.f32 %v19246_v7 }
 0x7e4   :  { %9675 = vmatmul.bf16.gmra.mxu0 %v9591_v11  ;;  %v12507_v11 = vpop.eup %12506  ;;  %v19279_v43 = vpop.xlane.xlu0 %8603  ;;  %12526 = vrcp.f32 %v19258_v6  ;;  %v20408_v6 = vld [vmem:[#allocation54_spill] sm:$0xff] }
 0x7e5   :  { %9820 = vmatmul.bf16.gmra.mxu1 %v9736_v22  ;;  %v12509_v3 = vpop.eup %12508  ;;  %v19274_v22 = vpop.xlane.xlu2 %8635  ;;  %v8809_v56 = vmul.f32 %v12507_v11, %v20402_v27  ;;  %12528 = vrcp.f32 %v19262_v16 }
 0x7e6   :  { %v8778_v15 = vmul.f32 %v12509_v3, %v20403_v1  ;;  %12530 = vrcp.f32 %v19266_v59 }
 0x7e7   :  { %v8873_v38 = vpack.c.bf16 %v8809_v56, %v8809_v56  ;;  %12532 = vrcp.f32 %v19274_v22  ;;  %v20413_v22 = vld [vmem:[#allocation116_spill] sm:$0xff] }
 0x7e8   :  { %9530 = vmatmul.bf16.gmra.mxu3 %v9446_v28  ;;  %v12511_v28 = vpop.eup %12510  ;;  %v8842_v26 = vpack.c.bf16 %v8778_v15, %v8778_v15  ;;  %v19287_v24 = vpop.xlane.xlu1 %8699 }
 0x7e9   :  { %v8777_v60 = vmul.f32 %v12511_v28, %v20404_v46  ;;  %v12513_v45 = vpop.eup %12512  ;;  %v9727_v58 = vunpack.c.l.b16 %v8873_v38  ;;  %v20414_v38 = vld [vmem:[#allocation113_spill] sm:$0xff] }
 0x7ea   :  { %v12515_v31 = vpop.eup %12514  ;;  %v9438_v17 = vunpack.c.l.b16 %v8842_v26 }
 0x7eb   :  { %v8841_v21 = vpack.c.bf16 %v8777_v60, %v8777_v60  ;;  %v12517_v52 = vpop.eup %12516  ;;  %v8826_v54 = vmul.f32 %v12515_v31, %v20406_v41  ;;  %v9738_v25 = vpack.c.b16 %v9728_v40, %v9727_v58  ;;  %v20416_v58 = vld [vmem:[#allocation79_spill] sm:$0xff] }
 0x7ec   :  { %v12519_v39 = vpop.eup %12518  ;;  %v19293_v18 = vpop.xlane.xlu0 %8701  ;;  %v8796_v61 = vmul.f32 %v12517_v52, %v20407_v53 }
 0x7ed   :  { %9965 = vmatmul.bf16.gmra.mxu2 %v9881_v35  ;;  %v8825_v35 = vmul.f32 %v12513_v45, %v20405_v47  ;;  %v8606_v51 = vpop.xlane.xlu2 %8605  ;;  %v9437_v4 = vunpack.c.l.b16 %v8841_v21  ;;  %v12521_v57 = vpop.eup %12520  ;;  %v8890_v48 = vpack.c.bf16 %v8826_v54, %v8826_v54  ;;  %v8795_v19 = vmul.f32 %v12519_v39, %v20408_v6 }
 0x7ee   :  { %v12523_v7 = vpop.eup %12522  ;;  %v8860_v37 = vpack.c.bf16 %v8796_v61, %v8796_v61 }
 0x7ef   :  { %v8889_v29 = vpack.c.bf16 %v8825_v35, %v8825_v35  ;;  %v12525_v14 = vpop.eup %12524  ;;  %v9873_v0 = vunpack.c.l.b16 %v8890_v48  ;;  %v8859_v16 = vpack.c.bf16 %v8795_v19, %v8795_v19  ;;  %v20420_v48 = vld [vmem:[#allocation114_spill] sm:$0xff] }
 0x7f0   :  { %v12527_v49 = vpop.eup %12526  ;;  %v8638_v11 = vpop.xlane.xlu1 %8637  ;;  %v8779_v3 = vmul.f32 %v12525_v14, %v20411_v9  ;;  %v9585_v27 = vunpack.c.l.b16 %v8860_v37 }
 0x7f1   :  { %v9872_v10 = vunpack.c.l.b16 %v8889_v29  ;;  %v8780_v34 = vmul.f32 %v12527_v49, %v20412_v8  ;;  %12534 = vrcp.f32 %v8638_v11  ;;  %v12529_v42 = vpop.eup %12528  ;;  %v9584_v15 = vunpack.c.l.b16 %v8859_v16  ;;  %v20418_v29 = vld [vmem:[#allocation59_spill] sm:$0xff] }
 0x7f2   :  { %v8843_v56 = vpack.c.bf16 %v8779_v3, %v8779_v3  ;;  %v12531_v1 = vpop.eup %12530  ;;  %v8828_v62 = vmul.f32 %v12529_v42, %v20413_v22 }
 0x7f3   :  { %v9883_v28 = vpack.c.b16 %v9873_v0, %v9872_v10  ;;  %v8844_v36 = vpack.c.bf16 %v8780_v34, %v8780_v34  ;;  %v12533_v46 = vpop.eup %12532  ;;  %v9594_v60 = vpack.c.b16 %v9585_v27, %v9584_v15  ;;  %v8827_v26 = vmul.f32 %v12531_v1, %v20414_v38 }
 0x7f4   :  { %9680 = vmatmul.bf16.gmra.mxu0 %v9592_v2  ;;  %v9448_v2 = vpack.c.b16 %v9438_v17, %v9437_v4  ;;  %v8668_v44 = vpop.xlane.xlu0 %8667  ;;  %v9439_v45 = vunpack.c.l.b16 %v8843_v56  ;;  %v8892_v21 = vpack.c.bf16 %v8828_v62, %v8828_v62 }
 0x7f5   :  { %9825 = vmatmul.bf16.gmra.mxu1 %v9737_v30  ;;  %v20409_v30 = vld [vmem:[#allocation108_spill] sm:$0xff]  ;;  %v8670_v63 = vpop.xlane.xlu2 %8669  ;;  %v9440_v20 = vunpack.c.l.b16 %v8844_v36  ;;  %v8891_v41 = vpack.c.bf16 %v8827_v26, %v8827_v26  ;;  %v20423_v26 = vld [vmem:[#allocation35_spill] sm:$0xff] }
 0x7f6   :  { %v8812_v12 = vmul.f32 %v12521_v57, %v20409_v30  ;;  %12536 = vrcp.f32 %v8670_v63  ;;  %v20422_v63 = vld [vmem:[#allocation56_spill] sm:$0xff] }
 0x7f7   :  { %12538 = vrcp.f32 %v8606_v51  ;;  %v12535_v23 = vpop.eup %12534  ;;  %v9449_v35 = vpack.c.b16 %v9440_v20, %v9439_v45  ;;  %v20415_v51 = vld [vmem:[#allocation57_spill] sm:$0xff]  ;;  %v9874_v61 = vunpack.c.l.b16 %v8891_v41 }
 0x7f8   :  { %9535 = vmatmul.bf16.gmra.mxu3 %v9447_v50  ;;  %v20410_v50 = vld [vmem:[#allocation125_spill] sm:$0xff]  ;;  %v8876_v55 = vpack.c.bf16 %v8812_v12, %v8812_v12  ;;  %12540 = vrcp.f32 %v8668_v44  ;;  %v8798_v17 = vmul.f32 %v12535_v23, %v20416_v58 }
 0x7f9   :  { %v8811_v32 = vmul.f32 %v12523_v7, %v20410_v50  ;;  %12542 = vrcp.f32 %v19279_v43  ;;  %v20417_v43 = vld [vmem:[#allocation64_spill] sm:$0xff]  ;;  %v20421_v50 = vld [vmem:[#allocation78_spill] sm:$0xff] }
 0x7fa   :  { %v9730_v5 = vunpack.c.l.b16 %v8876_v55  ;;  %12544 = vrcp.f32 %v19293_v18  ;;  %v8862_v57 = vpack.c.bf16 %v8798_v17, %v8798_v17  ;;  %v20424_v17 = vld [vmem:[#allocation38_spill] sm:$0xff] }
 0x7fb   :  { %v8875_v59 = vpack.c.bf16 %v8811_v32, %v8811_v32  ;;  %12546 = vrcp.f32 %v19287_v24 }
 0x7fc   :  { %v12537_v40 = vpop.eup %12536  ;;  %v9587_v12 = vunpack.c.l.b16 %v8862_v57 }
 0x7fd   :  { %9970 = vmatmul.bf16.gmra.mxu2 %v9882_v33  ;;  %v9729_v33 = vunpack.c.l.b16 %v8875_v59  ;;  %v12539_v47 = vpop.eup %12538  ;;  %v8814_v54 = vmul.f32 %v12537_v40, %v20417_v43 }
 0x7fe   :  { %v12541_v52 = vpop.eup %12540 }
 0x7ff   :  { %v9739_v31 = vpack.c.b16 %v9730_v5, %v9729_v33  ;;  %v12543_v39 = vpop.eup %12542  ;;  %v8813_v7 = vmul.f32 %v12541_v52, %v20418_v29  ;;  %v8878_v14 = vpack.c.bf16 %v8814_v54, %v8814_v54 }
 0x800   :  { %v8781_v6 = vmul.f32 %v12543_v39, %v20420_v48  ;;  %v12545_v30 = vpop.eup %12544 }
 0x801   :  { %v8877_v49 = vpack.c.bf16 %v8813_v7, %v8813_v7  ;;  %v12547_v11 = vpop.eup %12546  ;;  %v9732_v24 = vunpack.c.l.b16 %v8878_v14  ;;  %v8830_v32 = vmul.f32 %v12545_v30, %v20421_v50  ;;  %v20425_v7 = vld [vmem:[#allocation34_spill] sm:$0xff] }
 0x802   :  { %v8845_v37 = vpack.c.bf16 %v8781_v6, %v8781_v6  ;;  %v8829_v16 = vmul.f32 %v12547_v11, %v20422_v63 }
 0x803   :  { %v9731_v3 = vunpack.c.l.b16 %v8877_v49  ;;  %v8894_v34 = vpack.c.bf16 %v8830_v32, %v8830_v32 }
 0x804   :  { %9685 = vmatmul.bf16.gmra.mxu0 %v9593_v13  ;;  %v8797_v13 = vmul.f32 %v12533_v46, %v20415_v51  ;;  %v9441_v8 = vunpack.c.l.b16 %v8845_v37  ;;  %v8893_v42 = vpack.c.bf16 %v8829_v16, %v8829_v16 }
 0x805   :  { %9830 = vmatmul.bf16.gmra.mxu1 %v9738_v25  ;;  %v9875_v25 = vunpack.c.l.b16 %v8892_v21  ;;  %v9740_v55 = vpack.c.b16 %v9732_v24, %v9731_v3  ;;  %v9877_v44 = vunpack.c.l.b16 %v8894_v34 }
 0x806   :  { %v8861_v4 = vpack.c.bf16 %v8797_v13, %v8797_v13  ;;  %v9876_v27 = vunpack.c.l.b16 %v8893_v42 }
 0x807   :  { %v9884_v19 = vpack.c.b16 %v9875_v25, %v9874_v61 }
 0x808   :  { %9540 = vmatmul.bf16.gmra.mxu3 %v9448_v2  ;;  %v20419_v2 = vld [vmem:[#allocation82_spill] sm:$0xff]  ;;  %v9586_v18 = vunpack.c.l.b16 %v8861_v4  ;;  %v9885_v59 = vpack.c.b16 %v9877_v44, %v9876_v27 }
 0x809   :  { %v8782_v53 = vmul.f32 %v12539_v47, %v20419_v2 }
 0x80a   :  { %v9595_v9 = vpack.c.b16 %v9587_v12, %v9586_v18  ;;  %v20426_v12 = vld [vmem:[#allocation37_spill] sm:$0xff] }
 0x80b   :  { %v8846_v10 = vpack.c.bf16 %v8782_v53, %v8782_v53 }
 0x80d   :  { %9975 = vmatmul.bf16.gmra.mxu2 %v9883_v28  ;;  %v9442_v0 = vunpack.c.l.b16 %v8846_v10 }
 0x80f   :  { %v9450_v28 = vpack.c.b16 %v9442_v0, %v9441_v8  ;;  %v20427_v0 = vld [vmem:[#allocation36_spill] sm:$0xff] }
 0x814   :  { %9690 = vmatmul.bf16.gmra.mxu0 %v9594_v60 }
 0x815   :  { %9835 = vmatmul.bf16.gmra.mxu1 %v9739_v31 }
 0x818   :  { %9545 = vmatmul.bf16.gmra.mxu3 %v9449_v35 }
 0x81d   :  { %9980 = vmatmul.bf16.gmra.mxu2 %v9884_v19 }
 0x824   :  { %9695 = vmatmul.bf16.gmra.mxu0 %v9595_v9 }
 0x825   :  { %9840 = vmatmul.bf16.gmra.mxu1 %v9740_v55 }
 0x828   :  { %9550 = vmatmul.bf16.gmra.mxu3 %v9450_v28 }
 0x82d   :  { %9985 = vmatmul.bf16.gmra.mxu2 %v9885_v59  ;;  %v20428_v59 = vld [vmem:[#allocation39_spill] sm:$0xff] }
 0x831   :  { %v9661_v56 = vpop.f32.mrf.mxu0 }
 0x832   :  { %v9806_v1 = vpop.f32.mrf.mxu1 }
 0x839   :  { %v9663_v15 = vpop.f32.mrf.mxu0 }
 0x83a   :  { %v9808_v5 = vpop.f32.mrf.mxu1 }
 0x83b   :  { %v9516_v36 = vpop.f32.mrf.mxu3 }
 0x83c   :  { %v9991_v22 = vadd.f32 %v9661_v56, %v9516_v36 }
 0x83e   :  { %v9992_v62 = vadd.f32 %v9991_v22, %v9806_v1 }
 0x840   :  { %v9951_v60 = vpop.f32.mrf.mxu2 }
 0x841   :  { %v9666_v46 = vpop.f32.mrf.mxu0  ;;  %v9993_v33 = vadd.f32 %v9992_v62, %v9951_v60 }
 0x842   :  { %v9811_v45 = vpop.f32.mrf.mxu1 }
 0x843   :  { %v9518_v23 = vpop.f32.mrf.mxu3  ;;  %v19318_v31 = vadd.f32 %v9993_v33, %v20423_v26  ;;  %v20429_v33 = vld [vmem:[#allocation41_spill] sm:$0xff] }
 0x844   :  { %v9994_v38 = vadd.f32 %v9663_v15, %v9518_v23 }
 0x845   :  { %v10055_v20 = vmul.f32 %v19318_v31, %v19318_v31 }
 0x846   :  { %v9995_v40 = vadd.f32 %v9994_v38, %v9808_v5 }
 0x847   :  { %10071 = vadd.xlane.f32.xlu1 %v10055_v20 }
 0x848   :  { %v9953_v47 = vpop.f32.mrf.mxu2 }
 0x849   :  { %v9668_v21 = vpop.f32.mrf.mxu0  ;;  %v9996_v35 = vadd.f32 %v9995_v40, %v9953_v47 }
 0x84a   :  { %v9813_v51 = vpop.f32.mrf.mxu1 }
 0x84b   :  { %v9521_v13 = vpop.f32.mrf.mxu3  ;;  %v19323_v52 = vadd.f32 %v9996_v35, %v20424_v17 }
 0x84c   :  { %v9997_v58 = vadd.f32 %v9666_v46, %v9521_v13 }
 0x84d   :  { %v10056_v41 = vmul.f32 %v19323_v52, %v19323_v52 }
 0x84e   :  { %v9998_v43 = vadd.f32 %v9997_v58, %v9811_v45 }
 0x84f   :  { %10073 = vadd.xlane.f32.xlu0 %v10056_v41 }
 0x850   :  { %v9956_v39 = vpop.f32.mrf.mxu2 }
 0x851   :  { %v9671_v54 = vpop.f32.mrf.mxu0  ;;  %v9999_v25 = vadd.f32 %v9998_v43, %v9956_v39 }
 0x852   :  { %v9816_v4 = vpop.f32.mrf.mxu1 }
 0x853   :  { %v9523_v57 = vpop.f32.mrf.mxu3  ;;  %v19328_v2 = vadd.f32 %v9999_v25, %v20425_v7 }
 0x854   :  { %v10000_v29 = vadd.f32 %v9668_v21, %v9523_v57  ;;  %v20431_v57 = vld [vmem:[#allocation42_spill] sm:$0xff] }
 0x855   :  { %v10057_v53 = vmul.f32 %v19328_v2, %v19328_v2 }
 0x856   :  { %v10001_v61 = vadd.f32 %v10000_v29, %v9813_v51  ;;  %v20430_v51 = vld [vmem:[#allocation40_spill] sm:$0xff] }
 0x857   :  { %10075 = vadd.xlane.f32.xlu2 %v10057_v53 }
 0x858   :  { %v9958_v48 = vpop.f32.mrf.mxu2 }
 0x859   :  { %v9673_v14 = vpop.f32.mrf.mxu0  ;;  %v10002_v6 = vadd.f32 %v10001_v61, %v9958_v48 }
 0x85a   :  { %v9818_v19 = vpop.f32.mrf.mxu1 }
 0x85b   :  { %v9526_v30 = vpop.f32.mrf.mxu3  ;;  %v19333_v49 = vadd.f32 %v10002_v6, %v20426_v12 }
 0x85c   :  { %v10003_v18 = vadd.f32 %v9671_v54, %v9526_v30  ;;  %v20432_v30 = vld [vmem:[#allocation43_spill] sm:$0xff] }
 0x85d   :  { %v10058_v10 = vmul.f32 %v19333_v49, %v19333_v49 }
 0x85e   :  { %v10004_v11 = vadd.f32 %v10003_v18, %v9816_v4 }
 0x85f   :  { %10077 = vadd.xlane.f32.xlu1 %v10058_v10 }
 0x860   :  { %v9961_v37 = vpop.f32.mrf.mxu2 }
 0x861   :  { %v9676_v24 = vpop.f32.mrf.mxu0  ;;  %v10005_v50 = vadd.f32 %v10004_v11, %v9961_v37 }
 0x862   :  { %v9821_v32 = vpop.f32.mrf.mxu1 }
 0x863   :  { %v9528_v9 = vpop.f32.mrf.mxu3  ;;  %v19338_v63 = vadd.f32 %v10005_v50, %v20427_v0 }
 0x864   :  { %v10006_v3 = vadd.f32 %v9673_v14, %v9528_v9  ;;  %v20433_v9 = vld [vmem:[#allocation44_spill] sm:$0xff] }
 0x865   :  { %v10059_v16 = vmul.f32 %v19338_v63, %v19338_v63 }
 0x866   :  { %v10007_v55 = vadd.f32 %v10006_v3, %v9818_v19 }
 0x867   :  { %10079 = vadd.xlane.f32.xlu0 %v10059_v16 }
 0x868   :  { %v9963_v34 = vpop.f32.mrf.mxu2 }
 0x869   :  { %v9678_v8 = vpop.f32.mrf.mxu0  ;;  %v10008_v28 = vadd.f32 %v10007_v55, %v9963_v34 }
 0x86a   :  { %v9823_v42 = vpop.f32.mrf.mxu1 }
 0x86b   :  { %v9531_v44 = vpop.f32.mrf.mxu3  ;;  %v19343_v56 = vadd.f32 %v10008_v28, %v20428_v59 }
 0x86c   :  { %v10009_v27 = vadd.f32 %v9676_v24, %v9531_v44 }
 0x86d   :  { %v10060_v1 = vmul.f32 %v19343_v56, %v19343_v56 }
 0x86e   :  { %v10010_v15 = vadd.f32 %v10009_v27, %v9821_v32  ;;  %v20434_v27 = vld [vmem:[#allocation45_spill] sm:$0xff] }
 0x86f   :  { %10081 = vadd.xlane.f32.xlu2 %v10060_v1 }
 0x870   :  { %v9966_v36 = vpop.f32.mrf.mxu2 }
 0x871   :  { %v9681_v5 = vpop.f32.mrf.mxu0  ;;  %v10011_v22 = vadd.f32 %v10010_v15, %v9966_v36 }
 0x872   :  { %v9826_v62 = vpop.f32.mrf.mxu1 }
 0x873   :  { %v9533_v46 = vpop.f32.mrf.mxu3  ;;  %v19348_v45 = vadd.f32 %v10011_v22, %v20429_v33  ;;  %v20435_v33 = vld [vmem:[#allocation47_spill] sm:$0xff] }
 0x874   :  { %v10012_v60 = vadd.f32 %v9678_v8, %v9533_v46 }
 0x875   :  { %v10061_v23 = vmul.f32 %v19348_v45, %v19348_v45 }
 0x876   :  { %v10013_v38 = vadd.f32 %v10012_v60, %v9823_v42 }
 0x877   :  { %10083 = vadd.xlane.f32.xlu1 %v10061_v23 }
 0x878   :  { %v9968_v20 = vpop.f32.mrf.mxu2 }
 0x879   :  { %v9683_v26 = vpop.f32.mrf.mxu0  ;;  %v10014_v40 = vadd.f32 %v10013_v38, %v9968_v20 }
 0x87a   :  { %v9828_v21 = vpop.f32.mrf.mxu1 }
 0x87b   :  { %v9536_v47 = vpop.f32.mrf.mxu3  ;;  %v19353_v13 = vadd.f32 %v10014_v40, %v20430_v51 }
 0x87c   :  { %v10015_v35 = vadd.f32 %v9681_v5, %v9536_v47 }
 0x87d   :  { %v10062_v58 = vmul.f32 %v19353_v13, %v19353_v13 }
 0x87e   :  { %v10016_v17 = vadd.f32 %v10015_v35, %v9826_v62 }
 0x87f   :  { %10085 = vadd.xlane.f32.xlu0 %v10062_v58  ;;  %v20436_v58 = vld [vmem:[#allocation46_spill] sm:$0xff] }
 0x880   :  { %v9971_v43 = vpop.f32.mrf.mxu2 }
 0x881   :  { %v9686_v41 = vpop.f32.mrf.mxu0  ;;  %v10017_v54 = vadd.f32 %v10016_v17, %v9971_v43 }
 0x882   :  { %v9831_v39 = vpop.f32.mrf.mxu1 }
 0x883   :  { %v9538_v25 = vpop.f32.mrf.mxu3  ;;  %v19358_v29 = vadd.f32 %v10017_v54, %v20431_v57  ;;  %v11765_v57 = vld [vmem:[#allocation19 + $0xe0] sm:$0xf] }
 0x884   :  { %v10018_v4 = vadd.f32 %v9683_v26, %v9538_v25 }
 0x885   :  { %v10063_v7 = vmul.f32 %v19358_v29, %v19358_v29 }
 0x886   :  { %v10019_v53 = vadd.f32 %v10018_v4, %v9828_v21 }
 0x887   :  { %10087 = vadd.xlane.f32.xlu2 %v10063_v7  ;;  %v11985_v7 = vld [vmem:[#allocation19 + $0xec] sm:$0xf0] }
 0x888   :  { %v9973_v61 = vpop.f32.mrf.mxu2 }
 0x889   :  { %v10020_v14 = vadd.f32 %v10019_v53, %v9973_v61  ;;  %v9688_v48 = vpop.f32.mrf.mxu0  ;;  %v11983_v53 = vld [vmem:[#allocation19 + $0xe4] sm:$0xf] }
 0x88a   :  { %v9833_v12 = vpop.f32.mrf.mxu1 }
 0x88b   :  { %v9541_v6 = vpop.f32.mrf.mxu3  ;;  %v19363_v18 = vadd.f32 %v10020_v14, %v20432_v30  ;;  %v11766_v14 = vor.u32 %v11985_v7, %v11765_v57  ;;  %v11717_v7 = vld [vmem:[#allocation19 + $0x80] sm:$0xf] }
 0x88c   :  { %v10021_v19 = vadd.f32 %v9686_v41, %v9541_v6  ;;  %v11773_v6 = vld [vmem:[#allocation19 + $0xe8] sm:$0xf] }
 0x88d   :  { %v10064_v10 = vmul.f32 %v19363_v18, %v19363_v18  ;;  %10511 = vmatpush.bf16.msra.mxu3 %v11766_v14 }
 0x88e   :  { %v10022_v11 = vadd.f32 %v10021_v19, %v9831_v39  ;;  %v11986_v19 = vld [vmem:[#allocation19 + $0xf4] sm:$0xf0] }
 0x88f   :  { %10089 = vadd.xlane.f32.xlu1 %v10064_v10 }
 0x890   :  { %v9976_v24 = vpop.f32.mrf.mxu2 }
 0x891   :  { %v10023_v37 = vadd.f32 %v10022_v11, %v9976_v24  ;;  %v9691_v0 = vpop.f32.mrf.mxu0  ;;  %v11774_v24 = vor.u32 %v11986_v19, %v11773_v6  ;;  %v11725_v6 = vld [vmem:[#allocation19 + $0x88] sm:$0xf]  ;;  %v11974_v19 = vld [vmem:[#allocation19 + $0x94] sm:$0xf0] }
 0x892   :  { %v9836_v16 = vpop.f32.mrf.mxu1 }
 0x893   :  { %v9543_v50 = vpop.f32.mrf.mxu3  ;;  %v19368_v3 = vadd.f32 %v10023_v37, %v20433_v9  ;;  %v11984_v37 = vld [vmem:[#allocation19 + $0xec] sm:$0xf]  ;;  %10609 = vmatpush.bf16.msrb.mxu1 %v11774_v24  ;;  %v11727_v24 = vld [vmem:[#allocation19 + $0x98] sm:$0xf0] }
 0x894   :  { %v10024_v32 = vadd.f32 %v9688_v48, %v9543_v50  ;;  %v11767_v48 = vld [vmem:[#allocation19 + $0xf0] sm:$0xf0]  ;;  %v11775_v50 = vld [vmem:[#allocation19 + $0xf8] sm:$0xf0] }
 0x895   :  { %v10065_v55 = vmul.f32 %v19368_v3, %v19368_v3  ;;  %v11770_v11 = vor.u32 %v11983_v53, %v11767_v48  ;;  %v11973_v53 = vld [vmem:[#allocation19 + $0x8c] sm:$0xf0]  ;;  %v11719_v48 = vld [vmem:[#allocation19 + $0x90] sm:$0xf0] }
 0x896   :  { %v10025_v8 = vadd.f32 %v10024_v32, %v9833_v12  ;;  %v20437_v12 = vld [vmem:[#allocation48_spill] sm:$0xff]  ;;  %v11749_v32 = vld [vmem:[#allocation19 + $0xc0] sm:$0xf]  ;;  %v11718_v14 = vor.u32 %v11973_v53, %v11717_v7  ;;  %v11677_v7 = vld [vmem:[#allocation19 + $0x28] sm:$0xf] }
 0x897   :  { %10091 = vadd.xlane.f32.xlu0 %v10065_v55  ;;  %v11979_v55 = vld [vmem:[#allocation19 + $0xc4] sm:$0xf]  ;;  %10560 = vmatpush.bf16.msra.mxu0 %v11770_v11  ;;  %v11972_v11 = vld [vmem:[#allocation19 + $0x8c] sm:$0xf]  ;;  %v11962_v53 = vld [vmem:[#allocation19 + $0x34] sm:$0xf0] }
 0x898   :  { %v9978_v34 = vpop.f32.mrf.mxu2 }
 0x899   :  { %v10026_v28 = vadd.f32 %v10025_v8, %v9978_v34  ;;  %v9693_v1 = vpop.f32.mrf.mxu0  ;;  %v11751_v8 = vld [vmem:[#allocation19 + $0xd0] sm:$0xf0] }
 0x89a   :  { %v9838_v36 = vpop.f32.mrf.mxu1 }
 0x89b   :  { %v9546_v42 = vpop.f32.mrf.mxu3  ;;  %v19373_v59 = vadd.f32 %v10026_v28, %v20434_v27  ;;  %v11982_v27 = vld [vmem:[#allocation19 + $0xd4] sm:$0xf0] }
 0x89c   :  { %v10027_v44 = vadd.f32 %v9691_v0, %v9546_v42  ;;  %v11778_v0 = vor.u32 %v11984_v37, %v11775_v50  ;;  %v11754_v42 = vor.u32 %v11979_v55, %v11751_v8  ;;  %v11701_v37 = vld [vmem:[#allocation19 + $0x60] sm:$0xf]  ;;  %v11730_v50 = vor.u32 %v11972_v11, %v11727_v24  ;;  %v11709_v8 = vld [vmem:[#allocation19 + $0x68] sm:$0xf]  ;;  %v11957_v24 = vld [vmem:[#allocation19 + $0xc] sm:$0xf0] }
 0x89d   :  { %v10066_v15 = vmul.f32 %v19373_v59, %v19373_v59  ;;  %v11653_v11 = vld [vmem:[#allocation19] sm:$0xf] }
 0x89e   :  { %v10028_v5 = vadd.f32 %v10027_v44, %v9836_v16  ;;  %v11981_v16 = vld [vmem:[#allocation19 + $0xcc] sm:$0xf0]  ;;  %v11757_v44 = vld [vmem:[#allocation19 + $0xc8] sm:$0xf]  ;;  %10658 = vmatpush.bf16.msrb.mxu2 %v11778_v0  ;;  %10561 = vmatpush.bf16.msra.mxu0 %v11754_v42  ;;  %v11703_v0 = vld [vmem:[#allocation19 + $0x70] sm:$0xf0] }
 0x89f   :  { %10093 = vadd.xlane.f32.xlu2 %v10066_v15  ;;  %v11750_v28 = vor.u32 %v11981_v16, %v11749_v32  ;;  %v11758_v15 = vor.u32 %v11982_v27, %v11757_v44  ;;  %v11969_v32 = vld [vmem:[#allocation19 + $0x6c] sm:$0xf0]  ;;  %v11711_v27 = vld [vmem:[#allocation19 + $0x78] sm:$0xf0] }
 0x8a0   :  { %v9981_v22 = vpop.f32.mrf.mxu2  ;;  %v11702_v55 = vor.u32 %v11969_v32, %v11701_v37  ;;  %v11678_v37 = vor.u32 %v11962_v53, %v11677_v7  ;;  %v11955_v32 = vld [vmem:[#allocation19 + $0x4] sm:$0xf] }
 0x8a1   :  { %v10029_v62 = vadd.f32 %v10028_v5, %v9981_v22  ;;  %v9696_v20 = vpop.f32.mrf.mxu0  ;;  %v11759_v5 = vld [vmem:[#allocation19 + $0xd8] sm:$0xf0]  ;;  %10512 = vmatpush.bf16.msra.mxu3 %v11750_v28  ;;  %10610 = vmatpush.bf16.msrb.mxu1 %v11758_v15  ;;  %v11968_v28 = vld [vmem:[#allocation19 + $0x6c] sm:$0xf]  ;;  %v11965_v15 = vld [vmem:[#allocation19 + $0x4c] sm:$0xf0] }
 0x8a2   :  { %v9841_v21 = vpop.f32.mrf.mxu1 }
 0x8a3   :  { %v9548_v46 = vpop.f32.mrf.mxu3  ;;  %v19378_v23 = vadd.f32 %v10029_v62, %v20435_v33 }
 0x8a4   :  { %v10030_v60 = vadd.f32 %v9693_v1, %v9548_v46  ;;  %v11980_v1 = vld [vmem:[#allocation19 + $0xcc] sm:$0xf] }
 0x8a5   :  { %v10067_v38 = vmul.f32 %v19378_v23, %v19378_v23 }
 0x8a6   :  { %v10031_v26 = vadd.f32 %v10030_v60, %v9838_v36  ;;  %v11762_v36 = vor.u32 %v11980_v1, %v11759_v5  ;;  %v20438_v60 = vld [vmem:[#allocation49_spill] sm:$0xff]  ;;  %v11685_v1 = vld [vmem:[#allocation19 + $0x40] sm:$0xf] }
 0x8a7   :  { %10095 = vadd.xlane.f32.xlu1 %v10067_v38  ;;  %v20439_v38 = vld [vmem:[#allocation50_spill] sm:$0xff] }
 0x8a8   :  { %v9983_v40 = vpop.f32.mrf.mxu2  ;;  %10659 = vmatpush.bf16.msrb.mxu2 %v11762_v36  ;;  %v11714_v36 = vor.u32 %v11968_v28, %v11711_v27  ;;  %v11663_v27 = vld [vmem:[#allocation19 + $0x18] sm:$0xf0] }
 0x8a9   :  { %v10032_v47 = vadd.f32 %v10031_v26, %v9983_v40  ;;  %v9698_v39 = vpop.f32.mrf.mxu0  ;;  %v11977_v40 = vld [vmem:[#allocation19 + $0xac] sm:$0xf0] }
 0x8aa   :  { %v9843_v30 = vpop.f32.mrf.mxu1 }
 0x8ab   :  { %v9551_v35 = vpop.f32.mrf.mxu3  ;;  %v19383_v17 = vadd.f32 %v10032_v47, %v20436_v58  ;;  %v11978_v58 = vld [vmem:[#allocation19 + $0xb4] sm:$0xf0] }
 0x8ac   :  { %v10033_v51 = vadd.f32 %v9696_v20, %v9551_v35  ;;  %v11733_v20 = vld [vmem:[#allocation19 + $0xa0] sm:$0xf]  ;;  %v11735_v35 = vld [vmem:[#allocation19 + $0xb0] sm:$0xf0] }
 0x8ad   :  { %v10068_v41 = vmul.f32 %v19383_v17, %v19383_v17  ;;  %v11734_v47 = vor.u32 %v11977_v40, %v11733_v20  ;;  %v11966_v20 = vld [vmem:[#allocation19 + $0x54] sm:$0xf0]  ;;  %v11964_v40 = vld [vmem:[#allocation19 + $0x4c] sm:$0xf] }
 0x8ae   :  { %v10034_v43 = vadd.f32 %v10033_v51, %v9841_v21  ;;  %v11975_v21 = vld [vmem:[#allocation19 + $0xa4] sm:$0xf]  ;;  %v11741_v51 = vld [vmem:[#allocation19 + $0xa8] sm:$0xf] }
 0x8af   :  { %10097 = vadd.xlane.f32.xlu0 %v10068_v41  ;;  %10513 = vmatpush.bf16.msra.mxu3 %v11734_v47  ;;  %v11686_v47 = vor.u32 %v11965_v15, %v11685_v1 }
 0x8b0   :  { %v9986_v54 = vpop.f32.mrf.mxu2 }
 0x8b1   :  { %v10035_v25 = vadd.f32 %v10034_v43, %v9986_v54  ;;  %v11738_v54 = vor.u32 %v11975_v21, %v11735_v35  ;;  %v11695_v35 = vld [vmem:[#allocation19 + $0x58] sm:$0xf0] }
 0x8b3   :  { %v9553_v4 = vpop.f32.mrf.mxu3  ;;  %v19388_v10 = vadd.f32 %v10035_v25, %v20437_v12  ;;  %v11976_v25 = vld [vmem:[#allocation19 + $0xac] sm:$0xf]  ;;  %10562 = vmatpush.bf16.msra.mxu0 %v11738_v54  ;;  %v11726_v12 = vor.u32 %v11974_v19, %v11725_v6  ;;  %10514 = vmatpush.bf16.msra.mxu3 %v11718_v14  ;;  %v11698_v54 = vor.u32 %v11964_v40, %v11695_v35  ;;  %v11679_v19 = vld [vmem:[#allocation19 + $0x38] sm:$0xf0] }
 0x8b4   :  { %v10036_v61 = vadd.f32 %v9698_v39, %v9553_v4  ;;  %v11742_v39 = vor.u32 %v11978_v58, %v11741_v51  ;;  %v11743_v4 = vld [vmem:[#allocation19 + $0xb8] sm:$0xf0]  ;;  %v11960_v6 = vld [vmem:[#allocation19 + $0x2c] sm:$0xf] }
 0x8b5   :  { %v10069_v34 = vmul.f32 %v19388_v10, %v19388_v10  ;;  %v11746_v57 = vor.u32 %v11976_v25, %v11743_v4  ;;  %v11961_v25 = vld [vmem:[#allocation19 + $0x2c] sm:$0xf0]  ;;  %v11959_v4 = vld [vmem:[#allocation19 + $0x24] sm:$0xf] }
 0x8b6   :  { %v10037_v9 = vadd.f32 %v10036_v61, %v9843_v30  ;;  %v11971_v61 = vld [vmem:[#allocation19 + $0x84] sm:$0xf]  ;;  %10611 = vmatpush.bf16.msrb.mxu1 %v11742_v39  ;;  %v11669_v39 = vld [vmem:[#allocation19 + $0x20] sm:$0xf] }
 0x8b7   :  { %10099 = vadd.xlane.f32.xlu2 %v10069_v34  ;;  %10660 = vmatpush.bf16.msrb.mxu2 %v11746_v57  ;;  %v11722_v30 = vor.u32 %v11971_v61, %v11719_v48  ;;  %v11970_v34 = vld [vmem:[#allocation19 + $0x74] sm:$0xf0]  ;;  %v11671_v57 = vld [vmem:[#allocation19 + $0x30] sm:$0xf0]  ;;  %v11670_v48 = vor.u32 %v11961_v25, %v11669_v39 }
 0x8b8   :  { %v9988_v22 = vpop.f32.mrf.mxu2  ;;  %v11710_v5 = vor.u32 %v11970_v34, %v11709_v8  ;;  %10515 = vmatpush.bf16.msra.mxu3 %v11702_v55  ;;  %v11958_v8 = vld [vmem:[#allocation19 + $0x14] sm:$0xf0]  ;;  %v11956_v34 = vld [vmem:[#allocation19 + $0xc] sm:$0xf] }
 0x8b9   :  { %v10038_v62 = vadd.f32 %v10037_v9, %v9988_v22  ;;  %v11967_v9 = vld [vmem:[#allocation19 + $0x64] sm:$0xf]  ;;  %10563 = vmatpush.bf16.msra.mxu0 %v11722_v30 }
 0x8ba   :  { %v10072_v46 = vpop.xlane.xlu1 %10071  ;;  %v11706_v44 = vor.u32 %v11967_v9, %v11703_v0  ;;  %10612 = vmatpush.bf16.msrb.mxu1 %v11726_v12  ;;  %v11963_v22 = vld [vmem:[#allocation19 + $0x44] sm:$0xf]  ;;  %v11674_v12 = vor.u32 %v11959_v4, %v11671_v57  ;;  %v11655_v9 = vld [vmem:[#allocation19 + $0x10] sm:$0xf0]  ;;  %v11661_v0 = vld [vmem:[#allocation19 + $0x8] sm:$0xf] }
 0x8bb   :  { %v19393_v33 = vadd.f32 %v10038_v62, %v20438_v60  ;;  %v10103_v26 = vmul.f32 %v10072_v46, %v20439_v38  ;;  %10661 = vmatpush.bf16.msrb.mxu2 %v11730_v50  ;;  %v11687_v62 = vld [vmem:[#allocation19 + $0x50] sm:$0xf0]  ;;  %v11693_v46 = vld [vmem:[#allocation19 + $0x48] sm:$0xf]  ;;  %v11682_v50 = vor.u32 %v11960_v6, %v11679_v19  ;;  %v11658_v1 = vor.u32 %v11955_v32, %v11655_v9 }
 0x8bc   :  { %v11690_v51 = vor.u32 %v11963_v22, %v11687_v62  ;;  %10516 = vmatpush.bf16.msra.mxu3 %v11686_v47 }
 0x8bd   :  { %v19396_v41 = vadd.f32 1.1920929e-07, %v10103_v26  ;;  %v10070_v43 = vmul.f32 %v19393_v33, %v19393_v33  ;;  %10564 = vmatpush.bf16.msra.mxu0 %v11706_v44  ;;  %v11654_v44 = vor.u32 %v11957_v24, %v11653_v11 }
 0x8be   :  { %10613 = vmatpush.bf16.msrb.mxu1 %v11710_v5  ;;  %v11662_v5 = vor.u32 %v11958_v8, %v11661_v0 }
 0x8bf   :  { %12548 = vrsqrt.f32 %v19396_v41  ;;  %10101 = vadd.xlane.f32.xlu1 %v10070_v43  ;;  %10662 = vmatpush.bf16.msrb.mxu2 %v11714_v36  ;;  %v11694_v43 = vor.u32 %v11966_v20, %v11693_v46  ;;  %v11666_v36 = vor.u32 %v11956_v34, %v11663_v27  ;;  %vm10141_vm4 = vweird.f32 %v19396_v41 }
 0x8c0   :  { %10517 = vmatpush.bf16.msra.mxu3 %v11670_v48 }
 0x8c1   :  { %10565 = vmatpush.bf16.msra.mxu0 %v11690_v51 }
 0x8c2   :  { %v10074_v16 = vpop.xlane.xlu0 %10073  ;;  %10614 = vmatpush.bf16.msrb.mxu1 %v11694_v43 }
 0x8c3   :  { %v10104_v42 = vmul.f32 %v10074_v16, %v20439_v38  ;;  %10663 = vmatpush.bf16.msrb.mxu2 %v11698_v54 }
 0x8c4   :  { %10518 = vmatpush.bf16.msra.mxu3 %v11654_v44 }
 0x8c5   :  { %v19402_v60 = vpop.eup %12548  ;;  %v19404_v26 = vadd.f32 1.1920929e-07, %v10104_v42  ;;  %10566 = vmatpush.bf16.msra.mxu0 %v11674_v12 }
 0x8c6   :  { %v10136_v21 = vmul.f32 %v19402_v60, %v19396_v41  ;;  %10615 = vmatpush.bf16.msrb.mxu1 %v11678_v37  ;;  %vm10142_vm2 = vweird.f32 %v19402_v60 }
 0x8c7   :  { %12550 = vrsqrt.f32 %v19404_v26  ;;  %10664 = vmatpush.bf16.msrb.mxu2 %v11682_v50  ;;  %vm10143_vm6 = vmor %vm10141_vm4, %vm10142_vm2  ;;  %vm10151_vm7 = vweird.f32 %v19404_v26 }
 0x8c8   :  { %v10137_v58 = vmul.f32 %v19402_v60, %v10136_v21 }
 0x8c9   :  { %10567 = vmatpush.bf16.msra.mxu0 %v11658_v1 }
 0x8ca   :  { %v10138_v61 = vmul.f32 0.5, %v10137_v58  ;;  %v10076_v14 = vpop.xlane.xlu2 %10075  ;;  %10616 = vmatpush.bf16.msrb.mxu1 %v11662_v5 }
 0x8cb   :  { %v10105_v30 = vmul.f32 %v10076_v14, %v20439_v38  ;;  %10665 = vmatpush.bf16.msrb.mxu2 %v11666_v36 }
 0x8cc   :  { %v10139_v28 = vsub.f32 1.5, %v10138_v61 }
 0x8cd   :  { %v12551_v16 = vpop.eup %12550  ;;  %v19411_v55 = vadd.f32 1.1920929e-07, %v10105_v30 }
 0x8ce   :  { %v10146_v42 = vmul.f32 %v12551_v16, %v19404_v26  ;;  %v10140_v22 = vmul.f32 %v19402_v60, %v10139_v28  ;;  %vm10152_vm5 = vweird.f32 %v12551_v16 }
 0x8cf   :  { %12552 = vrsqrt.f32 %v19411_v55  ;;  %vm10153_vm8 = vmor %vm10151_vm7, %vm10152_vm5  ;;  %vm10161_vm10 = vweird.f32 %v19411_v55 }
 0x8d0   :  { %v10147_v15 = vmul.f32 %v12551_v16, %v10146_v42  ;;  %v10144_v35 = vsel %vm10143_vm6, %v19402_v60, %v10140_v22 }
 0x8d1   :  { %v10295_v41 = vmul.f32 %v10144_v35, %v19318_v31 }
 0x8d2   :  { %v10148_v62 = vmul.f32 0.5, %v10147_v15  ;;  %v10078_v46 = vpop.xlane.xlu1 %10077 }
 0x8d3   :  { %v10106_v20 = vmul.f32 %v10078_v46, %v20439_v38 }
 0x8d4   :  { %v10149_v40 = vsub.f32 1.5, %v10148_v62 }
 0x8d5   :  { %v12553_v21 = vpop.eup %12552  ;;  %v10122_v47 = vadd.f32 1.1920929e-07, %v10106_v20 }
 0x8d6   :  { %v10150_v51 = vmul.f32 %v12551_v16, %v10149_v40  ;;  %v10156_v58 = vmul.f32 %v12553_v21, %v19411_v55  ;;  %vm10162_vm9 = vweird.f32 %v12553_v21 }
 0x8d7   :  { %12554 = vrsqrt.f32 %v10122_v47  ;;  %vm10163_vm12 = vmor %vm10161_vm10, %vm10162_vm9  ;;  %vm10171_vm13 = vweird.f32 %v10122_v47 }
 0x8d8   :  { %v10154_v43 = vsel %vm10153_vm8, %v12551_v16, %v10150_v51  ;;  %v10157_v54 = vmul.f32 %v12553_v21, %v10156_v58 }
 0x8d9   :  { %v10296_v39 = vmul.f32 %v10154_v43, %v19323_v52 }
 0x8da   :  { %v10158_v25 = vmul.f32 0.5, %v10157_v54  ;;  %v10080_v4 = vpop.xlane.xlu0 %10079 }
 0x8db   :  { %v10311_v57 = vpack.c.bf16 %v10296_v39, %v10295_v41  ;;  %v10107_v7 = vmul.f32 %v10080_v4, %v20439_v38 }
 0x8dc   :  { %v10159_v26 = vsub.f32 1.5, %v10158_v25 }
 0x8dd   :  { %v12555_v53 = vpop.eup %12554  ;;  %v10123_v60 = vadd.f32 1.1920929e-07, %v10107_v7  ;;  %10519 = vmatmul.bf16.vlgmr.msra.gmra.mxu3 %v10311_v57  ;;  %10568 = vmatmul.bf16.vlgmr.msra.gmra.mxu0 %v10311_v57 }
 0x8de   :  { %v10166_v61 = vmul.f32 %v12555_v53, %v10122_v47  ;;  %10617 = vmatmul.bf16.vlgmr.msrb.gmra.mxu1 %v10311_v57  ;;  %10666 = vmatmul.bf16.vlgmr.msrb.gmra.mxu2 %v10311_v57  ;;  %v10160_v48 = vmul.f32 %v12553_v21, %v10159_v26  ;;  %vm10172_vm11 = vweird.f32 %v12555_v53 }
 0x8df   :  { %12556 = vrsqrt.f32 %v10123_v60  ;;  %vm10173_vm14 = vmor %vm10171_vm13, %vm10172_vm11  ;;  %vm10181_vm0 = vweird.f32 %v10123_v60 }
 0x8e0   :  { %v10167_v14 = vmul.f32 %v12555_v53, %v10166_v61  ;;  %v10164_v37 = vsel %vm10163_vm12, %v12553_v21, %v10160_v48 }
 0x8e1   :  { %v10297_v16 = vmul.f32 %v10164_v37, %v19328_v2 }
 0x8e2   :  { %v10168_v6 = vmul.f32 0.5, %v10167_v14  ;;  %v10082_v19 = vpop.xlane.xlu2 %10081 }
 0x8e3   :  { %v10108_v30 = vmul.f32 %v10082_v19, %v20439_v38 }
 0x8e4   :  { %v10169_v12 = vsub.f32 1.5, %v10168_v6 }
 0x8e5   :  { %v12557_v11 = vpop.eup %12556  ;;  %v10124_v24 = vadd.f32 1.1920929e-07, %v10108_v30 }
 0x8e6   :  { %v10170_v50 = vmul.f32 %v12555_v53, %v10169_v12  ;;  %v10176_v32 = vmul.f32 %v12557_v11, %v10123_v60  ;;  %vm10182_vm15 = vweird.f32 %v12557_v11 }
 0x8e7   :  { %12558 = vrsqrt.f32 %v10124_v24  ;;  %vm10183_vm1 = vmor %vm10181_vm0, %vm10182_vm15  ;;  %vm10191_vm2 = vweird.f32 %v10124_v24 }
 0x8e8   :  { %v10174_v9 = vsel %vm10173_vm14, %v12555_v53, %v10170_v50  ;;  %v10177_v0 = vmul.f32 %v12557_v11, %v10176_v32 }
 0x8e9   :  { %v10298_v8 = vmul.f32 %v10174_v9, %v19333_v49 }
 0x8ea   :  { %v10178_v34 = vmul.f32 0.5, %v10177_v0  ;;  %v10084_v28 = vpop.xlane.xlu1 %10083 }
 0x8eb   :  { %v10109_v55 = vmul.f32 %v10084_v28, %v20439_v38  ;;  %v10312_v42 = vpack.c.bf16 %v10298_v8, %v10297_v16 }
 0x8ec   :  { %v10179_v1 = vsub.f32 1.5, %v10178_v34 }
 0x8ed   :  { %v12559_v44 = vpop.eup %12558  ;;  %v10125_v27 = vadd.f32 1.1920929e-07, %v10109_v55  ;;  %10524 = vmatmul.bf16.gmra.mxu3 %v10312_v42  ;;  %10573 = vmatmul.bf16.gmra.mxu0 %v10312_v42 }
 0x8ee   :  { %v10186_v15 = vmul.f32 %v12559_v44, %v10124_v24  ;;  %10622 = vmatmul.bf16.gmra.mxu1 %v10312_v42  ;;  %10671 = vmatmul.bf16.gmra.mxu2 %v10312_v42  ;;  %v10180_v36 = vmul.f32 %v12557_v11, %v10179_v1  ;;  %vm10192_vm3 = vweird.f32 %v12559_v44 }
 0x8ef   :  { %12560 = vrsqrt.f32 %v10125_v27  ;;  %vm10193_vm4 = vmor %vm10191_vm2, %vm10192_vm3  ;;  %vm10201_vm6 = vweird.f32 %v10125_v27 }
 0x8f0   :  { %v10187_v5 = vmul.f32 %v12559_v44, %v10186_v15  ;;  %v10184_v47 = vsel %vm10183_vm1, %v12557_v11, %v10180_v36 }
 0x8f1   :  { %v10299_v54 = vmul.f32 %v10184_v47, %v19338_v63 }
 0x8f2   :  { %v10188_v22 = vmul.f32 0.5, %v10187_v5  ;;  %v10086_v62 = vpop.xlane.xlu0 %10085 }
 0x8f3   :  { %v10110_v46 = vmul.f32 %v10086_v62, %v20439_v38 }
 0x8f4   :  { %v10189_v20 = vsub.f32 1.5, %v10188_v22 }
 0x8f5   :  { %v12561_v40 = vpop.eup %12560  ;;  %v10126_v21 = vadd.f32 1.1920929e-07, %v10110_v46 }
 0x8f6   :  { %v10190_v35 = vmul.f32 %v12559_v44, %v10189_v20  ;;  %v10196_v51 = vmul.f32 %v12561_v40, %v10125_v27  ;;  %vm10202_vm5 = vweird.f32 %v12561_v40 }
 0x8f7   :  { %12562 = vrsqrt.f32 %v10126_v21  ;;  %vm10203_vm8 = vmor %vm10201_vm6, %vm10202_vm5  ;;  %vm10211_vm9 = vweird.f32 %v10126_v21 }
 0x8f8   :  { %v10194_v58 = vsel %vm10193_vm4, %v12559_v44, %v10190_v35  ;;  %v10197_v43 = vmul.f32 %v12561_v40, %v10196_v51 }
 0x8f9   :  { %v10300_v41 = vmul.f32 %v10194_v58, %v19343_v56 }
 0x8fa   :  { %v10198_v39 = vmul.f32 0.5, %v10197_v43  ;;  %v10088_v25 = vpop.xlane.xlu2 %10087 }
 0x8fb   :  { %v10111_v4 = vmul.f32 %v10088_v25, %v20439_v38  ;;  %v10313_v57 = vpack.c.bf16 %v10300_v41, %v10299_v54 }
 0x8fc   :  { %v10199_v60 = vsub.f32 1.5, %v10198_v39 }
 0x8fd   :  { %v12563_v7 = vpop.eup %12562  ;;  %v10127_v53 = vadd.f32 1.1920929e-07, %v10111_v4  ;;  %10529 = vmatmul.bf16.gmra.mxu3 %v10313_v57  ;;  %10578 = vmatmul.bf16.gmra.mxu0 %v10313_v57 }
 0x8fe   :  { %v10206_v26 = vmul.f32 %v12563_v7, %v10126_v21  ;;  %10627 = vmatmul.bf16.gmra.mxu1 %v10313_v57  ;;  %10676 = vmatmul.bf16.gmra.mxu2 %v10313_v57  ;;  %v10200_v14 = vmul.f32 %v12561_v40, %v10199_v60  ;;  %vm10212_vm7 = vweird.f32 %v12563_v7 }
 0x8ff   :  { %12564 = vrsqrt.f32 %v10127_v53  ;;  %vm10213_vm10 = vmor %vm10211_vm9, %vm10212_vm7  ;;  %vm10221_vm12 = vweird.f32 %v10127_v53 }
 0x900   :  { %v10207_v61 = vmul.f32 %v12563_v7, %v10206_v26  ;;  %v10204_v24 = vsel %vm10203_vm8, %v12561_v40, %v10200_v14 }
 0x901   :  { %v10301_v0 = vmul.f32 %v10204_v24, %v19348_v45 }
 0x902   :  { %v10208_v48 = vmul.f32 0.5, %v10207_v61  ;;  %v10090_v6 = vpop.xlane.xlu1 %10089 }
 0x903   :  { %v10112_v19 = vmul.f32 %v10090_v6, %v20439_v38 }
 0x904   :  { %v10209_v30 = vsub.f32 1.5, %v10208_v48 }
 0x905   :  { %v12565_v12 = vpop.eup %12564  ;;  %v10128_v11 = vadd.f32 1.1920929e-07, %v10112_v19 }
 0x906   :  { %v10210_v37 = vmul.f32 %v12563_v7, %v10209_v30  ;;  %v10216_v50 = vmul.f32 %v12565_v12, %v10127_v53  ;;  %vm10222_vm11 = vweird.f32 %v12565_v12 }
 0x907   :  { %12566 = vrsqrt.f32 %v10128_v11  ;;  %vm10223_vm14 = vmor %vm10221_vm12, %vm10222_vm11  ;;  %vm10231_vm15 = vweird.f32 %v10128_v11 }
 0x908   :  { %v10214_v32 = vsel %vm10213_vm10, %v12563_v7, %v10210_v37  ;;  %v10217_v9 = vmul.f32 %v12565_v12, %v10216_v50 }
 0x909   :  { %v10302_v16 = vmul.f32 %v10214_v32, %v19353_v13 }
 0x90a   :  { %v10218_v8 = vmul.f32 0.5, %v10217_v9  ;;  %v10092_v34 = vpop.xlane.xlu0 %10091  ;;  %v12002_v9 = vld [vmem:[#allocation20 + $0x78] sm:$0xff] }
 0x90b   :  { %v10113_v28 = vmul.f32 %v10092_v34, %v20439_v38  ;;  %v10314_v55 = vpack.c.bf16 %v10302_v16, %v10301_v0  ;;  %v12010_v0 = vld [vmem:[#allocation20 + $0xb8] sm:$0xff]  ;;  %11172 = vmatpush.bf16.msrb.mxu0 %v12002_v9  ;;  %v12015_v9 = vld [vmem:[#allocation20 + $0xe0] sm:$0xff] }
 0x90c   :  { %v10219_v27 = vsub.f32 1.5, %v10218_v8  ;;  %11221 = vmatpush.bf16.msra.mxu1 %v12010_v0 }
 0x90d   :  { %v12567_v42 = vpop.eup %12566  ;;  %v10129_v44 = vadd.f32 1.1920929e-07, %v10113_v28  ;;  %10534 = vmatmul.bf16.gmra.mxu3 %v10314_v55  ;;  %10583 = vmatmul.bf16.gmra.mxu0 %v10314_v55 }
 0x90e   :  { %v10226_v1 = vmul.f32 %v12567_v42, %v10128_v11  ;;  %10632 = vmatmul.bf16.gmra.mxu1 %v10314_v55  ;;  %10681 = vmatmul.bf16.gmra.mxu2 %v10314_v55  ;;  %v10220_v5 = vmul.f32 %v12565_v12, %v10219_v27  ;;  %vm10232_vm13 = vweird.f32 %v12567_v42 }
 0x90f   :  { %12568 = vrsqrt.f32 %v10129_v44  ;;  %vm10233_vm0 = vmor %vm10231_vm15, %vm10232_vm13  ;;  %vm10241_vm1 = vweird.f32 %v10129_v44 }
 0x910   :  { %v10227_v15 = vmul.f32 %v12567_v42, %v10226_v1  ;;  %v10224_v21 = vsel %vm10223_vm14, %v12565_v12, %v10220_v5  ;;  %v12001_v5 = vld [vmem:[#allocation20 + $0x70] sm:$0xff] }
 0x911   :  { %v10303_v43 = vmul.f32 %v10224_v21, %v19358_v29  ;;  %11173 = vmatpush.bf16.msrb.mxu0 %v12001_v5  ;;  %v11993_v21 = vld [vmem:[#allocation20 + $0x30] sm:$0xff] }
 0x912   :  { %v10228_v36 = vmul.f32 0.5, %v10227_v15  ;;  %v10094_v22 = vpop.xlane.xlu2 %10093 }
 0x913   :  { %v10114_v62 = vmul.f32 %v10094_v22, %v20439_v38  ;;  %v11994_v22 = vld [vmem:[#allocation20 + $0x38] sm:$0xff] }
 0x914   :  { %v10229_v46 = vsub.f32 1.5, %v10228_v36  ;;  %v12009_v36 = vld [vmem:[#allocation20 + $0xb0] sm:$0xff]  ;;  %11123 = vmatpush.bf16.msrb.mxu3 %v11994_v22  ;;  %v12004_v22 = vld [vmem:[#allocation20 + $0x88] sm:$0xff] }
 0x915   :  { %v12569_v20 = vpop.eup %12568  ;;  %v10130_v40 = vadd.f32 1.1920929e-07, %v10114_v62  ;;  %v12018_v62 = vld [vmem:[#allocation20 + $0xf8] sm:$0xff]  ;;  %11222 = vmatpush.bf16.msra.mxu1 %v12009_v36  ;;  %v11996_v36 = vld [vmem:[#allocation20 + $0x48] sm:$0xff] }
 0x916   :  { %v10230_v47 = vmul.f32 %v12567_v42, %v10229_v46  ;;  %v10236_v35 = vmul.f32 %v12569_v20, %v10129_v44  ;;  %vm10242_vm3 = vweird.f32 %v12569_v20  ;;  %11270 = vmatpush.bf16.msra.mxu2 %v12018_v62  ;;  %v11989_v62 = vld [vmem:[#allocation20 + $0x10] sm:$0xff] }
 0x917   :  { %12570 = vrsqrt.f32 %v10130_v40  ;;  %vm10243_vm4 = vmor %vm10241_vm1, %vm10242_vm3  ;;  %vm10251_vm5 = vweird.f32 %v10130_v40 }
 0x918   :  { %v10234_v51 = vsel %vm10233_vm0, %v12567_v42, %v10230_v47  ;;  %v10237_v58 = vmul.f32 %v12569_v20, %v10236_v35  ;;  %v12017_v47 = vld [vmem:[#allocation20 + $0xf0] sm:$0xff]  ;;  %11124 = vmatpush.bf16.msrb.mxu3 %v11993_v21  ;;  %v11995_v21 = vld [vmem:[#allocation20 + $0x40] sm:$0xff] }
 0x919   :  { %v10304_v54 = vmul.f32 %v10234_v51, %v19363_v18 }
 0x91a   :  { %v10238_v41 = vmul.f32 0.5, %v10237_v58  ;;  %v10096_v39 = vpop.xlane.xlu1 %10095  ;;  %11271 = vmatpush.bf16.msra.mxu2 %v12017_v47  ;;  %v12003_v47 = vld [vmem:[#allocation20 + $0x80] sm:$0xff] }
 0x91b   :  { %v10115_v25 = vmul.f32 %v10096_v39, %v20439_v38  ;;  %v10315_v4 = vpack.c.bf16 %v10304_v54, %v10303_v43  ;;  %v12007_v39 = vld [vmem:[#allocation20 + $0xa0] sm:$0xff] }
 0x91c   :  { %v10239_v53 = vsub.f32 1.5, %v10238_v41  ;;  %v11999_v41 = vld [vmem:[#allocation20 + $0x60] sm:$0xff] }
 0x91d   :  { %v12571_v57 = vpop.eup %12570  ;;  %v19442_v7 = vadd.f32 1.1920929e-07, %v10115_v25  ;;  %10539 = vmatmul.bf16.gmra.mxu3 %v10315_v4  ;;  %10588 = vmatmul.bf16.gmra.mxu0 %v10315_v4 }
 0x91e   :  { %v10246_v60 = vmul.f32 %v12571_v57, %v10130_v40  ;;  %10637 = vmatmul.bf16.gmra.mxu1 %v10315_v4  ;;  %10686 = vmatmul.bf16.gmra.mxu2 %v10315_v4  ;;  %v10240_v61 = vmul.f32 %v12569_v20, %v10239_v53  ;;  %vm10252_vm2 = vweird.f32 %v12571_v57  ;;  %v12008_v40 = vld [vmem:[#allocation20 + $0xa8] sm:$0xff] }
 0x91f   :  { %12572 = vrsqrt.f32 %v19442_v7  ;;  %vm10253_vm6 = vmor %vm10251_vm5, %vm10252_vm2  ;;  %vm10261_vm8 = vweird.f32 %v19442_v7  ;;  %11223 = vmatpush.bf16.msra.mxu1 %v12008_v40  ;;  %v11992_v53 = vld [vmem:[#allocation20 + $0x28] sm:$0xff] }
 0x920   :  { %v10247_v26 = vmul.f32 %v12571_v57, %v10246_v60  ;;  %v10244_v11 = vsel %vm10243_vm4, %v12569_v20, %v10240_v61  ;;  %v12000_v20 = vld [vmem:[#allocation20 + $0x68] sm:$0xff]  ;;  %11125 = vmatpush.bf16.msrb.mxu3 %v11992_v53 }
 0x921   :  { %v10305_v16 = vmul.f32 %v10244_v11, %v19368_v3  ;;  %11174 = vmatpush.bf16.msrb.mxu0 %v12000_v20  ;;  %v12016_v60 = vld [vmem:[#allocation20 + $0xe8] sm:$0xff]  ;;  %v12013_v20 = vld [vmem:[#allocation20 + $0xd0] sm:$0xff] }
 0x922   :  { %v10248_v14 = vmul.f32 0.5, %v10247_v26  ;;  %v10098_v48 = vpop.xlane.xlu0 %10097  ;;  %11272 = vmatpush.bf16.msra.mxu2 %v12016_v60 }
 0x923   :  { %v10116_v6 = vmul.f32 %v10098_v48, %v20439_v38  ;;  %11224 = vmatpush.bf16.msra.mxu1 %v12007_v39 }
 0x924   :  { %v10249_v19 = vsub.f32 1.5, %v10248_v14 }
 0x925   :  { %v19446_v30 = vpop.eup %12572  ;;  %v19448_v12 = vadd.f32 1.1920929e-07, %v10116_v6  ;;  %11175 = vmatpush.bf16.msrb.mxu0 %v11999_v41 }
 0x926   :  { %v10250_v24 = vmul.f32 %v12571_v57, %v10249_v19  ;;  %v10256_v37 = vmul.f32 %v19446_v30, %v19442_v7  ;;  %vm10262_vm7 = vweird.f32 %v19446_v30  ;;  %11273 = vmatpush.bf16.msra.mxu2 %v12015_v9 }
 0x927   :  { %12574 = vrsqrt.f32 %v19448_v12  ;;  %vm19467_vm10 = vmor %vm10261_vm8, %vm10262_vm7  ;;  %vm10271_vm11 = vweird.f32 %v19448_v12 }
 0x928   :  { %v10254_v50 = vsel %vm10253_vm6, %v12571_v57, %v10250_v24  ;;  %v10257_v32 = vmul.f32 %v19446_v30, %v10256_v37  ;;  %v11998_v37 = vld [vmem:[#allocation20 + $0x58] sm:$0xff] }
 0x929   :  { %v10306_v8 = vmul.f32 %v10254_v50, %v19373_v59  ;;  %v12006_v50 = vld [vmem:[#allocation20 + $0x98] sm:$0xff]  ;;  %11176 = vmatpush.bf16.msrb.mxu0 %v11998_v37 }
 0x92a   :  { %v10258_v34 = vmul.f32 0.5, %v10257_v32  ;;  %v10100_v28 = vpop.xlane.xlu2 %10099  ;;  %v11991_v32 = vld [vmem:[#allocation20 + $0x20] sm:$0xff]  ;;  %11225 = vmatpush.bf16.msra.mxu1 %v12006_v50 }
 0x92b   :  { %v10117_v55 = vmul.f32 %v10100_v28, %v20439_v38  ;;  %v10316_v42 = vpack.c.bf16 %v10306_v8, %v10305_v16  ;;  %v11997_v16 = vld [vmem:[#allocation20 + $0x50] sm:$0xff]  ;;  %11126 = vmatpush.bf16.msrb.mxu3 %v11991_v32 }
 0x92c   :  { %v10259_v1 = vsub.f32 1.5, %v10258_v34  ;;  %v12005_v8 = vld [vmem:[#allocation20 + $0x90] sm:$0xff] }
 0x92d   :  { %v12575_v44 = vpop.eup %12574  ;;  %v19457_v27 = vadd.f32 1.1920929e-07, %v10117_v55  ;;  %10544 = vmatmul.bf16.gmra.mxu3 %v10316_v42  ;;  %10593 = vmatmul.bf16.gmra.mxu0 %v10316_v42 }
 0x92e   :  { %v10266_v15 = vmul.f32 %v12575_v44, %v19448_v12  ;;  %10642 = vmatmul.bf16.gmra.mxu1 %v10316_v42  ;;  %10691 = vmatmul.bf16.gmra.mxu2 %v10316_v42  ;;  %v10260_v35 = vmul.f32 %v19446_v30, %v10259_v1  ;;  %vm10272_vm9 = vweird.f32 %v12575_v44  ;;  %v11990_v42 = vld [vmem:[#allocation20 + $0x18] sm:$0xff] }
 0x92f   :  { %12576 = vrsqrt.f32 %v19457_v27  ;;  %vm10273_vm12 = vmor %vm10271_vm11, %vm10272_vm9  ;;  %vm10281_vm14 = vweird.f32 %v19457_v27  ;;  %11177 = vmatpush.bf16.msrb.mxu0 %v11997_v16  ;;  %11226 = vmatpush.bf16.msra.mxu1 %v12005_v8 }
 0x930   :  { %v10267_v46 = vmul.f32 %v12575_v44, %v10266_v15  ;;  %11127 = vmatpush.bf16.msrb.mxu3 %v11990_v42 }
 0x932   :  { %v10268_v51 = vmul.f32 0.5, %v10267_v46  ;;  %v10102_v58 = vpop.xlane.xlu1 %10101 }
 0x933   :  { %v10118_v43 = vmul.f32 %v10102_v58, %v20439_v38  ;;  %v10264_v38 = vsel %vm19467_vm10, %v19446_v30, %v10260_v35  ;;  %11178 = vmatpush.bf16.msrb.mxu0 %v11996_v36  ;;  %11227 = vmatpush.bf16.msra.mxu1 %v12004_v22  ;;  %v11988_v35 = vld [vmem:[#allocation20 + $0x8] sm:$0xff]  ;;  %v11987_v58 = vld [vmem:[#allocation20] sm:$0xff] }
 0x934   :  { %v10269_v54 = vsub.f32 1.5, %v10268_v51  ;;  %v10307_v48 = vmul.f32 %v10264_v38, %v19378_v23  ;;  %11128 = vmatpush.bf16.msrb.mxu3 %v11989_v62  ;;  %v12012_v51 = vld [vmem:[#allocation20 + $0xc8] sm:$0xff] }
 0x935   :  { %v19465_v25 = vpop.eup %12576  ;;  %v10134_v57 = vadd.f32 1.1920929e-07, %v10118_v43  ;;  %v12011_v43 = vld [vmem:[#allocation20 + $0xc0] sm:$0xff] }
 0x936   :  { %v10270_v7 = vmul.f32 %v12575_v44, %v10269_v54  ;;  %v10276_v26 = vmul.f32 %v19465_v25, %v19457_v27  ;;  %vm10282_vm13 = vweird.f32 %v19465_v25 }
 0x937   :  { %12578 = vrsqrt.f32 %v10134_v57  ;;  %vm10283_vm0 = vmor %vm10281_vm14, %vm10282_vm13  ;;  %vm10291_vm3 = vweird.f32 %v10134_v57  ;;  %11179 = vmatpush.bf16.msrb.mxu0 %v11995_v21  ;;  %11228 = vmatpush.bf16.msra.mxu1 %v12003_v47 }
 0x938   :  { %v10274_v61 = vsel %vm10273_vm12, %v12575_v44, %v10270_v7  ;;  %v10277_v14 = vmul.f32 %v19465_v25, %v10276_v26  ;;  %v12014_v44 = vld [vmem:[#allocation20 + $0xd8] sm:$0xff]  ;;  %11129 = vmatpush.bf16.msrb.mxu3 %v11988_v35 }
 0x939   :  { %v10308_v6 = vmul.f32 %v10274_v61, %v19383_v17  ;;  %11274 = vmatpush.bf16.msra.mxu2 %v12014_v44 }
 0x93a   :  { %v10278_v19 = vmul.f32 0.5, %v10277_v14 }
 0x93b   :  { %v10317_v30 = vpack.c.bf16 %v10308_v6, %v10307_v48 }
 0x93c   :  { %v10279_v11 = vsub.f32 1.5, %v10278_v19  ;;  %11130 = vmatpush.bf16.msrb.mxu3 %v11987_v58 }
 0x93d   :  { %v12579_v12 = vpop.eup %12578  ;;  %10549 = vmatmul.bf16.gmra.mxu3 %v10317_v30  ;;  %10598 = vmatmul.bf16.gmra.mxu0 %v10317_v30 }
 0x93e   :  { %v10286_v24 = vmul.f32 %v12579_v12, %v10134_v57  ;;  %10647 = vmatmul.bf16.gmra.mxu1 %v10317_v30  ;;  %10696 = vmatmul.bf16.gmra.mxu2 %v10317_v30  ;;  %v10280_v34 = vmul.f32 %v19465_v25, %v10279_v11  ;;  %vm10292_vm15 = vweird.f32 %v12579_v12 }
 0x93f   :  { %vm10293_vm1 = vmor %vm10291_vm3, %vm10292_vm15  ;;  %11275 = vmatpush.bf16.msra.mxu2 %v12013_v20 }
 0x940   :  { %v10287_v0 = vmul.f32 %v12579_v12, %v10286_v24  ;;  %v10284_v1 = vsel %vm10283_vm0, %v19465_v25, %v10280_v34 }
 0x941   :  { %v10309_v27 = vmul.f32 %v10284_v1, %v19388_v10 }
 0x942   :  { %v10288_v28 = vmul.f32 0.5, %v10287_v0 }
 0x943   :  { %11276 = vmatpush.bf16.msra.mxu2 %v12012_v51 }
 0x944   :  { %v10289_v55 = vsub.f32 1.5, %v10288_v28 }
 0x946   :  { %v10290_v15 = vmul.f32 %v12579_v12, %v10289_v55 }
 0x947   :  { %11277 = vmatpush.bf16.msra.mxu2 %v12011_v43 }
 0x948   :  { %v10294_v5 = vsel %vm10293_vm1, %v12579_v12, %v10290_v15 }
 0x949   :  { %v10310_v46 = vmul.f32 %v10294_v5, %v19393_v33 }
 0x94b   :  { %v10318_v40 = vpack.c.bf16 %v10310_v46, %v10309_v27 }
 0x94d   :  { %10554 = vmatmul.bf16.gmra.mxu3 %v10318_v40  ;;  %10603 = vmatmul.bf16.gmra.mxu0 %v10318_v40 }
 0x94e   :  { %10652 = vmatmul.bf16.gmra.mxu1 %v10318_v40  ;;  %10701 = vmatmul.bf16.gmra.mxu2 %v10318_v40 }
 0x95a   :  { %v10569_v54 = vpop.f32.mrf.mxu0 }
 0x95b   :  { %v10618_v41 = vpop.f32.mrf.mxu1  ;;  %v10708_v25 = vmax.f32 %v10569_v54, 0.0 }
 0x95c   :  { %v10709_v57 = vmax.f32 %v10618_v41, 0.0 }
 0x95d   :  { %v10772_v26 = vmul.f32 %v10708_v25, %v10708_v25 }
 0x95e   :  { %v10773_v14 = vmul.f32 %v10709_v57, %v10709_v57 }
 0x960   :  { %v10520_v39 = vpop.f32.mrf.mxu3 }
 0x961   :  { %v10667_v4 = vpop.f32.mrf.mxu2  ;;  %v10707_v6 = vmax.f32 %v10520_v39, 0.0 }
 0x962   :  { %v10571_v53 = vpop.f32.mrf.mxu0  ;;  %v10710_v30 = vmax.f32 %v10667_v4, 0.0 }
 0x963   :  { %v10712_v60 = vmax.f32 %v10571_v53, 0.0  ;;  %v10620_v38 = vpop.f32.mrf.mxu1  ;;  %v10771_v9 = vmul.f32 %v10707_v6, %v10707_v6 }
 0x964   :  { %v10713_v7 = vmax.f32 %v10620_v38, 0.0  ;;  %v10774_v8 = vmul.f32 %v10710_v30, %v10710_v30 }
 0x965   :  { %v10776_v61 = vmul.f32 %v10712_v60, %v10712_v60 }
 0x966   :  { %v10777_v48 = vmul.f32 %v10713_v7, %v10713_v7 }
 0x967   :  { %v10836_v19 = vpack.c.bf16 %v10776_v61, %v10772_v26 }
 0x968   :  { %v10837_v12 = vpack.c.bf16 %v10777_v48, %v10773_v14  ;;  %v10522_v11 = vpop.f32.mrf.mxu3 }
 0x969   :  { %v10711_v24 = vmax.f32 %v10522_v11, 0.0  ;;  %v10669_v37 = vpop.f32.mrf.mxu2  ;;  %11180 = vmatmul.bf16.vlgmr.msrb.gmra.mxu0 %v10836_v19 }
 0x96a   :  { %v10714_v50 = vmax.f32 %v10669_v37, 0.0  ;;  %11229 = vmatmul.bf16.vlgmr.msra.gmra.mxu1 %v10837_v12  ;;  %v10574_v32 = vpop.f32.mrf.mxu0 }
 0x96b   :  { %v10775_v0 = vmul.f32 %v10711_v24, %v10711_v24  ;;  %v10623_v16 = vpop.f32.mrf.mxu1  ;;  %v10716_v44 = vmax.f32 %v10574_v32, 0.0 }
 0x96c   :  { %v10778_v34 = vmul.f32 %v10714_v50, %v10714_v50  ;;  %v10717_v15 = vmax.f32 %v10623_v16, 0.0 }
 0x96d   :  { %v10835_v28 = vpack.c.bf16 %v10775_v0, %v10771_v9  ;;  %v10780_v27 = vmul.f32 %v10716_v44, %v10716_v44 }
 0x96e   :  { %v10838_v55 = vpack.c.bf16 %v10778_v34, %v10774_v8  ;;  %v10781_v20 = vmul.f32 %v10717_v15, %v10717_v15 }
 0x96f   :  { %11131 = vmatmul.bf16.vlgmr.msrb.gmra.mxu3 %v10835_v28 }
 0x970   :  { %11278 = vmatmul.bf16.vlgmr.msra.gmra.mxu2 %v10838_v55  ;;  %v10525_v42 = vpop.f32.mrf.mxu3 }
 0x971   :  { %v10672_v1 = vpop.f32.mrf.mxu2  ;;  %v10715_v21 = vmax.f32 %v10525_v42, 0.0 }
 0x972   :  { %v10576_v5 = vpop.f32.mrf.mxu0  ;;  %v10718_v35 = vmax.f32 %v10672_v1, 0.0 }
 0x973   :  { %v10720_v36 = vmax.f32 %v10576_v5, 0.0  ;;  %v10625_v22 = vpop.f32.mrf.mxu1  ;;  %v10779_v25 = vmul.f32 %v10715_v21, %v10715_v21 }
 0x974   :  { %v10721_v62 = vmax.f32 %v10625_v22, 0.0  ;;  %v10782_v53 = vmul.f32 %v10718_v35, %v10718_v35 }
 0x975   :  { %v10784_v46 = vmul.f32 %v10720_v36, %v10720_v36 }
 0x976   :  { %v10785_v40 = vmul.f32 %v10721_v62, %v10721_v62 }
 0x977   :  { %v10840_v47 = vpack.c.bf16 %v10784_v46, %v10780_v27 }
 0x978   :  { %v10527_v51 = vpop.f32.mrf.mxu3  ;;  %v10841_v58 = vpack.c.bf16 %v10785_v40, %v10781_v20 }
 0x979   :  { %v10719_v43 = vmax.f32 %v10527_v51, 0.0  ;;  %v10674_v54 = vpop.f32.mrf.mxu2  ;;  %11185 = vmatmul.bf16.gmra.mxu0 %v10840_v47 }
 0x97a   :  { %v10722_v41 = vmax.f32 %v10674_v54, 0.0  ;;  %11234 = vmatmul.bf16.gmra.mxu1 %v10841_v58  ;;  %v10579_v39 = vpop.f32.mrf.mxu0 }
 0x97b   :  { %v10783_v4 = vmul.f32 %v10719_v43, %v10719_v43  ;;  %v10628_v57 = vpop.f32.mrf.mxu1  ;;  %v10724_v61 = vmax.f32 %v10579_v39, 0.0 }
 0x97c   :  { %v10786_v60 = vmul.f32 %v10722_v41, %v10722_v41  ;;  %v10725_v48 = vmax.f32 %v10628_v57, 0.0 }
 0x97d   :  { %v10839_v38 = vpack.c.bf16 %v10783_v4, %v10779_v25  ;;  %v10788_v11 = vmul.f32 %v10724_v61, %v10724_v61 }
 0x97e   :  { %v10842_v7 = vpack.c.bf16 %v10786_v60, %v10782_v53  ;;  %v10789_v37 = vmul.f32 %v10725_v48, %v10725_v48 }
 0x97f   :  { %11136 = vmatmul.bf16.gmra.mxu3 %v10839_v38 }
 0x980   :  { %11283 = vmatmul.bf16.gmra.mxu2 %v10842_v7  ;;  %v10530_v26 = vpop.f32.mrf.mxu3 }
 0x981   :  { %v10677_v14 = vpop.f32.mrf.mxu2  ;;  %v10723_v32 = vmax.f32 %v10530_v26, 0.0 }
 0x982   :  { %v10581_v6 = vpop.f32.mrf.mxu0  ;;  %v10726_v0 = vmax.f32 %v10677_v14, 0.0 }
 0x983   :  { %v10728_v19 = vmax.f32 %v10581_v6, 0.0  ;;  %v10630_v30 = vpop.f32.mrf.mxu1  ;;  %v10787_v44 = vmul.f32 %v10723_v32, %v10723_v32 }
 0x984   :  { %v10729_v12 = vmax.f32 %v10630_v30, 0.0  ;;  %v10790_v5 = vmul.f32 %v10726_v0, %v10726_v0 }
 0x985   :  { %v10792_v24 = vmul.f32 %v10728_v19, %v10728_v19 }
 0x986   :  { %v10793_v50 = vmul.f32 %v10729_v12, %v10729_v12 }
 0x987   :  { %v10844_v9 = vpack.c.bf16 %v10792_v24, %v10788_v11 }
 0x988   :  { %v10532_v16 = vpop.f32.mrf.mxu3  ;;  %v10845_v8 = vpack.c.bf16 %v10793_v50, %v10789_v37 }
 0x989   :  { %v10727_v34 = vmax.f32 %v10532_v16, 0.0  ;;  %v10679_v28 = vpop.f32.mrf.mxu2  ;;  %11190 = vmatmul.bf16.gmra.mxu0 %v10844_v9 }
 0x98a   :  { %v10730_v55 = vmax.f32 %v10679_v28, 0.0  ;;  %11239 = vmatmul.bf16.gmra.mxu1 %v10845_v8  ;;  %v10584_v42 = vpop.f32.mrf.mxu0 }
 0x98b   :  { %v10791_v1 = vmul.f32 %v10727_v34, %v10727_v34  ;;  %v10633_v15 = vpop.f32.mrf.mxu1  ;;  %v10732_v46 = vmax.f32 %v10584_v42, 0.0 }
 0x98c   :  { %v10794_v36 = vmul.f32 %v10730_v55, %v10730_v55  ;;  %v10733_v40 = vmax.f32 %v10633_v15, 0.0 }
 0x98d   :  { %v10843_v22 = vpack.c.bf16 %v10791_v1, %v10787_v44  ;;  %v10796_v58 = vmul.f32 %v10732_v46, %v10732_v46 }
 0x98e   :  { %v10846_v62 = vpack.c.bf16 %v10794_v36, %v10790_v5  ;;  %v10797_v54 = vmul.f32 %v10733_v40, %v10733_v40 }
 0x98f   :  { %11141 = vmatmul.bf16.gmra.mxu3 %v10843_v22 }
 0x990   :  { %11288 = vmatmul.bf16.gmra.mxu2 %v10846_v62  ;;  %v10535_v27 = vpop.f32.mrf.mxu3 }
 0x991   :  { %v10682_v20 = vpop.f32.mrf.mxu2  ;;  %v10731_v39 = vmax.f32 %v10535_v27, 0.0 }
 0x992   :  { %v10586_v21 = vpop.f32.mrf.mxu0  ;;  %v10734_v4 = vmax.f32 %v10682_v20, 0.0 }
 0x993   :  { %v10736_v47 = vmax.f32 %v10586_v21, 0.0  ;;  %v10635_v35 = vpop.f32.mrf.mxu1  ;;  %v10795_v61 = vmul.f32 %v10731_v39, %v10731_v39 }
 0x994   :  { %v10737_v51 = vmax.f32 %v10635_v35, 0.0  ;;  %v10798_v6 = vmul.f32 %v10734_v4, %v10734_v4 }
 0x995   :  { %v10800_v43 = vmul.f32 %v10736_v47, %v10736_v47 }
 0x996   :  { %v10801_v41 = vmul.f32 %v10737_v51, %v10737_v51 }
 0x997   :  { %v10848_v25 = vpack.c.bf16 %v10800_v43, %v10796_v58 }
 0x998   :  { %v10537_v57 = vpop.f32.mrf.mxu3  ;;  %v10849_v53 = vpack.c.bf16 %v10801_v41, %v10797_v54 }
 0x999   :  { %v10735_v60 = vmax.f32 %v10537_v57, 0.0  ;;  %v10684_v38 = vpop.f32.mrf.mxu2  ;;  %11195 = vmatmul.bf16.gmra.mxu0 %v10848_v25 }
 0x99a   :  { %v10738_v7 = vmax.f32 %v10684_v38, 0.0  ;;  %11244 = vmatmul.bf16.gmra.mxu1 %v10849_v53  ;;  %v10589_v26 = vpop.f32.mrf.mxu0 }
 0x99b   :  { %v10799_v14 = vmul.f32 %v10735_v60, %v10735_v60  ;;  %v10638_v48 = vpop.f32.mrf.mxu1  ;;  %v10740_v24 = vmax.f32 %v10589_v26, 0.0 }
 0x99c   :  { %v10802_v19 = vmul.f32 %v10738_v7, %v10738_v7  ;;  %v10741_v50 = vmax.f32 %v10638_v48, 0.0 }
 0x99d   :  { %v10847_v30 = vpack.c.bf16 %v10799_v14, %v10795_v61  ;;  %v10804_v8 = vmul.f32 %v10740_v24, %v10740_v24 }
 0x99e   :  { %v10850_v12 = vpack.c.bf16 %v10802_v19, %v10798_v6  ;;  %v10805_v28 = vmul.f32 %v10741_v50, %v10741_v50 }
 0x99f   :  { %11146 = vmatmul.bf16.gmra.mxu3 %v10847_v30 }
 0x9a0   :  { %11293 = vmatmul.bf16.gmra.mxu2 %v10850_v12  ;;  %v10540_v11 = vpop.f32.mrf.mxu3 }
 0x9a1   :  { %v10687_v37 = vpop.f32.mrf.mxu2  ;;  %v10739_v42 = vmax.f32 %v10540_v11, 0.0 }
 0x9a2   :  { %v10591_v32 = vpop.f32.mrf.mxu0  ;;  %v10742_v1 = vmax.f32 %v10687_v37, 0.0 }
 0x9a3   :  { %v10744_v9 = vmax.f32 %v10591_v32, 0.0  ;;  %v10640_v0 = vpop.f32.mrf.mxu1  ;;  %v10803_v46 = vmul.f32 %v10739_v42, %v10739_v42 }
 0x9a4   :  { %v10745_v16 = vmax.f32 %v10640_v0, 0.0  ;;  %v10806_v21 = vmul.f32 %v10742_v1, %v10742_v1 }
 0x9a5   :  { %v10808_v34 = vmul.f32 %v10744_v9, %v10744_v9 }
 0x9a6   :  { %v10809_v55 = vmul.f32 %v10745_v16, %v10745_v16 }
 0x9a7   :  { %v10852_v44 = vpack.c.bf16 %v10808_v34, %v10804_v8 }
 0x9a8   :  { %v10853_v15 = vpack.c.bf16 %v10809_v55, %v10805_v28  ;;  %v10542_v5 = vpop.f32.mrf.mxu3 }
 0x9a9   :  { %v10743_v36 = vmax.f32 %v10542_v5, 0.0  ;;  %v10689_v22 = vpop.f32.mrf.mxu2  ;;  %11200 = vmatmul.bf16.gmra.mxu0 %v10852_v44 }
 0x9aa   :  { %v10746_v62 = vmax.f32 %v10689_v22, 0.0  ;;  %11249 = vmatmul.bf16.gmra.mxu1 %v10853_v15  ;;  %v10594_v27 = vpop.f32.mrf.mxu0 }
 0x9ab   :  { %v10807_v20 = vmul.f32 %v10743_v36, %v10743_v36  ;;  %v10643_v40 = vpop.f32.mrf.mxu1  ;;  %v10748_v43 = vmax.f32 %v10594_v27, 0.0 }
 0x9ac   :  { %v10810_v47 = vmul.f32 %v10746_v62, %v10746_v62  ;;  %v10749_v41 = vmax.f32 %v10643_v40, 0.0 }
 0x9ad   :  { %v10851_v35 = vpack.c.bf16 %v10807_v20, %v10803_v46  ;;  %v10812_v53 = vmul.f32 %v10748_v43, %v10748_v43 }
 0x9ae   :  { %v10854_v51 = vpack.c.bf16 %v10810_v47, %v10806_v21  ;;  %v10813_v38 = vmul.f32 %v10749_v41, %v10749_v41 }
 0x9af   :  { %11151 = vmatmul.bf16.gmra.mxu3 %v10851_v35 }
 0x9b0   :  { %11298 = vmatmul.bf16.gmra.mxu2 %v10854_v51  ;;  %v10545_v58 = vpop.f32.mrf.mxu3 }
 0x9b1   :  { %v10692_v54 = vpop.f32.mrf.mxu2  ;;  %v10747_v26 = vmax.f32 %v10545_v58, 0.0 }
 0x9b2   :  { %v10596_v39 = vpop.f32.mrf.mxu0  ;;  %v10750_v14 = vmax.f32 %v10692_v54, 0.0 }
 0x9b3   :  { %v10752_v25 = vmax.f32 %v10596_v39, 0.0  ;;  %v10645_v4 = vpop.f32.mrf.mxu1  ;;  %v10811_v24 = vmul.f32 %v10747_v26, %v10747_v26 }
 0x9b4   :  { %v10753_v57 = vmax.f32 %v10645_v4, 0.0  ;;  %v10814_v32 = vmul.f32 %v10750_v14, %v10750_v14 }
 0x9b5   :  { %v10816_v60 = vmul.f32 %v10752_v25, %v10752_v25 }
 0x9b6   :  { %v10817_v7 = vmul.f32 %v10753_v57, %v10753_v57 }
 0x9b7   :  { %v10856_v61 = vpack.c.bf16 %v10816_v60, %v10812_v53 }
 0x9b8   :  { %v10857_v48 = vpack.c.bf16 %v10817_v7, %v10813_v38  ;;  %v10547_v6 = vpop.f32.mrf.mxu3 }
 0x9b9   :  { %v10751_v19 = vmax.f32 %v10547_v6, 0.0  ;;  %v10694_v30 = vpop.f32.mrf.mxu2  ;;  %11205 = vmatmul.bf16.gmra.mxu0 %v10856_v61 }
 0x9ba   :  { %v10754_v12 = vmax.f32 %v10694_v30, 0.0  ;;  %11254 = vmatmul.bf16.gmra.mxu1 %v10857_v48  ;;  %v10599_v11 = vpop.f32.mrf.mxu0 }
 0x9bb   :  { %v10815_v37 = vmul.f32 %v10751_v19, %v10751_v19  ;;  %v10648_v50 = vpop.f32.mrf.mxu1  ;;  %v10756_v34 = vmax.f32 %v10599_v11, 0.0 }
 0x9bc   :  { %v10818_v9 = vmul.f32 %v10754_v12, %v10754_v12  ;;  %v10757_v55 = vmax.f32 %v10648_v50, 0.0 }
 0x9bd   :  { %v10855_v0 = vpack.c.bf16 %v10815_v37, %v10811_v24  ;;  %v10820_v5 = vmul.f32 %v10756_v34, %v10756_v34 }
 0x9be   :  { %v10858_v16 = vpack.c.bf16 %v10818_v9, %v10814_v32  ;;  %v10821_v22 = vmul.f32 %v10757_v55, %v10757_v55 }
 0x9bf   :  { %11156 = vmatmul.bf16.gmra.mxu3 %v10855_v0 }
 0x9c0   :  { %11303 = vmatmul.bf16.gmra.mxu2 %v10858_v16  ;;  %v10550_v8 = vpop.f32.mrf.mxu3 }
 0x9c1   :  { %v10697_v28 = vpop.f32.mrf.mxu2  ;;  %v10755_v27 = vmax.f32 %v10550_v8, 0.0 }
 0x9c2   :  { %v10601_v42 = vpop.f32.mrf.mxu0  ;;  %v10758_v20 = vmax.f32 %v10697_v28, 0.0 }
 0x9c3   :  { %v10760_v44 = vmax.f32 %v10601_v42, 0.0  ;;  %v10650_v1 = vpop.f32.mrf.mxu1  ;;  %v10819_v43 = vmul.f32 %v10755_v27, %v10755_v27 }
 0x9c4   :  { %v10761_v15 = vmax.f32 %v10650_v1, 0.0  ;;  %v10822_v39 = vmul.f32 %v10758_v20, %v10758_v20 }
 0x9c5   :  { %v10824_v36 = vmul.f32 %v10760_v44, %v10760_v44 }
 0x9c6   :  { %v10825_v62 = vmul.f32 %v10761_v15, %v10761_v15 }
 0x9c7   :  { %v10860_v46 = vpack.c.bf16 %v10824_v36, %v10820_v5 }
 0x9c8   :  { %v10861_v40 = vpack.c.bf16 %v10825_v62, %v10821_v22  ;;  %v10552_v21 = vpop.f32.mrf.mxu3 }
 0x9c9   :  { %v10759_v47 = vmax.f32 %v10552_v21, 0.0  ;;  %v10699_v35 = vpop.f32.mrf.mxu2  ;;  %11210 = vmatmul.bf16.gmra.mxu0 %v10860_v46 }
 0x9ca   :  { %v10762_v51 = vmax.f32 %v10699_v35, 0.0  ;;  %11259 = vmatmul.bf16.gmra.mxu1 %v10861_v40  ;;  %v10604_v58 = vpop.f32.mrf.mxu0 }
 0x9cb   :  { %v10823_v54 = vmul.f32 %v10759_v47, %v10759_v47  ;;  %v10653_v41 = vpop.f32.mrf.mxu1  ;;  %v10764_v60 = vmax.f32 %v10604_v58, 0.0 }
 0x9cc   :  { %v10826_v25 = vmul.f32 %v10762_v51, %v10762_v51  ;;  %v10765_v7 = vmax.f32 %v10653_v41, 0.0 }
 0x9cd   :  { %v10859_v4 = vpack.c.bf16 %v10823_v54, %v10819_v43  ;;  %v10828_v6 = vmul.f32 %v10764_v60, %v10764_v60 }
 0x9ce   :  { %v10862_v57 = vpack.c.bf16 %v10826_v25, %v10822_v39  ;;  %v10829_v30 = vmul.f32 %v10765_v7, %v10765_v7 }
 0x9cf   :  { %11161 = vmatmul.bf16.gmra.mxu3 %v10859_v4 }
 0x9d0   :  { %11308 = vmatmul.bf16.gmra.mxu2 %v10862_v57  ;;  %v10555_v53 = vpop.f32.mrf.mxu3 }
 0x9d1   :  { %v10702_v38 = vpop.f32.mrf.mxu2  ;;  %v10763_v11 = vmax.f32 %v10555_v53, 0.0 }
 0x9d2   :  { %v10606_v26 = vpop.f32.mrf.mxu0  ;;  %v10766_v37 = vmax.f32 %v10702_v38, 0.0 }
 0x9d3   :  { %v10768_v61 = vmax.f32 %v10606_v26, 0.0  ;;  %v10655_v14 = vpop.f32.mrf.mxu1  ;;  %v10827_v8 = vmul.f32 %v10763_v11, %v10763_v11 }
 0x9d4   :  { %v10769_v48 = vmax.f32 %v10655_v14, 0.0  ;;  %v10830_v28 = vmul.f32 %v10766_v37, %v10766_v37 }
 0x9d5   :  { %v10832_v19 = vmul.f32 %v10768_v61, %v10768_v61 }
 0x9d6   :  { %v10833_v12 = vmul.f32 %v10769_v48, %v10769_v48 }
 0x9d7   :  { %v10864_v24 = vpack.c.bf16 %v10832_v19, %v10828_v6 }
 0x9d8   :  { %v10865_v50 = vpack.c.bf16 %v10833_v12, %v10829_v30  ;;  %v10557_v32 = vpop.f32.mrf.mxu3 }
 0x9d9   :  { %v10767_v9 = vmax.f32 %v10557_v32, 0.0  ;;  %v10704_v0 = vpop.f32.mrf.mxu2  ;;  %11215 = vmatmul.bf16.gmra.mxu0 %v10864_v24 }
 0x9da   :  { %v10770_v16 = vmax.f32 %v10704_v0, 0.0  ;;  %11264 = vmatmul.bf16.gmra.mxu1 %v10865_v50 }
 0x9db   :  { %v10831_v34 = vmul.f32 %v10767_v9, %v10767_v9 }
 0x9dc   :  { %v10834_v55 = vmul.f32 %v10770_v16, %v10770_v16 }
 0x9dd   :  { %v10863_v42 = vpack.c.bf16 %v10831_v34, %v10827_v8 }
 0x9de   :  { %v10866_v44 = vpack.c.bf16 %v10834_v55, %v10830_v28 }
 0x9df   :  { %11166 = vmatmul.bf16.gmra.mxu3 %v10863_v42 }
 0x9e0   :  { %11313 = vmatmul.bf16.gmra.mxu2 %v10866_v44 }
 0x9e6   :  { %v11181_v1 = vpop.f32.mrf.mxu0 }
 0x9e7   :  { %v11230_v15 = vpop.f32.mrf.mxu1 }
 0x9ee   :  { %v11183_v5 = vpop.f32.mrf.mxu0 }
 0x9ef   :  { %v11232_v36 = vpop.f32.mrf.mxu1 }
 0x9f2   :  { %v11132_v22 = vpop.f32.mrf.mxu3 }
 0x9f3   :  { %v11182_v62 = vadd.f32 %v11181_v1, %v11132_v22  ;;  %v11279_v27 = vpop.f32.mrf.mxu2 }
 0x9f5   :  { %v11231_v46 = vadd.f32 %v11230_v15, %v11182_v62 }
 0x9f6   :  { %v11186_v20 = vpop.f32.mrf.mxu0 }
 0x9f7   :  { %v11280_v40 = vadd.f32 %v11279_v27, %v11231_v46  ;;  %v11235_v21 = vpop.f32.mrf.mxu1 }
 0x9f9   :  { %v11319_v47 = vadd.f32 %v11280_v40, %v19318_v31 }
 0x9fa   :  { %v11134_v35 = vpop.f32.mrf.mxu3 }
 0x9fb   :  { %11335 = vst [vmem:[#allocation22] sm:$0xff] %v11319_v47  ;;  %v11184_v51 = vadd.f32 %v11183_v5, %v11134_v35  ;;  %v11281_v58 = vpop.f32.mrf.mxu2 }
 0x9fd   :  { %v11233_v43 = vadd.f32 %v11232_v36, %v11184_v51 }
 0x9fe   :  { %v11188_v54 = vpop.f32.mrf.mxu0 }
 0x9ff   :  { %v11282_v41 = vadd.f32 %v11281_v58, %v11233_v43  ;;  %v11237_v39 = vpop.f32.mrf.mxu1 }
 0xa01   :  { %v11320_v25 = vadd.f32 %v11282_v41, %v19323_v52 }
 0xa02   :  { %v11137_v4 = vpop.f32.mrf.mxu3 }
 0xa03   :  { %11336 = vst [vmem:[#allocation22 + $0x8] sm:$0xff] %v11320_v25  ;;  %v11187_v57 = vadd.f32 %v11186_v20, %v11137_v4  ;;  %v11284_v53 = vpop.f32.mrf.mxu2 }
 0xa05   :  { %v11236_v60 = vadd.f32 %v11235_v21, %v11187_v57 }
 0xa06   :  { %v11191_v38 = vpop.f32.mrf.mxu0 }
 0xa07   :  { %v11285_v7 = vadd.f32 %v11284_v53, %v11236_v60  ;;  %v11240_v26 = vpop.f32.mrf.mxu1 }
 0xa09   :  { %v11321_v31 = vadd.f32 %v11285_v7, %v19328_v2 }
 0xa0a   :  { %v11139_v61 = vpop.f32.mrf.mxu3 }
 0xa0b   :  { %11337 = vst [vmem:[#allocation22 + $0x10] sm:$0xff] %v11321_v31  ;;  %v11189_v14 = vadd.f32 %v11188_v54, %v11139_v61  ;;  %v11286_v48 = vpop.f32.mrf.mxu2 }
 0xa0d   :  { %v11238_v6 = vadd.f32 %v11237_v39, %v11189_v14 }
 0xa0e   :  { %v11193_v19 = vpop.f32.mrf.mxu0 }
 0xa0f   :  { %v11287_v30 = vadd.f32 %v11286_v48, %v11238_v6  ;;  %v11242_v12 = vpop.f32.mrf.mxu1 }
 0xa11   :  { %v11322_v52 = vadd.f32 %v11287_v30, %v19333_v49 }
 0xa12   :  { %v11142_v11 = vpop.f32.mrf.mxu3 }
 0xa13   :  { %11338 = vst [vmem:[#allocation22 + $0x18] sm:$0xff] %v11322_v52  ;;  %v11192_v24 = vadd.f32 %v11191_v38, %v11142_v11  ;;  %v11289_v37 = vpop.f32.mrf.mxu2 }
 0xa15   :  { %v11241_v50 = vadd.f32 %v11240_v26, %v11192_v24 }
 0xa16   :  { %v11196_v32 = vpop.f32.mrf.mxu0 }
 0xa17   :  { %v11290_v9 = vadd.f32 %v11289_v37, %v11241_v50  ;;  %v11245_v0 = vpop.f32.mrf.mxu1 }
 0xa19   :  { %v11323_v2 = vadd.f32 %v11290_v9, %v19338_v63 }
 0xa1a   :  { %v11144_v16 = vpop.f32.mrf.mxu3 }
 0xa1b   :  { %11339 = vst [vmem:[#allocation22 + $0x20] sm:$0xff] %v11323_v2  ;;  %v11194_v8 = vadd.f32 %v11193_v19, %v11144_v16  ;;  %v11291_v34 = vpop.f32.mrf.mxu2 }
 0xa1d   :  { %v11243_v28 = vadd.f32 %v11242_v12, %v11194_v8 }
 0xa1e   :  { %v11198_v55 = vpop.f32.mrf.mxu0 }
 0xa1f   :  { %v11292_v42 = vadd.f32 %v11291_v34, %v11243_v28  ;;  %v11247_v44 = vpop.f32.mrf.mxu1 }
 0xa21   :  { %v11324_v49 = vadd.f32 %v11292_v42, %v19343_v56 }
 0xa22   :  { %v11147_v1 = vpop.f32.mrf.mxu3 }
 0xa23   :  { %11340 = vst [vmem:[#allocation22 + $0x28] sm:$0xff] %v11324_v49  ;;  %v11197_v15 = vadd.f32 %v11196_v32, %v11147_v1  ;;  %v11294_v5 = vpop.f32.mrf.mxu2 }
 0xa25   :  { %v11246_v36 = vadd.f32 %v11245_v0, %v11197_v15 }
 0xa26   :  { %v11201_v22 = vpop.f32.mrf.mxu0 }
 0xa27   :  { %v11295_v62 = vadd.f32 %v11294_v5, %v11246_v36  ;;  %v11250_v27 = vpop.f32.mrf.mxu1 }
 0xa29   :  { %v11325_v63 = vadd.f32 %v11295_v62, %v19348_v45 }
 0xa2a   :  { %v11149_v46 = vpop.f32.mrf.mxu3 }
 0xa2b   :  { %11341 = vst [vmem:[#allocation22 + $0x30] sm:$0xff] %v11325_v63  ;;  %v11199_v20 = vadd.f32 %v11198_v55, %v11149_v46  ;;  %v11296_v40 = vpop.f32.mrf.mxu2 }
 0xa2d   :  { %v11248_v21 = vadd.f32 %v11247_v44, %v11199_v20 }
 0xa2e   :  { %v11203_v47 = vpop.f32.mrf.mxu0 }
 0xa2f   :  { %v11297_v35 = vadd.f32 %v11296_v40, %v11248_v21  ;;  %v11252_v51 = vpop.f32.mrf.mxu1 }
 0xa31   :  { %v11326_v56 = vadd.f32 %v11297_v35, %v19353_v13 }
 0xa32   :  { %v11152_v58 = vpop.f32.mrf.mxu3 }
 0xa33   :  { %11342 = vst [vmem:[#allocation22 + $0x38] sm:$0xff] %v11326_v56  ;;  %v11202_v43 = vadd.f32 %v11201_v22, %v11152_v58  ;;  %v11299_v54 = vpop.f32.mrf.mxu2 }
 0xa35   :  { %v11251_v41 = vadd.f32 %v11250_v27, %v11202_v43 }
 0xa36   :  { %v11206_v25 = vpop.f32.mrf.mxu0 }
 0xa37   :  { %v11300_v39 = vadd.f32 %v11299_v54, %v11251_v41  ;;  %v11255_v45 = vpop.f32.mrf.mxu1 }
 0xa39   :  { %v11327_v4 = vadd.f32 %v11300_v39, %v19358_v29 }
 0xa3a   :  { %v11154_v57 = vpop.f32.mrf.mxu3 }
 0xa3b   :  { %11343 = vst [vmem:[#allocation22 + $0x40] sm:$0xff] %v11327_v4  ;;  %v11204_v53 = vadd.f32 %v11203_v47, %v11154_v57  ;;  %v11301_v60 = vpop.f32.mrf.mxu2 }
 0xa3d   :  { %v11253_v38 = vadd.f32 %v11252_v51, %v11204_v53 }
 0xa3e   :  { %v11208_v31 = vpop.f32.mrf.mxu0 }
 0xa3f   :  { %v11302_v7 = vadd.f32 %v11301_v60, %v11253_v38  ;;  %v11257_v48 = vpop.f32.mrf.mxu1 }
 0xa41   :  { %v11328_v26 = vadd.f32 %v11302_v7, %v19363_v18 }
 0xa42   :  { %v11157_v13 = vpop.f32.mrf.mxu3 }
 0xa43   :  { %11344 = vst [vmem:[#allocation22 + $0x48] sm:$0xff] %v11328_v26  ;;  %v11207_v61 = vadd.f32 %v11206_v25, %v11157_v13  ;;  %v11304_v14 = vpop.f32.mrf.mxu2 }
 0xa45   :  { %v11256_v6 = vadd.f32 %v11255_v45, %v11207_v61 }
 0xa46   :  { %v11211_v11 = vpop.f32.mrf.mxu0 }
 0xa47   :  { %v11305_v19 = vadd.f32 %v11304_v14, %v11256_v6  ;;  %v11260_v37 = vpop.f32.mrf.mxu1 }
 0xa49   :  { %v11329_v30 = vadd.f32 %v11305_v19, %v19368_v3 }
 0xa4a   :  { %v11159_v29 = vpop.f32.mrf.mxu3 }
 0xa4b   :  { %11345 = vst [vmem:[#allocation22 + $0x50] sm:$0xff] %v11329_v30  ;;  %v11209_v12 = vadd.f32 %v11208_v31, %v11159_v29  ;;  %v11306_v52 = vpop.f32.mrf.mxu2 }
 0xa4d   :  { %v11258_v24 = vadd.f32 %v11257_v48, %v11209_v12 }
 0xa4e   :  { %v11213_v16 = vpop.f32.mrf.mxu0 }
 0xa4f   :  { %v11307_v50 = vadd.f32 %v11306_v52, %v11258_v24  ;;  %v11262_v34 = vpop.f32.mrf.mxu1 }
 0xa51   :  { %v11330_v18 = vadd.f32 %v11307_v50, %v19373_v59 }
 0xa52   :  { %v11162_v32 = vpop.f32.mrf.mxu3 }
 0xa53   :  { %11346 = vst [vmem:[#allocation22 + $0x58] sm:$0xff] %v11330_v18  ;;  %v11212_v9 = vadd.f32 %v11211_v11, %v11162_v32  ;;  %v11309_v0 = vpop.f32.mrf.mxu2 }
 0xa55   :  { %v11261_v2 = vadd.f32 %v11260_v37, %v11212_v9 }
 0xa56   :  { %v11216_v1 = vpop.f32.mrf.mxu0 }
 0xa57   :  { %v11310_v8 = vadd.f32 %v11309_v0, %v11261_v2  ;;  %v11265_v59 = vpop.f32.mrf.mxu1 }
 0xa59   :  { %v11331_v3 = vadd.f32 %v11310_v8, %v19378_v23 }
 0xa5a   :  { %v11164_v28 = vpop.f32.mrf.mxu3 }
 0xa5b   :  { %11347 = vst [vmem:[#allocation22 + $0x60] sm:$0xff] %v11331_v3  ;;  %v11214_v55 = vadd.f32 %v11213_v16, %v11164_v28  ;;  %v11311_v42 = vpop.f32.mrf.mxu2 }
 0xa5d   :  { %v11263_v44 = vadd.f32 %v11262_v34, %v11214_v55 }
 0xa5e   :  { %v11218_v46 = vpop.f32.mrf.mxu0 }
 0xa5f   :  { %v11312_v49 = vadd.f32 %v11311_v42, %v11263_v44  ;;  %v11267_v40 = vpop.f32.mrf.mxu1 }
 0xa61   :  { %v11332_v15 = vadd.f32 %v11312_v49, %v19383_v17 }
 0xa62   :  { %v11167_v5 = vpop.f32.mrf.mxu3 }
 0xa63   :  { %11348 = vst [vmem:[#allocation22 + $0x68] sm:$0xff] %v11332_v15  ;;  %v11217_v36 = vadd.f32 %v11216_v1, %v11167_v5  ;;  %v11314_v22 = vpop.f32.mrf.mxu2 }
 0xa65   :  { %v11266_v62 = vadd.f32 %v11265_v59, %v11217_v36 }
 0xa67   :  { %v11315_v27 = vadd.f32 %v11314_v22, %v11266_v62 }
 0xa69   :  { %v11333_v63 = vadd.f32 %v11315_v27, %v19388_v10 }
 0xa6a   :  { %v11169_v23 = vpop.f32.mrf.mxu3 }
 0xa6b   :  { %11349 = vst [vmem:[#allocation22 + $0x70] sm:$0xff] %v11333_v63  ;;  %v11219_v20 = vadd.f32 %v11218_v46, %v11169_v23  ;;  %v11316_v47 = vpop.f32.mrf.mxu2 }
 0xa6d   :  { %v11268_v21 = vadd.f32 %v11267_v40, %v11219_v20 }
 0xa6f   :  { %v11317_v17 = vadd.f32 %v11316_v47, %v11268_v21 }
 0xa71   :  { %v11334_v35 = vadd.f32 %v11317_v17, %v19393_v33 }
 0xa73   :  { %11350 = vst [vmem:[#allocation22 + $0x78] sm:$0xff] %v11334_v35 }
 0xa74   :  { %11363 = dma.vmem_to_hbm [thread:$0]  %s11356_s22, 2048, %s11358_s20, [#allocation5], %s12899_s30, %s12899_s30, %s12900_s14  }
 0xa75   :  { %12894 = dma.done.wait [#allocation5], 2048  }
 0xa76   :  { %12895 = vsyncadd [#allocation5], 4294965248 }
 0xa77   :  { %12896 = dma.done.wait [#allocation24], 1024  }
 0xa78   :  { %12897 = vsyncadd [#allocation24], 4294966272 }
 0xa79   :  { %11385 = vsyncpa [#allocation4], 1 }
 0xa7a   :  { %11386 = vsyncpa [#allocation9], 1 }
 0xa7b   :  { %11387 = vsyncpa [#allocation12], 1 }
 0xa7c   :  { %11388 = vsyncpa [#allocation15], 1 }
 0xa7d   :  { %11389 = vsyncpa [#allocation18], 1 }
 0xa7e   :  { %11390 = vsyncpa [#allocation21], 1 }
 0xa7f   :  { %11391 = vsyncpa [#allocation5], 1 }
 0xa80   :  { %11392 = vsyncpa [#allocation24], 1 }
 0xa81   :  { %11393 = vsyncpa [#allocation6], 1 }

</bundles_post_ra>
